<compile_context>
chip_gen: v6e
topology: v6e:2x2x1
jax: 0.10.0
libtpu: 0.0.40
codegen_flags: <defaults>
</compile_context>

<pallas_src>
import jax
import jax.numpy as jnp
from jax import lax
from jax.experimental import pallas as pl
from jax.experimental.pallas import tpu as pltpu

IN_FEATURES = 196608   # from Linear(196608, 10)
OUT_FEATURES = 10
CORE_SPLIT = 2         # leading 'parallel' axis -> both TCs on v7x
K_TILE = 98304         # 196608 = 2 (core split) * 1 (step/core) * 98304


def linear_kernel(x_ref, w_ref, o_ref):
    # x_ref: (B, k_tile)  w_ref: (OUT, k_tile)  o_ref: (B, OUT), resident over k
    k = pl.program_id(1)

    @pl.when(k == 0)
    def _():
        o_ref[...] = jnp.zeros_like(o_ref)

    # (B, tk) . (OUT, tk)^T -> (B, OUT): contract last dims on the MXU, f32 acc.
    o_ref[...] += lax.dot_general(
        x_ref[...],
        w_ref[...],
        dimension_numbers=(((1,), (1,)), ((), ())),
        preferred_element_type=jnp.float32,
    )


def pallas_linear(x, weight, bias, *, k_tile=K_TILE, core_split=CORE_SPLIT):
    """y = x @ weight.T + bias   (PyTorch nn.Linear semantics).

    x:      (B, K)   float32
    weight: (OUT, K) float32   (PyTorch layout, used as-is -- no transpose)
    bias:   (OUT,)   float32
    """
    B, K = x.shape
    OUT = weight.shape[0]
    assert weight.shape == (OUT, K)
    # TODO(synk): no ragged-K handling; K must split evenly over cores * k_tile.
    assert K % (core_split * k_tile) == 0
    steps = K // (core_split * k_tile)

    cost = pl.CostEstimate(
        flops=2 * B * K * OUT,
        transcendentals=0,
        bytes_accessed=(B * K + OUT * K + core_split * B * OUT) * 4,
    )

    partials = pl.pallas_call(
        linear_kernel,
        out_shape=jax.ShapeDtypeStruct((core_split, B, OUT), jnp.float32),
        grid_spec=pltpu.PrefetchScalarGridSpec(
            num_scalar_prefetch=0,
            grid=(core_split, steps),
            in_specs=[
                # x tile: (B, k_tile), march along K (offset by the core split).
                pl.BlockSpec((B, k_tile), lambda c, k: (0, c * steps + k)),
                # weight tile: (OUT, k_tile), lane-dense, PyTorch layout.
                pl.BlockSpec((OUT, k_tile), lambda c, k: (0, c * steps + k)),
            ],
            # One resident (B, OUT) partial-sum block per core.
            out_specs=pl.BlockSpec((None, B, OUT), lambda c, k: (c, 0, 0)),
        ),
        compiler_params=pltpu.CompilerParams(
            dimension_semantics=("parallel", "arbitrary"),
            # ~18 MiB of double-buffered tiles (with sublane padding); raise
            # v5e's 16 MiB default, stay within v6e/v7x defaults.
            vmem_limit_bytes=32 * 1024 * 1024,
        ),
        cost_estimate=cost,
    )(x, weight)

    # Tiny (core_split, B, OUT) cross-core reduction + bias add in plain JAX.
    return (partials.sum(axis=0) + bias[None, :]).astype(x.dtype)


if __name__ == "__main__":
    key = jax.random.PRNGKey(0)
    kx, kw, kb = jax.random.split(key, 3)

    B = 2
    # Deterministic synthetic parameters (PyTorch-uniform-like scale).
    bound = 1.0 / (IN_FEATURES ** 0.5)
    weight = jax.random.uniform(
        kw, (OUT_FEATURES, IN_FEATURES), jnp.float32, -bound, bound
    )
    bias = jax.random.uniform(kb, (OUT_FEATURES,), jnp.float32, -bound, bound)

    x = jax.random.normal(kx, (B, IN_FEATURES), jnp.float32)

    y = pallas_linear(x, weight, bias)
    y = jax.block_until_ready(y)

    # Sanity check against plain-JAX reference.
    y_ref = x @ weight.T + bias
    assert y.shape == (B, OUT_FEATURES)
    assert jnp.allclose(y, y_ref, atol=2e-3, rtol=2e-3)

    print("KERNEL_OK")
</pallas_src>

<mosaic_0001>
module attributes {stable_mosaic.version = 11 : i64} {
  func.func @linear_kernel(%arg0: i32, %arg1: i32, %arg2: memref<2x98304xf32, #tpu.memory_space<vmem>>, %arg3: memref<10x98304xf32, #tpu.memory_space<vmem>>, %arg4: memref<1x2x10xf32, #tpu.memory_space<vmem>>) attributes {dimension_semantics = [#tpu.dimension_semantics<parallel>, #tpu.dimension_semantics<arbitrary>], iteration_bounds = array<i64: 2, 1>, scalar_prefetch = 0 : i64, scratch_operands = 0 : i64, tpu.core_type = #tpu.core_type<tc>, window_params = [{transform_indices = @transform_0, window_bounds = array<i64: 2, 98304>}, {transform_indices = @transform_1, window_bounds = array<i64: 10, 98304>}, {transform_indices = @transform_2, window_bounds = array<i64: 1, 2, 10>}]} {
    %c0_i32 = arith.constant 0 : i32
    %0 = arith.cmpi eq, %arg1, %c0_i32 : i32
    %1 = arith.extui %0 : i1 to i32
    %c0_i32_0 = arith.constant 0 : i32
    %2 = arith.cmpi ne, %1, %c0_i32_0 : i32
    scf.if %2 {
      %cst_10 = arith.constant 0.000000e+00 : f32
      %12 = vector.broadcast %cst_10 : f32 to vector<2x10xf32>
      %c0_11 = arith.constant 0 : index
      %c0_12 = arith.constant 0 : index
      %c0_13 = arith.constant 0 : index
      %13 = vector.load %arg4[%c0_11, %c0_12, %c0_13] : memref<1x2x10xf32, #tpu.memory_space<vmem>>, vector<1x2x10xf32>
      %14 = vector.shape_cast %13 : vector<1x2x10xf32> to vector<2x10xf32>
      %15 = vector.shape_cast %12 : vector<2x10xf32> to vector<1x2x10xf32>
      tpu.vector_store %arg4[%c0_11, %c0_12, %c0_13], %15 {strides = array<i32>} : memref<1x2x10xf32, #tpu.memory_space<vmem>>, vector<1x2x10xf32>,
    } else {
    }
    %c0 = arith.constant 0 : index
    %c0_1 = arith.constant 0 : index
    %c0_2 = arith.constant 0 : index
    %3 = vector.load %arg4[%c0, %c0_1, %c0_2] : memref<1x2x10xf32, #tpu.memory_space<vmem>>, vector<1x2x10xf32>
    %4 = vector.shape_cast %3 : vector<1x2x10xf32> to vector<2x10xf32>
    %c0_3 = arith.constant 0 : index
    %c0_4 = arith.constant 0 : index
    %5 = vector.load %arg2[%c0_3, %c0_4] : memref<2x98304xf32, #tpu.memory_space<vmem>>, vector<2x98304xf32>
    %c0_5 = arith.constant 0 : index
    %c0_6 = arith.constant 0 : index
    %6 = vector.load %arg3[%c0_5, %c0_6] : memref<10x98304xf32, #tpu.memory_space<vmem>>, vector<10x98304xf32>
    %cst = arith.constant dense<0.000000e+00> : vector<2x10xf32>
    %7 = tpu.matmul %5, %6, %cst {dimension_numbers = #tpu.dot_dimension_numbers<[1], [1], [0], [0], [0, 0, 1, 0], [], []>} : vector<2x98304xf32>, vector<10x98304xf32>, vector<2x10xf32> -> vector<2x10xf32>
    %8 = arith.addf %4, %7 : vector<2x10xf32>
    %c0_7 = arith.constant 0 : index
    %c0_8 = arith.constant 0 : index
    %c0_9 = arith.constant 0 : index
    %9 = vector.load %arg4[%c0_7, %c0_8, %c0_9] : memref<1x2x10xf32, #tpu.memory_space<vmem>>, vector<1x2x10xf32>
    %10 = vector.shape_cast %9 : vector<1x2x10xf32> to vector<2x10xf32>
    %11 = vector.shape_cast %8 : vector<2x10xf32> to vector<1x2x10xf32>
    tpu.vector_store %arg4[%c0_7, %c0_8, %c0_9], %11 {strides = array<i32>} : memref<1x2x10xf32, #tpu.memory_space<vmem>>, vector<1x2x10xf32>,
    return
  }
  func.func @transform_0(%arg0: i32, %arg1: i32) -> (i32, i32) {
    %c1_i32 = arith.constant 1 : i32
    %0 = arith.muli %arg0, %c1_i32 : i32
    %1 = arith.addi %0, %arg1 : i32
    %c0_i32 = arith.constant 0 : i32
    %c0_i32_0 = arith.constant 0 : i32
    return %c0_i32, %1 : i32, i32
  }
  func.func @transform_1(%arg0: i32, %arg1: i32) -> (i32, i32) {
    %c1_i32 = arith.constant 1 : i32
    %0 = arith.muli %arg0, %c1_i32 : i32
    %1 = arith.addi %0, %arg1 : i32
    %c0_i32 = arith.constant 0 : i32
    %c0_i32_0 = arith.constant 0 : i32
    return %c0_i32, %1 : i32, i32
  }
  func.func @transform_2(%arg0: i32, %arg1: i32) -> (i32, i32, i32) {
    %c0_i32 = arith.constant 0 : i32
    %c0_i32_0 = arith.constant 0 : i32
    %c0_i32_1 = arith.constant 0 : i32
    return %arg0, %c0_i32, %c0_i32_0 : i32, i32, i32
  }
}

</mosaic_0001>

<bundles_post_ra>
// kernel: tpu_custom_call.1
= control target key start
LH: loop header
LB: loop body
LE: loop exit
PB: predicated region body
PF: predicated region fallthrough
CT: control target
= control target key end

     0   :  { %7 = vsyncpa [#allocation3], 0  ;;  %s35915_s0 = inlined_call_operand.hbm [shape: f32[2,196608], index: 0, kind: input, shape index: {}]   ;;  %s35916_s1 = inlined_call_operand.hbm [shape: f32[10,196608], index: 1, kind: input, shape index: {}]   ;;  %s35917_s2 = inlined_call_operand.hbm [shape: f32[2,2,10], index: 2, kind: output, shape index: {}]  }
   0x1   :  { %9 = vsyncpa [#allocation3 + $0x1], 0 }
   0x2   :  { %10 = vsyncpa [#allocation6], 0 }
   0x3   :  { %12 = vsyncpa [#allocation6 + $0x1], 0 }
   0x4   :  { %13 = vsyncpa [#allocation4], 0 }
   0x5   :  { %15 = vsyncpa [#allocation4 + $0x1], 0  ;;  %s33628_s9 = smov 0   ;;  %s33630_s10 = smov 0  }
   0x6   :  { %s33632_s11 = smov 0   ;;  %s33634_s12 = smov 0  }
   0x7   :  { %s33636_s13 = smov 0   ;;  %s33638_s14 = smov 0  }
   0x8 LB: > { %s33181_s15 = sadd.s32 4294967295, %s33603_s14   ;;  %s33182_s16 = sadd.s32 4294967294, %s33603_s14   ;;  %s33603_s14 = sphi %s33638_s14, %s21_s14   ;;  %s33599_s13 = sphi %s33636_s13, %s35929_s13   ;;  %s33595_s12 = sphi %s33634_s12, %s35928_s12   ;;  %s33591_s11 = sphi %s33632_s11, %s35927_s11   ;;  %s33587_s10 = sphi %s33630_s10, %s35926_s10   ;;  %s33583_s9 = sphi %s33628_s9, %s35925_s9  }
   0x9   : > { %s33_s17 = sadd.s32 1, %s33599_s13  ;;  %s42_s18 = sadd.s32 1, %s33591_s11 }
   0xa   : > { %p35_p0 = scmp.ge.s32.totalorder %s33_s17, 2  ;;  %p49_p1 = scmp.ne.s32.totalorder %s33591_s11, %s33587_s10 }
   0xb   : > { %p50_p2 = scmp.eq.s32.totalorder %s33603_s14, 0  ;;  %p55_p3 = scmp.ne.s32.totalorder %s33587_s10, %s33583_s9 }
   0xc   : > { %s35931_s17 = smov (%p35_p0, %s33_s17), 0  ;;  %p56_p5 = scmp.eq.s32.totalorder %s33181_s15, 0 }
   0xd   : > { %p33669_p4 = por %p50_p2, %p49_p1  ;;  %s39_s20 = ssub.s32 %s33599_s13, %s35931_s17 }
   0xe   : > { %p107_p6 = scmp.eq.s32.totalorder %s33181_s15, 1  ;;  %p40_p7 = scmp.eq.s32.totalorder %s39_s20, 0 }
   0xf   : > { %p33675_p8 = por %p56_p5, %p55_p3  ;;  %p113_p10 = scmp.eq.s32.totalorder %s33182_s16, 1 }
  0x10   : > { %p33679_p9 = por %p107_p6, %p49_p1  ;;  %p33216_p13 = scmp.lt.s32.totalorder %s33603_s14, 2 }
  0x11   : > { %s33684_s23 = scalar_select %p40_p7, %s33591_s11, %s42_s18  }
  0x12   : > { %p33686_p11 = por %p113_p10, %p55_p3  ;;  %s33693_s25 = sand.u32 1, %s33591_s11  }
  0x13   : > { %s33195_s26 = smul.u32 1536, %s33693_s25  ;;  %p33699_p0 = pnand %p33216_p13, %p33669_p4 }
  0x14   : > { %s33193_s27 = smul.u32 24576, %s33599_s13  ;;  %s134_s6 = scalar_lea.sflag [#allocation3], %s33693_s25 }
  0x15   : > { %s137_s4 = scalar_lea.vmem [#allocation2], %s33195_s26  ;;  %p33465_p1 = pneg %p33699_p0 }
  0x16   : > { %s144_s3 = scalar_lea.hbm %s35915_s0, %s33193_s27  ;;  %s146_s5 = sshll.u32 %s137_s4, 4  ;;  %s147_s5 = int_to_ptr.vmem [resolvable:$true] %s146_s5 }
  0x17   : > { %s33476_s7 = scalar_lea.vmem %s147_s5, 24576  ;;  %s33605_s8 = smov [#allocation2]  }
  0x18   : > { %p33477_p2 = scmp.ne.s32.totalorder %s147_s5, %s33476_s7  ;;  %s33481_s15 = sshll.u32 %s33605_s8, 4  ;;  %s33482_s15 = int_to_ptr.vmem [resolvable:$false] %s33481_s15 }
  0x19   : > { %s33483_s16 = scalar_lea.vmem %s33482_s15, 49152  ;;  %p33484_p5 = scmp.lt.s32.totalorder %s147_s5, %s33482_s15 }
  0x1a   : > { %p33479_p3 = pnand %p33477_p2, %p33465_p1  ;;  %p33485_p6 = scmp.lt.s32.totalorder %s33483_s16, %s33476_s7 }
  0x1c   : > { %p33480_p4 = pneg %p33479_p3  ;;  %p33486_p7 = por %p33485_p6, %p33484_p5 }
  0x1e   : > { %p33487_p10 = pnand %p33486_p7, %p33480_p4 }
  0x20   : > { %33490 = shalt.err (!%p33487_p10)
}
  0x21   : > { %33208 = dma.hbm_to_vmem [thread:$0]  (!%p33699_p0), %s144_s3, 24576, %s147_s5, %s134_s6  }
  0x22   : > { %s33196_s18 = smul.u32 12288, %s33693_s25  ;;  %p33187_p13 = scmp.ge.s32.totalorder %s33603_s14, 1 }
  0x23   : > { %s33194_s19 = smul.u32 98304, %s33599_s13  ;;  %p173_p2 = scmp.lt.s32.totalorder %s33603_s14, 3 }
  0x24   : > { %s157_s30 = scalar_lea.vmem [#allocation5], %s33196_s18  ;;  %s154_s7 = scalar_lea.sflag [#allocation6], %s33693_s25 }
  0x25   : > { %p33718_p3 = pnand %p33187_p13, %p173_p2  ;;  %s164_s29 = scalar_lea.hbm %s35916_s1, %s33194_s19 }
  0x26   : > { %s165_s4 = sshll.u32 %s157_s30, 4  ;;  %s33606_s3 = smov [#allocation5]   ;;  %s166_s4 = int_to_ptr.vmem [resolvable:$true] %s165_s4 }
  0x27   : > { %s33504_s8 = scalar_lea.vmem %s166_s4, 196608  ;;  %s33509_s5 = sshll.u32 %s33606_s3, 4  ;;  %s33510_s5 = int_to_ptr.vmem [resolvable:$false] %s33509_s5 }
  0x28   : > { %p33505_p4 = scmp.ne.s32.totalorder %s166_s4, %s33504_s8  ;;  %s33511_s6 = scalar_lea.vmem %s33510_s5, 393216 }
  0x29   : > { %p33512_p7 = scmp.lt.s32.totalorder %s166_s4, %s33510_s5  ;;  %p33513_p10 = scmp.lt.s32.totalorder %s33511_s6, %s33504_s8 }
  0x2a   : > { %p33507_p5 = pnand %p33505_p4, %p33465_p1 }
  0x2b   : > { %p33514_p13 = por %p33513_p10, %p33512_p7 }
  0x2c   : > { %p33508_p6 = pneg %p33507_p5 }
  0x2e   : > { %p33515_p2 = pnand %p33514_p13, %p33508_p6 }
  0x30   : > { %33518 = shalt.err (!%p33515_p2)
}
  0x31   : > { %s33607_s15 = smov 196608   ;;  %s33608_s16 = smov 98304  }
  0x32   : > { %s33609_s18 = smov 6144   ;;  %177 = sbr.rel (%p33718_p3) target bundleno = 1813 (0x715), region = 28 }
  0x33   : > { %33211 = dma.hbm_to_vmem [thread:$0]  (!%p33699_p0), %s164_s29, 196608, %s166_s4, %s154_s7, %s33607_s15, %s33608_s16, %s33609_s18  }
  0x34   : > { %s33734_s25 = sand.u32 (!%p33718_p3), 1, %s33587_s10  }
  0x35   : > { %s33197_s19 = smul.u32 (!%p33718_p3), 1536, %s33734_s25  ;;  %s180_s26 = scalar_lea.sflag (!%p33718_p3), [#allocation3], %s33734_s25 }
  0x37   : > { %s33738_s27 = scalar_lea.vmem [#allocation2], %s33197_s19 }
  0x38   : > { %33570 = dma.done.wait (%p33675_p8), %s180_s26, 24576  }
  0x39   : > { %33572 = vsyncadd (%p33675_p8), %s180_s26, 4294942720  ;;  %s33198_s28 = smul.u32 12288, %s33734_s25  ;;  %s189_s20 = scalar_lea.sflag [#allocation6], %s33734_s25 }
  0x3b   : > { %s33746_s29 = scalar_lea.vmem [#allocation5], %s33198_s28 }
  0x3c   : > { %33574 = dma.done.wait (%p33675_p8), %s189_s20, 196608  }
  0x3d   : > { %33576 = vsyncadd (%p33675_p8), %s189_s20, 4294770688  ;;  %v2153_v0 = vlaneseq  ;;  %v33610_v1 = vmov 1983009808   ;;  %v1190_v6 = vld [vmem:[%s33746_s29 + $0x1808] sm:$0x3]  ;;  %v424_v11 = vld [vmem:[%s33746_s29 + $0x18] sm:$0xff] }
  0x3e   : > { %v2151_v2 = vunpack.c.l.s4 %v33610_v1  ;;  %v1192_v7 = vld [vmem:[%s33746_s29 + $0x1818] sm:$0x3]  ;;  %v1189_v8 = vld [vmem:[%s33746_s29 + $0x1800] sm:$0x3]  ;;  %6209 = vmatprep.subr.mxu0 %v1190_v6  ;;  %v1191_v9 = vld [vmem:[%s33746_s29 + $0x1810] sm:$0x3] }
  0x3f   : > { %v2154_v3 = vshrl.u32 %v2153_v0, 7  ;;  %6279 = vmatprep.subr.mxu1 %v1192_v7  ;;  %v422_v10 = vld [vmem:[%s33746_s29 + $0x8] sm:$0xff]  ;;  %6210 = vmatpush1.xpose.msra.mxu0 %v1189_v8  ;;  %v229_v12 = vld [vmem:[%s33738_s27] sm:$0xff]  ;;  %v423_v14 = vld [vmem:[%s33746_s29 + $0x10] sm:$0xff]  ;;  %s33188_s21 = sshll.u32 %s33734_s25, 1  ;;  %vm226_vm0 = vcmask 74752  }
  0x40   : > { %v2152_v4 = vunpack.c.0.s8 %v2151_v2  ;;  %6280 = vmatpush1.xpose.msra.mxu1 %v1191_v9  ;;  %6211 = vmatprep.subr.mxu0 %v422_v10  ;;  %v421_v13 = vld [vmem:[%s33746_s29] sm:$0xff]  ;;  %v2149_v16 = vcombine.high %v229_v12, %v229_v12  ;;  %v1194_v17 = vld [vmem:[%s33746_s29 + $0x1828] sm:$0x3]  ;;  %v1196_v20 = vld [vmem:[%s33746_s29 + $0x1838] sm:$0x3]  ;;  %s35867_s30 = scalar_lea.vmem [#allocation7], %s33188_s21 }
  0x41   : > { %6281 = vmatprep.subr.mxu1 %v424_v11  ;;  %v230_v21 = vld [vmem:[%s33738_s27 + $0x8] sm:$0xff]  ;;  %v1193_v25 = vld [vmem:[%s33746_s29 + $0x1820] sm:$0x3]  ;;  %v1195_v26 = vld [vmem:[%s33746_s29 + $0x1830] sm:$0x3]  ;;  %s33190_s4 = sshll.u32 %s33595_s12, 5 }
  0x42   : > { %v33752_v5 = vsub.s32 %v2152_v4, %v2154_v3  ;;  %v2166_v23 = vcombine.high %v230_v21, %v230_v21  ;;  %v426_v27 = vld [vmem:[%s33746_s29 + $0x28] sm:$0xff]  ;;  %v231_v30 = vld [vmem:[%s33738_s27 + $0x10] sm:$0xff]  ;;  %v428_v31 = vld [vmem:[%s33746_s29 + $0x38] sm:$0xff]  ;;  %s33078_s7 = sshll.u32 %s35867_s30, 4  ;;  %s33076_s5 = scalar_lea.hbm %s35917_s2, %s33190_s4  ;;  %s33079_s7 = int_to_ptr.vmem [resolvable:$true] %s33078_s7 }
  0x43   : > { %6212 = vmatpush1.xpose.msra.mxu0 %v421_v13  ;;  %v2183_v32 = vcombine.high %v231_v30, %v231_v30  ;;  %v425_v34 = vld [vmem:[%s33746_s29 + $0x20] sm:$0xff]  ;;  %v427_v35 = vld [vmem:[%s33746_s29 + $0x30] sm:$0xff]  ;;  %v1198_v36 = vld [vmem:[%s33746_s29 + $0x1848] sm:$0x3]  ;;  %s33065_s6 = scalar_lea.sflag [#allocation4], %s33734_s25  ;;  %s33519_s15 = scalar_lea.vmem %s33079_s7, 32 }
  0x44   : > { %v2156_v15 = vrot.slane %v229_v12, %v33752_v5  ;;  %v2163_v19 = vrot.slane %v2149_v16, %v33752_v5  ;;  %6282 = vmatpush1.xpose.msra.mxu1 %v423_v14  ;;  %v2173_v22 = vrot.slane %v230_v21, %v33752_v5  ;;  %6349 = vmatprep.subr.mxu0 %v1194_v17  ;;  %v1200_v38 = vld [vmem:[%s33746_s29 + $0x1858] sm:$0x3]  ;;  %v1197_v41 = vld [vmem:[%s33746_s29 + $0x1840] sm:$0x3]  ;;  %v1199_v42 = vld [vmem:[%s33746_s29 + $0x1850] sm:$0x3]  ;;  %p33520_p8 = scmp.ne.s32.totalorder %s33079_s7, %s33519_s15 }
  0x45   : > { %6419 = vmatprep.subr.mxu1 %v1196_v20  ;;  %v2180_v29 = vrot.slane %v2166_v23, %v33752_v5  ;;  %v2190_v37 = vrot.slane %v231_v30, %v33752_v5  ;;  %v2197_v39 = vrot.slane %v2183_v32, %v33752_v5  ;;  %v232_v40 = vld [vmem:[%s33738_s27 + $0x18] sm:$0xff]  ;;  %v430_v43 = vld [vmem:[%s33746_s29 + $0x48] sm:$0xff]  ;;  %v429_v48 = vld [vmem:[%s33746_s29 + $0x40] sm:$0xff]  ;;  %s33612_s16 = smov [#allocation7]  }
  0x46   : > { %v2164_v18 = vcombine.high %v2156_v15, %v2156_v15  ;;  %v2165_v24 = vcombine.high %v2163_v19, %v2163_v19  ;;  %v2181_v28 = vcombine.high %v2173_v22, %v2173_v22  ;;  %v432_v45 = vld [vmem:[%s33746_s29 + $0x58] sm:$0xff]  ;;  %v2200_v47 = vcombine.high %v232_v40, %v232_v40  ;;  %v431_v49 = vld [vmem:[%s33746_s29 + $0x50] sm:$0xff]  ;;  %v1202_v50 = vld [vmem:[%s33746_s29 + $0x1868] sm:$0x3]  ;;  %p33521_p0 = pnand %p33520_p8, %p33679_p9  ;;  %s33523_s18 = sshll.u32 %s33612_s16, 4  ;;  %s33524_s18 = int_to_ptr.vmem [resolvable:$false] %s33523_s18 }
  0x47   : > { %v2182_v33 = vcombine.high %v2180_v29, %v2180_v29  ;;  %v2198_v44 = vcombine.high %v2190_v37, %v2190_v37  ;;  %v2199_v46 = vcombine.high %v2197_v39, %v2197_v39  ;;  %v2207_v51 = vrot.slane %v232_v40, %v33752_v5  ;;  %v1204_v52 = vld [vmem:[%s33746_s29 + $0x1878] sm:$0x3]  ;;  %v233_v54 = vld [vmem:[%s33738_s27 + $0x20] sm:$0xff]  ;;  %v1203_v56 = vld [vmem:[%s33746_s29 + $0x1870] sm:$0x3]  ;;  %s33525_s12 = scalar_lea.vmem %s33524_s18, 64  ;;  %p33526_p3 = scmp.lt.s32.totalorder %s33079_s7, %s33524_s18 }
  0x48   : > { %6245 = vmatprep.mubr.f32.mxu0 %v2164_v18  ;;  %6315 = vmatprep.mubr.f32.mxu1 %v2165_v24  ;;  %v2214_v53 = vrot.slane %v2200_v47, %v33752_v5  ;;  %v1201_v55 = vld [vmem:[%s33746_s29 + $0x1860] sm:$0x3]  ;;  %v434_v57 = vld [vmem:[%s33746_s29 + $0x68] sm:$0xff]  ;;  %v436_v59 = vld [vmem:[%s33746_s29 + $0x78] sm:$0xff]  ;;  %v2217_v61 = vcombine.high %v233_v54, %v233_v54  ;;  %v2224_v1 = vrot.slane %v233_v54, %v33752_v5  ;;  %p33522_p1 = pneg %p33521_p0  ;;  %p33527_p4 = scmp.lt.s32.totalorder %s33525_s12, %s33519_s15 }
  0x49   : > { %6246 = vmatmul.mubr.f32.vlgmr.msra.gmra.mxu0 %v2156_v15  ;;  %6316 = vmatmul.mubr.f32.vlgmr.msra.gmra.mxu1 %v2163_v19  ;;  %v2215_v58 = vcombine.high %v2207_v51, %v2207_v51  ;;  %v433_v62 = vld [vmem:[%s33746_s29 + $0x60] sm:$0xff]  ;;  %v435_v63 = vld [vmem:[%s33746_s29 + $0x70] sm:$0xff]  ;;  %v1206_v0 = vld [vmem:[%s33746_s29 + $0x1888] sm:$0x3] }
  0x4a   : > { %6350 = vmatpush1.xpose.msra.mxu0 %v1193_v25  ;;  %6420 = vmatpush1.xpose.msra.mxu1 %v1195_v26  ;;  %v2216_v60 = vcombine.high %v2214_v53, %v2214_v53  ;;  %v1208_v2 = vld [vmem:[%s33746_s29 + $0x1898] sm:$0x3]  ;;  %v2231_v3 = vrot.slane %v2217_v61, %v33752_v5  ;;  %v234_v4 = vld [vmem:[%s33738_s27 + $0x28] sm:$0xff]  ;;  %v1205_v6 = vld [vmem:[%s33746_s29 + $0x1880] sm:$0x3]  ;;  %v2232_v9 = vcombine.high %v2224_v1, %v2224_v1  ;;  %p33528_p5 = por %p33527_p4, %p33526_p3 }
  0x4b   : > { %6351 = vmatprep.subr.mxu0 %v426_v27  ;;  %6421 = vmatprep.subr.mxu1 %v428_v31  ;;  %v1207_v7 = vld [vmem:[%s33746_s29 + $0x1890] sm:$0x3]  ;;  %v438_v8 = vld [vmem:[%s33746_s29 + $0x88] sm:$0xff]  ;;  %v440_v10 = vld [vmem:[%s33746_s29 + $0x98] sm:$0xff]  ;;  %v2234_v12 = vcombine.high %v234_v4, %v234_v4  ;;  %v2241_v16 = vrot.slane %v234_v4, %v33752_v5 }
  0x4c   : > { %6385 = vmatprep.mubr.f32.mxu0 %v2181_v28  ;;  %6455 = vmatprep.mubr.f32.mxu1 %v2182_v33  ;;  %v2233_v11 = vcombine.high %v2231_v3, %v2231_v3  ;;  %v437_v13 = vld [vmem:[%s33746_s29 + $0x80] sm:$0xff]  ;;  %v439_v14 = vld [vmem:[%s33746_s29 + $0x90] sm:$0xff]  ;;  %v1210_v15 = vld [vmem:[%s33746_s29 + $0x18a8] sm:$0x3]  ;;  %p33529_p6 = pnand %p33528_p5, %p33522_p1 }
  0x4d   : > { %v1212_v17 = vld [vmem:[%s33746_s29 + $0x18b8] sm:$0x3]  ;;  %v2248_v18 = vrot.slane %v2234_v12, %v33752_v5  ;;  %v235_v19 = vld [vmem:[%s33738_s27 + $0x30] sm:$0xff]  ;;  %v1209_v20 = vld [vmem:[%s33746_s29 + $0x18a0] sm:$0x3]  ;;  %v2249_v23 = vcombine.high %v2241_v16, %v2241_v16 }
  0x4e   : > { %6352 = vmatpush1.xpose.msra.mxu0 %v425_v34  ;;  %6422 = vmatpush1.xpose.msra.mxu1 %v427_v35  ;;  %v1211_v21 = vld [vmem:[%s33746_s29 + $0x18b0] sm:$0x3]  ;;  %v444_v24 = vld [vmem:[%s33746_s29 + $0xb8] sm:$0xff]  ;;  %v2251_v26 = vcombine.high %v235_v19, %v235_v19  ;;  %v441_v27 = vld [vmem:[%s33746_s29 + $0xa0] sm:$0xff]  ;;  %v2258_v30 = vrot.slane %v235_v19, %v33752_v5 }
  0x4f   : > { %6489 = vmatprep.subr.mxu0 %v1198_v36  ;;  %6559 = vmatprep.subr.mxu1 %v1200_v38  ;;  %v2250_v25 = vcombine.high %v2248_v18, %v2248_v18  ;;  %v443_v28 = vld [vmem:[%s33746_s29 + $0xb0] sm:$0xff]  ;;  %v1216_v31 = vld [vmem:[%s33746_s29 + $0x18d8] sm:$0x3]  ;;  %v1213_v34 = vld [vmem:[%s33746_s29 + $0x18c0] sm:$0x3] }
  0x50   : > { %v2265_v32 = vrot.slane %v2251_v26, %v33752_v5  ;;  %v236_v33 = vld [vmem:[%s33738_s27 + $0x38] sm:$0xff]  ;;  %v1215_v35 = vld [vmem:[%s33746_s29 + $0x18d0] sm:$0x3]  ;;  %v446_v36 = vld [vmem:[%s33746_s29 + $0xc8] sm:$0xff] }
  0x51   : > { %6386 = vmatmul.mubr.f32.vlgmr.msra.gmra.mxu0 %v2173_v22  ;;  %6456 = vmatmul.mubr.f32.vlgmr.msra.gmra.mxu1 %v2180_v29  ;;  %v442_v22 = vld [vmem:[%s33746_s29 + $0xa8] sm:$0xff]  ;;  %v448_v38 = vld [vmem:[%s33746_s29 + $0xd8] sm:$0xff]  ;;  %v2268_v40 = vcombine.high %v236_v33, %v236_v33  ;;  %v237_v47 = vld [vmem:[%s33738_s27 + $0x40] sm:$0xff] }
  0x52   : > { %6490 = vmatpush1.xpose.msra.mxu0 %v1197_v41  ;;  %6560 = vmatpush1.xpose.msra.mxu1 %v1199_v42  ;;  %v1214_v29 = vld [vmem:[%s33746_s29 + $0x18c8] sm:$0x3]  ;;  %v445_v41 = vld [vmem:[%s33746_s29 + $0xc0] sm:$0xff]  ;;  %v447_v42 = vld [vmem:[%s33746_s29 + $0xd0] sm:$0xff]  ;;  %v2285_v54 = vcombine.high %v237_v47, %v237_v47 }
  0x53   : > { %6491 = vmatprep.subr.mxu0 %v430_v43  ;;  %6561 = vmatprep.subr.mxu1 %v432_v45  ;;  %v1218_v43 = vld [vmem:[%s33746_s29 + $0x18e8] sm:$0x3]  ;;  %v1220_v45 = vld [vmem:[%s33746_s29 + $0x18f8] sm:$0x3]  ;;  %v239_v12 = vld [vmem:[%s33738_s27 + $0x50] sm:$0xff] }
  0x54   : > { %6525 = vmatprep.mubr.f32.mxu0 %v2198_v44  ;;  %6595 = vmatprep.mubr.f32.mxu1 %v2199_v46  ;;  %v2275_v44 = vrot.slane %v236_v33, %v33752_v5  ;;  %v2282_v46 = vrot.slane %v2268_v40, %v33752_v5  ;;  %v238_v61 = vld [vmem:[%s33738_s27 + $0x48] sm:$0xff]  ;;  %v2319_v19 = vcombine.high %v239_v12, %v239_v12  ;;  %v240_v26 = vld [vmem:[%s33738_s27 + $0x58] sm:$0xff]  ;;  %v241_v40 = vld [vmem:[%s33738_s27 + $0x60] sm:$0xff] }
  0x55   : > { %v2302_v4 = vcombine.high %v238_v61, %v238_v61  ;;  %v2336_v33 = vcombine.high %v240_v26, %v240_v26 }
  0x56   : > { %6492 = vmatpush1.xpose.msra.mxu0 %v429_v48  ;;  %6562 = vmatpush1.xpose.msra.mxu1 %v431_v49  ;;  %v1217_v48 = vld [vmem:[%s33746_s29 + $0x18e0] sm:$0x3]  ;;  %v1219_v49 = vld [vmem:[%s33746_s29 + $0x18f0] sm:$0x3] }
  0x57   : > { %6629 = vmatprep.subr.mxu0 %v1202_v50  ;;  %6699 = vmatprep.subr.mxu1 %v1204_v52  ;;  %v450_v50 = vld [vmem:[%s33746_s29 + $0xe8] sm:$0xff]  ;;  %v452_v52 = vld [vmem:[%s33746_s29 + $0xf8] sm:$0xff] }
  0x59   : > { %6526 = vmatmul.mubr.f32.vlgmr.msra.gmra.mxu0 %v2190_v37  ;;  %6596 = vmatmul.mubr.f32.vlgmr.msra.gmra.mxu1 %v2197_v39  ;;  %v2266_v37 = vcombine.high %v2258_v30, %v2258_v30  ;;  %v2267_v39 = vcombine.high %v2265_v32, %v2265_v32 }
  0x5a   : > { %6630 = vmatpush1.xpose.msra.mxu0 %v1201_v55  ;;  %6700 = vmatpush1.xpose.msra.mxu1 %v1203_v56  ;;  %v449_v55 = vld [vmem:[%s33746_s29 + $0xe0] sm:$0xff]  ;;  %v451_v56 = vld [vmem:[%s33746_s29 + $0xf0] sm:$0xff] }
  0x5b   : > { %6631 = vmatprep.subr.mxu0 %v434_v57  ;;  %6701 = vmatprep.subr.mxu1 %v436_v59  ;;  %v1222_v57 = vld [vmem:[%s33746_s29 + $0x1908] sm:$0x3]  ;;  %v1224_v59 = vld [vmem:[%s33746_s29 + $0x1918] sm:$0x3] }
  0x5c   : > { %6665 = vmatprep.mubr.f32.mxu0 %v2215_v58  ;;  %6735 = vmatprep.mubr.f32.mxu1 %v2216_v60  ;;  %v2292_v58 = vrot.slane %v237_v47, %v33752_v5  ;;  %v2299_v60 = vrot.slane %v2285_v54, %v33752_v5  ;;  %v2353_v47 = vcombine.high %v241_v40, %v241_v40  ;;  %v242_v54 = vld [vmem:[%s33738_s27 + $0x68] sm:$0xff] }
  0x5e   : > { %6632 = vmatpush1.xpose.msra.mxu0 %v433_v62  ;;  %6702 = vmatpush1.xpose.msra.mxu1 %v435_v63  ;;  %v1221_v62 = vld [vmem:[%s33746_s29 + $0x1900] sm:$0x3]  ;;  %v1223_v63 = vld [vmem:[%s33746_s29 + $0x1910] sm:$0x3] }
  0x5f   : > { %6769 = vmatprep.subr.mxu0 %v1206_v0  ;;  %6839 = vmatprep.subr.mxu1 %v1208_v2  ;;  %v454_v0 = vld [vmem:[%s33746_s29 + $0x108] sm:$0xff]  ;;  %v456_v2 = vld [vmem:[%s33746_s29 + $0x118] sm:$0xff] }
  0x61   : > { %6666 = vmatmul.mubr.f32.vlgmr.msra.gmra.mxu0 %v2207_v51  ;;  %6736 = vmatmul.mubr.f32.vlgmr.msra.gmra.mxu1 %v2214_v53  ;;  %v2283_v51 = vcombine.high %v2275_v44, %v2275_v44  ;;  %v2284_v53 = vcombine.high %v2282_v46, %v2282_v46 }
  0x62   : > { %6770 = vmatpush1.xpose.msra.mxu0 %v1205_v6  ;;  %6840 = vmatpush1.xpose.msra.mxu1 %v1207_v7  ;;  %v453_v6 = vld [vmem:[%s33746_s29 + $0x100] sm:$0xff]  ;;  %v455_v7 = vld [vmem:[%s33746_s29 + $0x110] sm:$0xff] }
  0x63   : > { %6771 = vmatprep.subr.mxu0 %v438_v8  ;;  %6841 = vmatprep.subr.mxu1 %v440_v10  ;;  %v1226_v8 = vld [vmem:[%s33746_s29 + $0x1928] sm:$0x3]  ;;  %v1228_v10 = vld [vmem:[%s33746_s29 + $0x1938] sm:$0x3] }
  0x64   : > { %6805 = vmatprep.mubr.f32.mxu0 %v2232_v9  ;;  %6875 = vmatprep.mubr.f32.mxu1 %v2233_v11  ;;  %v2309_v9 = vrot.slane %v238_v61, %v33752_v5  ;;  %v2316_v11 = vrot.slane %v2302_v4, %v33752_v5  ;;  %v2370_v61 = vcombine.high %v242_v54, %v242_v54  ;;  %v243_v4 = vld [vmem:[%s33738_s27 + $0x70] sm:$0xff] }
  0x66   : > { %6772 = vmatpush1.xpose.msra.mxu0 %v437_v13  ;;  %6842 = vmatpush1.xpose.msra.mxu1 %v439_v14  ;;  %v1225_v13 = vld [vmem:[%s33746_s29 + $0x1920] sm:$0x3]  ;;  %v1227_v14 = vld [vmem:[%s33746_s29 + $0x1930] sm:$0x3] }
  0x67   : > { %6909 = vmatprep.subr.mxu0 %v1210_v15  ;;  %6979 = vmatprep.subr.mxu1 %v1212_v17  ;;  %v458_v15 = vld [vmem:[%s33746_s29 + $0x128] sm:$0xff]  ;;  %v460_v17 = vld [vmem:[%s33746_s29 + $0x138] sm:$0xff] }
  0x69   : > { %6806 = vmatmul.mubr.f32.vlgmr.msra.gmra.mxu0 %v2224_v1  ;;  %6876 = vmatmul.mubr.f32.vlgmr.msra.gmra.mxu1 %v2231_v3  ;;  %v2300_v1 = vcombine.high %v2292_v58, %v2292_v58  ;;  %v2301_v3 = vcombine.high %v2299_v60, %v2299_v60 }
  0x6a   : > { %6910 = vmatpush1.xpose.msra.mxu0 %v1209_v20  ;;  %6980 = vmatpush1.xpose.msra.mxu1 %v1211_v21  ;;  %v457_v20 = vld [vmem:[%s33746_s29 + $0x120] sm:$0xff]  ;;  %v459_v21 = vld [vmem:[%s33746_s29 + $0x130] sm:$0xff] }
  0x6b   : > { %6911 = vmatprep.subr.mxu0 %v442_v22  ;;  %6981 = vmatprep.subr.mxu1 %v444_v24  ;;  %v1230_v22 = vld [vmem:[%s33746_s29 + $0x1948] sm:$0x3]  ;;  %v1232_v24 = vld [vmem:[%s33746_s29 + $0x1958] sm:$0x3] }
  0x6c   : > { %6945 = vmatprep.mubr.f32.mxu0 %v2249_v23  ;;  %7015 = vmatprep.mubr.f32.mxu1 %v2250_v25  ;;  %v2326_v23 = vrot.slane %v239_v12, %v33752_v5  ;;  %v2333_v25 = vrot.slane %v2319_v19, %v33752_v5  ;;  %v2387_v12 = vcombine.high %v243_v4, %v243_v4  ;;  %v244_v19 = vld [vmem:[%s33738_s27 + $0x78] sm:$0xff] }
  0x6e   : > { %6912 = vmatpush1.xpose.msra.mxu0 %v441_v27  ;;  %6982 = vmatpush1.xpose.msra.mxu1 %v443_v28  ;;  %v1229_v27 = vld [vmem:[%s33746_s29 + $0x1940] sm:$0x3]  ;;  %v1231_v28 = vld [vmem:[%s33746_s29 + $0x1950] sm:$0x3] }
  0x6f   : > { %7049 = vmatprep.subr.mxu0 %v1214_v29  ;;  %7119 = vmatprep.subr.mxu1 %v1216_v31  ;;  %v462_v29 = vld [vmem:[%s33746_s29 + $0x148] sm:$0xff]  ;;  %v464_v31 = vld [vmem:[%s33746_s29 + $0x158] sm:$0xff] }
  0x71   : > { %6946 = vmatmul.mubr.f32.vlgmr.msra.gmra.mxu0 %v2241_v16  ;;  %7016 = vmatmul.mubr.f32.vlgmr.msra.gmra.mxu1 %v2248_v18  ;;  %v2317_v16 = vcombine.high %v2309_v9, %v2309_v9  ;;  %v2318_v18 = vcombine.high %v2316_v11, %v2316_v11 }
  0x72   : > { %7050 = vmatpush1.xpose.msra.mxu0 %v1213_v34  ;;  %7120 = vmatpush1.xpose.msra.mxu1 %v1215_v35  ;;  %v461_v34 = vld [vmem:[%s33746_s29 + $0x140] sm:$0xff]  ;;  %v463_v35 = vld [vmem:[%s33746_s29 + $0x150] sm:$0xff] }
  0x73   : > { %7051 = vmatprep.subr.mxu0 %v446_v36  ;;  %7121 = vmatprep.subr.mxu1 %v448_v38  ;;  %v1234_v36 = vld [vmem:[%s33746_s29 + $0x1968] sm:$0x3]  ;;  %v1236_v38 = vld [vmem:[%s33746_s29 + $0x1978] sm:$0x3] }
  0x74   : > { %7085 = vmatprep.mubr.f32.mxu0 %v2266_v37  ;;  %7155 = vmatprep.mubr.f32.mxu1 %v2267_v39  ;;  %v2343_v37 = vrot.slane %v240_v26, %v33752_v5  ;;  %v2350_v39 = vrot.slane %v2336_v33, %v33752_v5  ;;  %v2404_v26 = vcombine.high %v244_v19, %v244_v19  ;;  %v245_v33 = vld [vmem:[%s33738_s27 + $0x80] sm:$0xff] }
  0x76   : > { %7052 = vmatpush1.xpose.msra.mxu0 %v445_v41  ;;  %7122 = vmatpush1.xpose.msra.mxu1 %v447_v42  ;;  %v1233_v41 = vld [vmem:[%s33746_s29 + $0x1960] sm:$0x3]  ;;  %v1235_v42 = vld [vmem:[%s33746_s29 + $0x1970] sm:$0x3] }
  0x77   : > { %7189 = vmatprep.subr.mxu0 %v1218_v43  ;;  %7259 = vmatprep.subr.mxu1 %v1220_v45  ;;  %v466_v43 = vld [vmem:[%s33746_s29 + $0x168] sm:$0xff]  ;;  %v468_v45 = vld [vmem:[%s33746_s29 + $0x178] sm:$0xff] }
  0x79   : > { %7086 = vmatmul.mubr.f32.vlgmr.msra.gmra.mxu0 %v2258_v30  ;;  %7156 = vmatmul.mubr.f32.vlgmr.msra.gmra.mxu1 %v2265_v32  ;;  %v2334_v30 = vcombine.high %v2326_v23, %v2326_v23  ;;  %v2335_v32 = vcombine.high %v2333_v25, %v2333_v25 }
  0x7a   : > { %7190 = vmatpush1.xpose.msra.mxu0 %v1217_v48  ;;  %7260 = vmatpush1.xpose.msra.mxu1 %v1219_v49  ;;  %v465_v48 = vld [vmem:[%s33746_s29 + $0x160] sm:$0xff]  ;;  %v467_v49 = vld [vmem:[%s33746_s29 + $0x170] sm:$0xff] }
  0x7b   : > { %7191 = vmatprep.subr.mxu0 %v450_v50  ;;  %7261 = vmatprep.subr.mxu1 %v452_v52  ;;  %v1238_v50 = vld [vmem:[%s33746_s29 + $0x1988] sm:$0x3]  ;;  %v1240_v52 = vld [vmem:[%s33746_s29 + $0x1998] sm:$0x3] }
  0x7c   : > { %7225 = vmatprep.mubr.f32.mxu0 %v2283_v51  ;;  %7295 = vmatprep.mubr.f32.mxu1 %v2284_v53  ;;  %v2360_v51 = vrot.slane %v241_v40, %v33752_v5  ;;  %v2367_v53 = vrot.slane %v2353_v47, %v33752_v5  ;;  %v2421_v40 = vcombine.high %v245_v33, %v245_v33  ;;  %v246_v47 = vld [vmem:[%s33738_s27 + $0x88] sm:$0xff] }
  0x7e   : > { %7192 = vmatpush1.xpose.msra.mxu0 %v449_v55  ;;  %7262 = vmatpush1.xpose.msra.mxu1 %v451_v56  ;;  %v1237_v55 = vld [vmem:[%s33746_s29 + $0x1980] sm:$0x3]  ;;  %v1239_v56 = vld [vmem:[%s33746_s29 + $0x1990] sm:$0x3] }
  0x7f   : > { %7329 = vmatprep.subr.mxu0 %v1222_v57  ;;  %7399 = vmatprep.subr.mxu1 %v1224_v59  ;;  %v470_v57 = vld [vmem:[%s33746_s29 + $0x188] sm:$0xff]  ;;  %v472_v59 = vld [vmem:[%s33746_s29 + $0x198] sm:$0xff] }
  0x81   : > { %7226 = vmatmul.mubr.f32.vlgmr.msra.gmra.mxu0 %v2275_v44  ;;  %7296 = vmatmul.mubr.f32.vlgmr.msra.gmra.mxu1 %v2282_v46  ;;  %v2351_v44 = vcombine.high %v2343_v37, %v2343_v37  ;;  %v2352_v46 = vcombine.high %v2350_v39, %v2350_v39 }
  0x82   : > { %7330 = vmatpush1.xpose.msra.mxu0 %v1221_v62  ;;  %7400 = vmatpush1.xpose.msra.mxu1 %v1223_v63  ;;  %v469_v62 = vld [vmem:[%s33746_s29 + $0x180] sm:$0xff]  ;;  %v471_v63 = vld [vmem:[%s33746_s29 + $0x190] sm:$0xff] }
  0x83   : > { %7331 = vmatprep.subr.mxu0 %v454_v0  ;;  %7401 = vmatprep.subr.mxu1 %v456_v2  ;;  %v1242_v0 = vld [vmem:[%s33746_s29 + $0x19a8] sm:$0x3]  ;;  %v1244_v2 = vld [vmem:[%s33746_s29 + $0x19b8] sm:$0x3] }
  0x84   : > { %7365 = vmatprep.mubr.f32.mxu0 %v2300_v1  ;;  %7435 = vmatprep.mubr.f32.mxu1 %v2301_v3  ;;  %v2377_v1 = vrot.slane %v242_v54, %v33752_v5  ;;  %v2384_v3 = vrot.slane %v2370_v61, %v33752_v5  ;;  %v2438_v54 = vcombine.high %v246_v47, %v246_v47  ;;  %v247_v61 = vld [vmem:[%s33738_s27 + $0x90] sm:$0xff] }
  0x86   : > { %7332 = vmatpush1.xpose.msra.mxu0 %v453_v6  ;;  %7402 = vmatpush1.xpose.msra.mxu1 %v455_v7  ;;  %v1241_v6 = vld [vmem:[%s33746_s29 + $0x19a0] sm:$0x3]  ;;  %v1243_v7 = vld [vmem:[%s33746_s29 + $0x19b0] sm:$0x3] }
  0x87   : > { %7469 = vmatprep.subr.mxu0 %v1226_v8  ;;  %7539 = vmatprep.subr.mxu1 %v1228_v10  ;;  %v474_v8 = vld [vmem:[%s33746_s29 + $0x1a8] sm:$0xff]  ;;  %v476_v10 = vld [vmem:[%s33746_s29 + $0x1b8] sm:$0xff] }
  0x89   : > { %7366 = vmatmul.mubr.f32.vlgmr.msra.gmra.mxu0 %v2292_v58  ;;  %7436 = vmatmul.mubr.f32.vlgmr.msra.gmra.mxu1 %v2299_v60  ;;  %v2368_v58 = vcombine.high %v2360_v51, %v2360_v51  ;;  %v2369_v60 = vcombine.high %v2367_v53, %v2367_v53 }
  0x8a   : > { %7470 = vmatpush1.xpose.msra.mxu0 %v1225_v13  ;;  %7540 = vmatpush1.xpose.msra.mxu1 %v1227_v14  ;;  %v473_v13 = vld [vmem:[%s33746_s29 + $0x1a0] sm:$0xff]  ;;  %v475_v14 = vld [vmem:[%s33746_s29 + $0x1b0] sm:$0xff] }
  0x8b   : > { %7471 = vmatprep.subr.mxu0 %v458_v15  ;;  %7541 = vmatprep.subr.mxu1 %v460_v17  ;;  %v1246_v15 = vld [vmem:[%s33746_s29 + $0x19c8] sm:$0x3]  ;;  %v1248_v17 = vld [vmem:[%s33746_s29 + $0x19d8] sm:$0x3] }
  0x8c   : > { %7505 = vmatprep.mubr.f32.mxu0 %v2317_v16  ;;  %7575 = vmatprep.mubr.f32.mxu1 %v2318_v18  ;;  %v2394_v16 = vrot.slane %v243_v4, %v33752_v5  ;;  %v2401_v18 = vrot.slane %v2387_v12, %v33752_v5  ;;  %v2455_v4 = vcombine.high %v247_v61, %v247_v61  ;;  %v248_v12 = vld [vmem:[%s33738_s27 + $0x98] sm:$0xff] }
  0x8e   : > { %7472 = vmatpush1.xpose.msra.mxu0 %v457_v20  ;;  %7542 = vmatpush1.xpose.msra.mxu1 %v459_v21  ;;  %v1245_v20 = vld [vmem:[%s33746_s29 + $0x19c0] sm:$0x3]  ;;  %v1247_v21 = vld [vmem:[%s33746_s29 + $0x19d0] sm:$0x3] }
  0x8f   : > { %7609 = vmatprep.subr.mxu0 %v1230_v22  ;;  %7679 = vmatprep.subr.mxu1 %v1232_v24  ;;  %v478_v22 = vld [vmem:[%s33746_s29 + $0x1c8] sm:$0xff]  ;;  %v480_v24 = vld [vmem:[%s33746_s29 + $0x1d8] sm:$0xff] }
  0x91   : > { %7506 = vmatmul.mubr.f32.vlgmr.msra.gmra.mxu0 %v2309_v9  ;;  %7576 = vmatmul.mubr.f32.vlgmr.msra.gmra.mxu1 %v2316_v11  ;;  %v2385_v9 = vcombine.high %v2377_v1, %v2377_v1  ;;  %v2386_v11 = vcombine.high %v2384_v3, %v2384_v3 }
  0x92   : > { %7610 = vmatpush1.xpose.msra.mxu0 %v1229_v27  ;;  %7680 = vmatpush1.xpose.msra.mxu1 %v1231_v28  ;;  %v477_v27 = vld [vmem:[%s33746_s29 + $0x1c0] sm:$0xff]  ;;  %v479_v28 = vld [vmem:[%s33746_s29 + $0x1d0] sm:$0xff] }
  0x93   : > { %7611 = vmatprep.subr.mxu0 %v462_v29  ;;  %7681 = vmatprep.subr.mxu1 %v464_v31  ;;  %v1250_v29 = vld [vmem:[%s33746_s29 + $0x19e8] sm:$0x3]  ;;  %v1252_v31 = vld [vmem:[%s33746_s29 + $0x19f8] sm:$0x3] }
  0x94   : > { %7645 = vmatprep.mubr.f32.mxu0 %v2334_v30  ;;  %7715 = vmatprep.mubr.f32.mxu1 %v2335_v32  ;;  %v2411_v30 = vrot.slane %v244_v19, %v33752_v5  ;;  %v2418_v32 = vrot.slane %v2404_v26, %v33752_v5  ;;  %v2472_v19 = vcombine.high %v248_v12, %v248_v12  ;;  %v249_v26 = vld [vmem:[%s33738_s27 + $0xa0] sm:$0xff] }
  0x96   : > { %7612 = vmatpush1.xpose.msra.mxu0 %v461_v34  ;;  %7682 = vmatpush1.xpose.msra.mxu1 %v463_v35  ;;  %v1249_v34 = vld [vmem:[%s33746_s29 + $0x19e0] sm:$0x3]  ;;  %v1251_v35 = vld [vmem:[%s33746_s29 + $0x19f0] sm:$0x3] }
  0x97   : > { %7749 = vmatprep.subr.mxu0 %v1234_v36  ;;  %7819 = vmatprep.subr.mxu1 %v1236_v38  ;;  %v482_v36 = vld [vmem:[%s33746_s29 + $0x1e8] sm:$0xff]  ;;  %v484_v38 = vld [vmem:[%s33746_s29 + $0x1f8] sm:$0xff] }
  0x99   : > { %7646 = vmatmul.mubr.f32.vlgmr.msra.gmra.mxu0 %v2326_v23  ;;  %7716 = vmatmul.mubr.f32.vlgmr.msra.gmra.mxu1 %v2333_v25  ;;  %v2402_v23 = vcombine.high %v2394_v16, %v2394_v16  ;;  %v2403_v25 = vcombine.high %v2401_v18, %v2401_v18 }
  0x9a   : > { %7750 = vmatpush1.xpose.msra.mxu0 %v1233_v41  ;;  %7820 = vmatpush1.xpose.msra.mxu1 %v1235_v42  ;;  %v481_v41 = vld [vmem:[%s33746_s29 + $0x1e0] sm:$0xff]  ;;  %v483_v42 = vld [vmem:[%s33746_s29 + $0x1f0] sm:$0xff] }
  0x9b   : > { %7751 = vmatprep.subr.mxu0 %v466_v43  ;;  %7821 = vmatprep.subr.mxu1 %v468_v45  ;;  %v1254_v43 = vld [vmem:[%s33746_s29 + $0x1a08] sm:$0x3]  ;;  %v1256_v45 = vld [vmem:[%s33746_s29 + $0x1a18] sm:$0x3] }
  0x9c   : > { %7785 = vmatprep.mubr.f32.mxu0 %v2351_v44  ;;  %7855 = vmatprep.mubr.f32.mxu1 %v2352_v46  ;;  %v2428_v44 = vrot.slane %v245_v33, %v33752_v5  ;;  %v2435_v46 = vrot.slane %v2421_v40, %v33752_v5  ;;  %v2489_v33 = vcombine.high %v249_v26, %v249_v26  ;;  %v250_v40 = vld [vmem:[%s33738_s27 + $0xa8] sm:$0xff] }
  0x9e   : > { %7752 = vmatpush1.xpose.msra.mxu0 %v465_v48  ;;  %7822 = vmatpush1.xpose.msra.mxu1 %v467_v49  ;;  %v1253_v48 = vld [vmem:[%s33746_s29 + $0x1a00] sm:$0x3]  ;;  %v1255_v49 = vld [vmem:[%s33746_s29 + $0x1a10] sm:$0x3] }
  0x9f   : > { %7889 = vmatprep.subr.mxu0 %v1238_v50  ;;  %7959 = vmatprep.subr.mxu1 %v1240_v52  ;;  %v486_v50 = vld [vmem:[%s33746_s29 + $0x208] sm:$0xff]  ;;  %v488_v52 = vld [vmem:[%s33746_s29 + $0x218] sm:$0xff] }
  0xa1   : > { %7786 = vmatmul.mubr.f32.vlgmr.msra.gmra.mxu0 %v2343_v37  ;;  %7856 = vmatmul.mubr.f32.vlgmr.msra.gmra.mxu1 %v2350_v39  ;;  %v2419_v37 = vcombine.high %v2411_v30, %v2411_v30  ;;  %v2420_v39 = vcombine.high %v2418_v32, %v2418_v32 }
  0xa2   : > { %7890 = vmatpush1.xpose.msra.mxu0 %v1237_v55  ;;  %7960 = vmatpush1.xpose.msra.mxu1 %v1239_v56  ;;  %v485_v55 = vld [vmem:[%s33746_s29 + $0x200] sm:$0xff]  ;;  %v487_v56 = vld [vmem:[%s33746_s29 + $0x210] sm:$0xff] }
  0xa3   : > { %7891 = vmatprep.subr.mxu0 %v470_v57  ;;  %7961 = vmatprep.subr.mxu1 %v472_v59  ;;  %v1258_v57 = vld [vmem:[%s33746_s29 + $0x1a28] sm:$0x3]  ;;  %v1260_v59 = vld [vmem:[%s33746_s29 + $0x1a38] sm:$0x3] }
  0xa4   : > { %7925 = vmatprep.mubr.f32.mxu0 %v2368_v58  ;;  %7995 = vmatprep.mubr.f32.mxu1 %v2369_v60  ;;  %v2445_v58 = vrot.slane %v246_v47, %v33752_v5  ;;  %v2452_v60 = vrot.slane %v2438_v54, %v33752_v5  ;;  %v2506_v47 = vcombine.high %v250_v40, %v250_v40  ;;  %v251_v54 = vld [vmem:[%s33738_s27 + $0xb0] sm:$0xff] }
  0xa6   : > { %7892 = vmatpush1.xpose.msra.mxu0 %v469_v62  ;;  %7962 = vmatpush1.xpose.msra.mxu1 %v471_v63  ;;  %v1257_v62 = vld [vmem:[%s33746_s29 + $0x1a20] sm:$0x3]  ;;  %v1259_v63 = vld [vmem:[%s33746_s29 + $0x1a30] sm:$0x3] }
  0xa7   : > { %8029 = vmatprep.subr.mxu0 %v1242_v0  ;;  %8099 = vmatprep.subr.mxu1 %v1244_v2  ;;  %v490_v0 = vld [vmem:[%s33746_s29 + $0x228] sm:$0xff]  ;;  %v492_v2 = vld [vmem:[%s33746_s29 + $0x238] sm:$0xff] }
  0xa9   : > { %7926 = vmatmul.mubr.f32.vlgmr.msra.gmra.mxu0 %v2360_v51  ;;  %7996 = vmatmul.mubr.f32.vlgmr.msra.gmra.mxu1 %v2367_v53  ;;  %v2436_v51 = vcombine.high %v2428_v44, %v2428_v44  ;;  %v2437_v53 = vcombine.high %v2435_v46, %v2435_v46 }
  0xaa   : > { %8030 = vmatpush1.xpose.msra.mxu0 %v1241_v6  ;;  %8100 = vmatpush1.xpose.msra.mxu1 %v1243_v7  ;;  %v489_v6 = vld [vmem:[%s33746_s29 + $0x220] sm:$0xff]  ;;  %v491_v7 = vld [vmem:[%s33746_s29 + $0x230] sm:$0xff] }
  0xab   : > { %8031 = vmatprep.subr.mxu0 %v474_v8  ;;  %8101 = vmatprep.subr.mxu1 %v476_v10  ;;  %v1262_v8 = vld [vmem:[%s33746_s29 + $0x1a48] sm:$0x3]  ;;  %v1264_v10 = vld [vmem:[%s33746_s29 + $0x1a58] sm:$0x3] }
  0xac   : > { %8065 = vmatprep.mubr.f32.mxu0 %v2385_v9  ;;  %8135 = vmatprep.mubr.f32.mxu1 %v2386_v11  ;;  %v2462_v9 = vrot.slane %v247_v61, %v33752_v5  ;;  %v2469_v11 = vrot.slane %v2455_v4, %v33752_v5  ;;  %v2523_v61 = vcombine.high %v251_v54, %v251_v54  ;;  %v252_v4 = vld [vmem:[%s33738_s27 + $0xb8] sm:$0xff] }
  0xae   : > { %8032 = vmatpush1.xpose.msra.mxu0 %v473_v13  ;;  %8102 = vmatpush1.xpose.msra.mxu1 %v475_v14  ;;  %v1261_v13 = vld [vmem:[%s33746_s29 + $0x1a40] sm:$0x3]  ;;  %v1263_v14 = vld [vmem:[%s33746_s29 + $0x1a50] sm:$0x3] }
  0xaf   : > { %8169 = vmatprep.subr.mxu0 %v1246_v15  ;;  %8239 = vmatprep.subr.mxu1 %v1248_v17  ;;  %v494_v15 = vld [vmem:[%s33746_s29 + $0x248] sm:$0xff]  ;;  %v496_v17 = vld [vmem:[%s33746_s29 + $0x258] sm:$0xff] }
  0xb1   : > { %8066 = vmatmul.mubr.f32.vlgmr.msra.gmra.mxu0 %v2377_v1  ;;  %8136 = vmatmul.mubr.f32.vlgmr.msra.gmra.mxu1 %v2384_v3  ;;  %v2453_v1 = vcombine.high %v2445_v58, %v2445_v58  ;;  %v2454_v3 = vcombine.high %v2452_v60, %v2452_v60 }
  0xb2   : > { %8170 = vmatpush1.xpose.msra.mxu0 %v1245_v20  ;;  %8240 = vmatpush1.xpose.msra.mxu1 %v1247_v21  ;;  %v493_v20 = vld [vmem:[%s33746_s29 + $0x240] sm:$0xff]  ;;  %v495_v21 = vld [vmem:[%s33746_s29 + $0x250] sm:$0xff] }
  0xb3   : > { %8171 = vmatprep.subr.mxu0 %v478_v22  ;;  %8241 = vmatprep.subr.mxu1 %v480_v24  ;;  %v1266_v22 = vld [vmem:[%s33746_s29 + $0x1a68] sm:$0x3]  ;;  %v1268_v24 = vld [vmem:[%s33746_s29 + $0x1a78] sm:$0x3] }
  0xb4   : > { %8205 = vmatprep.mubr.f32.mxu0 %v2402_v23  ;;  %8275 = vmatprep.mubr.f32.mxu1 %v2403_v25  ;;  %v2479_v23 = vrot.slane %v248_v12, %v33752_v5  ;;  %v2486_v25 = vrot.slane %v2472_v19, %v33752_v5  ;;  %v2540_v12 = vcombine.high %v252_v4, %v252_v4  ;;  %v253_v19 = vld [vmem:[%s33738_s27 + $0xc0] sm:$0xff] }
  0xb6   : > { %8172 = vmatpush1.xpose.msra.mxu0 %v477_v27  ;;  %8242 = vmatpush1.xpose.msra.mxu1 %v479_v28  ;;  %v1265_v27 = vld [vmem:[%s33746_s29 + $0x1a60] sm:$0x3]  ;;  %v1267_v28 = vld [vmem:[%s33746_s29 + $0x1a70] sm:$0x3] }
  0xb7   : > { %8309 = vmatprep.subr.mxu0 %v1250_v29  ;;  %8379 = vmatprep.subr.mxu1 %v1252_v31  ;;  %v498_v29 = vld [vmem:[%s33746_s29 + $0x268] sm:$0xff]  ;;  %v500_v31 = vld [vmem:[%s33746_s29 + $0x278] sm:$0xff] }
  0xb9   : > { %8206 = vmatmul.mubr.f32.vlgmr.msra.gmra.mxu0 %v2394_v16  ;;  %8276 = vmatmul.mubr.f32.vlgmr.msra.gmra.mxu1 %v2401_v18  ;;  %v2470_v16 = vcombine.high %v2462_v9, %v2462_v9  ;;  %v2471_v18 = vcombine.high %v2469_v11, %v2469_v11 }
  0xba   : > { %8310 = vmatpush1.xpose.msra.mxu0 %v1249_v34  ;;  %8380 = vmatpush1.xpose.msra.mxu1 %v1251_v35  ;;  %v497_v34 = vld [vmem:[%s33746_s29 + $0x260] sm:$0xff]  ;;  %v499_v35 = vld [vmem:[%s33746_s29 + $0x270] sm:$0xff] }
  0xbb   : > { %8311 = vmatprep.subr.mxu0 %v482_v36  ;;  %8381 = vmatprep.subr.mxu1 %v484_v38  ;;  %v1270_v36 = vld [vmem:[%s33746_s29 + $0x1a88] sm:$0x3]  ;;  %v1272_v38 = vld [vmem:[%s33746_s29 + $0x1a98] sm:$0x3] }
  0xbc   : > { %8345 = vmatprep.mubr.f32.mxu0 %v2419_v37  ;;  %8415 = vmatprep.mubr.f32.mxu1 %v2420_v39  ;;  %v2496_v37 = vrot.slane %v249_v26, %v33752_v5  ;;  %v2503_v39 = vrot.slane %v2489_v33, %v33752_v5  ;;  %v2557_v26 = vcombine.high %v253_v19, %v253_v19  ;;  %v254_v33 = vld [vmem:[%s33738_s27 + $0xc8] sm:$0xff] }
  0xbe   : > { %8312 = vmatpush1.xpose.msra.mxu0 %v481_v41  ;;  %8382 = vmatpush1.xpose.msra.mxu1 %v483_v42  ;;  %v1269_v41 = vld [vmem:[%s33746_s29 + $0x1a80] sm:$0x3]  ;;  %v1271_v42 = vld [vmem:[%s33746_s29 + $0x1a90] sm:$0x3] }
  0xbf   : > { %8449 = vmatprep.subr.mxu0 %v1254_v43  ;;  %8519 = vmatprep.subr.mxu1 %v1256_v45  ;;  %v502_v43 = vld [vmem:[%s33746_s29 + $0x288] sm:$0xff]  ;;  %v504_v45 = vld [vmem:[%s33746_s29 + $0x298] sm:$0xff] }
  0xc1   : > { %8346 = vmatmul.mubr.f32.vlgmr.msra.gmra.mxu0 %v2411_v30  ;;  %8416 = vmatmul.mubr.f32.vlgmr.msra.gmra.mxu1 %v2418_v32  ;;  %v2487_v30 = vcombine.high %v2479_v23, %v2479_v23  ;;  %v2488_v32 = vcombine.high %v2486_v25, %v2486_v25 }
  0xc2   : > { %8450 = vmatpush1.xpose.msra.mxu0 %v1253_v48  ;;  %8520 = vmatpush1.xpose.msra.mxu1 %v1255_v49  ;;  %v501_v48 = vld [vmem:[%s33746_s29 + $0x280] sm:$0xff]  ;;  %v503_v49 = vld [vmem:[%s33746_s29 + $0x290] sm:$0xff] }
  0xc3   : > { %8451 = vmatprep.subr.mxu0 %v486_v50  ;;  %8521 = vmatprep.subr.mxu1 %v488_v52  ;;  %v1274_v50 = vld [vmem:[%s33746_s29 + $0x1aa8] sm:$0x3]  ;;  %v1276_v52 = vld [vmem:[%s33746_s29 + $0x1ab8] sm:$0x3] }
  0xc4   : > { %8485 = vmatprep.mubr.f32.mxu0 %v2436_v51  ;;  %8555 = vmatprep.mubr.f32.mxu1 %v2437_v53  ;;  %v2513_v51 = vrot.slane %v250_v40, %v33752_v5  ;;  %v2520_v53 = vrot.slane %v2506_v47, %v33752_v5  ;;  %v2574_v40 = vcombine.high %v254_v33, %v254_v33  ;;  %v255_v47 = vld [vmem:[%s33738_s27 + $0xd0] sm:$0xff] }
  0xc6   : > { %8452 = vmatpush1.xpose.msra.mxu0 %v485_v55  ;;  %8522 = vmatpush1.xpose.msra.mxu1 %v487_v56  ;;  %v1273_v55 = vld [vmem:[%s33746_s29 + $0x1aa0] sm:$0x3]  ;;  %v1275_v56 = vld [vmem:[%s33746_s29 + $0x1ab0] sm:$0x3] }
  0xc7   : > { %8589 = vmatprep.subr.mxu0 %v1258_v57  ;;  %8659 = vmatprep.subr.mxu1 %v1260_v59  ;;  %v506_v57 = vld [vmem:[%s33746_s29 + $0x2a8] sm:$0xff]  ;;  %v508_v59 = vld [vmem:[%s33746_s29 + $0x2b8] sm:$0xff] }
  0xc9   : > { %8486 = vmatmul.mubr.f32.vlgmr.msra.gmra.mxu0 %v2428_v44  ;;  %8556 = vmatmul.mubr.f32.vlgmr.msra.gmra.mxu1 %v2435_v46  ;;  %v2504_v44 = vcombine.high %v2496_v37, %v2496_v37  ;;  %v2505_v46 = vcombine.high %v2503_v39, %v2503_v39 }
  0xca   : > { %8590 = vmatpush1.xpose.msra.mxu0 %v1257_v62  ;;  %8660 = vmatpush1.xpose.msra.mxu1 %v1259_v63  ;;  %v505_v62 = vld [vmem:[%s33746_s29 + $0x2a0] sm:$0xff]  ;;  %v507_v63 = vld [vmem:[%s33746_s29 + $0x2b0] sm:$0xff] }
  0xcb   : > { %8591 = vmatprep.subr.mxu0 %v490_v0  ;;  %8661 = vmatprep.subr.mxu1 %v492_v2  ;;  %v1278_v0 = vld [vmem:[%s33746_s29 + $0x1ac8] sm:$0x3]  ;;  %v1280_v2 = vld [vmem:[%s33746_s29 + $0x1ad8] sm:$0x3] }
  0xcc   : > { %8625 = vmatprep.mubr.f32.mxu0 %v2453_v1  ;;  %8695 = vmatprep.mubr.f32.mxu1 %v2454_v3  ;;  %v2530_v1 = vrot.slane %v251_v54, %v33752_v5  ;;  %v2537_v3 = vrot.slane %v2523_v61, %v33752_v5  ;;  %v523_v61 = vld [vmem:[%s33746_s29 + $0x330] sm:$0xff] }
  0xce   : > { %8592 = vmatpush1.xpose.msra.mxu0 %v489_v6  ;;  %8662 = vmatpush1.xpose.msra.mxu1 %v491_v7  ;;  %v1277_v6 = vld [vmem:[%s33746_s29 + $0x1ac0] sm:$0x3]  ;;  %v1279_v7 = vld [vmem:[%s33746_s29 + $0x1ad0] sm:$0x3] }
  0xcf   : > { %8729 = vmatprep.subr.mxu0 %v1262_v8  ;;  %8799 = vmatprep.subr.mxu1 %v1264_v10  ;;  %v510_v8 = vld [vmem:[%s33746_s29 + $0x2c8] sm:$0xff]  ;;  %v512_v10 = vld [vmem:[%s33746_s29 + $0x2d8] sm:$0xff] }
  0xd1   : > { %8626 = vmatmul.mubr.f32.vlgmr.msra.gmra.mxu0 %v2445_v58  ;;  %8696 = vmatmul.mubr.f32.vlgmr.msra.gmra.mxu1 %v2452_v60  ;;  %v2521_v58 = vcombine.high %v2513_v51, %v2513_v51  ;;  %v2522_v60 = vcombine.high %v2520_v53, %v2520_v53 }
  0xd2   : > { %8730 = vmatpush1.xpose.msra.mxu0 %v1261_v13  ;;  %8800 = vmatpush1.xpose.msra.mxu1 %v1263_v14  ;;  %v509_v13 = vld [vmem:[%s33746_s29 + $0x2c0] sm:$0xff]  ;;  %v511_v14 = vld [vmem:[%s33746_s29 + $0x2d0] sm:$0xff] }
  0xd3   : > { %8731 = vmatprep.subr.mxu0 %v494_v15  ;;  %8801 = vmatprep.subr.mxu1 %v496_v17  ;;  %v1282_v15 = vld [vmem:[%s33746_s29 + $0x1ae8] sm:$0x3]  ;;  %v1284_v17 = vld [vmem:[%s33746_s29 + $0x1af8] sm:$0x3] }
  0xd4   : > { %8765 = vmatprep.mubr.f32.mxu0 %v2470_v16  ;;  %8835 = vmatprep.mubr.f32.mxu1 %v2471_v18  ;;  %v2547_v16 = vrot.slane %v252_v4, %v33752_v5  ;;  %v2554_v18 = vrot.slane %v2540_v12, %v33752_v5  ;;  %v1295_v4 = vld [vmem:[%s33746_s29 + $0x1b50] sm:$0x3] }
  0xd6   : > { %8732 = vmatpush1.xpose.msra.mxu0 %v493_v20  ;;  %8802 = vmatpush1.xpose.msra.mxu1 %v495_v21  ;;  %v1281_v20 = vld [vmem:[%s33746_s29 + $0x1ae0] sm:$0x3]  ;;  %v1283_v21 = vld [vmem:[%s33746_s29 + $0x1af0] sm:$0x3] }
  0xd7   : > { %8869 = vmatprep.subr.mxu0 %v1266_v22  ;;  %8939 = vmatprep.subr.mxu1 %v1268_v24  ;;  %v514_v22 = vld [vmem:[%s33746_s29 + $0x2e8] sm:$0xff]  ;;  %v516_v24 = vld [vmem:[%s33746_s29 + $0x2f8] sm:$0xff] }
  0xd9   : > { %8766 = vmatmul.mubr.f32.vlgmr.msra.gmra.mxu0 %v2462_v9  ;;  %8836 = vmatmul.mubr.f32.vlgmr.msra.gmra.mxu1 %v2469_v11  ;;  %v2538_v9 = vcombine.high %v2530_v1, %v2530_v1  ;;  %v2539_v11 = vcombine.high %v2537_v3, %v2537_v3 }
  0xda   : > { %8870 = vmatpush1.xpose.msra.mxu0 %v1265_v27  ;;  %8940 = vmatpush1.xpose.msra.mxu1 %v1267_v28  ;;  %v513_v27 = vld [vmem:[%s33746_s29 + $0x2e0] sm:$0xff]  ;;  %v515_v28 = vld [vmem:[%s33746_s29 + $0x2f0] sm:$0xff] }
  0xdb   : > { %8871 = vmatprep.subr.mxu0 %v498_v29  ;;  %8941 = vmatprep.subr.mxu1 %v500_v31  ;;  %v1286_v29 = vld [vmem:[%s33746_s29 + $0x1b08] sm:$0x3]  ;;  %v1288_v31 = vld [vmem:[%s33746_s29 + $0x1b18] sm:$0x3] }
  0xdc   : > { %8905 = vmatprep.mubr.f32.mxu0 %v2487_v30  ;;  %8975 = vmatprep.mubr.f32.mxu1 %v2488_v32  ;;  %v2564_v30 = vrot.slane %v253_v19, %v33752_v5  ;;  %v2571_v32 = vrot.slane %v2557_v26, %v33752_v5  ;;  %v1298_v19 = vld [vmem:[%s33746_s29 + $0x1b68] sm:$0x3] }
  0xdd   : > { %v530_v26 = vld [vmem:[%s33746_s29 + $0x368] sm:$0xff] }
  0xde   : > { %8872 = vmatpush1.xpose.msra.mxu0 %v497_v34  ;;  %8942 = vmatpush1.xpose.msra.mxu1 %v499_v35  ;;  %v1285_v34 = vld [vmem:[%s33746_s29 + $0x1b00] sm:$0x3]  ;;  %v1287_v35 = vld [vmem:[%s33746_s29 + $0x1b10] sm:$0x3] }
  0xdf   : > { %9009 = vmatprep.subr.mxu0 %v1270_v36  ;;  %9079 = vmatprep.subr.mxu1 %v1272_v38  ;;  %v518_v36 = vld [vmem:[%s33746_s29 + $0x308] sm:$0xff]  ;;  %v520_v38 = vld [vmem:[%s33746_s29 + $0x318] sm:$0xff] }
  0xe1   : > { %8906 = vmatmul.mubr.f32.vlgmr.msra.gmra.mxu0 %v2479_v23  ;;  %8976 = vmatmul.mubr.f32.vlgmr.msra.gmra.mxu1 %v2486_v25  ;;  %v2555_v23 = vcombine.high %v2547_v16, %v2547_v16  ;;  %v2556_v25 = vcombine.high %v2554_v18, %v2554_v18 }
  0xe2   : > { %9010 = vmatpush1.xpose.msra.mxu0 %v1269_v41  ;;  %9080 = vmatpush1.xpose.msra.mxu1 %v1271_v42  ;;  %v517_v41 = vld [vmem:[%s33746_s29 + $0x300] sm:$0xff]  ;;  %v519_v42 = vld [vmem:[%s33746_s29 + $0x310] sm:$0xff] }
  0xe3   : > { %9011 = vmatprep.subr.mxu0 %v502_v43  ;;  %9081 = vmatprep.subr.mxu1 %v504_v45  ;;  %v1290_v43 = vld [vmem:[%s33746_s29 + $0x1b28] sm:$0x3]  ;;  %v1292_v45 = vld [vmem:[%s33746_s29 + $0x1b38] sm:$0x3] }
  0xe4   : > { %9045 = vmatprep.mubr.f32.mxu0 %v2504_v44  ;;  %9115 = vmatprep.mubr.f32.mxu1 %v2505_v46  ;;  %v2581_v44 = vrot.slane %v254_v33, %v33752_v5  ;;  %v2588_v46 = vrot.slane %v2574_v40, %v33752_v5 }
  0xe6   : > { %9012 = vmatpush1.xpose.msra.mxu0 %v501_v48  ;;  %9082 = vmatpush1.xpose.msra.mxu1 %v503_v49  ;;  %v1289_v48 = vld [vmem:[%s33746_s29 + $0x1b20] sm:$0x3]  ;;  %v1291_v49 = vld [vmem:[%s33746_s29 + $0x1b30] sm:$0x3]  ;;  %v2590_v54 = vcombine.high %v2588_v46, %v2588_v46 }
  0xe7   : > { %9149 = vmatprep.subr.mxu0 %v1274_v50  ;;  %9219 = vmatprep.subr.mxu1 %v1276_v52  ;;  %v522_v50 = vld [vmem:[%s33746_s29 + $0x328] sm:$0xff] }
  0xe9   : > { %9046 = vmatmul.mubr.f32.vlgmr.msra.gmra.mxu0 %v2496_v37  ;;  %9116 = vmatmul.mubr.f32.vlgmr.msra.gmra.mxu1 %v2503_v39  ;;  %v2572_v37 = vcombine.high %v2564_v30, %v2564_v30  ;;  %v2573_v39 = vcombine.high %v2571_v32, %v2571_v32 }
  0xea   : > { %9150 = vmatpush1.xpose.msra.mxu0 %v1273_v55  ;;  %9220 = vmatpush1.xpose.msra.mxu1 %v1275_v56  ;;  %v2591_v55 = vcombine.high %v255_v47, %v255_v47 }
  0xeb   : > { %9151 = vmatprep.subr.mxu0 %v506_v57  ;;  %9221 = vmatprep.subr.mxu1 %v508_v59  ;;  %v521_v59 = vld [vmem:[%s33746_s29 + $0x320] sm:$0xff] }
  0xec   : > { %9185 = vmatprep.mubr.f32.mxu0 %v2521_v58  ;;  %9255 = vmatprep.mubr.f32.mxu1 %v2522_v60 }
  0xee   : > { %9152 = vmatpush1.xpose.msra.mxu0 %v505_v62  ;;  %9222 = vmatpush1.xpose.msra.mxu1 %v507_v63  ;;  %v1294_v62 = vld [vmem:[%s33746_s29 + $0x1b48] sm:$0x3]  ;;  %v2598_v63 = vrot.slane %v255_v47, %v33752_v5 }
  0xef   : > { %9289 = vmatprep.subr.mxu0 %v1278_v0  ;;  %9359 = vmatprep.subr.mxu1 %v1280_v2  ;;  %v1296_v0 = vld [vmem:[%s33746_s29 + $0x1b58] sm:$0x3] }
  0xf0   : > { %v256_v2 = vld [vmem:[%s33738_s27 + $0xd8] sm:$0xff] }
  0xf1   : > { %9186 = vmatmul.mubr.f32.vlgmr.msra.gmra.mxu0 %v2513_v51  ;;  %9256 = vmatmul.mubr.f32.vlgmr.msra.gmra.mxu1 %v2520_v53  ;;  %v2589_v51 = vcombine.high %v2581_v44, %v2581_v44  ;;  %v524_v53 = vld [vmem:[%s33746_s29 + $0x338] sm:$0xff] }
  0xf2   : > { %9290 = vmatpush1.xpose.msra.mxu0 %v1277_v6  ;;  %9360 = vmatpush1.xpose.msra.mxu1 %v1279_v7  ;;  %v526_v6 = vld [vmem:[%s33746_s29 + $0x348] sm:$0xff]  ;;  %v2606_v7 = vcombine.high %v2598_v63, %v2598_v63 }
  0xf3   : > { %9291 = vmatprep.subr.mxu0 %v510_v8  ;;  %9361 = vmatprep.subr.mxu1 %v512_v10 }
  0xf4   : > { %9325 = vmatprep.mubr.f32.mxu0 %v2538_v9  ;;  %9395 = vmatprep.mubr.f32.mxu1 %v2539_v11  ;;  %v528_v9 = vld [vmem:[%s33746_s29 + $0x358] sm:$0xff]  ;;  %v2608_v11 = vcombine.high %v256_v2, %v256_v2 }
  0xf6   : > { %9292 = vmatpush1.xpose.msra.mxu0 %v509_v13  ;;  %9362 = vmatpush1.xpose.msra.mxu1 %v511_v14 }
  0xf7   : > { %9429 = vmatprep.subr.mxu0 %v1282_v15  ;;  %9499 = vmatprep.subr.mxu1 %v1284_v17  ;;  %v525_v15 = vld [vmem:[%s33746_s29 + $0x340] sm:$0xff] }
  0xf9   : > { %9326 = vmatmul.mubr.f32.vlgmr.msra.gmra.mxu0 %v2530_v1  ;;  %9396 = vmatmul.mubr.f32.vlgmr.msra.gmra.mxu1 %v2537_v3  ;;  %v2605_v1 = vrot.slane %v2591_v55, %v33752_v5  ;;  %v1293_v3 = vld [vmem:[%s33746_s29 + $0x1b40] sm:$0x3] }
  0xfa   : > { %9430 = vmatpush1.xpose.msra.mxu0 %v1281_v20  ;;  %9500 = vmatpush1.xpose.msra.mxu1 %v1283_v21  ;;  %v2615_v20 = vrot.slane %v256_v2, %v33752_v5  ;;  %v1300_v21 = vld [vmem:[%s33746_s29 + $0x1b78] sm:$0x3]  ;;  %v533_v55 = vld [vmem:[%s33746_s29 + $0x380] sm:$0xff]  ;;  %v538_v2 = vld [vmem:[%s33746_s29 + $0x3a8] sm:$0xff] }
  0xfb   : > { %9431 = vmatprep.subr.mxu0 %v514_v22  ;;  %9501 = vmatprep.subr.mxu1 %v516_v24  ;;  %v2607_v10 = vcombine.high %v2605_v1, %v2605_v1  ;;  %v2622_v22 = vrot.slane %v2608_v11, %v33752_v5  ;;  %v1297_v24 = vld [vmem:[%s33746_s29 + $0x1b60] sm:$0x3] }
  0xfc   : > { %9465 = vmatprep.mubr.f32.mxu0 %v2555_v23  ;;  %9535 = vmatprep.mubr.f32.mxu1 %v2556_v25  ;;  %v257_v23 = vld [vmem:[%s33738_s27 + $0xe0] sm:$0xff]  ;;  %v1299_v25 = vld [vmem:[%s33746_s29 + $0x1b70] sm:$0x3] }
  0xfd   : > { %v2632_v40 = vrot.slane %v257_v23, %v33752_v5 }
  0xfe   : > { %9432 = vmatpush1.xpose.msra.mxu0 %v513_v27  ;;  %9502 = vmatpush1.xpose.msra.mxu1 %v515_v28  ;;  %v2623_v27 = vcombine.high %v2615_v20, %v2615_v20 }
  0xff   : > { %9569 = vmatprep.subr.mxu0 %v1286_v29  ;;  %9639 = vmatprep.subr.mxu1 %v1288_v31  ;;  %v532_v29 = vld [vmem:[%s33746_s29 + $0x378] sm:$0xff]  ;;  %v2625_v31 = vcombine.high %v257_v23, %v257_v23  ;;  %v2640_v47 = vcombine.high %v2632_v40, %v2632_v40  ;;  %v542_v23 = vld [vmem:[%s33746_s29 + $0x3c8] sm:$0xff] }
 0x101   : > { %9466 = vmatmul.mubr.f32.vlgmr.msra.gmra.mxu0 %v2547_v16  ;;  %9536 = vmatmul.mubr.f32.vlgmr.msra.gmra.mxu1 %v2554_v18  ;;  %v527_v18 = vld [vmem:[%s33746_s29 + $0x350] sm:$0xff] }
 0x102   : > { %9570 = vmatpush1.xpose.msra.mxu0 %v1285_v34  ;;  %9640 = vmatpush1.xpose.msra.mxu1 %v1287_v35  ;;  %v529_v35 = vld [vmem:[%s33746_s29 + $0x360] sm:$0xff] }
 0x103   : > { %9571 = vmatprep.subr.mxu0 %v518_v36  ;;  %9641 = vmatprep.subr.mxu1 %v520_v38  ;;  %v531_v38 = vld [vmem:[%s33746_s29 + $0x370] sm:$0xff] }
 0x104   : > { %9605 = vmatprep.mubr.f32.mxu0 %v2572_v37  ;;  %9675 = vmatprep.mubr.f32.mxu1 %v2573_v39  ;;  %v1302_v39 = vld [vmem:[%s33746_s29 + $0x1b88] sm:$0x3] }
 0x106   : > { %9572 = vmatpush1.xpose.msra.mxu0 %v517_v41  ;;  %9642 = vmatpush1.xpose.msra.mxu1 %v519_v42  ;;  %v1304_v41 = vld [vmem:[%s33746_s29 + $0x1b98] sm:$0x3]  ;;  %v2639_v42 = vrot.slane %v2625_v31, %v33752_v5 }
 0x107   : > { %9709 = vmatprep.subr.mxu0 %v1290_v43  ;;  %9779 = vmatprep.subr.mxu1 %v1292_v45  ;;  %v258_v43 = vld [vmem:[%s33738_s27 + $0xe8] sm:$0xff]  ;;  %v1303_v45 = vld [vmem:[%s33746_s29 + $0x1b90] sm:$0x3] }
 0x109   : > { %v6247_v52 = vpop.f32.mrf.mxu0  ;;  %9606 = vmatmul.mubr.f32.vlgmr.msra.gmra.mxu0 %v2564_v30  ;;  %v6317_v56 = vpop.f32.mrf.mxu1  ;;  %9676 = vmatmul.mubr.f32.vlgmr.msra.gmra.mxu1 %v2571_v32  ;;  %v2624_v30 = vcombine.high %v2622_v22, %v2622_v22 }
 0x10a   : > { %9710 = vmatpush1.xpose.msra.mxu0 %v1289_v48  ;;  %v6318_v57 = vadd.f32 %v6317_v56, %v6247_v52  ;;  %9780 = vmatpush1.xpose.msra.mxu1 %v1291_v49  ;;  %v536_v49 = vld [vmem:[%s33746_s29 + $0x398] sm:$0xff] }
 0x10b   : > { %v6249_v58 = vpop.f32.mrf.mxu0  ;;  %9711 = vmatprep.subr.mxu0 %v522_v50  ;;  %v6319_v60 = vpop.f32.mrf.mxu1  ;;  %9781 = vmatprep.subr.mxu1 %v524_v53  ;;  %v2641_v50 = vcombine.high %v2639_v42, %v2639_v42 }
 0x10c   : > { %9745 = vmatprep.mubr.f32.mxu0 %v2589_v51  ;;  %9815 = vmatprep.mubr.f32.mxu1 %v2590_v54  ;;  %v2642_v51 = vcombine.high %v258_v43, %v258_v43  ;;  %v535_v58 = vld [vmem:[%s33746_s29 + $0x390] sm:$0xff]  ;;  %v2649_v60 = vrot.slane %v258_v43, %v33752_v5  ;;  %v546_v43 = vld [vmem:[%s33746_s29 + $0x3e8] sm:$0xff] }
 0x10e   : > { %9712 = vmatpush1.xpose.msra.mxu0 %v521_v59  ;;  %9782 = vmatpush1.xpose.msra.mxu1 %v523_v61  ;;  %v1306_v59 = vld [vmem:[%s33746_s29 + $0x1ba8] sm:$0x3]  ;;  %v1308_v61 = vld [vmem:[%s33746_s29 + $0x1bb8] sm:$0x3] }
 0x10f   : > { %9849 = vmatprep.subr.mxu0 %v1294_v62  ;;  %9919 = vmatprep.subr.mxu1 %v1296_v0  ;;  %v2656_v62 = vrot.slane %v2642_v51, %v33752_v5  ;;  %v1305_v0 = vld [vmem:[%s33746_s29 + $0x1ba0] sm:$0x3] }
 0x111   : > { %v6387_v8 = vpop.f32.mrf.mxu0  ;;  %9746 = vmatmul.mubr.f32.vlgmr.msra.gmra.mxu0 %v2581_v44  ;;  %v6457_v13 = vpop.f32.mrf.mxu1  ;;  %9816 = vmatmul.mubr.f32.vlgmr.msra.gmra.mxu1 %v2588_v46  ;;  %v1301_v44 = vld [vmem:[%s33746_s29 + $0x1b80] sm:$0x3]  ;;  %v534_v46 = vld [vmem:[%s33746_s29 + $0x388] sm:$0xff] }
 0x112   : > { %v6388_v12 = vadd.f32 %v6387_v8, %v6318_v57  ;;  %9850 = vmatpush1.xpose.msra.mxu0 %v1293_v3  ;;  %9920 = vmatpush1.xpose.msra.mxu1 %v1295_v4  ;;  %v2657_v3 = vcombine.high %v2649_v60, %v2649_v60 }
 0x113   : > { %v6389_v14 = vpop.f32.mrf.mxu0  ;;  %9851 = vmatprep.subr.mxu0 %v526_v6  ;;  %v6459_v17 = vpop.f32.mrf.mxu1  ;;  %9921 = vmatprep.subr.mxu1 %v528_v9  ;;  %v540_v6 = vld [vmem:[%s33746_s29 + $0x3b8] sm:$0xff] }
 0x114   : > { %v6458_v16 = vadd.f32 %v6457_v13, %v6388_v12  ;;  %9885 = vmatprep.mubr.f32.mxu0 %v2606_v7  ;;  %9955 = vmatprep.mubr.f32.mxu1 %v2607_v10  ;;  %v2658_v7 = vcombine.high %v2656_v62, %v2656_v62  ;;  %v537_v12 = vld [vmem:[%s33746_s29 + $0x3a0] sm:$0xff] }
 0x116   : > { %9852 = vmatpush1.xpose.msra.mxu0 %v525_v15  ;;  %9922 = vmatpush1.xpose.msra.mxu1 %v527_v18  ;;  %v539_v15 = vld [vmem:[%s33746_s29 + $0x3b0] sm:$0xff]  ;;  %v1312_v18 = vld [vmem:[%s33746_s29 + $0x1bd8] sm:$0x3] }
 0x117   : > { %9989 = vmatprep.subr.mxu0 %v1298_v19  ;;  %10059 = vmatprep.subr.mxu1 %v1300_v21  ;;  %v1309_v21 = vld [vmem:[%s33746_s29 + $0x1bc0] sm:$0x3] }
 0x119   : > { %v6527_v28 = vpop.f32.mrf.mxu0  ;;  %9886 = vmatmul.mubr.f32.vlgmr.msra.gmra.mxu0 %v2598_v63  ;;  %v6597_v33 = vpop.f32.mrf.mxu1  ;;  %9956 = vmatmul.mubr.f32.vlgmr.msra.gmra.mxu1 %v2605_v1  ;;  %v259_v63 = vld [vmem:[%s33738_s27 + $0xf0] sm:$0xff] }
 0x11a   : > { %v6528_v32 = vadd.f32 %v6527_v28, %v6458_v16  ;;  %9990 = vmatpush1.xpose.msra.mxu0 %v1297_v24  ;;  %10060 = vmatpush1.xpose.msra.mxu1 %v1299_v25  ;;  %v1307_v1 = vld [vmem:[%s33746_s29 + $0x1bb0] sm:$0x3]  ;;  %v2659_v8 = vcombine.high %v259_v63, %v259_v63  ;;  %v1310_v16 = vld [vmem:[%s33746_s29 + $0x1bc8] sm:$0x3]  ;;  %v2666_v17 = vrot.slane %v259_v63, %v33752_v5 }
 0x11b   : > { %v6529_v34 = vpop.f32.mrf.mxu0  ;;  %9991 = vmatprep.subr.mxu0 %v530_v26  ;;  %v6599_v37 = vpop.f32.mrf.mxu1  ;;  %10061 = vmatprep.subr.mxu1 %v532_v29  ;;  %v544_v26 = vld [vmem:[%s33746_s29 + $0x3d8] sm:$0xff]  ;;  %v550_v63 = vld [vmem:[%s33746_s29 + $0x408] sm:$0xff] }
 0x11c   : > { %v6598_v36 = vadd.f32 %v6597_v33, %v6528_v32  ;;  %10025 = vmatprep.mubr.f32.mxu0 %v2623_v27  ;;  %10095 = vmatprep.mubr.f32.mxu1 %v2624_v30  ;;  %v2673_v19 = vrot.slane %v2659_v8, %v33752_v5  ;;  %v2674_v24 = vcombine.high %v2666_v17, %v2666_v17  ;;  %v541_v32 = vld [vmem:[%s33746_s29 + $0x3c0] sm:$0xff] }
 0x11e   : > { %9992 = vmatpush1.xpose.msra.mxu0 %v529_v35  ;;  %10062 = vmatpush1.xpose.msra.mxu1 %v531_v38  ;;  %v2675_v27 = vcombine.high %v2673_v19, %v2673_v19  ;;  %v543_v35 = vld [vmem:[%s33746_s29 + $0x3d0] sm:$0xff]  ;;  %v1316_v38 = vld [vmem:[%s33746_s29 + $0x1bf8] sm:$0x3] }
 0x11f   : > { %10129 = vmatprep.subr.mxu0 %v1302_v39  ;;  %10199 = vmatprep.subr.mxu1 %v1304_v41  ;;  %v1313_v41 = vld [vmem:[%s33746_s29 + $0x1be0] sm:$0x3] }
 0x121   : > { %v6667_v48 = vpop.f32.mrf.mxu0  ;;  %10026 = vmatmul.mubr.f32.vlgmr.msra.gmra.mxu0 %v2615_v20  ;;  %v6737_v53 = vpop.f32.mrf.mxu1  ;;  %10096 = vmatmul.mubr.f32.vlgmr.msra.gmra.mxu1 %v2622_v22  ;;  %v260_v20 = vld [vmem:[%s33738_s27 + $0xf8] sm:$0xff]  ;;  %v1311_v22 = vld [vmem:[%s33746_s29 + $0x1bd0] sm:$0x3] }
 0x122   : > { %v6668_v52 = vadd.f32 %v6667_v48, %v6598_v36  ;;  %10130 = vmatpush1.xpose.msra.mxu0 %v1301_v44  ;;  %10200 = vmatpush1.xpose.msra.mxu1 %v1303_v45  ;;  %v2676_v28 = vcombine.high %v260_v20, %v260_v20  ;;  %v1314_v36 = vld [vmem:[%s33746_s29 + $0x1be8] sm:$0x3]  ;;  %v2683_v37 = vrot.slane %v260_v20, %v33752_v5 }
 0x123   : > { %v6669_v54 = vpop.f32.mrf.mxu0  ;;  %10131 = vmatprep.subr.mxu0 %v534_v46  ;;  %v6739_v57 = vpop.f32.mrf.mxu1  ;;  %10201 = vmatprep.subr.mxu1 %v536_v49  ;;  %v548_v46 = vld [vmem:[%s33746_s29 + $0x3f8] sm:$0xff]  ;;  %v554_v20 = vld [vmem:[%s33746_s29 + $0x428] sm:$0xff] }
 0x124   : > { %v6738_v56 = vadd.f32 %v6737_v53, %v6668_v52  ;;  %10165 = vmatprep.mubr.f32.mxu0 %v2640_v47  ;;  %10235 = vmatprep.mubr.f32.mxu1 %v2641_v50  ;;  %v2690_v39 = vrot.slane %v2676_v28, %v33752_v5  ;;  %v2691_v44 = vcombine.high %v2683_v37, %v2683_v37  ;;  %v545_v52 = vld [vmem:[%s33746_s29 + $0x3e0] sm:$0xff] }
 0x126   : > { %10132 = vmatpush1.xpose.msra.mxu0 %v533_v55  ;;  %10202 = vmatpush1.xpose.msra.mxu1 %v535_v58  ;;  %v2692_v47 = vcombine.high %v2690_v39, %v2690_v39  ;;  %v547_v55 = vld [vmem:[%s33746_s29 + $0x3f0] sm:$0xff]  ;;  %v1320_v58 = vld [vmem:[%s33746_s29 + $0x1c18] sm:$0x3] }
 0x127   : > { %10269 = vmatprep.subr.mxu0 %v1306_v59  ;;  %10339 = vmatprep.subr.mxu1 %v1308_v61  ;;  %v1317_v61 = vld [vmem:[%s33746_s29 + $0x1c00] sm:$0x3] }
 0x129   : > { %v6807_v4 = vpop.f32.mrf.mxu0  ;;  %10166 = vmatmul.mubr.f32.vlgmr.msra.gmra.mxu0 %v2632_v40  ;;  %v6877_v10 = vpop.f32.mrf.mxu1  ;;  %10236 = vmatmul.mubr.f32.vlgmr.msra.gmra.mxu1 %v2639_v42  ;;  %v261_v40 = vld [vmem:[%s33738_s27 + $0x100] sm:$0xff]  ;;  %v1315_v42 = vld [vmem:[%s33746_s29 + $0x1bf0] sm:$0x3] }
 0x12a   : > { %v6808_v9 = vadd.f32 %v6807_v4, %v6738_v56  ;;  %10270 = vmatpush1.xpose.msra.mxu0 %v1305_v0  ;;  %10340 = vmatpush1.xpose.msra.mxu1 %v1307_v1  ;;  %v2693_v48 = vcombine.high %v261_v40, %v261_v40  ;;  %v1318_v56 = vld [vmem:[%s33746_s29 + $0x1c08] sm:$0x3]  ;;  %v2700_v57 = vrot.slane %v261_v40, %v33752_v5 }
 0x12b   : > { %v6809_v11 = vpop.f32.mrf.mxu0  ;;  %10271 = vmatprep.subr.mxu0 %v538_v2  ;;  %v6879_v14 = vpop.f32.mrf.mxu1  ;;  %10341 = vmatprep.subr.mxu1 %v540_v6  ;;  %v552_v2 = vld [vmem:[%s33746_s29 + $0x418] sm:$0xff]  ;;  %v558_v40 = vld [vmem:[%s33746_s29 + $0x448] sm:$0xff] }
 0x12c   : > { %v6878_v13 = vadd.f32 %v6877_v10, %v6808_v9  ;;  %10305 = vmatprep.mubr.f32.mxu0 %v2657_v3  ;;  %10375 = vmatprep.mubr.f32.mxu1 %v2658_v7  ;;  %v2707_v59 = vrot.slane %v2693_v48, %v33752_v5  ;;  %v2708_v0 = vcombine.high %v2700_v57, %v2700_v57  ;;  %v549_v9 = vld [vmem:[%s33746_s29 + $0x400] sm:$0xff] }
 0x12e   : > { %10272 = vmatpush1.xpose.msra.mxu0 %v537_v12  ;;  %10342 = vmatpush1.xpose.msra.mxu1 %v539_v15  ;;  %v2709_v3 = vcombine.high %v2707_v59, %v2707_v59  ;;  %v551_v12 = vld [vmem:[%s33746_s29 + $0x410] sm:$0xff]  ;;  %v1324_v15 = vld [vmem:[%s33746_s29 + $0x1c38] sm:$0x3] }
 0x12f   : > { %10409 = vmatprep.subr.mxu0 %v1310_v16  ;;  %10479 = vmatprep.subr.mxu1 %v1312_v18  ;;  %v1321_v18 = vld [vmem:[%s33746_s29 + $0x1c20] sm:$0x3] }
 0x131   : > { %v6947_v25 = vpop.f32.mrf.mxu0  ;;  %10306 = vmatmul.mubr.f32.vlgmr.msra.gmra.mxu0 %v2649_v60  ;;  %v7017_v30 = vpop.f32.mrf.mxu1  ;;  %10376 = vmatmul.mubr.f32.vlgmr.msra.gmra.mxu1 %v2656_v62  ;;  %v262_v60 = vld [vmem:[%s33738_s27 + $0x108] sm:$0xff]  ;;  %v1319_v62 = vld [vmem:[%s33746_s29 + $0x1c10] sm:$0x3] }
 0x132   : > { %v6948_v29 = vadd.f32 %v6947_v25, %v6878_v13  ;;  %10410 = vmatpush1.xpose.msra.mxu0 %v1309_v21  ;;  %10480 = vmatpush1.xpose.msra.mxu1 %v1311_v22  ;;  %v2710_v4 = vcombine.high %v262_v60, %v262_v60  ;;  %v1322_v13 = vld [vmem:[%s33746_s29 + $0x1c28] sm:$0x3]  ;;  %v2717_v14 = vrot.slane %v262_v60, %v33752_v5 }
 0x133   : > { %v6949_v31 = vpop.f32.mrf.mxu0  ;;  %10411 = vmatprep.subr.mxu0 %v542_v23  ;;  %v7019_v34 = vpop.f32.mrf.mxu1  ;;  %10481 = vmatprep.subr.mxu1 %v544_v26  ;;  %v556_v23 = vld [vmem:[%s33746_s29 + $0x438] sm:$0xff]  ;;  %v562_v60 = vld [vmem:[%s33746_s29 + $0x468] sm:$0xff] }
 0x134   : > { %v7018_v33 = vadd.f32 %v7017_v30, %v6948_v29  ;;  %10445 = vmatprep.mubr.f32.mxu0 %v2674_v24  ;;  %10515 = vmatprep.mubr.f32.mxu1 %v2675_v27  ;;  %v2724_v16 = vrot.slane %v2710_v4, %v33752_v5  ;;  %v2725_v21 = vcombine.high %v2717_v14, %v2717_v14  ;;  %v553_v29 = vld [vmem:[%s33746_s29 + $0x420] sm:$0xff] }
 0x136   : > { %10412 = vmatpush1.xpose.msra.mxu0 %v541_v32  ;;  %10482 = vmatpush1.xpose.msra.mxu1 %v543_v35  ;;  %v2726_v24 = vcombine.high %v2724_v16, %v2724_v16  ;;  %v555_v32 = vld [vmem:[%s33746_s29 + $0x430] sm:$0xff]  ;;  %v1328_v35 = vld [vmem:[%s33746_s29 + $0x1c58] sm:$0x3] }
 0x137   : > { %10549 = vmatprep.subr.mxu0 %v1314_v36  ;;  %10619 = vmatprep.subr.mxu1 %v1316_v38  ;;  %v1325_v38 = vld [vmem:[%s33746_s29 + $0x1c40] sm:$0x3] }
 0x139   : > { %v7087_v45 = vpop.f32.mrf.mxu0  ;;  %10446 = vmatmul.mubr.f32.vlgmr.msra.gmra.mxu0 %v2666_v17  ;;  %v7157_v50 = vpop.f32.mrf.mxu1  ;;  %10516 = vmatmul.mubr.f32.vlgmr.msra.gmra.mxu1 %v2673_v19  ;;  %v263_v17 = vld [vmem:[%s33738_s27 + $0x110] sm:$0xff] }
 0x13a   : > { %v7088_v49 = vadd.f32 %v7087_v45, %v7018_v33  ;;  %10550 = vmatpush1.xpose.msra.mxu0 %v1313_v41  ;;  %10620 = vmatpush1.xpose.msra.mxu1 %v1315_v42  ;;  %v1323_v19 = vld [vmem:[%s33746_s29 + $0x1c30] sm:$0x3]  ;;  %v2727_v25 = vcombine.high %v263_v17, %v263_v17  ;;  %v1326_v33 = vld [vmem:[%s33746_s29 + $0x1c48] sm:$0x3]  ;;  %v2734_v34 = vrot.slane %v263_v17, %v33752_v5 }
 0x13b   : > { %v7089_v51 = vpop.f32.mrf.mxu0  ;;  %10551 = vmatprep.subr.mxu0 %v546_v43  ;;  %v7159_v54 = vpop.f32.mrf.mxu1  ;;  %10621 = vmatprep.subr.mxu1 %v548_v46  ;;  %v560_v43 = vld [vmem:[%s33746_s29 + $0x458] sm:$0xff]  ;;  %v566_v17 = vld [vmem:[%s33746_s29 + $0x488] sm:$0xff] }
 0x13c   : > { %v7158_v53 = vadd.f32 %v7157_v50, %v7088_v49  ;;  %10585 = vmatprep.mubr.f32.mxu0 %v2691_v44  ;;  %10655 = vmatprep.mubr.f32.mxu1 %v2692_v47  ;;  %v2741_v36 = vrot.slane %v2727_v25, %v33752_v5  ;;  %v2742_v41 = vcombine.high %v2734_v34, %v2734_v34  ;;  %v557_v49 = vld [vmem:[%s33746_s29 + $0x440] sm:$0xff] }
 0x13e   : > { %10552 = vmatpush1.xpose.msra.mxu0 %v545_v52  ;;  %10622 = vmatpush1.xpose.msra.mxu1 %v547_v55  ;;  %v2743_v44 = vcombine.high %v2741_v36, %v2741_v36  ;;  %v559_v52 = vld [vmem:[%s33746_s29 + $0x450] sm:$0xff]  ;;  %v1332_v55 = vld [vmem:[%s33746_s29 + $0x1c78] sm:$0x3] }
 0x13f   : > { %10689 = vmatprep.subr.mxu0 %v1318_v56  ;;  %10759 = vmatprep.subr.mxu1 %v1320_v58  ;;  %v1329_v58 = vld [vmem:[%s33746_s29 + $0x1c60] sm:$0x3] }
 0x141   : > { %v7227_v1 = vpop.f32.mrf.mxu0  ;;  %10586 = vmatmul.mubr.f32.vlgmr.msra.gmra.mxu0 %v2683_v37  ;;  %v7297_v7 = vpop.f32.mrf.mxu1  ;;  %10656 = vmatmul.mubr.f32.vlgmr.msra.gmra.mxu1 %v2690_v39  ;;  %v264_v37 = vld [vmem:[%s33738_s27 + $0x118] sm:$0xff]  ;;  %v1327_v39 = vld [vmem:[%s33746_s29 + $0x1c50] sm:$0x3] }
 0x142   : > { %v7228_v6 = vadd.f32 %v7227_v1, %v7158_v53  ;;  %10690 = vmatpush1.xpose.msra.mxu0 %v1317_v61  ;;  %10760 = vmatpush1.xpose.msra.mxu1 %v1319_v62  ;;  %v2744_v45 = vcombine.high %v264_v37, %v264_v37  ;;  %v1330_v53 = vld [vmem:[%s33746_s29 + $0x1c68] sm:$0x3]  ;;  %v2751_v54 = vrot.slane %v264_v37, %v33752_v5 }
 0x143   : > { %v7229_v8 = vpop.f32.mrf.mxu0  ;;  %10691 = vmatprep.subr.mxu0 %v550_v63  ;;  %v7299_v11 = vpop.f32.mrf.mxu1  ;;  %10761 = vmatprep.subr.mxu1 %v552_v2  ;;  %v564_v63 = vld [vmem:[%s33746_s29 + $0x478] sm:$0xff]  ;;  %v570_v37 = vld [vmem:[%s33746_s29 + $0x4a8] sm:$0xff] }
 0x144   : > { %v7298_v10 = vadd.f32 %v7297_v7, %v7228_v6  ;;  %10725 = vmatprep.mubr.f32.mxu0 %v2708_v0  ;;  %10795 = vmatprep.mubr.f32.mxu1 %v2709_v3  ;;  %v2758_v56 = vrot.slane %v2744_v45, %v33752_v5  ;;  %v2759_v61 = vcombine.high %v2751_v54, %v2751_v54  ;;  %v561_v6 = vld [vmem:[%s33746_s29 + $0x460] sm:$0xff] }
 0x146   : > { %10692 = vmatpush1.xpose.msra.mxu0 %v549_v9  ;;  %10762 = vmatpush1.xpose.msra.mxu1 %v551_v12  ;;  %v2760_v0 = vcombine.high %v2758_v56, %v2758_v56  ;;  %v563_v9 = vld [vmem:[%s33746_s29 + $0x470] sm:$0xff]  ;;  %v1336_v12 = vld [vmem:[%s33746_s29 + $0x1c98] sm:$0x3] }
 0x147   : > { %10829 = vmatprep.subr.mxu0 %v1322_v13  ;;  %10899 = vmatprep.subr.mxu1 %v1324_v15  ;;  %v1333_v15 = vld [vmem:[%s33746_s29 + $0x1c80] sm:$0x3] }
 0x149   : > { %v7367_v22 = vpop.f32.mrf.mxu0  ;;  %10726 = vmatmul.mubr.f32.vlgmr.msra.gmra.mxu0 %v2700_v57  ;;  %v7437_v27 = vpop.f32.mrf.mxu1  ;;  %10796 = vmatmul.mubr.f32.vlgmr.msra.gmra.mxu1 %v2707_v59  ;;  %v265_v57 = vld [vmem:[%s33738_s27 + $0x120] sm:$0xff]  ;;  %v1331_v59 = vld [vmem:[%s33746_s29 + $0x1c70] sm:$0x3] }
 0x14a   : > { %v7368_v26 = vadd.f32 %v7367_v22, %v7298_v10  ;;  %10830 = vmatpush1.xpose.msra.mxu0 %v1321_v18  ;;  %10900 = vmatpush1.xpose.msra.mxu1 %v1323_v19  ;;  %v2761_v1 = vcombine.high %v265_v57, %v265_v57  ;;  %v1334_v10 = vld [vmem:[%s33746_s29 + $0x1c88] sm:$0x3]  ;;  %v2768_v11 = vrot.slane %v265_v57, %v33752_v5 }
 0x14b   : > { %v7369_v28 = vpop.f32.mrf.mxu0  ;;  %10831 = vmatprep.subr.mxu0 %v554_v20  ;;  %v7439_v31 = vpop.f32.mrf.mxu1  ;;  %10901 = vmatprep.subr.mxu1 %v556_v23  ;;  %v568_v20 = vld [vmem:[%s33746_s29 + $0x498] sm:$0xff]  ;;  %v574_v57 = vld [vmem:[%s33746_s29 + $0x4c8] sm:$0xff] }
 0x14c   : > { %v7438_v30 = vadd.f32 %v7437_v27, %v7368_v26  ;;  %10865 = vmatprep.mubr.f32.mxu0 %v2725_v21  ;;  %10935 = vmatprep.mubr.f32.mxu1 %v2726_v24  ;;  %v2775_v13 = vrot.slane %v2761_v1, %v33752_v5  ;;  %v2776_v18 = vcombine.high %v2768_v11, %v2768_v11  ;;  %v565_v26 = vld [vmem:[%s33746_s29 + $0x480] sm:$0xff] }
 0x14e   : > { %10832 = vmatpush1.xpose.msra.mxu0 %v553_v29  ;;  %10902 = vmatpush1.xpose.msra.mxu1 %v555_v32  ;;  %v2777_v21 = vcombine.high %v2775_v13, %v2775_v13  ;;  %v567_v29 = vld [vmem:[%s33746_s29 + $0x490] sm:$0xff]  ;;  %v1340_v32 = vld [vmem:[%s33746_s29 + $0x1cb8] sm:$0x3] }
 0x14f   : > { %10969 = vmatprep.subr.mxu0 %v1326_v33  ;;  %11039 = vmatprep.subr.mxu1 %v1328_v35  ;;  %v1337_v35 = vld [vmem:[%s33746_s29 + $0x1ca0] sm:$0x3] }
 0x151   : > { %v7507_v42 = vpop.f32.mrf.mxu0  ;;  %10866 = vmatmul.mubr.f32.vlgmr.msra.gmra.mxu0 %v2717_v14  ;;  %v7577_v47 = vpop.f32.mrf.mxu1  ;;  %10936 = vmatmul.mubr.f32.vlgmr.msra.gmra.mxu1 %v2724_v16  ;;  %v266_v14 = vld [vmem:[%s33738_s27 + $0x128] sm:$0xff]  ;;  %v1335_v16 = vld [vmem:[%s33746_s29 + $0x1c90] sm:$0x3] }
 0x152   : > { %v7508_v46 = vadd.f32 %v7507_v42, %v7438_v30  ;;  %10970 = vmatpush1.xpose.msra.mxu0 %v1325_v38  ;;  %11040 = vmatpush1.xpose.msra.mxu1 %v1327_v39  ;;  %v2778_v22 = vcombine.high %v266_v14, %v266_v14  ;;  %v1338_v30 = vld [vmem:[%s33746_s29 + $0x1ca8] sm:$0x3]  ;;  %v2785_v31 = vrot.slane %v266_v14, %v33752_v5 }
 0x153   : > { %v7509_v48 = vpop.f32.mrf.mxu0  ;;  %10971 = vmatprep.subr.mxu0 %v558_v40  ;;  %v7579_v51 = vpop.f32.mrf.mxu1  ;;  %11041 = vmatprep.subr.mxu1 %v560_v43  ;;  %v572_v40 = vld [vmem:[%s33746_s29 + $0x4b8] sm:$0xff]  ;;  %v578_v14 = vld [vmem:[%s33746_s29 + $0x4e8] sm:$0xff] }
 0x154   : > { %v7578_v50 = vadd.f32 %v7577_v47, %v7508_v46  ;;  %11005 = vmatprep.mubr.f32.mxu0 %v2742_v41  ;;  %11075 = vmatprep.mubr.f32.mxu1 %v2743_v44  ;;  %v2792_v33 = vrot.slane %v2778_v22, %v33752_v5  ;;  %v2793_v38 = vcombine.high %v2785_v31, %v2785_v31  ;;  %v569_v46 = vld [vmem:[%s33746_s29 + $0x4a0] sm:$0xff] }
 0x156   : > { %10972 = vmatpush1.xpose.msra.mxu0 %v557_v49  ;;  %11042 = vmatpush1.xpose.msra.mxu1 %v559_v52  ;;  %v2794_v41 = vcombine.high %v2792_v33, %v2792_v33  ;;  %v571_v49 = vld [vmem:[%s33746_s29 + $0x4b0] sm:$0xff]  ;;  %v1344_v52 = vld [vmem:[%s33746_s29 + $0x1cd8] sm:$0x3] }
 0x157   : > { %11109 = vmatprep.subr.mxu0 %v1330_v53  ;;  %11179 = vmatprep.subr.mxu1 %v1332_v55  ;;  %v1341_v55 = vld [vmem:[%s33746_s29 + $0x1cc0] sm:$0x3] }
 0x159   : > { %v7647_v62 = vpop.f32.mrf.mxu0  ;;  %11006 = vmatmul.mubr.f32.vlgmr.msra.gmra.mxu0 %v2734_v34  ;;  %v7717_v3 = vpop.f32.mrf.mxu1  ;;  %11076 = vmatmul.mubr.f32.vlgmr.msra.gmra.mxu1 %v2741_v36  ;;  %v267_v34 = vld [vmem:[%s33738_s27 + $0x130] sm:$0xff] }
 0x15a   : > { %v7648_v2 = vadd.f32 %v7647_v62, %v7578_v50  ;;  %11110 = vmatpush1.xpose.msra.mxu0 %v1329_v58  ;;  %11180 = vmatpush1.xpose.msra.mxu1 %v1331_v59  ;;  %v1339_v36 = vld [vmem:[%s33746_s29 + $0x1cb0] sm:$0x3]  ;;  %v2795_v42 = vcombine.high %v267_v34, %v267_v34  ;;  %v1342_v50 = vld [vmem:[%s33746_s29 + $0x1cc8] sm:$0x3]  ;;  %v2802_v51 = vrot.slane %v267_v34, %v33752_v5 }
 0x15b   : > { %v7649_v4 = vpop.f32.mrf.mxu0  ;;  %11111 = vmatprep.subr.mxu0 %v562_v60  ;;  %v7719_v8 = vpop.f32.mrf.mxu1  ;;  %11181 = vmatprep.subr.mxu1 %v564_v63  ;;  %v576_v60 = vld [vmem:[%s33746_s29 + $0x4d8] sm:$0xff]  ;;  %v582_v34 = vld [vmem:[%s33746_s29 + $0x508] sm:$0xff] }
 0x15c   : > { %v7718_v7 = vadd.f32 %v7717_v3, %v7648_v2  ;;  %11145 = vmatprep.mubr.f32.mxu0 %v2759_v61  ;;  %11215 = vmatprep.mubr.f32.mxu1 %v2760_v0  ;;  %v2809_v53 = vrot.slane %v2795_v42, %v33752_v5  ;;  %v2810_v58 = vcombine.high %v2802_v51, %v2802_v51  ;;  %v573_v2 = vld [vmem:[%s33746_s29 + $0x4c0] sm:$0xff] }
 0x15e   : > { %11112 = vmatpush1.xpose.msra.mxu0 %v561_v6  ;;  %11182 = vmatpush1.xpose.msra.mxu1 %v563_v9  ;;  %v2811_v61 = vcombine.high %v2809_v53, %v2809_v53  ;;  %v575_v6 = vld [vmem:[%s33746_s29 + $0x4d0] sm:$0xff]  ;;  %v1348_v9 = vld [vmem:[%s33746_s29 + $0x1cf8] sm:$0x3] }
 0x15f   : > { %11249 = vmatprep.subr.mxu0 %v1334_v10  ;;  %11319 = vmatprep.subr.mxu1 %v1336_v12  ;;  %v1345_v12 = vld [vmem:[%s33746_s29 + $0x1ce0] sm:$0x3] }
 0x161   : > { %v7787_v19 = vpop.f32.mrf.mxu0  ;;  %11146 = vmatmul.mubr.f32.vlgmr.msra.gmra.mxu0 %v2751_v54  ;;  %v7857_v24 = vpop.f32.mrf.mxu1  ;;  %11216 = vmatmul.mubr.f32.vlgmr.msra.gmra.mxu1 %v2758_v56  ;;  %v268_v54 = vld [vmem:[%s33738_s27 + $0x138] sm:$0xff]  ;;  %v1343_v56 = vld [vmem:[%s33746_s29 + $0x1cd0] sm:$0x3] }
 0x162   : > { %v7788_v23 = vadd.f32 %v7787_v19, %v7718_v7  ;;  %11250 = vmatpush1.xpose.msra.mxu0 %v1333_v15  ;;  %11320 = vmatpush1.xpose.msra.mxu1 %v1335_v16  ;;  %v2812_v62 = vcombine.high %v268_v54, %v268_v54  ;;  %v1346_v7 = vld [vmem:[%s33746_s29 + $0x1ce8] sm:$0x3]  ;;  %v2819_v8 = vrot.slane %v268_v54, %v33752_v5 }
 0x163   : > { %v7789_v25 = vpop.f32.mrf.mxu0  ;;  %11251 = vmatprep.subr.mxu0 %v566_v17  ;;  %v7859_v28 = vpop.f32.mrf.mxu1  ;;  %11321 = vmatprep.subr.mxu1 %v568_v20  ;;  %v580_v17 = vld [vmem:[%s33746_s29 + $0x4f8] sm:$0xff]  ;;  %v586_v54 = vld [vmem:[%s33746_s29 + $0x528] sm:$0xff] }
 0x164   : > { %v7858_v27 = vadd.f32 %v7857_v24, %v7788_v23  ;;  %11285 = vmatprep.mubr.f32.mxu0 %v2776_v18  ;;  %11355 = vmatprep.mubr.f32.mxu1 %v2777_v21  ;;  %v2826_v10 = vrot.slane %v2812_v62, %v33752_v5  ;;  %v2827_v15 = vcombine.high %v2819_v8, %v2819_v8  ;;  %v577_v23 = vld [vmem:[%s33746_s29 + $0x4e0] sm:$0xff] }
 0x166   : > { %11252 = vmatpush1.xpose.msra.mxu0 %v565_v26  ;;  %11322 = vmatpush1.xpose.msra.mxu1 %v567_v29  ;;  %v2828_v18 = vcombine.high %v2826_v10, %v2826_v10  ;;  %v579_v26 = vld [vmem:[%s33746_s29 + $0x4f0] sm:$0xff]  ;;  %v1352_v29 = vld [vmem:[%s33746_s29 + $0x1d18] sm:$0x3] }
 0x167   : > { %11389 = vmatprep.subr.mxu0 %v1338_v30  ;;  %11459 = vmatprep.subr.mxu1 %v1340_v32  ;;  %v1349_v32 = vld [vmem:[%s33746_s29 + $0x1d00] sm:$0x3] }
 0x169   : > { %v7927_v39 = vpop.f32.mrf.mxu0  ;;  %11286 = vmatmul.mubr.f32.vlgmr.msra.gmra.mxu0 %v2768_v11  ;;  %v7997_v44 = vpop.f32.mrf.mxu1  ;;  %11356 = vmatmul.mubr.f32.vlgmr.msra.gmra.mxu1 %v2775_v13  ;;  %v269_v11 = vld [vmem:[%s33738_s27 + $0x140] sm:$0xff]  ;;  %v1347_v13 = vld [vmem:[%s33746_s29 + $0x1cf0] sm:$0x3] }
 0x16a   : > { %v7928_v43 = vadd.f32 %v7927_v39, %v7858_v27  ;;  %11390 = vmatpush1.xpose.msra.mxu0 %v1337_v35  ;;  %11460 = vmatpush1.xpose.msra.mxu1 %v1339_v36  ;;  %v2829_v19 = vcombine.high %v269_v11, %v269_v11  ;;  %v1350_v27 = vld [vmem:[%s33746_s29 + $0x1d08] sm:$0x3]  ;;  %v2836_v28 = vrot.slane %v269_v11, %v33752_v5 }
 0x16b   : > { %v7929_v45 = vpop.f32.mrf.mxu0  ;;  %11391 = vmatprep.subr.mxu0 %v570_v37  ;;  %v7999_v48 = vpop.f32.mrf.mxu1  ;;  %11461 = vmatprep.subr.mxu1 %v572_v40  ;;  %v584_v37 = vld [vmem:[%s33746_s29 + $0x518] sm:$0xff]  ;;  %v590_v11 = vld [vmem:[%s33746_s29 + $0x548] sm:$0xff] }
 0x16c   : > { %v7998_v47 = vadd.f32 %v7997_v44, %v7928_v43  ;;  %11425 = vmatprep.mubr.f32.mxu0 %v2793_v38  ;;  %11495 = vmatprep.mubr.f32.mxu1 %v2794_v41  ;;  %v2843_v30 = vrot.slane %v2829_v19, %v33752_v5  ;;  %v2844_v35 = vcombine.high %v2836_v28, %v2836_v28  ;;  %v581_v43 = vld [vmem:[%s33746_s29 + $0x500] sm:$0xff] }
 0x16e   : > { %11392 = vmatpush1.xpose.msra.mxu0 %v569_v46  ;;  %11462 = vmatpush1.xpose.msra.mxu1 %v571_v49  ;;  %v2845_v38 = vcombine.high %v2843_v30, %v2843_v30  ;;  %v583_v46 = vld [vmem:[%s33746_s29 + $0x510] sm:$0xff]  ;;  %v1356_v49 = vld [vmem:[%s33746_s29 + $0x1d38] sm:$0x3] }
 0x16f   : > { %11529 = vmatprep.subr.mxu0 %v1342_v50  ;;  %11599 = vmatprep.subr.mxu1 %v1344_v52  ;;  %v1353_v52 = vld [vmem:[%s33746_s29 + $0x1d20] sm:$0x3] }
 0x171   : > { %v8067_v59 = vpop.f32.mrf.mxu0  ;;  %11426 = vmatmul.mubr.f32.vlgmr.msra.gmra.mxu0 %v2785_v31  ;;  %v8137_v0 = vpop.f32.mrf.mxu1  ;;  %11496 = vmatmul.mubr.f32.vlgmr.msra.gmra.mxu1 %v2792_v33  ;;  %v270_v31 = vld [vmem:[%s33738_s27 + $0x148] sm:$0xff]  ;;  %v1351_v33 = vld [vmem:[%s33746_s29 + $0x1d10] sm:$0x3] }
 0x172   : > { %v8068_v63 = vadd.f32 %v8067_v59, %v7998_v47  ;;  %11530 = vmatpush1.xpose.msra.mxu0 %v1341_v55  ;;  %11600 = vmatpush1.xpose.msra.mxu1 %v1343_v56  ;;  %v2846_v39 = vcombine.high %v270_v31, %v270_v31  ;;  %v1354_v47 = vld [vmem:[%s33746_s29 + $0x1d28] sm:$0x3]  ;;  %v2853_v48 = vrot.slane %v270_v31, %v33752_v5 }
 0x173   : > { %v8069_v1 = vpop.f32.mrf.mxu0  ;;  %11531 = vmatprep.subr.mxu0 %v574_v57  ;;  %v8139_v4 = vpop.f32.mrf.mxu1  ;;  %11601 = vmatprep.subr.mxu1 %v576_v60  ;;  %v588_v57 = vld [vmem:[%s33746_s29 + $0x538] sm:$0xff]  ;;  %v594_v31 = vld [vmem:[%s33746_s29 + $0x568] sm:$0xff] }
 0x174   : > { %v8138_v3 = vadd.f32 %v8137_v0, %v8068_v63  ;;  %11565 = vmatprep.mubr.f32.mxu0 %v2810_v58  ;;  %11635 = vmatprep.mubr.f32.mxu1 %v2811_v61  ;;  %v2860_v50 = vrot.slane %v2846_v39, %v33752_v5  ;;  %v2861_v55 = vcombine.high %v2853_v48, %v2853_v48  ;;  %v585_v63 = vld [vmem:[%s33746_s29 + $0x520] sm:$0xff] }
 0x176   : > { %11532 = vmatpush1.xpose.msra.mxu0 %v573_v2  ;;  %11602 = vmatpush1.xpose.msra.mxu1 %v575_v6  ;;  %v2862_v58 = vcombine.high %v2860_v50, %v2860_v50  ;;  %v587_v2 = vld [vmem:[%s33746_s29 + $0x530] sm:$0xff]  ;;  %v1360_v6 = vld [vmem:[%s33746_s29 + $0x1d58] sm:$0x3] }
 0x177   : > { %11669 = vmatprep.subr.mxu0 %v1346_v7  ;;  %11739 = vmatprep.subr.mxu1 %v1348_v9  ;;  %v1357_v9 = vld [vmem:[%s33746_s29 + $0x1d40] sm:$0x3] }
 0x179   : > { %v8207_v16 = vpop.f32.mrf.mxu0  ;;  %11566 = vmatmul.mubr.f32.vlgmr.msra.gmra.mxu0 %v2802_v51  ;;  %v8277_v21 = vpop.f32.mrf.mxu1  ;;  %11636 = vmatmul.mubr.f32.vlgmr.msra.gmra.mxu1 %v2809_v53  ;;  %v271_v51 = vld [vmem:[%s33738_s27 + $0x150] sm:$0xff] }
 0x17a   : > { %v8208_v20 = vadd.f32 %v8207_v16, %v8138_v3  ;;  %11670 = vmatpush1.xpose.msra.mxu0 %v1345_v12  ;;  %11740 = vmatpush1.xpose.msra.mxu1 %v1347_v13  ;;  %v1355_v53 = vld [vmem:[%s33746_s29 + $0x1d30] sm:$0x3]  ;;  %v2863_v59 = vcombine.high %v271_v51, %v271_v51  ;;  %v1358_v3 = vld [vmem:[%s33746_s29 + $0x1d48] sm:$0x3]  ;;  %v2870_v4 = vrot.slane %v271_v51, %v33752_v5 }
 0x17b   : > { %v8209_v22 = vpop.f32.mrf.mxu0  ;;  %11671 = vmatprep.subr.mxu0 %v578_v14  ;;  %v8279_v25 = vpop.f32.mrf.mxu1  ;;  %11741 = vmatprep.subr.mxu1 %v580_v17  ;;  %v592_v14 = vld [vmem:[%s33746_s29 + $0x558] sm:$0xff]  ;;  %v598_v51 = vld [vmem:[%s33746_s29 + $0x588] sm:$0xff] }
 0x17c   : > { %v8278_v24 = vadd.f32 %v8277_v21, %v8208_v20  ;;  %11705 = vmatprep.mubr.f32.mxu0 %v2827_v15  ;;  %11775 = vmatprep.mubr.f32.mxu1 %v2828_v18  ;;  %v2877_v7 = vrot.slane %v2863_v59, %v33752_v5  ;;  %v2878_v12 = vcombine.high %v2870_v4, %v2870_v4  ;;  %v589_v20 = vld [vmem:[%s33746_s29 + $0x540] sm:$0xff] }
 0x17e   : > { %11672 = vmatpush1.xpose.msra.mxu0 %v577_v23  ;;  %11742 = vmatpush1.xpose.msra.mxu1 %v579_v26  ;;  %v2879_v15 = vcombine.high %v2877_v7, %v2877_v7  ;;  %v591_v23 = vld [vmem:[%s33746_s29 + $0x550] sm:$0xff]  ;;  %v1364_v26 = vld [vmem:[%s33746_s29 + $0x1d78] sm:$0x3] }
 0x17f   : > { %11809 = vmatprep.subr.mxu0 %v1350_v27  ;;  %11879 = vmatprep.subr.mxu1 %v1352_v29  ;;  %v1361_v29 = vld [vmem:[%s33746_s29 + $0x1d60] sm:$0x3] }
 0x181   : > { %v8347_v36 = vpop.f32.mrf.mxu0  ;;  %11706 = vmatmul.mubr.f32.vlgmr.msra.gmra.mxu0 %v2819_v8  ;;  %v8417_v41 = vpop.f32.mrf.mxu1  ;;  %11776 = vmatmul.mubr.f32.vlgmr.msra.gmra.mxu1 %v2826_v10  ;;  %v272_v8 = vld [vmem:[%s33738_s27 + $0x158] sm:$0xff]  ;;  %v1359_v10 = vld [vmem:[%s33746_s29 + $0x1d50] sm:$0x3] }
 0x182   : > { %v8348_v40 = vadd.f32 %v8347_v36, %v8278_v24  ;;  %11810 = vmatpush1.xpose.msra.mxu0 %v1349_v32  ;;  %11880 = vmatpush1.xpose.msra.mxu1 %v1351_v33  ;;  %v2880_v16 = vcombine.high %v272_v8, %v272_v8  ;;  %v1362_v24 = vld [vmem:[%s33746_s29 + $0x1d68] sm:$0x3]  ;;  %v2887_v25 = vrot.slane %v272_v8, %v33752_v5 }
 0x183   : > { %v8349_v42 = vpop.f32.mrf.mxu0  ;;  %11811 = vmatprep.subr.mxu0 %v582_v34  ;;  %v8419_v45 = vpop.f32.mrf.mxu1  ;;  %11881 = vmatprep.subr.mxu1 %v584_v37  ;;  %v596_v34 = vld [vmem:[%s33746_s29 + $0x578] sm:$0xff]  ;;  %v602_v8 = vld [vmem:[%s33746_s29 + $0x5a8] sm:$0xff] }
 0x184   : > { %v8418_v44 = vadd.f32 %v8417_v41, %v8348_v40  ;;  %11845 = vmatprep.mubr.f32.mxu0 %v2844_v35  ;;  %11915 = vmatprep.mubr.f32.mxu1 %v2845_v38  ;;  %v2894_v27 = vrot.slane %v2880_v16, %v33752_v5  ;;  %v2895_v32 = vcombine.high %v2887_v25, %v2887_v25  ;;  %v593_v40 = vld [vmem:[%s33746_s29 + $0x560] sm:$0xff] }
 0x186   : > { %11812 = vmatpush1.xpose.msra.mxu0 %v581_v43  ;;  %11882 = vmatpush1.xpose.msra.mxu1 %v583_v46  ;;  %v2896_v35 = vcombine.high %v2894_v27, %v2894_v27  ;;  %v595_v43 = vld [vmem:[%s33746_s29 + $0x570] sm:$0xff]  ;;  %v1368_v46 = vld [vmem:[%s33746_s29 + $0x1d98] sm:$0x3] }
 0x187   : > { %11949 = vmatprep.subr.mxu0 %v1354_v47  ;;  %12019 = vmatprep.subr.mxu1 %v1356_v49  ;;  %v1365_v49 = vld [vmem:[%s33746_s29 + $0x1d80] sm:$0x3] }
 0x189   : > { %v8487_v56 = vpop.f32.mrf.mxu0  ;;  %11846 = vmatmul.mubr.f32.vlgmr.msra.gmra.mxu0 %v2836_v28  ;;  %v8557_v61 = vpop.f32.mrf.mxu1  ;;  %11916 = vmatmul.mubr.f32.vlgmr.msra.gmra.mxu1 %v2843_v30  ;;  %v273_v28 = vld [vmem:[%s33738_s27 + $0x160] sm:$0xff]  ;;  %v1363_v30 = vld [vmem:[%s33746_s29 + $0x1d70] sm:$0x3] }
 0x18a   : > { %v8488_v60 = vadd.f32 %v8487_v56, %v8418_v44  ;;  %11950 = vmatpush1.xpose.msra.mxu0 %v1353_v52  ;;  %12020 = vmatpush1.xpose.msra.mxu1 %v1355_v53  ;;  %v2897_v36 = vcombine.high %v273_v28, %v273_v28  ;;  %v1366_v44 = vld [vmem:[%s33746_s29 + $0x1d88] sm:$0x3]  ;;  %v2904_v45 = vrot.slane %v273_v28, %v33752_v5 }
 0x18b   : > { %v8489_v62 = vpop.f32.mrf.mxu0  ;;  %11951 = vmatprep.subr.mxu0 %v586_v54  ;;  %v8559_v1 = vpop.f32.mrf.mxu1  ;;  %12021 = vmatprep.subr.mxu1 %v588_v57  ;;  %v600_v54 = vld [vmem:[%s33746_s29 + $0x598] sm:$0xff]  ;;  %v606_v28 = vld [vmem:[%s33746_s29 + $0x5c8] sm:$0xff] }
 0x18c   : > { %v8558_v0 = vadd.f32 %v8557_v61, %v8488_v60  ;;  %11985 = vmatprep.mubr.f32.mxu0 %v2861_v55  ;;  %12055 = vmatprep.mubr.f32.mxu1 %v2862_v58  ;;  %v2911_v47 = vrot.slane %v2897_v36, %v33752_v5  ;;  %v2912_v52 = vcombine.high %v2904_v45, %v2904_v45  ;;  %v597_v60 = vld [vmem:[%s33746_s29 + $0x580] sm:$0xff] }
 0x18e   : > { %11952 = vmatpush1.xpose.msra.mxu0 %v585_v63  ;;  %12022 = vmatpush1.xpose.msra.mxu1 %v587_v2  ;;  %v2913_v55 = vcombine.high %v2911_v47, %v2911_v47  ;;  %v599_v63 = vld [vmem:[%s33746_s29 + $0x590] sm:$0xff]  ;;  %v1372_v2 = vld [vmem:[%s33746_s29 + $0x1db8] sm:$0x3] }
 0x18f   : > { %12089 = vmatprep.subr.mxu0 %v1358_v3  ;;  %12159 = vmatprep.subr.mxu1 %v1360_v6  ;;  %v1369_v6 = vld [vmem:[%s33746_s29 + $0x1da0] sm:$0x3] }
 0x191   : > { %v8627_v13 = vpop.f32.mrf.mxu0  ;;  %11986 = vmatmul.mubr.f32.vlgmr.msra.gmra.mxu0 %v2853_v48  ;;  %v8697_v18 = vpop.f32.mrf.mxu1  ;;  %12056 = vmatmul.mubr.f32.vlgmr.msra.gmra.mxu1 %v2860_v50  ;;  %v274_v48 = vld [vmem:[%s33738_s27 + $0x168] sm:$0xff]  ;;  %v1367_v50 = vld [vmem:[%s33746_s29 + $0x1d90] sm:$0x3] }
 0x192   : > { %v8628_v17 = vadd.f32 %v8627_v13, %v8558_v0  ;;  %12090 = vmatpush1.xpose.msra.mxu0 %v1357_v9  ;;  %12160 = vmatpush1.xpose.msra.mxu1 %v1359_v10  ;;  %v2914_v56 = vcombine.high %v274_v48, %v274_v48  ;;  %v1370_v0 = vld [vmem:[%s33746_s29 + $0x1da8] sm:$0x3]  ;;  %v2921_v1 = vrot.slane %v274_v48, %v33752_v5 }
 0x193   : > { %v8629_v19 = vpop.f32.mrf.mxu0  ;;  %12091 = vmatprep.subr.mxu0 %v590_v11  ;;  %v8699_v22 = vpop.f32.mrf.mxu1  ;;  %12161 = vmatprep.subr.mxu1 %v592_v14  ;;  %v604_v11 = vld [vmem:[%s33746_s29 + $0x5b8] sm:$0xff]  ;;  %v610_v48 = vld [vmem:[%s33746_s29 + $0x5e8] sm:$0xff] }
 0x194   : > { %v8698_v21 = vadd.f32 %v8697_v18, %v8628_v17  ;;  %12125 = vmatprep.mubr.f32.mxu0 %v2878_v12  ;;  %12195 = vmatprep.mubr.f32.mxu1 %v2879_v15  ;;  %v2928_v3 = vrot.slane %v2914_v56, %v33752_v5  ;;  %v2929_v9 = vcombine.high %v2921_v1, %v2921_v1  ;;  %v601_v17 = vld [vmem:[%s33746_s29 + $0x5a0] sm:$0xff] }
 0x196   : > { %12092 = vmatpush1.xpose.msra.mxu0 %v589_v20  ;;  %12162 = vmatpush1.xpose.msra.mxu1 %v591_v23  ;;  %v2930_v12 = vcombine.high %v2928_v3, %v2928_v3  ;;  %v603_v20 = vld [vmem:[%s33746_s29 + $0x5b0] sm:$0xff]  ;;  %v1376_v23 = vld [vmem:[%s33746_s29 + $0x1dd8] sm:$0x3] }
 0x197   : > { %12229 = vmatprep.subr.mxu0 %v1362_v24  ;;  %12299 = vmatprep.subr.mxu1 %v1364_v26  ;;  %v1373_v26 = vld [vmem:[%s33746_s29 + $0x1dc0] sm:$0x3] }
 0x199   : > { %v8767_v33 = vpop.f32.mrf.mxu0  ;;  %12126 = vmatmul.mubr.f32.vlgmr.msra.gmra.mxu0 %v2870_v4  ;;  %v8837_v38 = vpop.f32.mrf.mxu1  ;;  %12196 = vmatmul.mubr.f32.vlgmr.msra.gmra.mxu1 %v2877_v7  ;;  %v275_v4 = vld [vmem:[%s33738_s27 + $0x170] sm:$0xff] }
 0x19a   : > { %v8768_v37 = vadd.f32 %v8767_v33, %v8698_v21  ;;  %12230 = vmatpush1.xpose.msra.mxu0 %v1361_v29  ;;  %12300 = vmatpush1.xpose.msra.mxu1 %v1363_v30  ;;  %v1371_v7 = vld [vmem:[%s33746_s29 + $0x1db0] sm:$0x3]  ;;  %v2931_v13 = vcombine.high %v275_v4, %v275_v4  ;;  %v1374_v21 = vld [vmem:[%s33746_s29 + $0x1dc8] sm:$0x3]  ;;  %v2938_v22 = vrot.slane %v275_v4, %v33752_v5 }
 0x19b   : > { %v8769_v39 = vpop.f32.mrf.mxu0  ;;  %12231 = vmatprep.subr.mxu0 %v594_v31  ;;  %v8839_v42 = vpop.f32.mrf.mxu1  ;;  %12301 = vmatprep.subr.mxu1 %v596_v34  ;;  %v608_v31 = vld [vmem:[%s33746_s29 + $0x5d8] sm:$0xff]  ;;  %v614_v4 = vld [vmem:[%s33746_s29 + $0x608] sm:$0xff] }
 0x19c   : > { %v8838_v41 = vadd.f32 %v8837_v38, %v8768_v37  ;;  %12265 = vmatprep.mubr.f32.mxu0 %v2895_v32  ;;  %12335 = vmatprep.mubr.f32.mxu1 %v2896_v35  ;;  %v2945_v24 = vrot.slane %v2931_v13, %v33752_v5  ;;  %v2946_v29 = vcombine.high %v2938_v22, %v2938_v22  ;;  %v605_v37 = vld [vmem:[%s33746_s29 + $0x5c0] sm:$0xff] }
 0x19e   : > { %12232 = vmatpush1.xpose.msra.mxu0 %v593_v40  ;;  %12302 = vmatpush1.xpose.msra.mxu1 %v595_v43  ;;  %v2947_v32 = vcombine.high %v2945_v24, %v2945_v24  ;;  %v607_v40 = vld [vmem:[%s33746_s29 + $0x5d0] sm:$0xff]  ;;  %v1380_v43 = vld [vmem:[%s33746_s29 + $0x1df8] sm:$0x3] }
 0x19f   : > { %12369 = vmatprep.subr.mxu0 %v1366_v44  ;;  %12439 = vmatprep.subr.mxu1 %v1368_v46  ;;  %v1377_v46 = vld [vmem:[%s33746_s29 + $0x1de0] sm:$0x3] }
 0x1a1   : > { %v8907_v53 = vpop.f32.mrf.mxu0  ;;  %12266 = vmatmul.mubr.f32.vlgmr.msra.gmra.mxu0 %v2887_v25  ;;  %v8977_v58 = vpop.f32.mrf.mxu1  ;;  %12336 = vmatmul.mubr.f32.vlgmr.msra.gmra.mxu1 %v2894_v27  ;;  %v276_v25 = vld [vmem:[%s33738_s27 + $0x178] sm:$0xff]  ;;  %v1375_v27 = vld [vmem:[%s33746_s29 + $0x1dd0] sm:$0x3] }
 0x1a2   : > { %v8908_v57 = vadd.f32 %v8907_v53, %v8838_v41  ;;  %12370 = vmatpush1.xpose.msra.mxu0 %v1365_v49  ;;  %12440 = vmatpush1.xpose.msra.mxu1 %v1367_v50  ;;  %v2948_v33 = vcombine.high %v276_v25, %v276_v25  ;;  %v1378_v41 = vld [vmem:[%s33746_s29 + $0x1de8] sm:$0x3]  ;;  %v2955_v42 = vrot.slane %v276_v25, %v33752_v5 }
 0x1a3   : > { %v8909_v59 = vpop.f32.mrf.mxu0  ;;  %12371 = vmatprep.subr.mxu0 %v598_v51  ;;  %v8979_v62 = vpop.f32.mrf.mxu1  ;;  %12441 = vmatprep.subr.mxu1 %v600_v54  ;;  %v612_v51 = vld [vmem:[%s33746_s29 + $0x5f8] sm:$0xff]  ;;  %v618_v25 = vld [vmem:[%s33746_s29 + $0x628] sm:$0xff] }
 0x1a4   : > { %v8978_v61 = vadd.f32 %v8977_v58, %v8908_v57  ;;  %12405 = vmatprep.mubr.f32.mxu0 %v2912_v52  ;;  %12475 = vmatprep.mubr.f32.mxu1 %v2913_v55  ;;  %v2962_v44 = vrot.slane %v2948_v33, %v33752_v5  ;;  %v2963_v49 = vcombine.high %v2955_v42, %v2955_v42  ;;  %v609_v57 = vld [vmem:[%s33746_s29 + $0x5e0] sm:$0xff] }
 0x1a6   : > { %12372 = vmatpush1.xpose.msra.mxu0 %v597_v60  ;;  %12442 = vmatpush1.xpose.msra.mxu1 %v599_v63  ;;  %v2964_v52 = vcombine.high %v2962_v44, %v2962_v44  ;;  %v611_v60 = vld [vmem:[%s33746_s29 + $0x5f0] sm:$0xff]  ;;  %v1384_v63 = vld [vmem:[%s33746_s29 + $0x1e18] sm:$0x3] }
 0x1a7   : > { %12509 = vmatprep.subr.mxu0 %v1370_v0  ;;  %12579 = vmatprep.subr.mxu1 %v1372_v2  ;;  %v1381_v2 = vld [vmem:[%s33746_s29 + $0x1e00] sm:$0x3] }
 0x1a9   : > { %v9047_v10 = vpop.f32.mrf.mxu0  ;;  %12406 = vmatmul.mubr.f32.vlgmr.msra.gmra.mxu0 %v2904_v45  ;;  %v9117_v15 = vpop.f32.mrf.mxu1  ;;  %12476 = vmatmul.mubr.f32.vlgmr.msra.gmra.mxu1 %v2911_v47  ;;  %v277_v45 = vld [vmem:[%s33738_s27 + $0x180] sm:$0xff]  ;;  %v1379_v47 = vld [vmem:[%s33746_s29 + $0x1df0] sm:$0x3] }
 0x1aa   : > { %v9048_v14 = vadd.f32 %v9047_v10, %v8978_v61  ;;  %12510 = vmatpush1.xpose.msra.mxu0 %v1369_v6  ;;  %12580 = vmatpush1.xpose.msra.mxu1 %v1371_v7  ;;  %v2965_v53 = vcombine.high %v277_v45, %v277_v45  ;;  %v1382_v61 = vld [vmem:[%s33746_s29 + $0x1e08] sm:$0x3]  ;;  %v2972_v62 = vrot.slane %v277_v45, %v33752_v5 }
 0x1ab   : > { %v9049_v16 = vpop.f32.mrf.mxu0  ;;  %12511 = vmatprep.subr.mxu0 %v602_v8  ;;  %v9119_v19 = vpop.f32.mrf.mxu1  ;;  %12581 = vmatprep.subr.mxu1 %v604_v11  ;;  %v616_v8 = vld [vmem:[%s33746_s29 + $0x618] sm:$0xff]  ;;  %v622_v45 = vld [vmem:[%s33746_s29 + $0x648] sm:$0xff] }
 0x1ac   : > { %v9118_v18 = vadd.f32 %v9117_v15, %v9048_v14  ;;  %12545 = vmatprep.mubr.f32.mxu0 %v2929_v9  ;;  %12615 = vmatprep.mubr.f32.mxu1 %v2930_v12  ;;  %v2979_v0 = vrot.slane %v2965_v53, %v33752_v5  ;;  %v2980_v6 = vcombine.high %v2972_v62, %v2972_v62  ;;  %v613_v14 = vld [vmem:[%s33746_s29 + $0x600] sm:$0xff] }
 0x1ae   : > { %12512 = vmatpush1.xpose.msra.mxu0 %v601_v17  ;;  %12582 = vmatpush1.xpose.msra.mxu1 %v603_v20  ;;  %v2981_v9 = vcombine.high %v2979_v0, %v2979_v0  ;;  %v615_v17 = vld [vmem:[%s33746_s29 + $0x610] sm:$0xff]  ;;  %v1388_v20 = vld [vmem:[%s33746_s29 + $0x1e38] sm:$0x3] }
 0x1af   : > { %12649 = vmatprep.subr.mxu0 %v1374_v21  ;;  %12719 = vmatprep.subr.mxu1 %v1376_v23  ;;  %v1385_v23 = vld [vmem:[%s33746_s29 + $0x1e20] sm:$0x3] }
 0x1b1   : > { %v9187_v30 = vpop.f32.mrf.mxu0  ;;  %12546 = vmatmul.mubr.f32.vlgmr.msra.gmra.mxu0 %v2921_v1  ;;  %v9257_v35 = vpop.f32.mrf.mxu1  ;;  %12616 = vmatmul.mubr.f32.vlgmr.msra.gmra.mxu1 %v2928_v3  ;;  %v278_v1 = vld [vmem:[%s33738_s27 + $0x188] sm:$0xff]  ;;  %v1383_v3 = vld [vmem:[%s33746_s29 + $0x1e10] sm:$0x3] }
 0x1b2   : > { %v9188_v34 = vadd.f32 %v9187_v30, %v9118_v18  ;;  %12650 = vmatpush1.xpose.msra.mxu0 %v1373_v26  ;;  %12720 = vmatpush1.xpose.msra.mxu1 %v1375_v27  ;;  %v2982_v10 = vcombine.high %v278_v1, %v278_v1  ;;  %v1386_v18 = vld [vmem:[%s33746_s29 + $0x1e28] sm:$0x3]  ;;  %v2989_v19 = vrot.slane %v278_v1, %v33752_v5 }
 0x1b3   : > { %v9189_v36 = vpop.f32.mrf.mxu0  ;;  %12651 = vmatprep.subr.mxu0 %v606_v28  ;;  %v9259_v39 = vpop.f32.mrf.mxu1  ;;  %12721 = vmatprep.subr.mxu1 %v608_v31  ;;  %v620_v28 = vld [vmem:[%s33746_s29 + $0x638] sm:$0xff]  ;;  %v626_v1 = vld [vmem:[%s33746_s29 + $0x668] sm:$0xff] }
 0x1b4   : > { %v9258_v38 = vadd.f32 %v9257_v35, %v9188_v34  ;;  %12685 = vmatprep.mubr.f32.mxu0 %v2946_v29  ;;  %12755 = vmatprep.mubr.f32.mxu1 %v2947_v32  ;;  %v2996_v21 = vrot.slane %v2982_v10, %v33752_v5  ;;  %v2997_v26 = vcombine.high %v2989_v19, %v2989_v19  ;;  %v617_v34 = vld [vmem:[%s33746_s29 + $0x620] sm:$0xff] }
 0x1b6   : > { %12652 = vmatpush1.xpose.msra.mxu0 %v605_v37  ;;  %12722 = vmatpush1.xpose.msra.mxu1 %v607_v40  ;;  %v2998_v29 = vcombine.high %v2996_v21, %v2996_v21  ;;  %v619_v37 = vld [vmem:[%s33746_s29 + $0x630] sm:$0xff]  ;;  %v1392_v40 = vld [vmem:[%s33746_s29 + $0x1e58] sm:$0x3] }
 0x1b7   : > { %12789 = vmatprep.subr.mxu0 %v1378_v41  ;;  %12859 = vmatprep.subr.mxu1 %v1380_v43  ;;  %v1389_v43 = vld [vmem:[%s33746_s29 + $0x1e40] sm:$0x3] }
 0x1b9   : > { %v9327_v50 = vpop.f32.mrf.mxu0  ;;  %12686 = vmatmul.mubr.f32.vlgmr.msra.gmra.mxu0 %v2938_v22  ;;  %v9397_v55 = vpop.f32.mrf.mxu1  ;;  %12756 = vmatmul.mubr.f32.vlgmr.msra.gmra.mxu1 %v2945_v24  ;;  %v279_v22 = vld [vmem:[%s33738_s27 + $0x190] sm:$0xff] }
 0x1ba   : > { %v9328_v54 = vadd.f32 %v9327_v50, %v9258_v38  ;;  %12790 = vmatpush1.xpose.msra.mxu0 %v1377_v46  ;;  %12860 = vmatpush1.xpose.msra.mxu1 %v1379_v47  ;;  %v1387_v24 = vld [vmem:[%s33746_s29 + $0x1e30] sm:$0x3]  ;;  %v2999_v30 = vcombine.high %v279_v22, %v279_v22  ;;  %v1390_v38 = vld [vmem:[%s33746_s29 + $0x1e48] sm:$0x3]  ;;  %v3006_v39 = vrot.slane %v279_v22, %v33752_v5 }
 0x1bb   : > { %v9329_v56 = vpop.f32.mrf.mxu0  ;;  %12791 = vmatprep.subr.mxu0 %v610_v48  ;;  %v9399_v59 = vpop.f32.mrf.mxu1  ;;  %12861 = vmatprep.subr.mxu1 %v612_v51  ;;  %v624_v48 = vld [vmem:[%s33746_s29 + $0x658] sm:$0xff]  ;;  %v630_v22 = vld [vmem:[%s33746_s29 + $0x688] sm:$0xff] }
 0x1bc   : > { %v9398_v58 = vadd.f32 %v9397_v55, %v9328_v54  ;;  %12825 = vmatprep.mubr.f32.mxu0 %v2963_v49  ;;  %12895 = vmatprep.mubr.f32.mxu1 %v2964_v52  ;;  %v3013_v41 = vrot.slane %v2999_v30, %v33752_v5  ;;  %v3014_v46 = vcombine.high %v3006_v39, %v3006_v39  ;;  %v621_v54 = vld [vmem:[%s33746_s29 + $0x640] sm:$0xff] }
 0x1be   : > { %12792 = vmatpush1.xpose.msra.mxu0 %v609_v57  ;;  %12862 = vmatpush1.xpose.msra.mxu1 %v611_v60  ;;  %v3015_v49 = vcombine.high %v3013_v41, %v3013_v41  ;;  %v623_v57 = vld [vmem:[%s33746_s29 + $0x650] sm:$0xff]  ;;  %v1396_v60 = vld [vmem:[%s33746_s29 + $0x1e78] sm:$0x3] }
 0x1bf   : > { %12929 = vmatprep.subr.mxu0 %v1382_v61  ;;  %12999 = vmatprep.subr.mxu1 %v1384_v63  ;;  %v1393_v63 = vld [vmem:[%s33746_s29 + $0x1e60] sm:$0x3] }
 0x1c1   : > { %v9467_v7 = vpop.f32.mrf.mxu0  ;;  %12826 = vmatmul.mubr.f32.vlgmr.msra.gmra.mxu0 %v2955_v42  ;;  %v9537_v12 = vpop.f32.mrf.mxu1  ;;  %12896 = vmatmul.mubr.f32.vlgmr.msra.gmra.mxu1 %v2962_v44  ;;  %v280_v42 = vld [vmem:[%s33738_s27 + $0x198] sm:$0xff]  ;;  %v1391_v44 = vld [vmem:[%s33746_s29 + $0x1e50] sm:$0x3] }
 0x1c2   : > { %v9468_v11 = vadd.f32 %v9467_v7, %v9398_v58  ;;  %12930 = vmatpush1.xpose.msra.mxu0 %v1381_v2  ;;  %13000 = vmatpush1.xpose.msra.mxu1 %v1383_v3  ;;  %v3016_v50 = vcombine.high %v280_v42, %v280_v42  ;;  %v1394_v58 = vld [vmem:[%s33746_s29 + $0x1e68] sm:$0x3]  ;;  %v3023_v59 = vrot.slane %v280_v42, %v33752_v5 }
 0x1c3   : > { %v9469_v13 = vpop.f32.mrf.mxu0  ;;  %12931 = vmatprep.subr.mxu0 %v614_v4  ;;  %v9539_v16 = vpop.f32.mrf.mxu1  ;;  %13001 = vmatprep.subr.mxu1 %v616_v8  ;;  %v628_v4 = vld [vmem:[%s33746_s29 + $0x678] sm:$0xff]  ;;  %v634_v42 = vld [vmem:[%s33746_s29 + $0x6a8] sm:$0xff] }
 0x1c4   : > { %v9538_v15 = vadd.f32 %v9537_v12, %v9468_v11  ;;  %12965 = vmatprep.mubr.f32.mxu0 %v2980_v6  ;;  %13035 = vmatprep.mubr.f32.mxu1 %v2981_v9  ;;  %v3030_v61 = vrot.slane %v3016_v50, %v33752_v5  ;;  %v3031_v2 = vcombine.high %v3023_v59, %v3023_v59  ;;  %v625_v11 = vld [vmem:[%s33746_s29 + $0x660] sm:$0xff] }
 0x1c6   : > { %12932 = vmatpush1.xpose.msra.mxu0 %v613_v14  ;;  %13002 = vmatpush1.xpose.msra.mxu1 %v615_v17  ;;  %v3032_v6 = vcombine.high %v3030_v61, %v3030_v61  ;;  %v627_v14 = vld [vmem:[%s33746_s29 + $0x670] sm:$0xff]  ;;  %v1400_v17 = vld [vmem:[%s33746_s29 + $0x1e98] sm:$0x3] }
 0x1c7   : > { %13069 = vmatprep.subr.mxu0 %v1386_v18  ;;  %13139 = vmatprep.subr.mxu1 %v1388_v20  ;;  %v1397_v20 = vld [vmem:[%s33746_s29 + $0x1e80] sm:$0x3] }
 0x1c9   : > { %v9607_v27 = vpop.f32.mrf.mxu0  ;;  %12966 = vmatmul.mubr.f32.vlgmr.msra.gmra.mxu0 %v2972_v62  ;;  %v9677_v32 = vpop.f32.mrf.mxu1  ;;  %13036 = vmatmul.mubr.f32.vlgmr.msra.gmra.mxu1 %v2979_v0  ;;  %v281_v62 = vld [vmem:[%s33738_s27 + $0x1a0] sm:$0xff]  ;;  %v1395_v0 = vld [vmem:[%s33746_s29 + $0x1e70] sm:$0x3] }
 0x1ca   : > { %v9608_v31 = vadd.f32 %v9607_v27, %v9538_v15  ;;  %13070 = vmatpush1.xpose.msra.mxu0 %v1385_v23  ;;  %13140 = vmatpush1.xpose.msra.mxu1 %v1387_v24  ;;  %v3033_v7 = vcombine.high %v281_v62, %v281_v62  ;;  %v1398_v15 = vld [vmem:[%s33746_s29 + $0x1e88] sm:$0x3]  ;;  %v3040_v16 = vrot.slane %v281_v62, %v33752_v5 }
 0x1cb   : > { %v9609_v33 = vpop.f32.mrf.mxu0  ;;  %13071 = vmatprep.subr.mxu0 %v618_v25  ;;  %v9679_v36 = vpop.f32.mrf.mxu1  ;;  %13141 = vmatprep.subr.mxu1 %v620_v28  ;;  %v632_v25 = vld [vmem:[%s33746_s29 + $0x698] sm:$0xff]  ;;  %v638_v62 = vld [vmem:[%s33746_s29 + $0x6c8] sm:$0xff] }
 0x1cc   : > { %v9678_v35 = vadd.f32 %v9677_v32, %v9608_v31  ;;  %13105 = vmatprep.mubr.f32.mxu0 %v2997_v26  ;;  %13175 = vmatprep.mubr.f32.mxu1 %v2998_v29  ;;  %v3047_v18 = vrot.slane %v3033_v7, %v33752_v5  ;;  %v3048_v23 = vcombine.high %v3040_v16, %v3040_v16  ;;  %v629_v31 = vld [vmem:[%s33746_s29 + $0x680] sm:$0xff] }
 0x1ce   : > { %13072 = vmatpush1.xpose.msra.mxu0 %v617_v34  ;;  %13142 = vmatpush1.xpose.msra.mxu1 %v619_v37  ;;  %v3049_v26 = vcombine.high %v3047_v18, %v3047_v18  ;;  %v631_v34 = vld [vmem:[%s33746_s29 + $0x690] sm:$0xff]  ;;  %v1404_v37 = vld [vmem:[%s33746_s29 + $0x1eb8] sm:$0x3] }
 0x1cf   : > { %13209 = vmatprep.subr.mxu0 %v1390_v38  ;;  %13279 = vmatprep.subr.mxu1 %v1392_v40  ;;  %v1401_v40 = vld [vmem:[%s33746_s29 + $0x1ea0] sm:$0x3] }
 0x1d1   : > { %v9747_v47 = vpop.f32.mrf.mxu0  ;;  %13106 = vmatmul.mubr.f32.vlgmr.msra.gmra.mxu0 %v2989_v19  ;;  %v9817_v52 = vpop.f32.mrf.mxu1  ;;  %13176 = vmatmul.mubr.f32.vlgmr.msra.gmra.mxu1 %v2996_v21  ;;  %v282_v19 = vld [vmem:[%s33738_s27 + $0x1a8] sm:$0xff]  ;;  %v1399_v21 = vld [vmem:[%s33746_s29 + $0x1e90] sm:$0x3] }
 0x1d2   : > { %v9748_v51 = vadd.f32 %v9747_v47, %v9678_v35  ;;  %13210 = vmatpush1.xpose.msra.mxu0 %v1389_v43  ;;  %13280 = vmatpush1.xpose.msra.mxu1 %v1391_v44  ;;  %v3050_v27 = vcombine.high %v282_v19, %v282_v19  ;;  %v1402_v35 = vld [vmem:[%s33746_s29 + $0x1ea8] sm:$0x3]  ;;  %v3057_v36 = vrot.slane %v282_v19, %v33752_v5 }
 0x1d3   : > { %v9749_v53 = vpop.f32.mrf.mxu0  ;;  %13211 = vmatprep.subr.mxu0 %v622_v45  ;;  %v9819_v56 = vpop.f32.mrf.mxu1  ;;  %13281 = vmatprep.subr.mxu1 %v624_v48  ;;  %v636_v45 = vld [vmem:[%s33746_s29 + $0x6b8] sm:$0xff]  ;;  %v642_v19 = vld [vmem:[%s33746_s29 + $0x6e8] sm:$0xff] }
 0x1d4   : > { %v9818_v55 = vadd.f32 %v9817_v52, %v9748_v51  ;;  %13245 = vmatprep.mubr.f32.mxu0 %v3014_v46  ;;  %13315 = vmatprep.mubr.f32.mxu1 %v3015_v49  ;;  %v3064_v38 = vrot.slane %v3050_v27, %v33752_v5  ;;  %v3065_v43 = vcombine.high %v3057_v36, %v3057_v36  ;;  %v633_v51 = vld [vmem:[%s33746_s29 + $0x6a0] sm:$0xff] }
 0x1d6   : > { %13212 = vmatpush1.xpose.msra.mxu0 %v621_v54  ;;  %13282 = vmatpush1.xpose.msra.mxu1 %v623_v57  ;;  %v3066_v46 = vcombine.high %v3064_v38, %v3064_v38  ;;  %v635_v54 = vld [vmem:[%s33746_s29 + $0x6b0] sm:$0xff]  ;;  %v1408_v57 = vld [vmem:[%s33746_s29 + $0x1ed8] sm:$0x3] }
 0x1d7   : > { %13349 = vmatprep.subr.mxu0 %v1394_v58  ;;  %13419 = vmatprep.subr.mxu1 %v1396_v60  ;;  %v1405_v60 = vld [vmem:[%s33746_s29 + $0x1ec0] sm:$0x3] }
 0x1d9   : > { %v9887_v3 = vpop.f32.mrf.mxu0  ;;  %13246 = vmatmul.mubr.f32.vlgmr.msra.gmra.mxu0 %v3006_v39  ;;  %v9957_v9 = vpop.f32.mrf.mxu1  ;;  %13316 = vmatmul.mubr.f32.vlgmr.msra.gmra.mxu1 %v3013_v41  ;;  %v283_v39 = vld [vmem:[%s33738_s27 + $0x1b0] sm:$0xff] }
 0x1da   : > { %v9888_v8 = vadd.f32 %v9887_v3, %v9818_v55  ;;  %13350 = vmatpush1.xpose.msra.mxu0 %v1393_v63  ;;  %13420 = vmatpush1.xpose.msra.mxu1 %v1395_v0  ;;  %v1403_v41 = vld [vmem:[%s33746_s29 + $0x1eb0] sm:$0x3]  ;;  %v3067_v47 = vcombine.high %v283_v39, %v283_v39  ;;  %v1406_v55 = vld [vmem:[%s33746_s29 + $0x1ec8] sm:$0x3]  ;;  %v3074_v56 = vrot.slane %v283_v39, %v33752_v5 }
 0x1db   : > { %v9889_v10 = vpop.f32.mrf.mxu0  ;;  %13351 = vmatprep.subr.mxu0 %v626_v1  ;;  %v9959_v13 = vpop.f32.mrf.mxu1  ;;  %13421 = vmatprep.subr.mxu1 %v628_v4  ;;  %v640_v1 = vld [vmem:[%s33746_s29 + $0x6d8] sm:$0xff]  ;;  %v646_v39 = vld [vmem:[%s33746_s29 + $0x708] sm:$0xff] }
 0x1dc   : > { %v9958_v12 = vadd.f32 %v9957_v9, %v9888_v8  ;;  %13385 = vmatprep.mubr.f32.mxu0 %v3031_v2  ;;  %13455 = vmatprep.mubr.f32.mxu1 %v3032_v6  ;;  %v3081_v58 = vrot.slane %v3067_v47, %v33752_v5  ;;  %v3082_v63 = vcombine.high %v3074_v56, %v3074_v56  ;;  %v637_v8 = vld [vmem:[%s33746_s29 + $0x6c0] sm:$0xff] }
 0x1de   : > { %13352 = vmatpush1.xpose.msra.mxu0 %v625_v11  ;;  %13422 = vmatpush1.xpose.msra.mxu1 %v627_v14  ;;  %v3083_v2 = vcombine.high %v3081_v58, %v3081_v58  ;;  %v639_v11 = vld [vmem:[%s33746_s29 + $0x6d0] sm:$0xff]  ;;  %v1412_v14 = vld [vmem:[%s33746_s29 + $0x1ef8] sm:$0x3] }
 0x1df   : > { %13489 = vmatprep.subr.mxu0 %v1398_v15  ;;  %13559 = vmatprep.subr.mxu1 %v1400_v17  ;;  %v1409_v17 = vld [vmem:[%s33746_s29 + $0x1ee0] sm:$0x3] }
 0x1e1   : > { %v10027_v24 = vpop.f32.mrf.mxu0  ;;  %13386 = vmatmul.mubr.f32.vlgmr.msra.gmra.mxu0 %v3023_v59  ;;  %v10097_v29 = vpop.f32.mrf.mxu1  ;;  %13456 = vmatmul.mubr.f32.vlgmr.msra.gmra.mxu1 %v3030_v61  ;;  %v284_v59 = vld [vmem:[%s33738_s27 + $0x1b8] sm:$0xff]  ;;  %v1407_v61 = vld [vmem:[%s33746_s29 + $0x1ed0] sm:$0x3] }
 0x1e2   : > { %v10028_v28 = vadd.f32 %v10027_v24, %v9958_v12  ;;  %13490 = vmatpush1.xpose.msra.mxu0 %v1397_v20  ;;  %13560 = vmatpush1.xpose.msra.mxu1 %v1399_v21  ;;  %v3084_v3 = vcombine.high %v284_v59, %v284_v59  ;;  %v1410_v12 = vld [vmem:[%s33746_s29 + $0x1ee8] sm:$0x3]  ;;  %v3091_v13 = vrot.slane %v284_v59, %v33752_v5 }
 0x1e3   : > { %v10029_v30 = vpop.f32.mrf.mxu0  ;;  %13491 = vmatprep.subr.mxu0 %v630_v22  ;;  %v10099_v33 = vpop.f32.mrf.mxu1  ;;  %13561 = vmatprep.subr.mxu1 %v632_v25  ;;  %v644_v22 = vld [vmem:[%s33746_s29 + $0x6f8] sm:$0xff]  ;;  %v650_v59 = vld [vmem:[%s33746_s29 + $0x728] sm:$0xff] }
 0x1e4   : > { %v10098_v32 = vadd.f32 %v10097_v29, %v10028_v28  ;;  %13525 = vmatprep.mubr.f32.mxu0 %v3048_v23  ;;  %13595 = vmatprep.mubr.f32.mxu1 %v3049_v26  ;;  %v3098_v15 = vrot.slane %v3084_v3, %v33752_v5  ;;  %v3099_v20 = vcombine.high %v3091_v13, %v3091_v13  ;;  %v641_v28 = vld [vmem:[%s33746_s29 + $0x6e0] sm:$0xff] }
 0x1e6   : > { %13492 = vmatpush1.xpose.msra.mxu0 %v629_v31  ;;  %13562 = vmatpush1.xpose.msra.mxu1 %v631_v34  ;;  %v3100_v23 = vcombine.high %v3098_v15, %v3098_v15  ;;  %v643_v31 = vld [vmem:[%s33746_s29 + $0x6f0] sm:$0xff]  ;;  %v1416_v34 = vld [vmem:[%s33746_s29 + $0x1f18] sm:$0x3] }
 0x1e7   : > { %13629 = vmatprep.subr.mxu0 %v1402_v35  ;;  %13699 = vmatprep.subr.mxu1 %v1404_v37  ;;  %v1413_v37 = vld [vmem:[%s33746_s29 + $0x1f00] sm:$0x3] }
 0x1e9   : > { %v10167_v44 = vpop.f32.mrf.mxu0  ;;  %13526 = vmatmul.mubr.f32.vlgmr.msra.gmra.mxu0 %v3040_v16  ;;  %v10237_v49 = vpop.f32.mrf.mxu1  ;;  %13596 = vmatmul.mubr.f32.vlgmr.msra.gmra.mxu1 %v3047_v18  ;;  %v285_v16 = vld [vmem:[%s33738_s27 + $0x1c0] sm:$0xff]  ;;  %v1411_v18 = vld [vmem:[%s33746_s29 + $0x1ef0] sm:$0x3] }
 0x1ea   : > { %v10168_v48 = vadd.f32 %v10167_v44, %v10098_v32  ;;  %13630 = vmatpush1.xpose.msra.mxu0 %v1401_v40  ;;  %13700 = vmatpush1.xpose.msra.mxu1 %v1403_v41  ;;  %v3101_v24 = vcombine.high %v285_v16, %v285_v16  ;;  %v1414_v32 = vld [vmem:[%s33746_s29 + $0x1f08] sm:$0x3]  ;;  %v3108_v33 = vrot.slane %v285_v16, %v33752_v5 }
 0x1eb   : > { %v10169_v50 = vpop.f32.mrf.mxu0  ;;  %13631 = vmatprep.subr.mxu0 %v634_v42  ;;  %v10239_v53 = vpop.f32.mrf.mxu1  ;;  %13701 = vmatprep.subr.mxu1 %v636_v45  ;;  %v648_v42 = vld [vmem:[%s33746_s29 + $0x718] sm:$0xff]  ;;  %v654_v16 = vld [vmem:[%s33746_s29 + $0x748] sm:$0xff] }
 0x1ec   : > { %v10238_v52 = vadd.f32 %v10237_v49, %v10168_v48  ;;  %13665 = vmatprep.mubr.f32.mxu0 %v3065_v43  ;;  %13735 = vmatprep.mubr.f32.mxu1 %v3066_v46  ;;  %v3115_v35 = vrot.slane %v3101_v24, %v33752_v5  ;;  %v3116_v40 = vcombine.high %v3108_v33, %v3108_v33  ;;  %v645_v48 = vld [vmem:[%s33746_s29 + $0x700] sm:$0xff] }
 0x1ee   : > { %13632 = vmatpush1.xpose.msra.mxu0 %v633_v51  ;;  %13702 = vmatpush1.xpose.msra.mxu1 %v635_v54  ;;  %v3117_v43 = vcombine.high %v3115_v35, %v3115_v35  ;;  %v647_v51 = vld [vmem:[%s33746_s29 + $0x710] sm:$0xff]  ;;  %v1420_v54 = vld [vmem:[%s33746_s29 + $0x1f38] sm:$0x3] }
 0x1ef   : > { %13769 = vmatprep.subr.mxu0 %v1406_v55  ;;  %13839 = vmatprep.subr.mxu1 %v1408_v57  ;;  %v1417_v57 = vld [vmem:[%s33746_s29 + $0x1f20] sm:$0x3] }
 0x1f1   : > { %v10307_v0 = vpop.f32.mrf.mxu0  ;;  %13666 = vmatmul.mubr.f32.vlgmr.msra.gmra.mxu0 %v3057_v36  ;;  %v10377_v6 = vpop.f32.mrf.mxu1  ;;  %13736 = vmatmul.mubr.f32.vlgmr.msra.gmra.mxu1 %v3064_v38  ;;  %v286_v36 = vld [vmem:[%s33738_s27 + $0x1c8] sm:$0xff]  ;;  %v1415_v38 = vld [vmem:[%s33746_s29 + $0x1f10] sm:$0x3] }
 0x1f2   : > { %v10308_v4 = vadd.f32 %v10307_v0, %v10238_v52  ;;  %13770 = vmatpush1.xpose.msra.mxu0 %v1405_v60  ;;  %13840 = vmatpush1.xpose.msra.mxu1 %v1407_v61  ;;  %v3118_v44 = vcombine.high %v286_v36, %v286_v36  ;;  %v1418_v52 = vld [vmem:[%s33746_s29 + $0x1f28] sm:$0x3]  ;;  %v3125_v53 = vrot.slane %v286_v36, %v33752_v5 }
 0x1f3   : > { %v10309_v7 = vpop.f32.mrf.mxu0  ;;  %13771 = vmatprep.subr.mxu0 %v638_v62  ;;  %v10379_v10 = vpop.f32.mrf.mxu1  ;;  %13841 = vmatprep.subr.mxu1 %v640_v1  ;;  %v652_v62 = vld [vmem:[%s33746_s29 + $0x738] sm:$0xff]  ;;  %v658_v36 = vld [vmem:[%s33746_s29 + $0x768] sm:$0xff] }
 0x1f4   : > { %v10378_v9 = vadd.f32 %v10377_v6, %v10308_v4  ;;  %13805 = vmatprep.mubr.f32.mxu0 %v3082_v63  ;;  %13875 = vmatprep.mubr.f32.mxu1 %v3083_v2  ;;  %v3132_v55 = vrot.slane %v3118_v44, %v33752_v5  ;;  %v3133_v60 = vcombine.high %v3125_v53, %v3125_v53  ;;  %v649_v4 = vld [vmem:[%s33746_s29 + $0x720] sm:$0xff] }
 0x1f6   : > { %13772 = vmatpush1.xpose.msra.mxu0 %v637_v8  ;;  %13842 = vmatpush1.xpose.msra.mxu1 %v639_v11  ;;  %v3134_v63 = vcombine.high %v3132_v55, %v3132_v55  ;;  %v651_v8 = vld [vmem:[%s33746_s29 + $0x730] sm:$0xff]  ;;  %v1424_v11 = vld [vmem:[%s33746_s29 + $0x1f58] sm:$0x3] }
 0x1f7   : > { %13909 = vmatprep.subr.mxu0 %v1410_v12  ;;  %13979 = vmatprep.subr.mxu1 %v1412_v14  ;;  %v1421_v14 = vld [vmem:[%s33746_s29 + $0x1f40] sm:$0x3] }
 0x1f9   : > { %v10447_v21 = vpop.f32.mrf.mxu0  ;;  %13806 = vmatmul.mubr.f32.vlgmr.msra.gmra.mxu0 %v3074_v56  ;;  %v10517_v26 = vpop.f32.mrf.mxu1  ;;  %13876 = vmatmul.mubr.f32.vlgmr.msra.gmra.mxu1 %v3081_v58  ;;  %v287_v56 = vld [vmem:[%s33738_s27 + $0x1d0] sm:$0xff] }
 0x1fa   : > { %v10448_v25 = vadd.f32 %v10447_v21, %v10378_v9  ;;  %13910 = vmatpush1.xpose.msra.mxu0 %v1409_v17  ;;  %13980 = vmatpush1.xpose.msra.mxu1 %v1411_v18  ;;  %v1419_v58 = vld [vmem:[%s33746_s29 + $0x1f30] sm:$0x3]  ;;  %v3135_v0 = vcombine.high %v287_v56, %v287_v56  ;;  %v1422_v9 = vld [vmem:[%s33746_s29 + $0x1f48] sm:$0x3]  ;;  %v3142_v10 = vrot.slane %v287_v56, %v33752_v5 }
 0x1fb   : > { %v10449_v27 = vpop.f32.mrf.mxu0  ;;  %13911 = vmatprep.subr.mxu0 %v642_v19  ;;  %v10519_v30 = vpop.f32.mrf.mxu1  ;;  %13981 = vmatprep.subr.mxu1 %v644_v22  ;;  %v656_v19 = vld [vmem:[%s33746_s29 + $0x758] sm:$0xff]  ;;  %v662_v56 = vld [vmem:[%s33746_s29 + $0x788] sm:$0xff] }
 0x1fc   : > { %v10518_v29 = vadd.f32 %v10517_v26, %v10448_v25  ;;  %13945 = vmatprep.mubr.f32.mxu0 %v3099_v20  ;;  %14015 = vmatprep.mubr.f32.mxu1 %v3100_v23  ;;  %v3149_v12 = vrot.slane %v3135_v0, %v33752_v5  ;;  %v3150_v17 = vcombine.high %v3142_v10, %v3142_v10  ;;  %v653_v25 = vld [vmem:[%s33746_s29 + $0x740] sm:$0xff] }
 0x1fe   : > { %13912 = vmatpush1.xpose.msra.mxu0 %v641_v28  ;;  %13982 = vmatpush1.xpose.msra.mxu1 %v643_v31  ;;  %v3151_v20 = vcombine.high %v3149_v12, %v3149_v12  ;;  %v655_v28 = vld [vmem:[%s33746_s29 + $0x750] sm:$0xff]  ;;  %v1428_v31 = vld [vmem:[%s33746_s29 + $0x1f78] sm:$0x3] }
 0x1ff   : > { %14049 = vmatprep.subr.mxu0 %v1414_v32  ;;  %14119 = vmatprep.subr.mxu1 %v1416_v34  ;;  %v1425_v34 = vld [vmem:[%s33746_s29 + $0x1f60] sm:$0x3] }
 0x201   : > { %v10587_v41 = vpop.f32.mrf.mxu0  ;;  %13946 = vmatmul.mubr.f32.vlgmr.msra.gmra.mxu0 %v3091_v13  ;;  %v10657_v46 = vpop.f32.mrf.mxu1  ;;  %14016 = vmatmul.mubr.f32.vlgmr.msra.gmra.mxu1 %v3098_v15  ;;  %v288_v13 = vld [vmem:[%s33738_s27 + $0x1d8] sm:$0xff]  ;;  %v1423_v15 = vld [vmem:[%s33746_s29 + $0x1f50] sm:$0x3] }
 0x202   : > { %v10588_v45 = vadd.f32 %v10587_v41, %v10518_v29  ;;  %14050 = vmatpush1.xpose.msra.mxu0 %v1413_v37  ;;  %14120 = vmatpush1.xpose.msra.mxu1 %v1415_v38  ;;  %v3152_v21 = vcombine.high %v288_v13, %v288_v13  ;;  %v1426_v29 = vld [vmem:[%s33746_s29 + $0x1f68] sm:$0x3]  ;;  %v3159_v30 = vrot.slane %v288_v13, %v33752_v5 }
 0x203   : > { %v10589_v47 = vpop.f32.mrf.mxu0  ;;  %14051 = vmatprep.subr.mxu0 %v646_v39  ;;  %v10659_v50 = vpop.f32.mrf.mxu1  ;;  %14121 = vmatprep.subr.mxu1 %v648_v42  ;;  %v660_v39 = vld [vmem:[%s33746_s29 + $0x778] sm:$0xff]  ;;  %v666_v13 = vld [vmem:[%s33746_s29 + $0x7a8] sm:$0xff] }
 0x204   : > { %v10658_v49 = vadd.f32 %v10657_v46, %v10588_v45  ;;  %14085 = vmatprep.mubr.f32.mxu0 %v3116_v40  ;;  %14155 = vmatprep.mubr.f32.mxu1 %v3117_v43  ;;  %v3166_v32 = vrot.slane %v3152_v21, %v33752_v5  ;;  %v3167_v37 = vcombine.high %v3159_v30, %v3159_v30  ;;  %v657_v45 = vld [vmem:[%s33746_s29 + $0x760] sm:$0xff] }
 0x206   : > { %14052 = vmatpush1.xpose.msra.mxu0 %v645_v48  ;;  %14122 = vmatpush1.xpose.msra.mxu1 %v647_v51  ;;  %v3168_v40 = vcombine.high %v3166_v32, %v3166_v32  ;;  %v659_v48 = vld [vmem:[%s33746_s29 + $0x770] sm:$0xff]  ;;  %v1432_v51 = vld [vmem:[%s33746_s29 + $0x1f98] sm:$0x3] }
 0x207   : > { %14189 = vmatprep.subr.mxu0 %v1418_v52  ;;  %14259 = vmatprep.subr.mxu1 %v1420_v54  ;;  %v1429_v54 = vld [vmem:[%s33746_s29 + $0x1f80] sm:$0x3] }
 0x209   : > { %v10727_v61 = vpop.f32.mrf.mxu0  ;;  %14086 = vmatmul.mubr.f32.vlgmr.msra.gmra.mxu0 %v3108_v33  ;;  %v10797_v2 = vpop.f32.mrf.mxu1  ;;  %14156 = vmatmul.mubr.f32.vlgmr.msra.gmra.mxu1 %v3115_v35  ;;  %v289_v33 = vld [vmem:[%s33738_s27 + $0x1e0] sm:$0xff]  ;;  %v1427_v35 = vld [vmem:[%s33746_s29 + $0x1f70] sm:$0x3] }
 0x20a   : > { %v10728_v1 = vadd.f32 %v10727_v61, %v10658_v49  ;;  %14190 = vmatpush1.xpose.msra.mxu0 %v1417_v57  ;;  %14260 = vmatpush1.xpose.msra.mxu1 %v1419_v58  ;;  %v3169_v41 = vcombine.high %v289_v33, %v289_v33  ;;  %v1430_v49 = vld [vmem:[%s33746_s29 + $0x1f88] sm:$0x3]  ;;  %v3176_v50 = vrot.slane %v289_v33, %v33752_v5 }
 0x20b   : > { %v10729_v3 = vpop.f32.mrf.mxu0  ;;  %14191 = vmatprep.subr.mxu0 %v650_v59  ;;  %v10799_v7 = vpop.f32.mrf.mxu1  ;;  %14261 = vmatprep.subr.mxu1 %v652_v62  ;;  %v664_v59 = vld [vmem:[%s33746_s29 + $0x798] sm:$0xff]  ;;  %v670_v33 = vld [vmem:[%s33746_s29 + $0x7c8] sm:$0xff] }
 0x20c   : > { %v10798_v6 = vadd.f32 %v10797_v2, %v10728_v1  ;;  %14225 = vmatprep.mubr.f32.mxu0 %v3133_v60  ;;  %14295 = vmatprep.mubr.f32.mxu1 %v3134_v63  ;;  %v3183_v52 = vrot.slane %v3169_v41, %v33752_v5  ;;  %v3184_v57 = vcombine.high %v3176_v50, %v3176_v50  ;;  %v661_v1 = vld [vmem:[%s33746_s29 + $0x780] sm:$0xff] }
 0x20e   : > { %14192 = vmatpush1.xpose.msra.mxu0 %v649_v4  ;;  %14262 = vmatpush1.xpose.msra.mxu1 %v651_v8  ;;  %v3185_v60 = vcombine.high %v3183_v52, %v3183_v52  ;;  %v663_v4 = vld [vmem:[%s33746_s29 + $0x790] sm:$0xff]  ;;  %v1436_v8 = vld [vmem:[%s33746_s29 + $0x1fb8] sm:$0x3] }
 0x20f   : > { %14329 = vmatprep.subr.mxu0 %v1422_v9  ;;  %14399 = vmatprep.subr.mxu1 %v1424_v11  ;;  %v1433_v11 = vld [vmem:[%s33746_s29 + $0x1fa0] sm:$0x3] }
 0x211   : > { %v10867_v18 = vpop.f32.mrf.mxu0  ;;  %14226 = vmatmul.mubr.f32.vlgmr.msra.gmra.mxu0 %v3125_v53  ;;  %v10937_v23 = vpop.f32.mrf.mxu1  ;;  %14296 = vmatmul.mubr.f32.vlgmr.msra.gmra.mxu1 %v3132_v55  ;;  %v290_v53 = vld [vmem:[%s33738_s27 + $0x1e8] sm:$0xff]  ;;  %v1431_v55 = vld [vmem:[%s33746_s29 + $0x1f90] sm:$0x3] }
 0x212   : > { %v10868_v22 = vadd.f32 %v10867_v18, %v10798_v6  ;;  %14330 = vmatpush1.xpose.msra.mxu0 %v1421_v14  ;;  %14400 = vmatpush1.xpose.msra.mxu1 %v1423_v15  ;;  %v3186_v61 = vcombine.high %v290_v53, %v290_v53  ;;  %v1434_v6 = vld [vmem:[%s33746_s29 + $0x1fa8] sm:$0x3]  ;;  %v3193_v7 = vrot.slane %v290_v53, %v33752_v5 }
 0x213   : > { %v10869_v24 = vpop.f32.mrf.mxu0  ;;  %14331 = vmatprep.subr.mxu0 %v654_v16  ;;  %v10939_v27 = vpop.f32.mrf.mxu1  ;;  %14401 = vmatprep.subr.mxu1 %v656_v19  ;;  %v668_v16 = vld [vmem:[%s33746_s29 + $0x7b8] sm:$0xff]  ;;  %v674_v53 = vld [vmem:[%s33746_s29 + $0x7e8] sm:$0xff] }
 0x214   : > { %v10938_v26 = vadd.f32 %v10937_v23, %v10868_v22  ;;  %14365 = vmatprep.mubr.f32.mxu0 %v3150_v17  ;;  %14435 = vmatprep.mubr.f32.mxu1 %v3151_v20  ;;  %v3200_v9 = vrot.slane %v3186_v61, %v33752_v5  ;;  %v3201_v14 = vcombine.high %v3193_v7, %v3193_v7  ;;  %v665_v22 = vld [vmem:[%s33746_s29 + $0x7a0] sm:$0xff] }
 0x216   : > { %14332 = vmatpush1.xpose.msra.mxu0 %v653_v25  ;;  %14402 = vmatpush1.xpose.msra.mxu1 %v655_v28  ;;  %v3202_v17 = vcombine.high %v3200_v9, %v3200_v9  ;;  %v667_v25 = vld [vmem:[%s33746_s29 + $0x7b0] sm:$0xff]  ;;  %v1440_v28 = vld [vmem:[%s33746_s29 + $0x1fd8] sm:$0x3] }
 0x217   : > { %14469 = vmatprep.subr.mxu0 %v1426_v29  ;;  %14539 = vmatprep.subr.mxu1 %v1428_v31  ;;  %v1437_v31 = vld [vmem:[%s33746_s29 + $0x1fc0] sm:$0x3] }
 0x219   : > { %v11007_v38 = vpop.f32.mrf.mxu0  ;;  %14366 = vmatmul.mubr.f32.vlgmr.msra.gmra.mxu0 %v3142_v10  ;;  %v11077_v43 = vpop.f32.mrf.mxu1  ;;  %14436 = vmatmul.mubr.f32.vlgmr.msra.gmra.mxu1 %v3149_v12  ;;  %v291_v10 = vld [vmem:[%s33738_s27 + $0x1f0] sm:$0xff] }
 0x21a   : > { %v11008_v42 = vadd.f32 %v11007_v38, %v10938_v26  ;;  %14470 = vmatpush1.xpose.msra.mxu0 %v1425_v34  ;;  %14540 = vmatpush1.xpose.msra.mxu1 %v1427_v35  ;;  %v1435_v12 = vld [vmem:[%s33746_s29 + $0x1fb0] sm:$0x3]  ;;  %v3203_v18 = vcombine.high %v291_v10, %v291_v10  ;;  %v1438_v26 = vld [vmem:[%s33746_s29 + $0x1fc8] sm:$0x3]  ;;  %v3210_v27 = vrot.slane %v291_v10, %v33752_v5 }
 0x21b   : > { %v11009_v44 = vpop.f32.mrf.mxu0  ;;  %14471 = vmatprep.subr.mxu0 %v658_v36  ;;  %v11079_v47 = vpop.f32.mrf.mxu1  ;;  %14541 = vmatprep.subr.mxu1 %v660_v39  ;;  %v672_v36 = vld [vmem:[%s33746_s29 + $0x7d8] sm:$0xff]  ;;  %v678_v10 = vld [vmem:[%s33746_s29 + $0x808] sm:$0xff] }
 0x21c   : > { %v11078_v46 = vadd.f32 %v11077_v43, %v11008_v42  ;;  %14505 = vmatprep.mubr.f32.mxu0 %v3167_v37  ;;  %14575 = vmatprep.mubr.f32.mxu1 %v3168_v40  ;;  %v3217_v29 = vrot.slane %v3203_v18, %v33752_v5  ;;  %v3218_v34 = vcombine.high %v3210_v27, %v3210_v27  ;;  %v669_v42 = vld [vmem:[%s33746_s29 + $0x7c0] sm:$0xff] }
 0x21e   : > { %14472 = vmatpush1.xpose.msra.mxu0 %v657_v45  ;;  %14542 = vmatpush1.xpose.msra.mxu1 %v659_v48  ;;  %v3219_v37 = vcombine.high %v3217_v29, %v3217_v29  ;;  %v671_v45 = vld [vmem:[%s33746_s29 + $0x7d0] sm:$0xff]  ;;  %v1444_v48 = vld [vmem:[%s33746_s29 + $0x1ff8] sm:$0x3] }
 0x21f   : > { %14609 = vmatprep.subr.mxu0 %v1430_v49  ;;  %14679 = vmatprep.subr.mxu1 %v1432_v51  ;;  %v1441_v51 = vld [vmem:[%s33746_s29 + $0x1fe0] sm:$0x3] }
 0x221   : > { %v11147_v58 = vpop.f32.mrf.mxu0  ;;  %14506 = vmatmul.mubr.f32.vlgmr.msra.gmra.mxu0 %v3159_v30  ;;  %v11217_v63 = vpop.f32.mrf.mxu1  ;;  %14576 = vmatmul.mubr.f32.vlgmr.msra.gmra.mxu1 %v3166_v32  ;;  %v292_v30 = vld [vmem:[%s33738_s27 + $0x1f8] sm:$0xff]  ;;  %v1439_v32 = vld [vmem:[%s33746_s29 + $0x1fd0] sm:$0x3] }
 0x222   : > { %v11148_v62 = vadd.f32 %v11147_v58, %v11078_v46  ;;  %14610 = vmatpush1.xpose.msra.mxu0 %v1429_v54  ;;  %14680 = vmatpush1.xpose.msra.mxu1 %v1431_v55  ;;  %v3220_v38 = vcombine.high %v292_v30, %v292_v30  ;;  %v1442_v46 = vld [vmem:[%s33746_s29 + $0x1fe8] sm:$0x3]  ;;  %v3227_v47 = vrot.slane %v292_v30, %v33752_v5 }
 0x223   : > { %v11149_v0 = vpop.f32.mrf.mxu0  ;;  %14611 = vmatprep.subr.mxu0 %v662_v56  ;;  %v11219_v3 = vpop.f32.mrf.mxu1  ;;  %14681 = vmatprep.subr.mxu1 %v664_v59  ;;  %v676_v56 = vld [vmem:[%s33746_s29 + $0x7f8] sm:$0xff]  ;;  %v682_v30 = vld [vmem:[%s33746_s29 + $0x828] sm:$0xff] }
 0x224   : > { %v11218_v2 = vadd.f32 %v11217_v63, %v11148_v62  ;;  %14645 = vmatprep.mubr.f32.mxu0 %v3184_v57  ;;  %14715 = vmatprep.mubr.f32.mxu1 %v3185_v60  ;;  %v3234_v49 = vrot.slane %v3220_v38, %v33752_v5  ;;  %v3235_v54 = vcombine.high %v3227_v47, %v3227_v47  ;;  %v673_v62 = vld [vmem:[%s33746_s29 + $0x7e0] sm:$0xff] }
 0x226   : > { %14612 = vmatpush1.xpose.msra.mxu0 %v661_v1  ;;  %14682 = vmatpush1.xpose.msra.mxu1 %v663_v4  ;;  %v3236_v57 = vcombine.high %v3234_v49, %v3234_v49  ;;  %v675_v1 = vld [vmem:[%s33746_s29 + $0x7f0] sm:$0xff]  ;;  %v1448_v4 = vld [vmem:[%s33746_s29 + $0x2018] sm:$0x3] }
 0x227   : > { %14749 = vmatprep.subr.mxu0 %v1434_v6  ;;  %14819 = vmatprep.subr.mxu1 %v1436_v8  ;;  %v1445_v8 = vld [vmem:[%s33746_s29 + $0x2000] sm:$0x3] }
 0x229   : > { %v11287_v15 = vpop.f32.mrf.mxu0  ;;  %14646 = vmatmul.mubr.f32.vlgmr.msra.gmra.mxu0 %v3176_v50  ;;  %v11357_v20 = vpop.f32.mrf.mxu1  ;;  %14716 = vmatmul.mubr.f32.vlgmr.msra.gmra.mxu1 %v3183_v52  ;;  %v293_v50 = vld [vmem:[%s33738_s27 + $0x200] sm:$0xff]  ;;  %v1443_v52 = vld [vmem:[%s33746_s29 + $0x1ff0] sm:$0x3] }
 0x22a   : > { %v11288_v19 = vadd.f32 %v11287_v15, %v11218_v2  ;;  %14750 = vmatpush1.xpose.msra.mxu0 %v1433_v11  ;;  %14820 = vmatpush1.xpose.msra.mxu1 %v1435_v12  ;;  %v3237_v58 = vcombine.high %v293_v50, %v293_v50  ;;  %v1446_v2 = vld [vmem:[%s33746_s29 + $0x2008] sm:$0x3]  ;;  %v3244_v3 = vrot.slane %v293_v50, %v33752_v5 }
 0x22b   : > { %v11289_v21 = vpop.f32.mrf.mxu0  ;;  %14751 = vmatprep.subr.mxu0 %v666_v13  ;;  %v11359_v24 = vpop.f32.mrf.mxu1  ;;  %14821 = vmatprep.subr.mxu1 %v668_v16  ;;  %v680_v13 = vld [vmem:[%s33746_s29 + $0x818] sm:$0xff]  ;;  %v686_v50 = vld [vmem:[%s33746_s29 + $0x848] sm:$0xff] }
 0x22c   : > { %v11358_v23 = vadd.f32 %v11357_v20, %v11288_v19  ;;  %14785 = vmatprep.mubr.f32.mxu0 %v3201_v14  ;;  %14855 = vmatprep.mubr.f32.mxu1 %v3202_v17  ;;  %v3251_v6 = vrot.slane %v3237_v58, %v33752_v5  ;;  %v3252_v11 = vcombine.high %v3244_v3, %v3244_v3  ;;  %v677_v19 = vld [vmem:[%s33746_s29 + $0x800] sm:$0xff] }
 0x22e   : > { %14752 = vmatpush1.xpose.msra.mxu0 %v665_v22  ;;  %14822 = vmatpush1.xpose.msra.mxu1 %v667_v25  ;;  %v3253_v14 = vcombine.high %v3251_v6, %v3251_v6  ;;  %v679_v22 = vld [vmem:[%s33746_s29 + $0x810] sm:$0xff]  ;;  %v1452_v25 = vld [vmem:[%s33746_s29 + $0x2038] sm:$0x3] }
 0x22f   : > { %14889 = vmatprep.subr.mxu0 %v1438_v26  ;;  %14959 = vmatprep.subr.mxu1 %v1440_v28  ;;  %v1449_v28 = vld [vmem:[%s33746_s29 + $0x2020] sm:$0x3] }
 0x231   : > { %v11427_v35 = vpop.f32.mrf.mxu0  ;;  %14786 = vmatmul.mubr.f32.vlgmr.msra.gmra.mxu0 %v3193_v7  ;;  %v11497_v40 = vpop.f32.mrf.mxu1  ;;  %14856 = vmatmul.mubr.f32.vlgmr.msra.gmra.mxu1 %v3200_v9  ;;  %v294_v7 = vld [vmem:[%s33738_s27 + $0x208] sm:$0xff]  ;;  %v1447_v9 = vld [vmem:[%s33746_s29 + $0x2010] sm:$0x3] }
 0x232   : > { %v11428_v39 = vadd.f32 %v11427_v35, %v11358_v23  ;;  %14890 = vmatpush1.xpose.msra.mxu0 %v1437_v31  ;;  %14960 = vmatpush1.xpose.msra.mxu1 %v1439_v32  ;;  %v3254_v15 = vcombine.high %v294_v7, %v294_v7  ;;  %v1450_v23 = vld [vmem:[%s33746_s29 + $0x2028] sm:$0x3]  ;;  %v3261_v24 = vrot.slane %v294_v7, %v33752_v5 }
 0x233   : > { %v11429_v41 = vpop.f32.mrf.mxu0  ;;  %14891 = vmatprep.subr.mxu0 %v670_v33  ;;  %v11499_v44 = vpop.f32.mrf.mxu1  ;;  %14961 = vmatprep.subr.mxu1 %v672_v36  ;;  %v684_v33 = vld [vmem:[%s33746_s29 + $0x838] sm:$0xff]  ;;  %v690_v7 = vld [vmem:[%s33746_s29 + $0x868] sm:$0xff] }
 0x234   : > { %v11498_v43 = vadd.f32 %v11497_v40, %v11428_v39  ;;  %14925 = vmatprep.mubr.f32.mxu0 %v3218_v34  ;;  %14995 = vmatprep.mubr.f32.mxu1 %v3219_v37  ;;  %v3268_v26 = vrot.slane %v3254_v15, %v33752_v5  ;;  %v3269_v31 = vcombine.high %v3261_v24, %v3261_v24  ;;  %v681_v39 = vld [vmem:[%s33746_s29 + $0x820] sm:$0xff] }
 0x236   : > { %14892 = vmatpush1.xpose.msra.mxu0 %v669_v42  ;;  %14962 = vmatpush1.xpose.msra.mxu1 %v671_v45  ;;  %v3270_v34 = vcombine.high %v3268_v26, %v3268_v26  ;;  %v683_v42 = vld [vmem:[%s33746_s29 + $0x830] sm:$0xff]  ;;  %v1456_v45 = vld [vmem:[%s33746_s29 + $0x2058] sm:$0x3] }
 0x237   : > { %15029 = vmatprep.subr.mxu0 %v1442_v46  ;;  %15099 = vmatprep.subr.mxu1 %v1444_v48  ;;  %v1453_v48 = vld [vmem:[%s33746_s29 + $0x2040] sm:$0x3] }
 0x239   : > { %v11567_v55 = vpop.f32.mrf.mxu0  ;;  %14926 = vmatmul.mubr.f32.vlgmr.msra.gmra.mxu0 %v3210_v27  ;;  %v11637_v60 = vpop.f32.mrf.mxu1  ;;  %14996 = vmatmul.mubr.f32.vlgmr.msra.gmra.mxu1 %v3217_v29  ;;  %v295_v27 = vld [vmem:[%s33738_s27 + $0x210] sm:$0xff] }
 0x23a   : > { %v11568_v59 = vadd.f32 %v11567_v55, %v11498_v43  ;;  %15030 = vmatpush1.xpose.msra.mxu0 %v1441_v51  ;;  %15100 = vmatpush1.xpose.msra.mxu1 %v1443_v52  ;;  %v1451_v29 = vld [vmem:[%s33746_s29 + $0x2030] sm:$0x3]  ;;  %v3271_v35 = vcombine.high %v295_v27, %v295_v27  ;;  %v1454_v43 = vld [vmem:[%s33746_s29 + $0x2048] sm:$0x3]  ;;  %v3278_v44 = vrot.slane %v295_v27, %v33752_v5 }
 0x23b   : > { %v11569_v61 = vpop.f32.mrf.mxu0  ;;  %15031 = vmatprep.subr.mxu0 %v674_v53  ;;  %v11639_v0 = vpop.f32.mrf.mxu1  ;;  %15101 = vmatprep.subr.mxu1 %v676_v56  ;;  %v688_v53 = vld [vmem:[%s33746_s29 + $0x858] sm:$0xff]  ;;  %v694_v27 = vld [vmem:[%s33746_s29 + $0x888] sm:$0xff] }
 0x23c   : > { %v11638_v63 = vadd.f32 %v11637_v60, %v11568_v59  ;;  %15065 = vmatprep.mubr.f32.mxu0 %v3235_v54  ;;  %15135 = vmatprep.mubr.f32.mxu1 %v3236_v57  ;;  %v3285_v46 = vrot.slane %v3271_v35, %v33752_v5  ;;  %v3286_v51 = vcombine.high %v3278_v44, %v3278_v44  ;;  %v685_v59 = vld [vmem:[%s33746_s29 + $0x840] sm:$0xff] }
 0x23e   : > { %15032 = vmatpush1.xpose.msra.mxu0 %v673_v62  ;;  %15102 = vmatpush1.xpose.msra.mxu1 %v675_v1  ;;  %v3287_v54 = vcombine.high %v3285_v46, %v3285_v46  ;;  %v687_v62 = vld [vmem:[%s33746_s29 + $0x850] sm:$0xff]  ;;  %v1460_v1 = vld [vmem:[%s33746_s29 + $0x2078] sm:$0x3] }
 0x23f   : > { %15169 = vmatprep.subr.mxu0 %v1446_v2  ;;  %15239 = vmatprep.subr.mxu1 %v1448_v4  ;;  %v1457_v4 = vld [vmem:[%s33746_s29 + $0x2060] sm:$0x3] }
 0x241   : > { %v11707_v12 = vpop.f32.mrf.mxu0  ;;  %15066 = vmatmul.mubr.f32.vlgmr.msra.gmra.mxu0 %v3227_v47  ;;  %v11777_v17 = vpop.f32.mrf.mxu1  ;;  %15136 = vmatmul.mubr.f32.vlgmr.msra.gmra.mxu1 %v3234_v49  ;;  %v296_v47 = vld [vmem:[%s33738_s27 + $0x218] sm:$0xff]  ;;  %v1455_v49 = vld [vmem:[%s33746_s29 + $0x2050] sm:$0x3] }
 0x242   : > { %v11708_v16 = vadd.f32 %v11707_v12, %v11638_v63  ;;  %15170 = vmatpush1.xpose.msra.mxu0 %v1445_v8  ;;  %15240 = vmatpush1.xpose.msra.mxu1 %v1447_v9  ;;  %v3288_v55 = vcombine.high %v296_v47, %v296_v47  ;;  %v1458_v63 = vld [vmem:[%s33746_s29 + $0x2068] sm:$0x3]  ;;  %v3295_v0 = vrot.slane %v296_v47, %v33752_v5 }
 0x243   : > { %v11709_v18 = vpop.f32.mrf.mxu0  ;;  %15171 = vmatprep.subr.mxu0 %v678_v10  ;;  %v11779_v21 = vpop.f32.mrf.mxu1  ;;  %15241 = vmatprep.subr.mxu1 %v680_v13  ;;  %v692_v10 = vld [vmem:[%s33746_s29 + $0x878] sm:$0xff]  ;;  %v698_v47 = vld [vmem:[%s33746_s29 + $0x8a8] sm:$0xff] }
 0x244   : > { %v11778_v20 = vadd.f32 %v11777_v17, %v11708_v16  ;;  %15205 = vmatprep.mubr.f32.mxu0 %v3252_v11  ;;  %15275 = vmatprep.mubr.f32.mxu1 %v3253_v14  ;;  %v3302_v2 = vrot.slane %v3288_v55, %v33752_v5  ;;  %v3303_v8 = vcombine.high %v3295_v0, %v3295_v0  ;;  %v689_v16 = vld [vmem:[%s33746_s29 + $0x860] sm:$0xff] }
 0x246   : > { %15172 = vmatpush1.xpose.msra.mxu0 %v677_v19  ;;  %15242 = vmatpush1.xpose.msra.mxu1 %v679_v22  ;;  %v3304_v11 = vcombine.high %v3302_v2, %v3302_v2  ;;  %v691_v19 = vld [vmem:[%s33746_s29 + $0x870] sm:$0xff]  ;;  %v1464_v22 = vld [vmem:[%s33746_s29 + $0x2098] sm:$0x3] }
 0x247   : > { %15309 = vmatprep.subr.mxu0 %v1450_v23  ;;  %15379 = vmatprep.subr.mxu1 %v1452_v25  ;;  %v1461_v25 = vld [vmem:[%s33746_s29 + $0x2080] sm:$0x3] }
 0x249   : > { %v11847_v32 = vpop.f32.mrf.mxu0  ;;  %15206 = vmatmul.mubr.f32.vlgmr.msra.gmra.mxu0 %v3244_v3  ;;  %v11917_v37 = vpop.f32.mrf.mxu1  ;;  %15276 = vmatmul.mubr.f32.vlgmr.msra.gmra.mxu1 %v3251_v6  ;;  %v297_v3 = vld [vmem:[%s33738_s27 + $0x220] sm:$0xff]  ;;  %v1459_v6 = vld [vmem:[%s33746_s29 + $0x2070] sm:$0x3] }
 0x24a   : > { %v11848_v36 = vadd.f32 %v11847_v32, %v11778_v20  ;;  %15310 = vmatpush1.xpose.msra.mxu0 %v1449_v28  ;;  %15380 = vmatpush1.xpose.msra.mxu1 %v1451_v29  ;;  %v3305_v12 = vcombine.high %v297_v3, %v297_v3  ;;  %v1462_v20 = vld [vmem:[%s33746_s29 + $0x2088] sm:$0x3]  ;;  %v3312_v21 = vrot.slane %v297_v3, %v33752_v5 }
 0x24b   : > { %v11849_v38 = vpop.f32.mrf.mxu0  ;;  %15311 = vmatprep.subr.mxu0 %v682_v30  ;;  %v11919_v41 = vpop.f32.mrf.mxu1  ;;  %15381 = vmatprep.subr.mxu1 %v684_v33  ;;  %v696_v30 = vld [vmem:[%s33746_s29 + $0x898] sm:$0xff]  ;;  %v702_v3 = vld [vmem:[%s33746_s29 + $0x8c8] sm:$0xff] }
 0x24c   : > { %v11918_v40 = vadd.f32 %v11917_v37, %v11848_v36  ;;  %15345 = vmatprep.mubr.f32.mxu0 %v3269_v31  ;;  %15415 = vmatprep.mubr.f32.mxu1 %v3270_v34  ;;  %v3319_v23 = vrot.slane %v3305_v12, %v33752_v5  ;;  %v3320_v28 = vcombine.high %v3312_v21, %v3312_v21  ;;  %v693_v36 = vld [vmem:[%s33746_s29 + $0x880] sm:$0xff] }
 0x24e   : > { %15312 = vmatpush1.xpose.msra.mxu0 %v681_v39  ;;  %15382 = vmatpush1.xpose.msra.mxu1 %v683_v42  ;;  %v3321_v31 = vcombine.high %v3319_v23, %v3319_v23  ;;  %v695_v39 = vld [vmem:[%s33746_s29 + $0x890] sm:$0xff]  ;;  %v1468_v42 = vld [vmem:[%s33746_s29 + $0x20b8] sm:$0x3] }
 0x24f   : > { %15449 = vmatprep.subr.mxu0 %v1454_v43  ;;  %15519 = vmatprep.subr.mxu1 %v1456_v45  ;;  %v1465_v45 = vld [vmem:[%s33746_s29 + $0x20a0] sm:$0x3] }
 0x251   : > { %v11987_v52 = vpop.f32.mrf.mxu0  ;;  %15346 = vmatmul.mubr.f32.vlgmr.msra.gmra.mxu0 %v3261_v24  ;;  %v12057_v57 = vpop.f32.mrf.mxu1  ;;  %15416 = vmatmul.mubr.f32.vlgmr.msra.gmra.mxu1 %v3268_v26  ;;  %v298_v24 = vld [vmem:[%s33738_s27 + $0x228] sm:$0xff]  ;;  %v1463_v26 = vld [vmem:[%s33746_s29 + $0x2090] sm:$0x3] }
 0x252   : > { %v11988_v56 = vadd.f32 %v11987_v52, %v11918_v40  ;;  %15450 = vmatpush1.xpose.msra.mxu0 %v1453_v48  ;;  %15520 = vmatpush1.xpose.msra.mxu1 %v1455_v49  ;;  %v3322_v32 = vcombine.high %v298_v24, %v298_v24  ;;  %v1466_v40 = vld [vmem:[%s33746_s29 + $0x20a8] sm:$0x3]  ;;  %v3329_v41 = vrot.slane %v298_v24, %v33752_v5 }
 0x253   : > { %v11989_v58 = vpop.f32.mrf.mxu0  ;;  %15451 = vmatprep.subr.mxu0 %v686_v50  ;;  %v12059_v61 = vpop.f32.mrf.mxu1  ;;  %15521 = vmatprep.subr.mxu1 %v688_v53  ;;  %v700_v50 = vld [vmem:[%s33746_s29 + $0x8b8] sm:$0xff]  ;;  %v706_v24 = vld [vmem:[%s33746_s29 + $0x8e8] sm:$0xff] }
 0x254   : > { %v12058_v60 = vadd.f32 %v12057_v57, %v11988_v56  ;;  %15485 = vmatprep.mubr.f32.mxu0 %v3286_v51  ;;  %15555 = vmatprep.mubr.f32.mxu1 %v3287_v54  ;;  %v3336_v43 = vrot.slane %v3322_v32, %v33752_v5  ;;  %v3337_v48 = vcombine.high %v3329_v41, %v3329_v41  ;;  %v697_v56 = vld [vmem:[%s33746_s29 + $0x8a0] sm:$0xff] }
 0x256   : > { %15452 = vmatpush1.xpose.msra.mxu0 %v685_v59  ;;  %15522 = vmatpush1.xpose.msra.mxu1 %v687_v62  ;;  %v3338_v51 = vcombine.high %v3336_v43, %v3336_v43  ;;  %v699_v59 = vld [vmem:[%s33746_s29 + $0x8b0] sm:$0xff]  ;;  %v1472_v62 = vld [vmem:[%s33746_s29 + $0x20d8] sm:$0x3] }
 0x257   : > { %15589 = vmatprep.subr.mxu0 %v1458_v63  ;;  %15659 = vmatprep.subr.mxu1 %v1460_v1  ;;  %v1469_v1 = vld [vmem:[%s33746_s29 + $0x20c0] sm:$0x3] }
 0x259   : > { %v12127_v9 = vpop.f32.mrf.mxu0  ;;  %15486 = vmatmul.mubr.f32.vlgmr.msra.gmra.mxu0 %v3278_v44  ;;  %v12197_v14 = vpop.f32.mrf.mxu1  ;;  %15556 = vmatmul.mubr.f32.vlgmr.msra.gmra.mxu1 %v3285_v46  ;;  %v299_v44 = vld [vmem:[%s33738_s27 + $0x230] sm:$0xff] }
 0x25a   : > { %v12128_v13 = vadd.f32 %v12127_v9, %v12058_v60  ;;  %15590 = vmatpush1.xpose.msra.mxu0 %v1457_v4  ;;  %15660 = vmatpush1.xpose.msra.mxu1 %v1459_v6  ;;  %v1467_v46 = vld [vmem:[%s33746_s29 + $0x20b0] sm:$0x3]  ;;  %v3339_v52 = vcombine.high %v299_v44, %v299_v44  ;;  %v1470_v60 = vld [vmem:[%s33746_s29 + $0x20c8] sm:$0x3]  ;;  %v3346_v61 = vrot.slane %v299_v44, %v33752_v5 }
 0x25b   : > { %v12129_v15 = vpop.f32.mrf.mxu0  ;;  %15591 = vmatprep.subr.mxu0 %v690_v7  ;;  %v12199_v18 = vpop.f32.mrf.mxu1  ;;  %15661 = vmatprep.subr.mxu1 %v692_v10  ;;  %v704_v7 = vld [vmem:[%s33746_s29 + $0x8d8] sm:$0xff]  ;;  %v710_v44 = vld [vmem:[%s33746_s29 + $0x908] sm:$0xff] }
 0x25c   : > { %v12198_v17 = vadd.f32 %v12197_v14, %v12128_v13  ;;  %15625 = vmatprep.mubr.f32.mxu0 %v3303_v8  ;;  %15695 = vmatprep.mubr.f32.mxu1 %v3304_v11  ;;  %v3353_v63 = vrot.slane %v3339_v52, %v33752_v5  ;;  %v3354_v4 = vcombine.high %v3346_v61, %v3346_v61  ;;  %v701_v13 = vld [vmem:[%s33746_s29 + $0x8c0] sm:$0xff] }
 0x25e   : > { %15592 = vmatpush1.xpose.msra.mxu0 %v689_v16  ;;  %15662 = vmatpush1.xpose.msra.mxu1 %v691_v19  ;;  %v3355_v8 = vcombine.high %v3353_v63, %v3353_v63  ;;  %v703_v16 = vld [vmem:[%s33746_s29 + $0x8d0] sm:$0xff]  ;;  %v1476_v19 = vld [vmem:[%s33746_s29 + $0x20f8] sm:$0x3] }
 0x25f   : > { %15729 = vmatprep.subr.mxu0 %v1462_v20  ;;  %15799 = vmatprep.subr.mxu1 %v1464_v22  ;;  %v1473_v22 = vld [vmem:[%s33746_s29 + $0x20e0] sm:$0x3] }
 0x261   : > { %v12267_v29 = vpop.f32.mrf.mxu0  ;;  %15626 = vmatmul.mubr.f32.vlgmr.msra.gmra.mxu0 %v3295_v0  ;;  %v12337_v34 = vpop.f32.mrf.mxu1  ;;  %15696 = vmatmul.mubr.f32.vlgmr.msra.gmra.mxu1 %v3302_v2  ;;  %v300_v0 = vld [vmem:[%s33738_s27 + $0x238] sm:$0xff]  ;;  %v1471_v2 = vld [vmem:[%s33746_s29 + $0x20d0] sm:$0x3] }
 0x262   : > { %v12268_v33 = vadd.f32 %v12267_v29, %v12198_v17  ;;  %15730 = vmatpush1.xpose.msra.mxu0 %v1461_v25  ;;  %15800 = vmatpush1.xpose.msra.mxu1 %v1463_v26  ;;  %v3356_v9 = vcombine.high %v300_v0, %v300_v0  ;;  %v1474_v17 = vld [vmem:[%s33746_s29 + $0x20e8] sm:$0x3]  ;;  %v3363_v18 = vrot.slane %v300_v0, %v33752_v5 }
 0x263   : > { %v12269_v35 = vpop.f32.mrf.mxu0  ;;  %15731 = vmatprep.subr.mxu0 %v694_v27  ;;  %v12339_v38 = vpop.f32.mrf.mxu1  ;;  %15801 = vmatprep.subr.mxu1 %v696_v30  ;;  %v708_v27 = vld [vmem:[%s33746_s29 + $0x8f8] sm:$0xff]  ;;  %v714_v0 = vld [vmem:[%s33746_s29 + $0x928] sm:$0xff] }
 0x264   : > { %v12338_v37 = vadd.f32 %v12337_v34, %v12268_v33  ;;  %15765 = vmatprep.mubr.f32.mxu0 %v3320_v28  ;;  %15835 = vmatprep.mubr.f32.mxu1 %v3321_v31  ;;  %v3370_v20 = vrot.slane %v3356_v9, %v33752_v5  ;;  %v3371_v25 = vcombine.high %v3363_v18, %v3363_v18  ;;  %v705_v33 = vld [vmem:[%s33746_s29 + $0x8e0] sm:$0xff] }
 0x266   : > { %15732 = vmatpush1.xpose.msra.mxu0 %v693_v36  ;;  %15802 = vmatpush1.xpose.msra.mxu1 %v695_v39  ;;  %v3372_v28 = vcombine.high %v3370_v20, %v3370_v20  ;;  %v707_v36 = vld [vmem:[%s33746_s29 + $0x8f0] sm:$0xff]  ;;  %v1480_v39 = vld [vmem:[%s33746_s29 + $0x2118] sm:$0x3] }
 0x267   : > { %15869 = vmatprep.subr.mxu0 %v1466_v40  ;;  %15939 = vmatprep.subr.mxu1 %v1468_v42  ;;  %v1477_v42 = vld [vmem:[%s33746_s29 + $0x2100] sm:$0x3] }
 0x269   : > { %v12407_v49 = vpop.f32.mrf.mxu0  ;;  %15766 = vmatmul.mubr.f32.vlgmr.msra.gmra.mxu0 %v3312_v21  ;;  %v12477_v54 = vpop.f32.mrf.mxu1  ;;  %15836 = vmatmul.mubr.f32.vlgmr.msra.gmra.mxu1 %v3319_v23  ;;  %v301_v21 = vld [vmem:[%s33738_s27 + $0x240] sm:$0xff]  ;;  %v1475_v23 = vld [vmem:[%s33746_s29 + $0x20f0] sm:$0x3] }
 0x26a   : > { %v12408_v53 = vadd.f32 %v12407_v49, %v12338_v37  ;;  %15870 = vmatpush1.xpose.msra.mxu0 %v1465_v45  ;;  %15940 = vmatpush1.xpose.msra.mxu1 %v1467_v46  ;;  %v3373_v29 = vcombine.high %v301_v21, %v301_v21  ;;  %v1478_v37 = vld [vmem:[%s33746_s29 + $0x2108] sm:$0x3]  ;;  %v3380_v38 = vrot.slane %v301_v21, %v33752_v5 }
 0x26b   : > { %v12409_v55 = vpop.f32.mrf.mxu0  ;;  %15871 = vmatprep.subr.mxu0 %v698_v47  ;;  %v12479_v58 = vpop.f32.mrf.mxu1  ;;  %15941 = vmatprep.subr.mxu1 %v700_v50  ;;  %v712_v47 = vld [vmem:[%s33746_s29 + $0x918] sm:$0xff]  ;;  %v718_v21 = vld [vmem:[%s33746_s29 + $0x948] sm:$0xff] }
 0x26c   : > { %v12478_v57 = vadd.f32 %v12477_v54, %v12408_v53  ;;  %15905 = vmatprep.mubr.f32.mxu0 %v3337_v48  ;;  %15975 = vmatprep.mubr.f32.mxu1 %v3338_v51  ;;  %v3387_v40 = vrot.slane %v3373_v29, %v33752_v5  ;;  %v3388_v45 = vcombine.high %v3380_v38, %v3380_v38  ;;  %v709_v53 = vld [vmem:[%s33746_s29 + $0x900] sm:$0xff] }
 0x26e   : > { %15872 = vmatpush1.xpose.msra.mxu0 %v697_v56  ;;  %15942 = vmatpush1.xpose.msra.mxu1 %v699_v59  ;;  %v3389_v48 = vcombine.high %v3387_v40, %v3387_v40  ;;  %v711_v56 = vld [vmem:[%s33746_s29 + $0x910] sm:$0xff]  ;;  %v1484_v59 = vld [vmem:[%s33746_s29 + $0x2138] sm:$0x3] }
 0x26f   : > { %16009 = vmatprep.subr.mxu0 %v1470_v60  ;;  %16079 = vmatprep.subr.mxu1 %v1472_v62  ;;  %v1481_v62 = vld [vmem:[%s33746_s29 + $0x2120] sm:$0x3] }
 0x271   : > { %v12547_v6 = vpop.f32.mrf.mxu0  ;;  %15906 = vmatmul.mubr.f32.vlgmr.msra.gmra.mxu0 %v3329_v41  ;;  %v12617_v11 = vpop.f32.mrf.mxu1  ;;  %15976 = vmatmul.mubr.f32.vlgmr.msra.gmra.mxu1 %v3336_v43  ;;  %v302_v41 = vld [vmem:[%s33738_s27 + $0x248] sm:$0xff]  ;;  %v1479_v43 = vld [vmem:[%s33746_s29 + $0x2110] sm:$0x3] }
 0x272   : > { %v12548_v10 = vadd.f32 %v12547_v6, %v12478_v57  ;;  %16010 = vmatpush1.xpose.msra.mxu0 %v1469_v1  ;;  %16080 = vmatpush1.xpose.msra.mxu1 %v1471_v2  ;;  %v3390_v49 = vcombine.high %v302_v41, %v302_v41  ;;  %v1482_v57 = vld [vmem:[%s33746_s29 + $0x2128] sm:$0x3]  ;;  %v3397_v58 = vrot.slane %v302_v41, %v33752_v5 }
 0x273   : > { %v12549_v12 = vpop.f32.mrf.mxu0  ;;  %16011 = vmatprep.subr.mxu0 %v702_v3  ;;  %v12619_v15 = vpop.f32.mrf.mxu1  ;;  %16081 = vmatprep.subr.mxu1 %v704_v7  ;;  %v716_v3 = vld [vmem:[%s33746_s29 + $0x938] sm:$0xff]  ;;  %v722_v41 = vld [vmem:[%s33746_s29 + $0x968] sm:$0xff] }
 0x274   : > { %v12618_v14 = vadd.f32 %v12617_v11, %v12548_v10  ;;  %16045 = vmatprep.mubr.f32.mxu0 %v3354_v4  ;;  %16115 = vmatprep.mubr.f32.mxu1 %v3355_v8  ;;  %v3404_v60 = vrot.slane %v3390_v49, %v33752_v5  ;;  %v3405_v1 = vcombine.high %v3397_v58, %v3397_v58  ;;  %v713_v10 = vld [vmem:[%s33746_s29 + $0x920] sm:$0xff] }
 0x276   : > { %16012 = vmatpush1.xpose.msra.mxu0 %v701_v13  ;;  %16082 = vmatpush1.xpose.msra.mxu1 %v703_v16  ;;  %v3406_v4 = vcombine.high %v3404_v60, %v3404_v60  ;;  %v715_v13 = vld [vmem:[%s33746_s29 + $0x930] sm:$0xff]  ;;  %v1488_v16 = vld [vmem:[%s33746_s29 + $0x2158] sm:$0x3] }
 0x277   : > { %16149 = vmatprep.subr.mxu0 %v1474_v17  ;;  %16219 = vmatprep.subr.mxu1 %v1476_v19  ;;  %v1485_v19 = vld [vmem:[%s33746_s29 + $0x2140] sm:$0x3] }
 0x279   : > { %v12687_v26 = vpop.f32.mrf.mxu0  ;;  %16046 = vmatmul.mubr.f32.vlgmr.msra.gmra.mxu0 %v3346_v61  ;;  %v12757_v31 = vpop.f32.mrf.mxu1  ;;  %16116 = vmatmul.mubr.f32.vlgmr.msra.gmra.mxu1 %v3353_v63  ;;  %v303_v61 = vld [vmem:[%s33738_s27 + $0x250] sm:$0xff] }
 0x27a   : > { %v12688_v30 = vadd.f32 %v12687_v26, %v12618_v14  ;;  %16150 = vmatpush1.xpose.msra.mxu0 %v1473_v22  ;;  %16220 = vmatpush1.xpose.msra.mxu1 %v1475_v23  ;;  %v1483_v63 = vld [vmem:[%s33746_s29 + $0x2130] sm:$0x3]  ;;  %v3407_v6 = vcombine.high %v303_v61, %v303_v61  ;;  %v1486_v14 = vld [vmem:[%s33746_s29 + $0x2148] sm:$0x3]  ;;  %v3414_v15 = vrot.slane %v303_v61, %v33752_v5 }
 0x27b   : > { %v12689_v32 = vpop.f32.mrf.mxu0  ;;  %16151 = vmatprep.subr.mxu0 %v706_v24  ;;  %v12759_v35 = vpop.f32.mrf.mxu1  ;;  %16221 = vmatprep.subr.mxu1 %v708_v27  ;;  %v720_v24 = vld [vmem:[%s33746_s29 + $0x958] sm:$0xff]  ;;  %v726_v61 = vld [vmem:[%s33746_s29 + $0x988] sm:$0xff] }
 0x27c   : > { %v12758_v34 = vadd.f32 %v12757_v31, %v12688_v30  ;;  %16185 = vmatprep.mubr.f32.mxu0 %v3371_v25  ;;  %16255 = vmatprep.mubr.f32.mxu1 %v3372_v28  ;;  %v3421_v17 = vrot.slane %v3407_v6, %v33752_v5  ;;  %v3422_v22 = vcombine.high %v3414_v15, %v3414_v15  ;;  %v717_v30 = vld [vmem:[%s33746_s29 + $0x940] sm:$0xff] }
 0x27e   : > { %16152 = vmatpush1.xpose.msra.mxu0 %v705_v33  ;;  %16222 = vmatpush1.xpose.msra.mxu1 %v707_v36  ;;  %v3423_v25 = vcombine.high %v3421_v17, %v3421_v17  ;;  %v719_v33 = vld [vmem:[%s33746_s29 + $0x950] sm:$0xff]  ;;  %v1492_v36 = vld [vmem:[%s33746_s29 + $0x2178] sm:$0x3] }
 0x27f   : > { %16289 = vmatprep.subr.mxu0 %v1478_v37  ;;  %16359 = vmatprep.subr.mxu1 %v1480_v39  ;;  %v1489_v39 = vld [vmem:[%s33746_s29 + $0x2160] sm:$0x3] }
 0x281   : > { %v12827_v46 = vpop.f32.mrf.mxu0  ;;  %16186 = vmatmul.mubr.f32.vlgmr.msra.gmra.mxu0 %v3363_v18  ;;  %v12897_v51 = vpop.f32.mrf.mxu1  ;;  %16256 = vmatmul.mubr.f32.vlgmr.msra.gmra.mxu1 %v3370_v20  ;;  %v304_v18 = vld [vmem:[%s33738_s27 + $0x258] sm:$0xff]  ;;  %v1487_v20 = vld [vmem:[%s33746_s29 + $0x2150] sm:$0x3] }
 0x282   : > { %v12828_v50 = vadd.f32 %v12827_v46, %v12758_v34  ;;  %16290 = vmatpush1.xpose.msra.mxu0 %v1477_v42  ;;  %16360 = vmatpush1.xpose.msra.mxu1 %v1479_v43  ;;  %v3424_v26 = vcombine.high %v304_v18, %v304_v18  ;;  %v1490_v34 = vld [vmem:[%s33746_s29 + $0x2168] sm:$0x3]  ;;  %v3431_v35 = vrot.slane %v304_v18, %v33752_v5 }
 0x283   : > { %v12829_v52 = vpop.f32.mrf.mxu0  ;;  %16291 = vmatprep.subr.mxu0 %v710_v44  ;;  %v12899_v55 = vpop.f32.mrf.mxu1  ;;  %16361 = vmatprep.subr.mxu1 %v712_v47  ;;  %v724_v44 = vld [vmem:[%s33746_s29 + $0x978] sm:$0xff]  ;;  %v730_v18 = vld [vmem:[%s33746_s29 + $0x9a8] sm:$0xff] }
 0x284   : > { %v12898_v54 = vadd.f32 %v12897_v51, %v12828_v50  ;;  %16325 = vmatprep.mubr.f32.mxu0 %v3388_v45  ;;  %16395 = vmatprep.mubr.f32.mxu1 %v3389_v48  ;;  %v3438_v37 = vrot.slane %v3424_v26, %v33752_v5  ;;  %v3439_v42 = vcombine.high %v3431_v35, %v3431_v35  ;;  %v721_v50 = vld [vmem:[%s33746_s29 + $0x960] sm:$0xff] }
 0x286   : > { %16292 = vmatpush1.xpose.msra.mxu0 %v709_v53  ;;  %16362 = vmatpush1.xpose.msra.mxu1 %v711_v56  ;;  %v3440_v45 = vcombine.high %v3438_v37, %v3438_v37  ;;  %v723_v53 = vld [vmem:[%s33746_s29 + $0x970] sm:$0xff]  ;;  %v1496_v56 = vld [vmem:[%s33746_s29 + $0x2198] sm:$0x3] }
 0x287   : > { %16429 = vmatprep.subr.mxu0 %v1482_v57  ;;  %16499 = vmatprep.subr.mxu1 %v1484_v59  ;;  %v1493_v59 = vld [vmem:[%s33746_s29 + $0x2180] sm:$0x3] }
 0x289   : > { %v12967_v2 = vpop.f32.mrf.mxu0  ;;  %16326 = vmatmul.mubr.f32.vlgmr.msra.gmra.mxu0 %v3380_v38  ;;  %v13037_v8 = vpop.f32.mrf.mxu1  ;;  %16396 = vmatmul.mubr.f32.vlgmr.msra.gmra.mxu1 %v3387_v40  ;;  %v305_v38 = vld [vmem:[%s33738_s27 + $0x260] sm:$0xff]  ;;  %v1491_v40 = vld [vmem:[%s33746_s29 + $0x2170] sm:$0x3] }
 0x28a   : > { %v12968_v7 = vadd.f32 %v12967_v2, %v12898_v54  ;;  %16430 = vmatpush1.xpose.msra.mxu0 %v1481_v62  ;;  %16500 = vmatpush1.xpose.msra.mxu1 %v1483_v63  ;;  %v3441_v46 = vcombine.high %v305_v38, %v305_v38  ;;  %v1494_v54 = vld [vmem:[%s33746_s29 + $0x2188] sm:$0x3]  ;;  %v3448_v55 = vrot.slane %v305_v38, %v33752_v5 }
 0x28b   : > { %v12969_v9 = vpop.f32.mrf.mxu0  ;;  %16431 = vmatprep.subr.mxu0 %v714_v0  ;;  %v13039_v12 = vpop.f32.mrf.mxu1  ;;  %16501 = vmatprep.subr.mxu1 %v716_v3  ;;  %v728_v0 = vld [vmem:[%s33746_s29 + $0x998] sm:$0xff]  ;;  %v734_v38 = vld [vmem:[%s33746_s29 + $0x9c8] sm:$0xff] }
 0x28c   : > { %v13038_v11 = vadd.f32 %v13037_v8, %v12968_v7  ;;  %16465 = vmatprep.mubr.f32.mxu0 %v3405_v1  ;;  %16535 = vmatprep.mubr.f32.mxu1 %v3406_v4  ;;  %v3455_v57 = vrot.slane %v3441_v46, %v33752_v5  ;;  %v3456_v62 = vcombine.high %v3448_v55, %v3448_v55  ;;  %v725_v7 = vld [vmem:[%s33746_s29 + $0x980] sm:$0xff] }
 0x28e   : > { %16432 = vmatpush1.xpose.msra.mxu0 %v713_v10  ;;  %16502 = vmatpush1.xpose.msra.mxu1 %v715_v13  ;;  %v3457_v1 = vcombine.high %v3455_v57, %v3455_v57  ;;  %v727_v10 = vld [vmem:[%s33746_s29 + $0x990] sm:$0xff]  ;;  %v1500_v13 = vld [vmem:[%s33746_s29 + $0x21b8] sm:$0x3] }
 0x28f   : > { %16569 = vmatprep.subr.mxu0 %v1486_v14  ;;  %16639 = vmatprep.subr.mxu1 %v1488_v16  ;;  %v1497_v16 = vld [vmem:[%s33746_s29 + $0x21a0] sm:$0x3] }
 0x291   : > { %v13107_v23 = vpop.f32.mrf.mxu0  ;;  %16466 = vmatmul.mubr.f32.vlgmr.msra.gmra.mxu0 %v3397_v58  ;;  %v13177_v28 = vpop.f32.mrf.mxu1  ;;  %16536 = vmatmul.mubr.f32.vlgmr.msra.gmra.mxu1 %v3404_v60  ;;  %v306_v58 = vld [vmem:[%s33738_s27 + $0x268] sm:$0xff]  ;;  %v1495_v60 = vld [vmem:[%s33746_s29 + $0x2190] sm:$0x3] }
 0x292   : > { %v13108_v27 = vadd.f32 %v13107_v23, %v13038_v11  ;;  %16570 = vmatpush1.xpose.msra.mxu0 %v1485_v19  ;;  %16640 = vmatpush1.xpose.msra.mxu1 %v1487_v20  ;;  %v3458_v2 = vcombine.high %v306_v58, %v306_v58  ;;  %v1498_v11 = vld [vmem:[%s33746_s29 + $0x21a8] sm:$0x3]  ;;  %v3465_v12 = vrot.slane %v306_v58, %v33752_v5 }
 0x293   : > { %v13109_v29 = vpop.f32.mrf.mxu0  ;;  %16571 = vmatprep.subr.mxu0 %v718_v21  ;;  %v13179_v32 = vpop.f32.mrf.mxu1  ;;  %16641 = vmatprep.subr.mxu1 %v720_v24  ;;  %v732_v21 = vld [vmem:[%s33746_s29 + $0x9b8] sm:$0xff]  ;;  %v738_v58 = vld [vmem:[%s33746_s29 + $0x9e8] sm:$0xff] }
 0x294   : > { %v13178_v31 = vadd.f32 %v13177_v28, %v13108_v27  ;;  %16605 = vmatprep.mubr.f32.mxu0 %v3422_v22  ;;  %16675 = vmatprep.mubr.f32.mxu1 %v3423_v25  ;;  %v3472_v14 = vrot.slane %v3458_v2, %v33752_v5  ;;  %v3473_v19 = vcombine.high %v3465_v12, %v3465_v12  ;;  %v729_v27 = vld [vmem:[%s33746_s29 + $0x9a0] sm:$0xff] }
 0x296   : > { %16572 = vmatpush1.xpose.msra.mxu0 %v717_v30  ;;  %16642 = vmatpush1.xpose.msra.mxu1 %v719_v33  ;;  %v3474_v22 = vcombine.high %v3472_v14, %v3472_v14  ;;  %v731_v30 = vld [vmem:[%s33746_s29 + $0x9b0] sm:$0xff]  ;;  %v1504_v33 = vld [vmem:[%s33746_s29 + $0x21d8] sm:$0x3] }
 0x297   : > { %16709 = vmatprep.subr.mxu0 %v1490_v34  ;;  %16779 = vmatprep.subr.mxu1 %v1492_v36  ;;  %v1501_v36 = vld [vmem:[%s33746_s29 + $0x21c0] sm:$0x3] }
 0x299   : > { %v13247_v43 = vpop.f32.mrf.mxu0  ;;  %16606 = vmatmul.mubr.f32.vlgmr.msra.gmra.mxu0 %v3414_v15  ;;  %v13317_v48 = vpop.f32.mrf.mxu1  ;;  %16676 = vmatmul.mubr.f32.vlgmr.msra.gmra.mxu1 %v3421_v17  ;;  %v307_v15 = vld [vmem:[%s33738_s27 + $0x270] sm:$0xff] }
 0x29a   : > { %v13248_v47 = vadd.f32 %v13247_v43, %v13178_v31  ;;  %16710 = vmatpush1.xpose.msra.mxu0 %v1489_v39  ;;  %16780 = vmatpush1.xpose.msra.mxu1 %v1491_v40  ;;  %v1499_v17 = vld [vmem:[%s33746_s29 + $0x21b0] sm:$0x3]  ;;  %v3475_v23 = vcombine.high %v307_v15, %v307_v15  ;;  %v1502_v31 = vld [vmem:[%s33746_s29 + $0x21c8] sm:$0x3]  ;;  %v3482_v32 = vrot.slane %v307_v15, %v33752_v5 }
 0x29b   : > { %v13249_v49 = vpop.f32.mrf.mxu0  ;;  %16711 = vmatprep.subr.mxu0 %v722_v41  ;;  %v13319_v52 = vpop.f32.mrf.mxu1  ;;  %16781 = vmatprep.subr.mxu1 %v724_v44  ;;  %v736_v41 = vld [vmem:[%s33746_s29 + $0x9d8] sm:$0xff]  ;;  %v742_v15 = vld [vmem:[%s33746_s29 + $0xa08] sm:$0xff] }
 0x29c   : > { %v13318_v51 = vadd.f32 %v13317_v48, %v13248_v47  ;;  %16745 = vmatprep.mubr.f32.mxu0 %v3439_v42  ;;  %16815 = vmatprep.mubr.f32.mxu1 %v3440_v45  ;;  %v3489_v34 = vrot.slane %v3475_v23, %v33752_v5  ;;  %v3490_v39 = vcombine.high %v3482_v32, %v3482_v32  ;;  %v733_v47 = vld [vmem:[%s33746_s29 + $0x9c0] sm:$0xff] }
 0x29e   : > { %16712 = vmatpush1.xpose.msra.mxu0 %v721_v50  ;;  %16782 = vmatpush1.xpose.msra.mxu1 %v723_v53  ;;  %v3491_v42 = vcombine.high %v3489_v34, %v3489_v34  ;;  %v735_v50 = vld [vmem:[%s33746_s29 + $0x9d0] sm:$0xff]  ;;  %v1508_v53 = vld [vmem:[%s33746_s29 + $0x21f8] sm:$0x3] }
 0x29f   : > { %16849 = vmatprep.subr.mxu0 %v1494_v54  ;;  %16919 = vmatprep.subr.mxu1 %v1496_v56  ;;  %v1505_v56 = vld [vmem:[%s33746_s29 + $0x21e0] sm:$0x3] }
 0x2a1   : > { %v13387_v63 = vpop.f32.mrf.mxu0  ;;  %16746 = vmatmul.mubr.f32.vlgmr.msra.gmra.mxu0 %v3431_v35  ;;  %v13457_v4 = vpop.f32.mrf.mxu1  ;;  %16816 = vmatmul.mubr.f32.vlgmr.msra.gmra.mxu1 %v3438_v37  ;;  %v308_v35 = vld [vmem:[%s33738_s27 + $0x278] sm:$0xff]  ;;  %v1503_v37 = vld [vmem:[%s33746_s29 + $0x21d0] sm:$0x3] }
 0x2a2   : > { %v13388_v3 = vadd.f32 %v13387_v63, %v13318_v51  ;;  %16850 = vmatpush1.xpose.msra.mxu0 %v1493_v59  ;;  %16920 = vmatpush1.xpose.msra.mxu1 %v1495_v60  ;;  %v3492_v43 = vcombine.high %v308_v35, %v308_v35  ;;  %v1506_v51 = vld [vmem:[%s33746_s29 + $0x21e8] sm:$0x3]  ;;  %v3499_v52 = vrot.slane %v308_v35, %v33752_v5 }
 0x2a3   : > { %v13389_v6 = vpop.f32.mrf.mxu0  ;;  %16851 = vmatprep.subr.mxu0 %v726_v61  ;;  %v13459_v9 = vpop.f32.mrf.mxu1  ;;  %16921 = vmatprep.subr.mxu1 %v728_v0  ;;  %v740_v61 = vld [vmem:[%s33746_s29 + $0x9f8] sm:$0xff]  ;;  %v746_v35 = vld [vmem:[%s33746_s29 + $0xa28] sm:$0xff] }
 0x2a4   : > { %v13458_v8 = vadd.f32 %v13457_v4, %v13388_v3  ;;  %16885 = vmatprep.mubr.f32.mxu0 %v3456_v62  ;;  %16955 = vmatprep.mubr.f32.mxu1 %v3457_v1  ;;  %v3506_v54 = vrot.slane %v3492_v43, %v33752_v5  ;;  %v3507_v59 = vcombine.high %v3499_v52, %v3499_v52  ;;  %v737_v3 = vld [vmem:[%s33746_s29 + $0x9e0] sm:$0xff] }
 0x2a6   : > { %16852 = vmatpush1.xpose.msra.mxu0 %v725_v7  ;;  %16922 = vmatpush1.xpose.msra.mxu1 %v727_v10  ;;  %v3508_v62 = vcombine.high %v3506_v54, %v3506_v54  ;;  %v739_v7 = vld [vmem:[%s33746_s29 + $0x9f0] sm:$0xff]  ;;  %v1512_v10 = vld [vmem:[%s33746_s29 + $0x2218] sm:$0x3] }
 0x2a7   : > { %16989 = vmatprep.subr.mxu0 %v1498_v11  ;;  %17059 = vmatprep.subr.mxu1 %v1500_v13  ;;  %v1509_v13 = vld [vmem:[%s33746_s29 + $0x2200] sm:$0x3] }
 0x2a9   : > { %v13527_v20 = vpop.f32.mrf.mxu0  ;;  %16886 = vmatmul.mubr.f32.vlgmr.msra.gmra.mxu0 %v3448_v55  ;;  %v13597_v25 = vpop.f32.mrf.mxu1  ;;  %16956 = vmatmul.mubr.f32.vlgmr.msra.gmra.mxu1 %v3455_v57  ;;  %v309_v55 = vld [vmem:[%s33738_s27 + $0x280] sm:$0xff]  ;;  %v1507_v57 = vld [vmem:[%s33746_s29 + $0x21f0] sm:$0x3] }
 0x2aa   : > { %v13528_v24 = vadd.f32 %v13527_v20, %v13458_v8  ;;  %16990 = vmatpush1.xpose.msra.mxu0 %v1497_v16  ;;  %17060 = vmatpush1.xpose.msra.mxu1 %v1499_v17  ;;  %v3509_v63 = vcombine.high %v309_v55, %v309_v55  ;;  %v1510_v8 = vld [vmem:[%s33746_s29 + $0x2208] sm:$0x3]  ;;  %v3516_v9 = vrot.slane %v309_v55, %v33752_v5 }
 0x2ab   : > { %v13529_v26 = vpop.f32.mrf.mxu0  ;;  %16991 = vmatprep.subr.mxu0 %v730_v18  ;;  %v13599_v29 = vpop.f32.mrf.mxu1  ;;  %17061 = vmatprep.subr.mxu1 %v732_v21  ;;  %v744_v18 = vld [vmem:[%s33746_s29 + $0xa18] sm:$0xff]  ;;  %v750_v55 = vld [vmem:[%s33746_s29 + $0xa48] sm:$0xff] }
 0x2ac   : > { %v13598_v28 = vadd.f32 %v13597_v25, %v13528_v24  ;;  %17025 = vmatprep.mubr.f32.mxu0 %v3473_v19  ;;  %17095 = vmatprep.mubr.f32.mxu1 %v3474_v22  ;;  %v3523_v11 = vrot.slane %v3509_v63, %v33752_v5  ;;  %v3524_v16 = vcombine.high %v3516_v9, %v3516_v9  ;;  %v741_v24 = vld [vmem:[%s33746_s29 + $0xa00] sm:$0xff] }
 0x2ae   : > { %16992 = vmatpush1.xpose.msra.mxu0 %v729_v27  ;;  %17062 = vmatpush1.xpose.msra.mxu1 %v731_v30  ;;  %v3525_v19 = vcombine.high %v3523_v11, %v3523_v11  ;;  %v743_v27 = vld [vmem:[%s33746_s29 + $0xa10] sm:$0xff]  ;;  %v1516_v30 = vld [vmem:[%s33746_s29 + $0x2238] sm:$0x3] }
 0x2af   : > { %17129 = vmatprep.subr.mxu0 %v1502_v31  ;;  %17199 = vmatprep.subr.mxu1 %v1504_v33  ;;  %v1513_v33 = vld [vmem:[%s33746_s29 + $0x2220] sm:$0x3] }
 0x2b1   : > { %v13667_v40 = vpop.f32.mrf.mxu0  ;;  %17026 = vmatmul.mubr.f32.vlgmr.msra.gmra.mxu0 %v3465_v12  ;;  %v13737_v45 = vpop.f32.mrf.mxu1  ;;  %17096 = vmatmul.mubr.f32.vlgmr.msra.gmra.mxu1 %v3472_v14  ;;  %v310_v12 = vld [vmem:[%s33738_s27 + $0x288] sm:$0xff]  ;;  %v1511_v14 = vld [vmem:[%s33746_s29 + $0x2210] sm:$0x3] }
 0x2b2   : > { %v13668_v44 = vadd.f32 %v13667_v40, %v13598_v28  ;;  %17130 = vmatpush1.xpose.msra.mxu0 %v1501_v36  ;;  %17200 = vmatpush1.xpose.msra.mxu1 %v1503_v37  ;;  %v3526_v20 = vcombine.high %v310_v12, %v310_v12  ;;  %v1514_v28 = vld [vmem:[%s33746_s29 + $0x2228] sm:$0x3]  ;;  %v3533_v29 = vrot.slane %v310_v12, %v33752_v5 }
 0x2b3   : > { %v13669_v46 = vpop.f32.mrf.mxu0  ;;  %17131 = vmatprep.subr.mxu0 %v734_v38  ;;  %v13739_v49 = vpop.f32.mrf.mxu1  ;;  %17201 = vmatprep.subr.mxu1 %v736_v41  ;;  %v748_v38 = vld [vmem:[%s33746_s29 + $0xa38] sm:$0xff]  ;;  %v754_v12 = vld [vmem:[%s33746_s29 + $0xa68] sm:$0xff] }
 0x2b4   : > { %v13738_v48 = vadd.f32 %v13737_v45, %v13668_v44  ;;  %17165 = vmatprep.mubr.f32.mxu0 %v3490_v39  ;;  %17235 = vmatprep.mubr.f32.mxu1 %v3491_v42  ;;  %v3540_v31 = vrot.slane %v3526_v20, %v33752_v5  ;;  %v3541_v36 = vcombine.high %v3533_v29, %v3533_v29  ;;  %v745_v44 = vld [vmem:[%s33746_s29 + $0xa20] sm:$0xff] }
 0x2b6   : > { %17132 = vmatpush1.xpose.msra.mxu0 %v733_v47  ;;  %17202 = vmatpush1.xpose.msra.mxu1 %v735_v50  ;;  %v3542_v39 = vcombine.high %v3540_v31, %v3540_v31  ;;  %v747_v47 = vld [vmem:[%s33746_s29 + $0xa30] sm:$0xff]  ;;  %v1520_v50 = vld [vmem:[%s33746_s29 + $0x2258] sm:$0x3] }
 0x2b7   : > { %17269 = vmatprep.subr.mxu0 %v1506_v51  ;;  %17339 = vmatprep.subr.mxu1 %v1508_v53  ;;  %v1517_v53 = vld [vmem:[%s33746_s29 + $0x2240] sm:$0x3] }
 0x2b9   : > { %v13807_v60 = vpop.f32.mrf.mxu0  ;;  %17166 = vmatmul.mubr.f32.vlgmr.msra.gmra.mxu0 %v3482_v32  ;;  %v13877_v1 = vpop.f32.mrf.mxu1  ;;  %17236 = vmatmul.mubr.f32.vlgmr.msra.gmra.mxu1 %v3489_v34  ;;  %v311_v32 = vld [vmem:[%s33738_s27 + $0x290] sm:$0xff] }
 0x2ba   : > { %v13808_v0 = vadd.f32 %v13807_v60, %v13738_v48  ;;  %17270 = vmatpush1.xpose.msra.mxu0 %v1505_v56  ;;  %17340 = vmatpush1.xpose.msra.mxu1 %v1507_v57  ;;  %v1515_v34 = vld [vmem:[%s33746_s29 + $0x2230] sm:$0x3]  ;;  %v3543_v40 = vcombine.high %v311_v32, %v311_v32  ;;  %v1518_v48 = vld [vmem:[%s33746_s29 + $0x2248] sm:$0x3]  ;;  %v3550_v49 = vrot.slane %v311_v32, %v33752_v5 }
 0x2bb   : > { %v13809_v2 = vpop.f32.mrf.mxu0  ;;  %17271 = vmatprep.subr.mxu0 %v738_v58  ;;  %v13879_v6 = vpop.f32.mrf.mxu1  ;;  %17341 = vmatprep.subr.mxu1 %v740_v61  ;;  %v752_v58 = vld [vmem:[%s33746_s29 + $0xa58] sm:$0xff]  ;;  %v758_v32 = vld [vmem:[%s33746_s29 + $0xa88] sm:$0xff] }
 0x2bc   : > { %v13878_v4 = vadd.f32 %v13877_v1, %v13808_v0  ;;  %17305 = vmatprep.mubr.f32.mxu0 %v3507_v59  ;;  %17375 = vmatprep.mubr.f32.mxu1 %v3508_v62  ;;  %v3557_v51 = vrot.slane %v3543_v40, %v33752_v5  ;;  %v3558_v56 = vcombine.high %v3550_v49, %v3550_v49  ;;  %v749_v0 = vld [vmem:[%s33746_s29 + $0xa40] sm:$0xff] }
 0x2be   : > { %17272 = vmatpush1.xpose.msra.mxu0 %v737_v3  ;;  %17342 = vmatpush1.xpose.msra.mxu1 %v739_v7  ;;  %v3559_v59 = vcombine.high %v3557_v51, %v3557_v51  ;;  %v751_v3 = vld [vmem:[%s33746_s29 + $0xa50] sm:$0xff]  ;;  %v1524_v7 = vld [vmem:[%s33746_s29 + $0x2278] sm:$0x3] }
 0x2bf   : > { %17409 = vmatprep.subr.mxu0 %v1510_v8  ;;  %17479 = vmatprep.subr.mxu1 %v1512_v10  ;;  %v1521_v10 = vld [vmem:[%s33746_s29 + $0x2260] sm:$0x3] }
 0x2c1   : > { %v13947_v17 = vpop.f32.mrf.mxu0  ;;  %17306 = vmatmul.mubr.f32.vlgmr.msra.gmra.mxu0 %v3499_v52  ;;  %v14017_v22 = vpop.f32.mrf.mxu1  ;;  %17376 = vmatmul.mubr.f32.vlgmr.msra.gmra.mxu1 %v3506_v54  ;;  %v312_v52 = vld [vmem:[%s33738_s27 + $0x298] sm:$0xff]  ;;  %v1519_v54 = vld [vmem:[%s33746_s29 + $0x2250] sm:$0x3] }
 0x2c2   : > { %v13948_v21 = vadd.f32 %v13947_v17, %v13878_v4  ;;  %17410 = vmatpush1.xpose.msra.mxu0 %v1509_v13  ;;  %17480 = vmatpush1.xpose.msra.mxu1 %v1511_v14  ;;  %v3560_v60 = vcombine.high %v312_v52, %v312_v52  ;;  %v1522_v4 = vld [vmem:[%s33746_s29 + $0x2268] sm:$0x3]  ;;  %v3567_v6 = vrot.slane %v312_v52, %v33752_v5 }
 0x2c3   : > { %v13949_v23 = vpop.f32.mrf.mxu0  ;;  %17411 = vmatprep.subr.mxu0 %v742_v15  ;;  %v14019_v26 = vpop.f32.mrf.mxu1  ;;  %17481 = vmatprep.subr.mxu1 %v744_v18  ;;  %v756_v15 = vld [vmem:[%s33746_s29 + $0xa78] sm:$0xff]  ;;  %v762_v52 = vld [vmem:[%s33746_s29 + $0xaa8] sm:$0xff] }
 0x2c4   : > { %v14018_v25 = vadd.f32 %v14017_v22, %v13948_v21  ;;  %17445 = vmatprep.mubr.f32.mxu0 %v3524_v16  ;;  %17515 = vmatprep.mubr.f32.mxu1 %v3525_v19  ;;  %v3574_v8 = vrot.slane %v3560_v60, %v33752_v5  ;;  %v3575_v13 = vcombine.high %v3567_v6, %v3567_v6  ;;  %v753_v21 = vld [vmem:[%s33746_s29 + $0xa60] sm:$0xff] }
 0x2c6   : > { %17412 = vmatpush1.xpose.msra.mxu0 %v741_v24  ;;  %17482 = vmatpush1.xpose.msra.mxu1 %v743_v27  ;;  %v3576_v16 = vcombine.high %v3574_v8, %v3574_v8  ;;  %v755_v24 = vld [vmem:[%s33746_s29 + $0xa70] sm:$0xff]  ;;  %v1528_v27 = vld [vmem:[%s33746_s29 + $0x2298] sm:$0x3] }
 0x2c7   : > { %17549 = vmatprep.subr.mxu0 %v1514_v28  ;;  %17619 = vmatprep.subr.mxu1 %v1516_v30  ;;  %v1525_v30 = vld [vmem:[%s33746_s29 + $0x2280] sm:$0x3] }
 0x2c9   : > { %v14087_v37 = vpop.f32.mrf.mxu0  ;;  %17446 = vmatmul.mubr.f32.vlgmr.msra.gmra.mxu0 %v3516_v9  ;;  %v14157_v42 = vpop.f32.mrf.mxu1  ;;  %17516 = vmatmul.mubr.f32.vlgmr.msra.gmra.mxu1 %v3523_v11  ;;  %v313_v9 = vld [vmem:[%s33738_s27 + $0x2a0] sm:$0xff]  ;;  %v1523_v11 = vld [vmem:[%s33746_s29 + $0x2270] sm:$0x3] }
 0x2ca   : > { %v14088_v41 = vadd.f32 %v14087_v37, %v14018_v25  ;;  %17550 = vmatpush1.xpose.msra.mxu0 %v1513_v33  ;;  %17620 = vmatpush1.xpose.msra.mxu1 %v1515_v34  ;;  %v3577_v17 = vcombine.high %v313_v9, %v313_v9  ;;  %v1526_v25 = vld [vmem:[%s33746_s29 + $0x2288] sm:$0x3]  ;;  %v3584_v26 = vrot.slane %v313_v9, %v33752_v5 }
 0x2cb   : > { %v14089_v43 = vpop.f32.mrf.mxu0  ;;  %17551 = vmatprep.subr.mxu0 %v746_v35  ;;  %v14159_v46 = vpop.f32.mrf.mxu1  ;;  %17621 = vmatprep.subr.mxu1 %v748_v38  ;;  %v760_v35 = vld [vmem:[%s33746_s29 + $0xa98] sm:$0xff]  ;;  %v766_v9 = vld [vmem:[%s33746_s29 + $0xac8] sm:$0xff] }
 0x2cc   : > { %v14158_v45 = vadd.f32 %v14157_v42, %v14088_v41  ;;  %17585 = vmatprep.mubr.f32.mxu0 %v3541_v36  ;;  %17655 = vmatprep.mubr.f32.mxu1 %v3542_v39  ;;  %v3591_v28 = vrot.slane %v3577_v17, %v33752_v5  ;;  %v3592_v33 = vcombine.high %v3584_v26, %v3584_v26  ;;  %v757_v41 = vld [vmem:[%s33746_s29 + $0xa80] sm:$0xff] }
 0x2ce   : > { %17552 = vmatpush1.xpose.msra.mxu0 %v745_v44  ;;  %17622 = vmatpush1.xpose.msra.mxu1 %v747_v47  ;;  %v3593_v36 = vcombine.high %v3591_v28, %v3591_v28  ;;  %v759_v44 = vld [vmem:[%s33746_s29 + $0xa90] sm:$0xff]  ;;  %v1532_v47 = vld [vmem:[%s33746_s29 + $0x22b8] sm:$0x3] }
 0x2cf   : > { %17689 = vmatprep.subr.mxu0 %v1518_v48  ;;  %17759 = vmatprep.subr.mxu1 %v1520_v50  ;;  %v1529_v50 = vld [vmem:[%s33746_s29 + $0x22a0] sm:$0x3] }
 0x2d1   : > { %v14227_v57 = vpop.f32.mrf.mxu0  ;;  %17586 = vmatmul.mubr.f32.vlgmr.msra.gmra.mxu0 %v3533_v29  ;;  %v14297_v62 = vpop.f32.mrf.mxu1  ;;  %17656 = vmatmul.mubr.f32.vlgmr.msra.gmra.mxu1 %v3540_v31  ;;  %v314_v29 = vld [vmem:[%s33738_s27 + $0x2a8] sm:$0xff]  ;;  %v1527_v31 = vld [vmem:[%s33746_s29 + $0x2290] sm:$0x3] }
 0x2d2   : > { %v14228_v61 = vadd.f32 %v14227_v57, %v14158_v45  ;;  %17690 = vmatpush1.xpose.msra.mxu0 %v1517_v53  ;;  %17760 = vmatpush1.xpose.msra.mxu1 %v1519_v54  ;;  %v3594_v37 = vcombine.high %v314_v29, %v314_v29  ;;  %v1530_v45 = vld [vmem:[%s33746_s29 + $0x22a8] sm:$0x3]  ;;  %v3601_v46 = vrot.slane %v314_v29, %v33752_v5 }
 0x2d3   : > { %v14229_v63 = vpop.f32.mrf.mxu0  ;;  %17691 = vmatprep.subr.mxu0 %v750_v55  ;;  %v14299_v2 = vpop.f32.mrf.mxu1  ;;  %17761 = vmatprep.subr.mxu1 %v752_v58  ;;  %v764_v55 = vld [vmem:[%s33746_s29 + $0xab8] sm:$0xff]  ;;  %v770_v29 = vld [vmem:[%s33746_s29 + $0xae8] sm:$0xff] }
 0x2d4   : > { %v14298_v1 = vadd.f32 %v14297_v62, %v14228_v61  ;;  %17725 = vmatprep.mubr.f32.mxu0 %v3558_v56  ;;  %17795 = vmatprep.mubr.f32.mxu1 %v3559_v59  ;;  %v3608_v48 = vrot.slane %v3594_v37, %v33752_v5  ;;  %v3609_v53 = vcombine.high %v3601_v46, %v3601_v46  ;;  %v761_v61 = vld [vmem:[%s33746_s29 + $0xaa0] sm:$0xff] }
 0x2d6   : > { %17692 = vmatpush1.xpose.msra.mxu0 %v749_v0  ;;  %17762 = vmatpush1.xpose.msra.mxu1 %v751_v3  ;;  %v3610_v56 = vcombine.high %v3608_v48, %v3608_v48  ;;  %v763_v0 = vld [vmem:[%s33746_s29 + $0xab0] sm:$0xff]  ;;  %v1536_v3 = vld [vmem:[%s33746_s29 + $0x22d8] sm:$0x3] }
 0x2d7   : > { %17829 = vmatprep.subr.mxu0 %v1522_v4  ;;  %17899 = vmatprep.subr.mxu1 %v1524_v7  ;;  %v1533_v7 = vld [vmem:[%s33746_s29 + $0x22c0] sm:$0x3] }
 0x2d9   : > { %v14367_v14 = vpop.f32.mrf.mxu0  ;;  %17726 = vmatmul.mubr.f32.vlgmr.msra.gmra.mxu0 %v3550_v49  ;;  %v14437_v19 = vpop.f32.mrf.mxu1  ;;  %17796 = vmatmul.mubr.f32.vlgmr.msra.gmra.mxu1 %v3557_v51  ;;  %v315_v49 = vld [vmem:[%s33738_s27 + $0x2b0] sm:$0xff] }
 0x2da   : > { %v14368_v18 = vadd.f32 %v14367_v14, %v14298_v1  ;;  %17830 = vmatpush1.xpose.msra.mxu0 %v1521_v10  ;;  %17900 = vmatpush1.xpose.msra.mxu1 %v1523_v11  ;;  %v1531_v51 = vld [vmem:[%s33746_s29 + $0x22b0] sm:$0x3]  ;;  %v3611_v57 = vcombine.high %v315_v49, %v315_v49  ;;  %v1534_v1 = vld [vmem:[%s33746_s29 + $0x22c8] sm:$0x3]  ;;  %v3618_v2 = vrot.slane %v315_v49, %v33752_v5 }
 0x2db   : > { %v14369_v20 = vpop.f32.mrf.mxu0  ;;  %17831 = vmatprep.subr.mxu0 %v754_v12  ;;  %v14439_v23 = vpop.f32.mrf.mxu1  ;;  %17901 = vmatprep.subr.mxu1 %v756_v15  ;;  %v768_v12 = vld [vmem:[%s33746_s29 + $0xad8] sm:$0xff]  ;;  %v774_v49 = vld [vmem:[%s33746_s29 + $0xb08] sm:$0xff] }
 0x2dc   : > { %v14438_v22 = vadd.f32 %v14437_v19, %v14368_v18  ;;  %17865 = vmatprep.mubr.f32.mxu0 %v3575_v13  ;;  %17935 = vmatprep.mubr.f32.mxu1 %v3576_v16  ;;  %v3625_v4 = vrot.slane %v3611_v57, %v33752_v5  ;;  %v3626_v10 = vcombine.high %v3618_v2, %v3618_v2  ;;  %v765_v18 = vld [vmem:[%s33746_s29 + $0xac0] sm:$0xff] }
 0x2de   : > { %17832 = vmatpush1.xpose.msra.mxu0 %v753_v21  ;;  %17902 = vmatpush1.xpose.msra.mxu1 %v755_v24  ;;  %v3627_v13 = vcombine.high %v3625_v4, %v3625_v4  ;;  %v767_v21 = vld [vmem:[%s33746_s29 + $0xad0] sm:$0xff]  ;;  %v1540_v24 = vld [vmem:[%s33746_s29 + $0x22f8] sm:$0x3] }
 0x2df   : > { %17969 = vmatprep.subr.mxu0 %v1526_v25  ;;  %18039 = vmatprep.subr.mxu1 %v1528_v27  ;;  %v1537_v27 = vld [vmem:[%s33746_s29 + $0x22e0] sm:$0x3] }
 0x2e1   : > { %v14507_v34 = vpop.f32.mrf.mxu0  ;;  %17866 = vmatmul.mubr.f32.vlgmr.msra.gmra.mxu0 %v3567_v6  ;;  %v14577_v39 = vpop.f32.mrf.mxu1  ;;  %17936 = vmatmul.mubr.f32.vlgmr.msra.gmra.mxu1 %v3574_v8  ;;  %v316_v6 = vld [vmem:[%s33738_s27 + $0x2b8] sm:$0xff]  ;;  %v1535_v8 = vld [vmem:[%s33746_s29 + $0x22d0] sm:$0x3] }
 0x2e2   : > { %v14508_v38 = vadd.f32 %v14507_v34, %v14438_v22  ;;  %17970 = vmatpush1.xpose.msra.mxu0 %v1525_v30  ;;  %18040 = vmatpush1.xpose.msra.mxu1 %v1527_v31  ;;  %v3628_v14 = vcombine.high %v316_v6, %v316_v6  ;;  %v1538_v22 = vld [vmem:[%s33746_s29 + $0x22e8] sm:$0x3]  ;;  %v3635_v23 = vrot.slane %v316_v6, %v33752_v5 }
 0x2e3   : > { %v14509_v40 = vpop.f32.mrf.mxu0  ;;  %17971 = vmatprep.subr.mxu0 %v758_v32  ;;  %v14579_v43 = vpop.f32.mrf.mxu1  ;;  %18041 = vmatprep.subr.mxu1 %v760_v35  ;;  %v772_v32 = vld [vmem:[%s33746_s29 + $0xaf8] sm:$0xff]  ;;  %v778_v6 = vld [vmem:[%s33746_s29 + $0xb28] sm:$0xff] }
 0x2e4   : > { %v14578_v42 = vadd.f32 %v14577_v39, %v14508_v38  ;;  %18005 = vmatprep.mubr.f32.mxu0 %v3592_v33  ;;  %18075 = vmatprep.mubr.f32.mxu1 %v3593_v36  ;;  %v3642_v25 = vrot.slane %v3628_v14, %v33752_v5  ;;  %v3643_v30 = vcombine.high %v3635_v23, %v3635_v23  ;;  %v769_v38 = vld [vmem:[%s33746_s29 + $0xae0] sm:$0xff] }
 0x2e6   : > { %17972 = vmatpush1.xpose.msra.mxu0 %v757_v41  ;;  %18042 = vmatpush1.xpose.msra.mxu1 %v759_v44  ;;  %v3644_v33 = vcombine.high %v3642_v25, %v3642_v25  ;;  %v771_v41 = vld [vmem:[%s33746_s29 + $0xaf0] sm:$0xff]  ;;  %v1544_v44 = vld [vmem:[%s33746_s29 + $0x2318] sm:$0x3] }
 0x2e7   : > { %18109 = vmatprep.subr.mxu0 %v1530_v45  ;;  %18179 = vmatprep.subr.mxu1 %v1532_v47  ;;  %v1541_v47 = vld [vmem:[%s33746_s29 + $0x2300] sm:$0x3] }
 0x2e9   : > { %v14647_v54 = vpop.f32.mrf.mxu0  ;;  %18006 = vmatmul.mubr.f32.vlgmr.msra.gmra.mxu0 %v3584_v26  ;;  %v14717_v59 = vpop.f32.mrf.mxu1  ;;  %18076 = vmatmul.mubr.f32.vlgmr.msra.gmra.mxu1 %v3591_v28  ;;  %v317_v26 = vld [vmem:[%s33738_s27 + $0x2c0] sm:$0xff]  ;;  %v1539_v28 = vld [vmem:[%s33746_s29 + $0x22f0] sm:$0x3] }
 0x2ea   : > { %v14648_v58 = vadd.f32 %v14647_v54, %v14578_v42  ;;  %18110 = vmatpush1.xpose.msra.mxu0 %v1529_v50  ;;  %18180 = vmatpush1.xpose.msra.mxu1 %v1531_v51  ;;  %v3645_v34 = vcombine.high %v317_v26, %v317_v26  ;;  %v1542_v42 = vld [vmem:[%s33746_s29 + $0x2308] sm:$0x3]  ;;  %v3652_v43 = vrot.slane %v317_v26, %v33752_v5 }
 0x2eb   : > { %v14649_v60 = vpop.f32.mrf.mxu0  ;;  %18111 = vmatprep.subr.mxu0 %v762_v52  ;;  %v14719_v63 = vpop.f32.mrf.mxu1  ;;  %18181 = vmatprep.subr.mxu1 %v764_v55  ;;  %v776_v52 = vld [vmem:[%s33746_s29 + $0xb18] sm:$0xff]  ;;  %v782_v26 = vld [vmem:[%s33746_s29 + $0xb48] sm:$0xff] }
 0x2ec   : > { %v14718_v62 = vadd.f32 %v14717_v59, %v14648_v58  ;;  %18145 = vmatprep.mubr.f32.mxu0 %v3609_v53  ;;  %18215 = vmatprep.mubr.f32.mxu1 %v3610_v56  ;;  %v3659_v45 = vrot.slane %v3645_v34, %v33752_v5  ;;  %v3660_v50 = vcombine.high %v3652_v43, %v3652_v43  ;;  %v773_v58 = vld [vmem:[%s33746_s29 + $0xb00] sm:$0xff] }
 0x2ee   : > { %18112 = vmatpush1.xpose.msra.mxu0 %v761_v61  ;;  %18182 = vmatpush1.xpose.msra.mxu1 %v763_v0  ;;  %v3661_v53 = vcombine.high %v3659_v45, %v3659_v45  ;;  %v775_v61 = vld [vmem:[%s33746_s29 + $0xb10] sm:$0xff]  ;;  %v1548_v0 = vld [vmem:[%s33746_s29 + $0x2338] sm:$0x3] }
 0x2ef   : > { %18249 = vmatprep.subr.mxu0 %v1534_v1  ;;  %18319 = vmatprep.subr.mxu1 %v1536_v3  ;;  %v1545_v3 = vld [vmem:[%s33746_s29 + $0x2320] sm:$0x3] }
 0x2f1   : > { %v14787_v11 = vpop.f32.mrf.mxu0  ;;  %18146 = vmatmul.mubr.f32.vlgmr.msra.gmra.mxu0 %v3601_v46  ;;  %v14857_v16 = vpop.f32.mrf.mxu1  ;;  %18216 = vmatmul.mubr.f32.vlgmr.msra.gmra.mxu1 %v3608_v48  ;;  %v318_v46 = vld [vmem:[%s33738_s27 + $0x2c8] sm:$0xff]  ;;  %v1543_v48 = vld [vmem:[%s33746_s29 + $0x2310] sm:$0x3] }
 0x2f2   : > { %v14788_v15 = vadd.f32 %v14787_v11, %v14718_v62  ;;  %18250 = vmatpush1.xpose.msra.mxu0 %v1533_v7  ;;  %18320 = vmatpush1.xpose.msra.mxu1 %v1535_v8  ;;  %v3662_v54 = vcombine.high %v318_v46, %v318_v46  ;;  %v1546_v62 = vld [vmem:[%s33746_s29 + $0x2328] sm:$0x3]  ;;  %v3669_v63 = vrot.slane %v318_v46, %v33752_v5 }
 0x2f3   : > { %v14789_v17 = vpop.f32.mrf.mxu0  ;;  %18251 = vmatprep.subr.mxu0 %v766_v9  ;;  %v14859_v20 = vpop.f32.mrf.mxu1  ;;  %18321 = vmatprep.subr.mxu1 %v768_v12  ;;  %v780_v9 = vld [vmem:[%s33746_s29 + $0xb38] sm:$0xff]  ;;  %v786_v46 = vld [vmem:[%s33746_s29 + $0xb68] sm:$0xff] }
 0x2f4   : > { %v14858_v19 = vadd.f32 %v14857_v16, %v14788_v15  ;;  %18285 = vmatprep.mubr.f32.mxu0 %v3626_v10  ;;  %18355 = vmatprep.mubr.f32.mxu1 %v3627_v13  ;;  %v3676_v1 = vrot.slane %v3662_v54, %v33752_v5  ;;  %v3677_v7 = vcombine.high %v3669_v63, %v3669_v63  ;;  %v777_v15 = vld [vmem:[%s33746_s29 + $0xb20] sm:$0xff] }
 0x2f6   : > { %18252 = vmatpush1.xpose.msra.mxu0 %v765_v18  ;;  %18322 = vmatpush1.xpose.msra.mxu1 %v767_v21  ;;  %v3678_v10 = vcombine.high %v3676_v1, %v3676_v1  ;;  %v779_v18 = vld [vmem:[%s33746_s29 + $0xb30] sm:$0xff]  ;;  %v1552_v21 = vld [vmem:[%s33746_s29 + $0x2358] sm:$0x3] }
 0x2f7   : > { %18389 = vmatprep.subr.mxu0 %v1538_v22  ;;  %18459 = vmatprep.subr.mxu1 %v1540_v24  ;;  %v1549_v24 = vld [vmem:[%s33746_s29 + $0x2340] sm:$0x3] }
 0x2f9   : > { %v14927_v31 = vpop.f32.mrf.mxu0  ;;  %18286 = vmatmul.mubr.f32.vlgmr.msra.gmra.mxu0 %v3618_v2  ;;  %v14997_v36 = vpop.f32.mrf.mxu1  ;;  %18356 = vmatmul.mubr.f32.vlgmr.msra.gmra.mxu1 %v3625_v4  ;;  %v319_v2 = vld [vmem:[%s33738_s27 + $0x2d0] sm:$0xff] }
 0x2fa   : > { %v14928_v35 = vadd.f32 %v14927_v31, %v14858_v19  ;;  %18390 = vmatpush1.xpose.msra.mxu0 %v1537_v27  ;;  %18460 = vmatpush1.xpose.msra.mxu1 %v1539_v28  ;;  %v1547_v4 = vld [vmem:[%s33746_s29 + $0x2330] sm:$0x3]  ;;  %v3679_v11 = vcombine.high %v319_v2, %v319_v2  ;;  %v1550_v19 = vld [vmem:[%s33746_s29 + $0x2348] sm:$0x3]  ;;  %v3686_v20 = vrot.slane %v319_v2, %v33752_v5 }
 0x2fb   : > { %v14929_v37 = vpop.f32.mrf.mxu0  ;;  %18391 = vmatprep.subr.mxu0 %v770_v29  ;;  %v14999_v40 = vpop.f32.mrf.mxu1  ;;  %18461 = vmatprep.subr.mxu1 %v772_v32  ;;  %v784_v29 = vld [vmem:[%s33746_s29 + $0xb58] sm:$0xff]  ;;  %v790_v2 = vld [vmem:[%s33746_s29 + $0xb88] sm:$0xff] }
 0x2fc   : > { %v14998_v39 = vadd.f32 %v14997_v36, %v14928_v35  ;;  %18425 = vmatprep.mubr.f32.mxu0 %v3643_v30  ;;  %18495 = vmatprep.mubr.f32.mxu1 %v3644_v33  ;;  %v3693_v22 = vrot.slane %v3679_v11, %v33752_v5  ;;  %v3694_v27 = vcombine.high %v3686_v20, %v3686_v20  ;;  %v781_v35 = vld [vmem:[%s33746_s29 + $0xb40] sm:$0xff] }
 0x2fe   : > { %18392 = vmatpush1.xpose.msra.mxu0 %v769_v38  ;;  %18462 = vmatpush1.xpose.msra.mxu1 %v771_v41  ;;  %v3695_v30 = vcombine.high %v3693_v22, %v3693_v22  ;;  %v783_v38 = vld [vmem:[%s33746_s29 + $0xb50] sm:$0xff]  ;;  %v1556_v41 = vld [vmem:[%s33746_s29 + $0x2378] sm:$0x3] }
 0x2ff   : > { %18529 = vmatprep.subr.mxu0 %v1542_v42  ;;  %18599 = vmatprep.subr.mxu1 %v1544_v44  ;;  %v1553_v44 = vld [vmem:[%s33746_s29 + $0x2360] sm:$0x3] }
 0x301   : > { %v15067_v51 = vpop.f32.mrf.mxu0  ;;  %18426 = vmatmul.mubr.f32.vlgmr.msra.gmra.mxu0 %v3635_v23  ;;  %v15137_v56 = vpop.f32.mrf.mxu1  ;;  %18496 = vmatmul.mubr.f32.vlgmr.msra.gmra.mxu1 %v3642_v25  ;;  %v320_v23 = vld [vmem:[%s33738_s27 + $0x2d8] sm:$0xff]  ;;  %v1551_v25 = vld [vmem:[%s33746_s29 + $0x2350] sm:$0x3] }
 0x302   : > { %v15068_v55 = vadd.f32 %v15067_v51, %v14998_v39  ;;  %18530 = vmatpush1.xpose.msra.mxu0 %v1541_v47  ;;  %18600 = vmatpush1.xpose.msra.mxu1 %v1543_v48  ;;  %v3696_v31 = vcombine.high %v320_v23, %v320_v23  ;;  %v1554_v39 = vld [vmem:[%s33746_s29 + $0x2368] sm:$0x3]  ;;  %v3703_v40 = vrot.slane %v320_v23, %v33752_v5 }
 0x303   : > { %v15069_v57 = vpop.f32.mrf.mxu0  ;;  %18531 = vmatprep.subr.mxu0 %v774_v49  ;;  %v15139_v60 = vpop.f32.mrf.mxu1  ;;  %18601 = vmatprep.subr.mxu1 %v776_v52  ;;  %v788_v49 = vld [vmem:[%s33746_s29 + $0xb78] sm:$0xff]  ;;  %v794_v23 = vld [vmem:[%s33746_s29 + $0xba8] sm:$0xff] }
 0x304   : > { %v15138_v59 = vadd.f32 %v15137_v56, %v15068_v55  ;;  %18565 = vmatprep.mubr.f32.mxu0 %v3660_v50  ;;  %18635 = vmatprep.mubr.f32.mxu1 %v3661_v53  ;;  %v3710_v42 = vrot.slane %v3696_v31, %v33752_v5  ;;  %v3711_v47 = vcombine.high %v3703_v40, %v3703_v40  ;;  %v785_v55 = vld [vmem:[%s33746_s29 + $0xb60] sm:$0xff] }
 0x306   : > { %18532 = vmatpush1.xpose.msra.mxu0 %v773_v58  ;;  %18602 = vmatpush1.xpose.msra.mxu1 %v775_v61  ;;  %v3712_v50 = vcombine.high %v3710_v42, %v3710_v42  ;;  %v787_v58 = vld [vmem:[%s33746_s29 + $0xb70] sm:$0xff]  ;;  %v1560_v61 = vld [vmem:[%s33746_s29 + $0x2398] sm:$0x3] }
 0x307   : > { %18669 = vmatprep.subr.mxu0 %v1546_v62  ;;  %18739 = vmatprep.subr.mxu1 %v1548_v0  ;;  %v1557_v0 = vld [vmem:[%s33746_s29 + $0x2380] sm:$0x3] }
 0x309   : > { %v15207_v8 = vpop.f32.mrf.mxu0  ;;  %18566 = vmatmul.mubr.f32.vlgmr.msra.gmra.mxu0 %v3652_v43  ;;  %v15277_v13 = vpop.f32.mrf.mxu1  ;;  %18636 = vmatmul.mubr.f32.vlgmr.msra.gmra.mxu1 %v3659_v45  ;;  %v321_v43 = vld [vmem:[%s33738_s27 + $0x2e0] sm:$0xff]  ;;  %v1555_v45 = vld [vmem:[%s33746_s29 + $0x2370] sm:$0x3] }
 0x30a   : > { %v15208_v12 = vadd.f32 %v15207_v8, %v15138_v59  ;;  %18670 = vmatpush1.xpose.msra.mxu0 %v1545_v3  ;;  %18740 = vmatpush1.xpose.msra.mxu1 %v1547_v4  ;;  %v3713_v51 = vcombine.high %v321_v43, %v321_v43  ;;  %v1558_v59 = vld [vmem:[%s33746_s29 + $0x2388] sm:$0x3]  ;;  %v3720_v60 = vrot.slane %v321_v43, %v33752_v5 }
 0x30b   : > { %v15209_v14 = vpop.f32.mrf.mxu0  ;;  %18671 = vmatprep.subr.mxu0 %v778_v6  ;;  %v15279_v17 = vpop.f32.mrf.mxu1  ;;  %18741 = vmatprep.subr.mxu1 %v780_v9  ;;  %v792_v6 = vld [vmem:[%s33746_s29 + $0xb98] sm:$0xff]  ;;  %v798_v43 = vld [vmem:[%s33746_s29 + $0xbc8] sm:$0xff] }
 0x30c   : > { %v15278_v16 = vadd.f32 %v15277_v13, %v15208_v12  ;;  %18705 = vmatprep.mubr.f32.mxu0 %v3677_v7  ;;  %18775 = vmatprep.mubr.f32.mxu1 %v3678_v10  ;;  %v3727_v62 = vrot.slane %v3713_v51, %v33752_v5  ;;  %v3728_v3 = vcombine.high %v3720_v60, %v3720_v60  ;;  %v789_v12 = vld [vmem:[%s33746_s29 + $0xb80] sm:$0xff] }
 0x30e   : > { %18672 = vmatpush1.xpose.msra.mxu0 %v777_v15  ;;  %18742 = vmatpush1.xpose.msra.mxu1 %v779_v18  ;;  %v3729_v7 = vcombine.high %v3727_v62, %v3727_v62  ;;  %v791_v15 = vld [vmem:[%s33746_s29 + $0xb90] sm:$0xff]  ;;  %v1564_v18 = vld [vmem:[%s33746_s29 + $0x23b8] sm:$0x3] }
 0x30f   : > { %18809 = vmatprep.subr.mxu0 %v1550_v19  ;;  %18879 = vmatprep.subr.mxu1 %v1552_v21  ;;  %v1561_v21 = vld [vmem:[%s33746_s29 + $0x23a0] sm:$0x3] }
 0x311   : > { %v15347_v28 = vpop.f32.mrf.mxu0  ;;  %18706 = vmatmul.mubr.f32.vlgmr.msra.gmra.mxu0 %v3669_v63  ;;  %v15417_v33 = vpop.f32.mrf.mxu1  ;;  %18776 = vmatmul.mubr.f32.vlgmr.msra.gmra.mxu1 %v3676_v1  ;;  %v322_v63 = vld [vmem:[%s33738_s27 + $0x2e8] sm:$0xff]  ;;  %v1559_v1 = vld [vmem:[%s33746_s29 + $0x2390] sm:$0x3] }
 0x312   : > { %v15348_v32 = vadd.f32 %v15347_v28, %v15278_v16  ;;  %18810 = vmatpush1.xpose.msra.mxu0 %v1549_v24  ;;  %18880 = vmatpush1.xpose.msra.mxu1 %v1551_v25  ;;  %v3730_v8 = vcombine.high %v322_v63, %v322_v63  ;;  %v1562_v16 = vld [vmem:[%s33746_s29 + $0x23a8] sm:$0x3]  ;;  %v3737_v17 = vrot.slane %v322_v63, %v33752_v5 }
 0x313   : > { %v15349_v34 = vpop.f32.mrf.mxu0  ;;  %18811 = vmatprep.subr.mxu0 %v782_v26  ;;  %v15419_v37 = vpop.f32.mrf.mxu1  ;;  %18881 = vmatprep.subr.mxu1 %v784_v29  ;;  %v796_v26 = vld [vmem:[%s33746_s29 + $0xbb8] sm:$0xff]  ;;  %v802_v63 = vld [vmem:[%s33746_s29 + $0xbe8] sm:$0xff] }
 0x314   : > { %v15418_v36 = vadd.f32 %v15417_v33, %v15348_v32  ;;  %18845 = vmatprep.mubr.f32.mxu0 %v3694_v27  ;;  %18915 = vmatprep.mubr.f32.mxu1 %v3695_v30  ;;  %v3744_v19 = vrot.slane %v3730_v8, %v33752_v5  ;;  %v3745_v24 = vcombine.high %v3737_v17, %v3737_v17  ;;  %v793_v32 = vld [vmem:[%s33746_s29 + $0xba0] sm:$0xff] }
 0x316   : > { %18812 = vmatpush1.xpose.msra.mxu0 %v781_v35  ;;  %18882 = vmatpush1.xpose.msra.mxu1 %v783_v38  ;;  %v3746_v27 = vcombine.high %v3744_v19, %v3744_v19  ;;  %v795_v35 = vld [vmem:[%s33746_s29 + $0xbb0] sm:$0xff]  ;;  %v1568_v38 = vld [vmem:[%s33746_s29 + $0x23d8] sm:$0x3] }
 0x317   : > { %18949 = vmatprep.subr.mxu0 %v1554_v39  ;;  %19019 = vmatprep.subr.mxu1 %v1556_v41  ;;  %v1565_v41 = vld [vmem:[%s33746_s29 + $0x23c0] sm:$0x3] }
 0x319   : > { %v15487_v48 = vpop.f32.mrf.mxu0  ;;  %18846 = vmatmul.mubr.f32.vlgmr.msra.gmra.mxu0 %v3686_v20  ;;  %v15557_v53 = vpop.f32.mrf.mxu1  ;;  %18916 = vmatmul.mubr.f32.vlgmr.msra.gmra.mxu1 %v3693_v22  ;;  %v323_v20 = vld [vmem:[%s33738_s27 + $0x2f0] sm:$0xff] }
 0x31a   : > { %v15488_v52 = vadd.f32 %v15487_v48, %v15418_v36  ;;  %18950 = vmatpush1.xpose.msra.mxu0 %v1553_v44  ;;  %19020 = vmatpush1.xpose.msra.mxu1 %v1555_v45  ;;  %v1563_v22 = vld [vmem:[%s33746_s29 + $0x23b0] sm:$0x3]  ;;  %v3747_v28 = vcombine.high %v323_v20, %v323_v20  ;;  %v1566_v36 = vld [vmem:[%s33746_s29 + $0x23c8] sm:$0x3]  ;;  %v3754_v37 = vrot.slane %v323_v20, %v33752_v5 }
 0x31b   : > { %v15489_v54 = vpop.f32.mrf.mxu0  ;;  %18951 = vmatprep.subr.mxu0 %v786_v46  ;;  %v15559_v57 = vpop.f32.mrf.mxu1  ;;  %19021 = vmatprep.subr.mxu1 %v788_v49  ;;  %v800_v46 = vld [vmem:[%s33746_s29 + $0xbd8] sm:$0xff]  ;;  %v806_v20 = vld [vmem:[%s33746_s29 + $0xc08] sm:$0xff] }
 0x31c   : > { %v15558_v56 = vadd.f32 %v15557_v53, %v15488_v52  ;;  %18985 = vmatprep.mubr.f32.mxu0 %v3711_v47  ;;  %19055 = vmatprep.mubr.f32.mxu1 %v3712_v50  ;;  %v3761_v39 = vrot.slane %v3747_v28, %v33752_v5  ;;  %v3762_v44 = vcombine.high %v3754_v37, %v3754_v37  ;;  %v797_v52 = vld [vmem:[%s33746_s29 + $0xbc0] sm:$0xff] }
 0x31e   : > { %18952 = vmatpush1.xpose.msra.mxu0 %v785_v55  ;;  %19022 = vmatpush1.xpose.msra.mxu1 %v787_v58  ;;  %v3763_v47 = vcombine.high %v3761_v39, %v3761_v39  ;;  %v799_v55 = vld [vmem:[%s33746_s29 + $0xbd0] sm:$0xff]  ;;  %v1572_v58 = vld [vmem:[%s33746_s29 + $0x23f8] sm:$0x3] }
 0x31f   : > { %19089 = vmatprep.subr.mxu0 %v1558_v59  ;;  %19159 = vmatprep.subr.mxu1 %v1560_v61  ;;  %v1569_v61 = vld [vmem:[%s33746_s29 + $0x23e0] sm:$0x3] }
 0x321   : > { %v15627_v4 = vpop.f32.mrf.mxu0  ;;  %18986 = vmatmul.mubr.f32.vlgmr.msra.gmra.mxu0 %v3703_v40  ;;  %v15697_v10 = vpop.f32.mrf.mxu1  ;;  %19056 = vmatmul.mubr.f32.vlgmr.msra.gmra.mxu1 %v3710_v42  ;;  %v324_v40 = vld [vmem:[%s33738_s27 + $0x2f8] sm:$0xff]  ;;  %v1567_v42 = vld [vmem:[%s33746_s29 + $0x23d0] sm:$0x3] }
 0x322   : > { %v15628_v9 = vadd.f32 %v15627_v4, %v15558_v56  ;;  %19090 = vmatpush1.xpose.msra.mxu0 %v1557_v0  ;;  %19160 = vmatpush1.xpose.msra.mxu1 %v1559_v1  ;;  %v3764_v48 = vcombine.high %v324_v40, %v324_v40  ;;  %v1570_v56 = vld [vmem:[%s33746_s29 + $0x23e8] sm:$0x3]  ;;  %v3771_v57 = vrot.slane %v324_v40, %v33752_v5 }
 0x323   : > { %v15629_v11 = vpop.f32.mrf.mxu0  ;;  %19091 = vmatprep.subr.mxu0 %v790_v2  ;;  %v15699_v14 = vpop.f32.mrf.mxu1  ;;  %19161 = vmatprep.subr.mxu1 %v792_v6  ;;  %v804_v2 = vld [vmem:[%s33746_s29 + $0xbf8] sm:$0xff]  ;;  %v810_v40 = vld [vmem:[%s33746_s29 + $0xc28] sm:$0xff] }
 0x324   : > { %v15698_v13 = vadd.f32 %v15697_v10, %v15628_v9  ;;  %19125 = vmatprep.mubr.f32.mxu0 %v3728_v3  ;;  %19195 = vmatprep.mubr.f32.mxu1 %v3729_v7  ;;  %v3778_v59 = vrot.slane %v3764_v48, %v33752_v5  ;;  %v3779_v0 = vcombine.high %v3771_v57, %v3771_v57  ;;  %v801_v9 = vld [vmem:[%s33746_s29 + $0xbe0] sm:$0xff] }
 0x326   : > { %19092 = vmatpush1.xpose.msra.mxu0 %v789_v12  ;;  %19162 = vmatpush1.xpose.msra.mxu1 %v791_v15  ;;  %v3780_v3 = vcombine.high %v3778_v59, %v3778_v59  ;;  %v803_v12 = vld [vmem:[%s33746_s29 + $0xbf0] sm:$0xff]  ;;  %v1576_v15 = vld [vmem:[%s33746_s29 + $0x2418] sm:$0x3] }
 0x327   : > { %19229 = vmatprep.subr.mxu0 %v1562_v16  ;;  %19299 = vmatprep.subr.mxu1 %v1564_v18  ;;  %v1573_v18 = vld [vmem:[%s33746_s29 + $0x2400] sm:$0x3] }
 0x329   : > { %v15767_v25 = vpop.f32.mrf.mxu0  ;;  %19126 = vmatmul.mubr.f32.vlgmr.msra.gmra.mxu0 %v3720_v60  ;;  %v15837_v30 = vpop.f32.mrf.mxu1  ;;  %19196 = vmatmul.mubr.f32.vlgmr.msra.gmra.mxu1 %v3727_v62  ;;  %v325_v60 = vld [vmem:[%s33738_s27 + $0x300] sm:$0xff]  ;;  %v1571_v62 = vld [vmem:[%s33746_s29 + $0x23f0] sm:$0x3] }
 0x32a   : > { %v15768_v29 = vadd.f32 %v15767_v25, %v15698_v13  ;;  %19230 = vmatpush1.xpose.msra.mxu0 %v1561_v21  ;;  %19300 = vmatpush1.xpose.msra.mxu1 %v1563_v22  ;;  %v3781_v4 = vcombine.high %v325_v60, %v325_v60  ;;  %v1574_v13 = vld [vmem:[%s33746_s29 + $0x2408] sm:$0x3]  ;;  %v3788_v14 = vrot.slane %v325_v60, %v33752_v5 }
 0x32b   : > { %v15769_v31 = vpop.f32.mrf.mxu0  ;;  %19231 = vmatprep.subr.mxu0 %v794_v23  ;;  %v15839_v34 = vpop.f32.mrf.mxu1  ;;  %19301 = vmatprep.subr.mxu1 %v796_v26  ;;  %v808_v23 = vld [vmem:[%s33746_s29 + $0xc18] sm:$0xff]  ;;  %v814_v60 = vld [vmem:[%s33746_s29 + $0xc48] sm:$0xff] }
 0x32c   : > { %v15838_v33 = vadd.f32 %v15837_v30, %v15768_v29  ;;  %19265 = vmatprep.mubr.f32.mxu0 %v3745_v24  ;;  %19335 = vmatprep.mubr.f32.mxu1 %v3746_v27  ;;  %v3795_v16 = vrot.slane %v3781_v4, %v33752_v5  ;;  %v3796_v21 = vcombine.high %v3788_v14, %v3788_v14  ;;  %v805_v29 = vld [vmem:[%s33746_s29 + $0xc00] sm:$0xff] }
 0x32e   : > { %19232 = vmatpush1.xpose.msra.mxu0 %v793_v32  ;;  %19302 = vmatpush1.xpose.msra.mxu1 %v795_v35  ;;  %v3797_v24 = vcombine.high %v3795_v16, %v3795_v16  ;;  %v807_v32 = vld [vmem:[%s33746_s29 + $0xc10] sm:$0xff]  ;;  %v1580_v35 = vld [vmem:[%s33746_s29 + $0x2438] sm:$0x3] }
 0x32f   : > { %19369 = vmatprep.subr.mxu0 %v1566_v36  ;;  %19439 = vmatprep.subr.mxu1 %v1568_v38  ;;  %v1577_v38 = vld [vmem:[%s33746_s29 + $0x2420] sm:$0x3] }
 0x331   : > { %v15907_v45 = vpop.f32.mrf.mxu0  ;;  %19266 = vmatmul.mubr.f32.vlgmr.msra.gmra.mxu0 %v3737_v17  ;;  %v15977_v50 = vpop.f32.mrf.mxu1  ;;  %19336 = vmatmul.mubr.f32.vlgmr.msra.gmra.mxu1 %v3744_v19  ;;  %v326_v17 = vld [vmem:[%s33738_s27 + $0x308] sm:$0xff]  ;;  %v1575_v19 = vld [vmem:[%s33746_s29 + $0x2410] sm:$0x3] }
 0x332   : > { %v15908_v49 = vadd.f32 %v15907_v45, %v15838_v33  ;;  %19370 = vmatpush1.xpose.msra.mxu0 %v1565_v41  ;;  %19440 = vmatpush1.xpose.msra.mxu1 %v1567_v42  ;;  %v3798_v25 = vcombine.high %v326_v17, %v326_v17  ;;  %v1578_v33 = vld [vmem:[%s33746_s29 + $0x2428] sm:$0x3]  ;;  %v3805_v34 = vrot.slane %v326_v17, %v33752_v5 }
 0x333   : > { %v15909_v51 = vpop.f32.mrf.mxu0  ;;  %19371 = vmatprep.subr.mxu0 %v798_v43  ;;  %v15979_v54 = vpop.f32.mrf.mxu1  ;;  %19441 = vmatprep.subr.mxu1 %v800_v46  ;;  %v812_v43 = vld [vmem:[%s33746_s29 + $0xc38] sm:$0xff]  ;;  %v818_v17 = vld [vmem:[%s33746_s29 + $0xc68] sm:$0xff] }
 0x334   : > { %v15978_v53 = vadd.f32 %v15977_v50, %v15908_v49  ;;  %19405 = vmatprep.mubr.f32.mxu0 %v3762_v44  ;;  %19475 = vmatprep.mubr.f32.mxu1 %v3763_v47  ;;  %v3812_v36 = vrot.slane %v3798_v25, %v33752_v5  ;;  %v3813_v41 = vcombine.high %v3805_v34, %v3805_v34  ;;  %v809_v49 = vld [vmem:[%s33746_s29 + $0xc20] sm:$0xff] }
 0x336   : > { %19372 = vmatpush1.xpose.msra.mxu0 %v797_v52  ;;  %19442 = vmatpush1.xpose.msra.mxu1 %v799_v55  ;;  %v3814_v44 = vcombine.high %v3812_v36, %v3812_v36  ;;  %v811_v52 = vld [vmem:[%s33746_s29 + $0xc30] sm:$0xff]  ;;  %v1584_v55 = vld [vmem:[%s33746_s29 + $0x2458] sm:$0x3] }
 0x337   : > { %19509 = vmatprep.subr.mxu0 %v1570_v56  ;;  %19579 = vmatprep.subr.mxu1 %v1572_v58  ;;  %v1581_v58 = vld [vmem:[%s33746_s29 + $0x2440] sm:$0x3] }
 0x339   : > { %v16047_v1 = vpop.f32.mrf.mxu0  ;;  %19406 = vmatmul.mubr.f32.vlgmr.msra.gmra.mxu0 %v3754_v37  ;;  %v16117_v7 = vpop.f32.mrf.mxu1  ;;  %19476 = vmatmul.mubr.f32.vlgmr.msra.gmra.mxu1 %v3761_v39  ;;  %v327_v37 = vld [vmem:[%s33738_s27 + $0x310] sm:$0xff] }
 0x33a   : > { %v16048_v6 = vadd.f32 %v16047_v1, %v15978_v53  ;;  %19510 = vmatpush1.xpose.msra.mxu0 %v1569_v61  ;;  %19580 = vmatpush1.xpose.msra.mxu1 %v1571_v62  ;;  %v1579_v39 = vld [vmem:[%s33746_s29 + $0x2430] sm:$0x3]  ;;  %v3815_v45 = vcombine.high %v327_v37, %v327_v37  ;;  %v1582_v53 = vld [vmem:[%s33746_s29 + $0x2448] sm:$0x3]  ;;  %v3822_v54 = vrot.slane %v327_v37, %v33752_v5 }
 0x33b   : > { %v16049_v8 = vpop.f32.mrf.mxu0  ;;  %19511 = vmatprep.subr.mxu0 %v802_v63  ;;  %v16119_v11 = vpop.f32.mrf.mxu1  ;;  %19581 = vmatprep.subr.mxu1 %v804_v2  ;;  %v816_v63 = vld [vmem:[%s33746_s29 + $0xc58] sm:$0xff]  ;;  %v822_v37 = vld [vmem:[%s33746_s29 + $0xc88] sm:$0xff] }
 0x33c   : > { %v16118_v10 = vadd.f32 %v16117_v7, %v16048_v6  ;;  %19545 = vmatprep.mubr.f32.mxu0 %v3779_v0  ;;  %19615 = vmatprep.mubr.f32.mxu1 %v3780_v3  ;;  %v3829_v56 = vrot.slane %v3815_v45, %v33752_v5  ;;  %v3830_v61 = vcombine.high %v3822_v54, %v3822_v54  ;;  %v813_v6 = vld [vmem:[%s33746_s29 + $0xc40] sm:$0xff] }
 0x33e   : > { %19512 = vmatpush1.xpose.msra.mxu0 %v801_v9  ;;  %19582 = vmatpush1.xpose.msra.mxu1 %v803_v12  ;;  %v3831_v0 = vcombine.high %v3829_v56, %v3829_v56  ;;  %v815_v9 = vld [vmem:[%s33746_s29 + $0xc50] sm:$0xff]  ;;  %v1588_v12 = vld [vmem:[%s33746_s29 + $0x2478] sm:$0x3] }
 0x33f   : > { %19649 = vmatprep.subr.mxu0 %v1574_v13  ;;  %19719 = vmatprep.subr.mxu1 %v1576_v15  ;;  %v1585_v15 = vld [vmem:[%s33746_s29 + $0x2460] sm:$0x3] }
 0x341   : > { %v16187_v22 = vpop.f32.mrf.mxu0  ;;  %19546 = vmatmul.mubr.f32.vlgmr.msra.gmra.mxu0 %v3771_v57  ;;  %v16257_v27 = vpop.f32.mrf.mxu1  ;;  %19616 = vmatmul.mubr.f32.vlgmr.msra.gmra.mxu1 %v3778_v59  ;;  %v328_v57 = vld [vmem:[%s33738_s27 + $0x318] sm:$0xff]  ;;  %v1583_v59 = vld [vmem:[%s33746_s29 + $0x2450] sm:$0x3] }
 0x342   : > { %v16188_v26 = vadd.f32 %v16187_v22, %v16118_v10  ;;  %19650 = vmatpush1.xpose.msra.mxu0 %v1573_v18  ;;  %19720 = vmatpush1.xpose.msra.mxu1 %v1575_v19  ;;  %v3832_v1 = vcombine.high %v328_v57, %v328_v57  ;;  %v1586_v10 = vld [vmem:[%s33746_s29 + $0x2468] sm:$0x3]  ;;  %v3839_v11 = vrot.slane %v328_v57, %v33752_v5 }
 0x343   : > { %v16189_v28 = vpop.f32.mrf.mxu0  ;;  %19651 = vmatprep.subr.mxu0 %v806_v20  ;;  %v16259_v31 = vpop.f32.mrf.mxu1  ;;  %19721 = vmatprep.subr.mxu1 %v808_v23  ;;  %v820_v20 = vld [vmem:[%s33746_s29 + $0xc78] sm:$0xff]  ;;  %v826_v57 = vld [vmem:[%s33746_s29 + $0xca8] sm:$0xff] }
 0x344   : > { %v16258_v30 = vadd.f32 %v16257_v27, %v16188_v26  ;;  %19685 = vmatprep.mubr.f32.mxu0 %v3796_v21  ;;  %19755 = vmatprep.mubr.f32.mxu1 %v3797_v24  ;;  %v3846_v13 = vrot.slane %v3832_v1, %v33752_v5  ;;  %v3847_v18 = vcombine.high %v3839_v11, %v3839_v11  ;;  %v817_v26 = vld [vmem:[%s33746_s29 + $0xc60] sm:$0xff] }
 0x346   : > { %19652 = vmatpush1.xpose.msra.mxu0 %v805_v29  ;;  %19722 = vmatpush1.xpose.msra.mxu1 %v807_v32  ;;  %v3848_v21 = vcombine.high %v3846_v13, %v3846_v13  ;;  %v819_v29 = vld [vmem:[%s33746_s29 + $0xc70] sm:$0xff]  ;;  %v1592_v32 = vld [vmem:[%s33746_s29 + $0x2498] sm:$0x3] }
 0x347   : > { %19789 = vmatprep.subr.mxu0 %v1578_v33  ;;  %19859 = vmatprep.subr.mxu1 %v1580_v35  ;;  %v1589_v35 = vld [vmem:[%s33746_s29 + $0x2480] sm:$0x3] }
 0x349   : > { %v16327_v42 = vpop.f32.mrf.mxu0  ;;  %19686 = vmatmul.mubr.f32.vlgmr.msra.gmra.mxu0 %v3788_v14  ;;  %v16397_v47 = vpop.f32.mrf.mxu1  ;;  %19756 = vmatmul.mubr.f32.vlgmr.msra.gmra.mxu1 %v3795_v16  ;;  %v329_v14 = vld [vmem:[%s33738_s27 + $0x320] sm:$0xff]  ;;  %v1587_v16 = vld [vmem:[%s33746_s29 + $0x2470] sm:$0x3] }
 0x34a   : > { %v16328_v46 = vadd.f32 %v16327_v42, %v16258_v30  ;;  %19790 = vmatpush1.xpose.msra.mxu0 %v1577_v38  ;;  %19860 = vmatpush1.xpose.msra.mxu1 %v1579_v39  ;;  %v3849_v22 = vcombine.high %v329_v14, %v329_v14  ;;  %v1590_v30 = vld [vmem:[%s33746_s29 + $0x2488] sm:$0x3]  ;;  %v3856_v31 = vrot.slane %v329_v14, %v33752_v5 }
 0x34b   : > { %v16329_v48 = vpop.f32.mrf.mxu0  ;;  %19791 = vmatprep.subr.mxu0 %v810_v40  ;;  %v16399_v51 = vpop.f32.mrf.mxu1  ;;  %19861 = vmatprep.subr.mxu1 %v812_v43  ;;  %v824_v40 = vld [vmem:[%s33746_s29 + $0xc98] sm:$0xff]  ;;  %v830_v14 = vld [vmem:[%s33746_s29 + $0xcc8] sm:$0xff] }
 0x34c   : > { %v16398_v50 = vadd.f32 %v16397_v47, %v16328_v46  ;;  %19825 = vmatprep.mubr.f32.mxu0 %v3813_v41  ;;  %19895 = vmatprep.mubr.f32.mxu1 %v3814_v44  ;;  %v3863_v33 = vrot.slane %v3849_v22, %v33752_v5  ;;  %v3864_v38 = vcombine.high %v3856_v31, %v3856_v31  ;;  %v821_v46 = vld [vmem:[%s33746_s29 + $0xc80] sm:$0xff] }
 0x34e   : > { %19792 = vmatpush1.xpose.msra.mxu0 %v809_v49  ;;  %19862 = vmatpush1.xpose.msra.mxu1 %v811_v52  ;;  %v3865_v41 = vcombine.high %v3863_v33, %v3863_v33  ;;  %v823_v49 = vld [vmem:[%s33746_s29 + $0xc90] sm:$0xff]  ;;  %v1596_v52 = vld [vmem:[%s33746_s29 + $0x24b8] sm:$0x3] }
 0x34f   : > { %19929 = vmatprep.subr.mxu0 %v1582_v53  ;;  %19999 = vmatprep.subr.mxu1 %v1584_v55  ;;  %v1593_v55 = vld [vmem:[%s33746_s29 + $0x24a0] sm:$0x3] }
 0x351   : > { %v16467_v62 = vpop.f32.mrf.mxu0  ;;  %19826 = vmatmul.mubr.f32.vlgmr.msra.gmra.mxu0 %v3805_v34  ;;  %v16537_v3 = vpop.f32.mrf.mxu1  ;;  %19896 = vmatmul.mubr.f32.vlgmr.msra.gmra.mxu1 %v3812_v36  ;;  %v330_v34 = vld [vmem:[%s33738_s27 + $0x328] sm:$0xff]  ;;  %v1591_v36 = vld [vmem:[%s33746_s29 + $0x2490] sm:$0x3] }
 0x352   : > { %v16468_v2 = vadd.f32 %v16467_v62, %v16398_v50  ;;  %19930 = vmatpush1.xpose.msra.mxu0 %v1581_v58  ;;  %20000 = vmatpush1.xpose.msra.mxu1 %v1583_v59  ;;  %v3866_v42 = vcombine.high %v330_v34, %v330_v34  ;;  %v1594_v50 = vld [vmem:[%s33746_s29 + $0x24a8] sm:$0x3]  ;;  %v3873_v51 = vrot.slane %v330_v34, %v33752_v5 }
 0x353   : > { %v16469_v4 = vpop.f32.mrf.mxu0  ;;  %19931 = vmatprep.subr.mxu0 %v814_v60  ;;  %v16539_v8 = vpop.f32.mrf.mxu1  ;;  %20001 = vmatprep.subr.mxu1 %v816_v63  ;;  %v828_v60 = vld [vmem:[%s33746_s29 + $0xcb8] sm:$0xff]  ;;  %v834_v34 = vld [vmem:[%s33746_s29 + $0xce8] sm:$0xff] }
 0x354   : > { %v16538_v7 = vadd.f32 %v16537_v3, %v16468_v2  ;;  %19965 = vmatprep.mubr.f32.mxu0 %v3830_v61  ;;  %20035 = vmatprep.mubr.f32.mxu1 %v3831_v0  ;;  %v3880_v53 = vrot.slane %v3866_v42, %v33752_v5  ;;  %v3881_v58 = vcombine.high %v3873_v51, %v3873_v51  ;;  %v825_v2 = vld [vmem:[%s33746_s29 + $0xca0] sm:$0xff] }
 0x356   : > { %19932 = vmatpush1.xpose.msra.mxu0 %v813_v6  ;;  %20002 = vmatpush1.xpose.msra.mxu1 %v815_v9  ;;  %v3882_v61 = vcombine.high %v3880_v53, %v3880_v53  ;;  %v827_v6 = vld [vmem:[%s33746_s29 + $0xcb0] sm:$0xff]  ;;  %v1600_v9 = vld [vmem:[%s33746_s29 + $0x24d8] sm:$0x3] }
 0x357   : > { %20069 = vmatprep.subr.mxu0 %v1586_v10  ;;  %20139 = vmatprep.subr.mxu1 %v1588_v12  ;;  %v1597_v12 = vld [vmem:[%s33746_s29 + $0x24c0] sm:$0x3] }
 0x359   : > { %v16607_v19 = vpop.f32.mrf.mxu0  ;;  %19966 = vmatmul.mubr.f32.vlgmr.msra.gmra.mxu0 %v3822_v54  ;;  %v16677_v24 = vpop.f32.mrf.mxu1  ;;  %20036 = vmatmul.mubr.f32.vlgmr.msra.gmra.mxu1 %v3829_v56  ;;  %v331_v54 = vld [vmem:[%s33738_s27 + $0x330] sm:$0xff] }
 0x35a   : > { %v16608_v23 = vadd.f32 %v16607_v19, %v16538_v7  ;;  %20070 = vmatpush1.xpose.msra.mxu0 %v1585_v15  ;;  %20140 = vmatpush1.xpose.msra.mxu1 %v1587_v16  ;;  %v1595_v56 = vld [vmem:[%s33746_s29 + $0x24b0] sm:$0x3]  ;;  %v3883_v62 = vcombine.high %v331_v54, %v331_v54  ;;  %v1598_v7 = vld [vmem:[%s33746_s29 + $0x24c8] sm:$0x3]  ;;  %v3890_v8 = vrot.slane %v331_v54, %v33752_v5 }
 0x35b   : > { %v16609_v25 = vpop.f32.mrf.mxu0  ;;  %20071 = vmatprep.subr.mxu0 %v818_v17  ;;  %v16679_v28 = vpop.f32.mrf.mxu1  ;;  %20141 = vmatprep.subr.mxu1 %v820_v20  ;;  %v832_v17 = vld [vmem:[%s33746_s29 + $0xcd8] sm:$0xff]  ;;  %v838_v54 = vld [vmem:[%s33746_s29 + $0xd08] sm:$0xff] }
 0x35c   : > { %v16678_v27 = vadd.f32 %v16677_v24, %v16608_v23  ;;  %20105 = vmatprep.mubr.f32.mxu0 %v3847_v18  ;;  %20175 = vmatprep.mubr.f32.mxu1 %v3848_v21  ;;  %v3897_v10 = vrot.slane %v3883_v62, %v33752_v5  ;;  %v3898_v15 = vcombine.high %v3890_v8, %v3890_v8  ;;  %v829_v23 = vld [vmem:[%s33746_s29 + $0xcc0] sm:$0xff] }
 0x35e   : > { %20072 = vmatpush1.xpose.msra.mxu0 %v817_v26  ;;  %20142 = vmatpush1.xpose.msra.mxu1 %v819_v29  ;;  %v3899_v18 = vcombine.high %v3897_v10, %v3897_v10  ;;  %v831_v26 = vld [vmem:[%s33746_s29 + $0xcd0] sm:$0xff]  ;;  %v1604_v29 = vld [vmem:[%s33746_s29 + $0x24f8] sm:$0x3] }
 0x35f   : > { %20209 = vmatprep.subr.mxu0 %v1590_v30  ;;  %20279 = vmatprep.subr.mxu1 %v1592_v32  ;;  %v1601_v32 = vld [vmem:[%s33746_s29 + $0x24e0] sm:$0x3] }
 0x361   : > { %v16747_v39 = vpop.f32.mrf.mxu0  ;;  %20106 = vmatmul.mubr.f32.vlgmr.msra.gmra.mxu0 %v3839_v11  ;;  %v16817_v44 = vpop.f32.mrf.mxu1  ;;  %20176 = vmatmul.mubr.f32.vlgmr.msra.gmra.mxu1 %v3846_v13  ;;  %v332_v11 = vld [vmem:[%s33738_s27 + $0x338] sm:$0xff]  ;;  %v1599_v13 = vld [vmem:[%s33746_s29 + $0x24d0] sm:$0x3] }
 0x362   : > { %v16748_v43 = vadd.f32 %v16747_v39, %v16678_v27  ;;  %20210 = vmatpush1.xpose.msra.mxu0 %v1589_v35  ;;  %20280 = vmatpush1.xpose.msra.mxu1 %v1591_v36  ;;  %v3900_v19 = vcombine.high %v332_v11, %v332_v11  ;;  %v1602_v27 = vld [vmem:[%s33746_s29 + $0x24e8] sm:$0x3]  ;;  %v3907_v28 = vrot.slane %v332_v11, %v33752_v5 }
 0x363   : > { %v16749_v45 = vpop.f32.mrf.mxu0  ;;  %20211 = vmatprep.subr.mxu0 %v822_v37  ;;  %v16819_v48 = vpop.f32.mrf.mxu1  ;;  %20281 = vmatprep.subr.mxu1 %v824_v40  ;;  %v836_v37 = vld [vmem:[%s33746_s29 + $0xcf8] sm:$0xff]  ;;  %v842_v11 = vld [vmem:[%s33746_s29 + $0xd28] sm:$0xff] }
 0x364   : > { %v16818_v47 = vadd.f32 %v16817_v44, %v16748_v43  ;;  %20245 = vmatprep.mubr.f32.mxu0 %v3864_v38  ;;  %20315 = vmatprep.mubr.f32.mxu1 %v3865_v41  ;;  %v3914_v30 = vrot.slane %v3900_v19, %v33752_v5  ;;  %v3915_v35 = vcombine.high %v3907_v28, %v3907_v28  ;;  %v833_v43 = vld [vmem:[%s33746_s29 + $0xce0] sm:$0xff] }
 0x366   : > { %20212 = vmatpush1.xpose.msra.mxu0 %v821_v46  ;;  %20282 = vmatpush1.xpose.msra.mxu1 %v823_v49  ;;  %v3916_v38 = vcombine.high %v3914_v30, %v3914_v30  ;;  %v835_v46 = vld [vmem:[%s33746_s29 + $0xcf0] sm:$0xff]  ;;  %v1608_v49 = vld [vmem:[%s33746_s29 + $0x2518] sm:$0x3] }
 0x367   : > { %20349 = vmatprep.subr.mxu0 %v1594_v50  ;;  %20419 = vmatprep.subr.mxu1 %v1596_v52  ;;  %v1605_v52 = vld [vmem:[%s33746_s29 + $0x2500] sm:$0x3] }
 0x369   : > { %v16887_v59 = vpop.f32.mrf.mxu0  ;;  %20246 = vmatmul.mubr.f32.vlgmr.msra.gmra.mxu0 %v3856_v31  ;;  %v16957_v0 = vpop.f32.mrf.mxu1  ;;  %20316 = vmatmul.mubr.f32.vlgmr.msra.gmra.mxu1 %v3863_v33  ;;  %v333_v31 = vld [vmem:[%s33738_s27 + $0x340] sm:$0xff]  ;;  %v1603_v33 = vld [vmem:[%s33746_s29 + $0x24f0] sm:$0x3] }
 0x36a   : > { %v16888_v63 = vadd.f32 %v16887_v59, %v16818_v47  ;;  %20350 = vmatpush1.xpose.msra.mxu0 %v1593_v55  ;;  %20420 = vmatpush1.xpose.msra.mxu1 %v1595_v56  ;;  %v3917_v39 = vcombine.high %v333_v31, %v333_v31  ;;  %v1606_v47 = vld [vmem:[%s33746_s29 + $0x2508] sm:$0x3]  ;;  %v3924_v48 = vrot.slane %v333_v31, %v33752_v5 }
 0x36b   : > { %v16889_v1 = vpop.f32.mrf.mxu0  ;;  %20351 = vmatprep.subr.mxu0 %v826_v57  ;;  %v16959_v4 = vpop.f32.mrf.mxu1  ;;  %20421 = vmatprep.subr.mxu1 %v828_v60  ;;  %v840_v57 = vld [vmem:[%s33746_s29 + $0xd18] sm:$0xff]  ;;  %v846_v31 = vld [vmem:[%s33746_s29 + $0xd48] sm:$0xff] }
 0x36c   : > { %v16958_v3 = vadd.f32 %v16957_v0, %v16888_v63  ;;  %20385 = vmatprep.mubr.f32.mxu0 %v3881_v58  ;;  %20455 = vmatprep.mubr.f32.mxu1 %v3882_v61  ;;  %v3931_v50 = vrot.slane %v3917_v39, %v33752_v5  ;;  %v3932_v55 = vcombine.high %v3924_v48, %v3924_v48  ;;  %v837_v63 = vld [vmem:[%s33746_s29 + $0xd00] sm:$0xff] }
 0x36e   : > { %20352 = vmatpush1.xpose.msra.mxu0 %v825_v2  ;;  %20422 = vmatpush1.xpose.msra.mxu1 %v827_v6  ;;  %v3933_v58 = vcombine.high %v3931_v50, %v3931_v50  ;;  %v839_v2 = vld [vmem:[%s33746_s29 + $0xd10] sm:$0xff]  ;;  %v1612_v6 = vld [vmem:[%s33746_s29 + $0x2538] sm:$0x3] }
 0x36f   : > { %20489 = vmatprep.subr.mxu0 %v1598_v7  ;;  %20559 = vmatprep.subr.mxu1 %v1600_v9  ;;  %v1609_v9 = vld [vmem:[%s33746_s29 + $0x2520] sm:$0x3] }
 0x371   : > { %v17027_v16 = vpop.f32.mrf.mxu0  ;;  %20386 = vmatmul.mubr.f32.vlgmr.msra.gmra.mxu0 %v3873_v51  ;;  %v17097_v21 = vpop.f32.mrf.mxu1  ;;  %20456 = vmatmul.mubr.f32.vlgmr.msra.gmra.mxu1 %v3880_v53  ;;  %v334_v51 = vld [vmem:[%s33738_s27 + $0x348] sm:$0xff]  ;;  %v1607_v53 = vld [vmem:[%s33746_s29 + $0x2510] sm:$0x3] }
 0x372   : > { %v17028_v20 = vadd.f32 %v17027_v16, %v16958_v3  ;;  %20490 = vmatpush1.xpose.msra.mxu0 %v1597_v12  ;;  %20560 = vmatpush1.xpose.msra.mxu1 %v1599_v13  ;;  %v3934_v59 = vcombine.high %v334_v51, %v334_v51  ;;  %v1610_v3 = vld [vmem:[%s33746_s29 + $0x2528] sm:$0x3]  ;;  %v3941_v4 = vrot.slane %v334_v51, %v33752_v5 }
 0x373   : > { %v17029_v22 = vpop.f32.mrf.mxu0  ;;  %20491 = vmatprep.subr.mxu0 %v830_v14  ;;  %v17099_v25 = vpop.f32.mrf.mxu1  ;;  %20561 = vmatprep.subr.mxu1 %v832_v17  ;;  %v844_v14 = vld [vmem:[%s33746_s29 + $0xd38] sm:$0xff]  ;;  %v850_v51 = vld [vmem:[%s33746_s29 + $0xd68] sm:$0xff] }
 0x374   : > { %v17098_v24 = vadd.f32 %v17097_v21, %v17028_v20  ;;  %20525 = vmatprep.mubr.f32.mxu0 %v3898_v15  ;;  %20595 = vmatprep.mubr.f32.mxu1 %v3899_v18  ;;  %v3948_v7 = vrot.slane %v3934_v59, %v33752_v5  ;;  %v3949_v12 = vcombine.high %v3941_v4, %v3941_v4  ;;  %v841_v20 = vld [vmem:[%s33746_s29 + $0xd20] sm:$0xff] }
 0x376   : > { %20492 = vmatpush1.xpose.msra.mxu0 %v829_v23  ;;  %20562 = vmatpush1.xpose.msra.mxu1 %v831_v26  ;;  %v3950_v15 = vcombine.high %v3948_v7, %v3948_v7  ;;  %v843_v23 = vld [vmem:[%s33746_s29 + $0xd30] sm:$0xff]  ;;  %v1616_v26 = vld [vmem:[%s33746_s29 + $0x2558] sm:$0x3] }
 0x377   : > { %20629 = vmatprep.subr.mxu0 %v1602_v27  ;;  %20699 = vmatprep.subr.mxu1 %v1604_v29  ;;  %v1613_v29 = vld [vmem:[%s33746_s29 + $0x2540] sm:$0x3] }
 0x379   : > { %v17167_v36 = vpop.f32.mrf.mxu0  ;;  %20526 = vmatmul.mubr.f32.vlgmr.msra.gmra.mxu0 %v3890_v8  ;;  %v17237_v41 = vpop.f32.mrf.mxu1  ;;  %20596 = vmatmul.mubr.f32.vlgmr.msra.gmra.mxu1 %v3897_v10  ;;  %v335_v8 = vld [vmem:[%s33738_s27 + $0x350] sm:$0xff] }
 0x37a   : > { %v17168_v40 = vadd.f32 %v17167_v36, %v17098_v24  ;;  %20630 = vmatpush1.xpose.msra.mxu0 %v1601_v32  ;;  %20700 = vmatpush1.xpose.msra.mxu1 %v1603_v33  ;;  %v1611_v10 = vld [vmem:[%s33746_s29 + $0x2530] sm:$0x3]  ;;  %v3951_v16 = vcombine.high %v335_v8, %v335_v8  ;;  %v1614_v24 = vld [vmem:[%s33746_s29 + $0x2548] sm:$0x3]  ;;  %v3958_v25 = vrot.slane %v335_v8, %v33752_v5 }
 0x37b   : > { %v17169_v42 = vpop.f32.mrf.mxu0  ;;  %20631 = vmatprep.subr.mxu0 %v834_v34  ;;  %v17239_v45 = vpop.f32.mrf.mxu1  ;;  %20701 = vmatprep.subr.mxu1 %v836_v37  ;;  %v848_v34 = vld [vmem:[%s33746_s29 + $0xd58] sm:$0xff]  ;;  %v854_v8 = vld [vmem:[%s33746_s29 + $0xd88] sm:$0xff] }
 0x37c   : > { %v17238_v44 = vadd.f32 %v17237_v41, %v17168_v40  ;;  %20665 = vmatprep.mubr.f32.mxu0 %v3915_v35  ;;  %20735 = vmatprep.mubr.f32.mxu1 %v3916_v38  ;;  %v3965_v27 = vrot.slane %v3951_v16, %v33752_v5  ;;  %v3966_v32 = vcombine.high %v3958_v25, %v3958_v25  ;;  %v845_v40 = vld [vmem:[%s33746_s29 + $0xd40] sm:$0xff] }
 0x37e   : > { %20632 = vmatpush1.xpose.msra.mxu0 %v833_v43  ;;  %20702 = vmatpush1.xpose.msra.mxu1 %v835_v46  ;;  %v3967_v35 = vcombine.high %v3965_v27, %v3965_v27  ;;  %v847_v43 = vld [vmem:[%s33746_s29 + $0xd50] sm:$0xff]  ;;  %v1620_v46 = vld [vmem:[%s33746_s29 + $0x2578] sm:$0x3] }
 0x37f   : > { %20769 = vmatprep.subr.mxu0 %v1606_v47  ;;  %20839 = vmatprep.subr.mxu1 %v1608_v49  ;;  %v1617_v49 = vld [vmem:[%s33746_s29 + $0x2560] sm:$0x3] }
 0x381   : > { %v17307_v56 = vpop.f32.mrf.mxu0  ;;  %20666 = vmatmul.mubr.f32.vlgmr.msra.gmra.mxu0 %v3907_v28  ;;  %v17377_v61 = vpop.f32.mrf.mxu1  ;;  %20736 = vmatmul.mubr.f32.vlgmr.msra.gmra.mxu1 %v3914_v30  ;;  %v336_v28 = vld [vmem:[%s33738_s27 + $0x358] sm:$0xff]  ;;  %v1615_v30 = vld [vmem:[%s33746_s29 + $0x2550] sm:$0x3] }
 0x382   : > { %v17308_v60 = vadd.f32 %v17307_v56, %v17238_v44  ;;  %20770 = vmatpush1.xpose.msra.mxu0 %v1605_v52  ;;  %20840 = vmatpush1.xpose.msra.mxu1 %v1607_v53  ;;  %v3968_v36 = vcombine.high %v336_v28, %v336_v28  ;;  %v1618_v44 = vld [vmem:[%s33746_s29 + $0x2568] sm:$0x3]  ;;  %v3975_v45 = vrot.slane %v336_v28, %v33752_v5 }
 0x383   : > { %v17309_v62 = vpop.f32.mrf.mxu0  ;;  %20771 = vmatprep.subr.mxu0 %v838_v54  ;;  %v17379_v1 = vpop.f32.mrf.mxu1  ;;  %20841 = vmatprep.subr.mxu1 %v840_v57  ;;  %v852_v54 = vld [vmem:[%s33746_s29 + $0xd78] sm:$0xff]  ;;  %v858_v28 = vld [vmem:[%s33746_s29 + $0xda8] sm:$0xff] }
 0x384   : > { %v17378_v0 = vadd.f32 %v17377_v61, %v17308_v60  ;;  %20805 = vmatprep.mubr.f32.mxu0 %v3932_v55  ;;  %20875 = vmatprep.mubr.f32.mxu1 %v3933_v58  ;;  %v3982_v47 = vrot.slane %v3968_v36, %v33752_v5  ;;  %v3983_v52 = vcombine.high %v3975_v45, %v3975_v45  ;;  %v849_v60 = vld [vmem:[%s33746_s29 + $0xd60] sm:$0xff] }
 0x386   : > { %20772 = vmatpush1.xpose.msra.mxu0 %v837_v63  ;;  %20842 = vmatpush1.xpose.msra.mxu1 %v839_v2  ;;  %v3984_v55 = vcombine.high %v3982_v47, %v3982_v47  ;;  %v851_v63 = vld [vmem:[%s33746_s29 + $0xd70] sm:$0xff]  ;;  %v1624_v2 = vld [vmem:[%s33746_s29 + $0x2598] sm:$0x3] }
 0x387   : > { %20909 = vmatprep.subr.mxu0 %v1610_v3  ;;  %20979 = vmatprep.subr.mxu1 %v1612_v6  ;;  %v1621_v6 = vld [vmem:[%s33746_s29 + $0x2580] sm:$0x3] }
 0x389   : > { %v17447_v13 = vpop.f32.mrf.mxu0  ;;  %20806 = vmatmul.mubr.f32.vlgmr.msra.gmra.mxu0 %v3924_v48  ;;  %v17517_v18 = vpop.f32.mrf.mxu1  ;;  %20876 = vmatmul.mubr.f32.vlgmr.msra.gmra.mxu1 %v3931_v50  ;;  %v337_v48 = vld [vmem:[%s33738_s27 + $0x360] sm:$0xff]  ;;  %v1619_v50 = vld [vmem:[%s33746_s29 + $0x2570] sm:$0x3] }
 0x38a   : > { %v17448_v17 = vadd.f32 %v17447_v13, %v17378_v0  ;;  %20910 = vmatpush1.xpose.msra.mxu0 %v1609_v9  ;;  %20980 = vmatpush1.xpose.msra.mxu1 %v1611_v10  ;;  %v3985_v56 = vcombine.high %v337_v48, %v337_v48  ;;  %v1622_v0 = vld [vmem:[%s33746_s29 + $0x2588] sm:$0x3]  ;;  %v3992_v1 = vrot.slane %v337_v48, %v33752_v5 }
 0x38b   : > { %v17449_v19 = vpop.f32.mrf.mxu0  ;;  %20911 = vmatprep.subr.mxu0 %v842_v11  ;;  %v17519_v22 = vpop.f32.mrf.mxu1  ;;  %20981 = vmatprep.subr.mxu1 %v844_v14  ;;  %v856_v11 = vld [vmem:[%s33746_s29 + $0xd98] sm:$0xff]  ;;  %v862_v48 = vld [vmem:[%s33746_s29 + $0xdc8] sm:$0xff] }
 0x38c   : > { %v17518_v21 = vadd.f32 %v17517_v18, %v17448_v17  ;;  %20945 = vmatprep.mubr.f32.mxu0 %v3949_v12  ;;  %21015 = vmatprep.mubr.f32.mxu1 %v3950_v15  ;;  %v3999_v3 = vrot.slane %v3985_v56, %v33752_v5  ;;  %v4000_v9 = vcombine.high %v3992_v1, %v3992_v1  ;;  %v853_v17 = vld [vmem:[%s33746_s29 + $0xd80] sm:$0xff] }
 0x38e   : > { %20912 = vmatpush1.xpose.msra.mxu0 %v841_v20  ;;  %20982 = vmatpush1.xpose.msra.mxu1 %v843_v23  ;;  %v4001_v12 = vcombine.high %v3999_v3, %v3999_v3  ;;  %v855_v20 = vld [vmem:[%s33746_s29 + $0xd90] sm:$0xff]  ;;  %v1628_v23 = vld [vmem:[%s33746_s29 + $0x25b8] sm:$0x3] }
 0x38f   : > { %21049 = vmatprep.subr.mxu0 %v1614_v24  ;;  %21119 = vmatprep.subr.mxu1 %v1616_v26  ;;  %v1625_v26 = vld [vmem:[%s33746_s29 + $0x25a0] sm:$0x3] }
 0x391   : > { %v17587_v33 = vpop.f32.mrf.mxu0  ;;  %20946 = vmatmul.mubr.f32.vlgmr.msra.gmra.mxu0 %v3941_v4  ;;  %v17657_v38 = vpop.f32.mrf.mxu1  ;;  %21016 = vmatmul.mubr.f32.vlgmr.msra.gmra.mxu1 %v3948_v7  ;;  %v338_v4 = vld [vmem:[%s33738_s27 + $0x368] sm:$0xff]  ;;  %v1623_v7 = vld [vmem:[%s33746_s29 + $0x2590] sm:$0x3] }
 0x392   : > { %v17588_v37 = vadd.f32 %v17587_v33, %v17518_v21  ;;  %21050 = vmatpush1.xpose.msra.mxu0 %v1613_v29  ;;  %21120 = vmatpush1.xpose.msra.mxu1 %v1615_v30  ;;  %v4002_v13 = vcombine.high %v338_v4, %v338_v4  ;;  %v1626_v21 = vld [vmem:[%s33746_s29 + $0x25a8] sm:$0x3]  ;;  %v4009_v22 = vrot.slane %v338_v4, %v33752_v5 }
 0x393   : > { %v17589_v39 = vpop.f32.mrf.mxu0  ;;  %21051 = vmatprep.subr.mxu0 %v846_v31  ;;  %v17659_v42 = vpop.f32.mrf.mxu1  ;;  %21121 = vmatprep.subr.mxu1 %v848_v34  ;;  %v860_v31 = vld [vmem:[%s33746_s29 + $0xdb8] sm:$0xff]  ;;  %v866_v4 = vld [vmem:[%s33746_s29 + $0xde8] sm:$0xff] }
 0x394   : > { %v17658_v41 = vadd.f32 %v17657_v38, %v17588_v37  ;;  %21085 = vmatprep.mubr.f32.mxu0 %v3966_v32  ;;  %21155 = vmatprep.mubr.f32.mxu1 %v3967_v35  ;;  %v4016_v24 = vrot.slane %v4002_v13, %v33752_v5  ;;  %v4017_v29 = vcombine.high %v4009_v22, %v4009_v22  ;;  %v857_v37 = vld [vmem:[%s33746_s29 + $0xda0] sm:$0xff] }
 0x396   : > { %21052 = vmatpush1.xpose.msra.mxu0 %v845_v40  ;;  %21122 = vmatpush1.xpose.msra.mxu1 %v847_v43  ;;  %v4018_v32 = vcombine.high %v4016_v24, %v4016_v24  ;;  %v859_v40 = vld [vmem:[%s33746_s29 + $0xdb0] sm:$0xff]  ;;  %v1632_v43 = vld [vmem:[%s33746_s29 + $0x25d8] sm:$0x3] }
 0x397   : > { %21189 = vmatprep.subr.mxu0 %v1618_v44  ;;  %21259 = vmatprep.subr.mxu1 %v1620_v46  ;;  %v1629_v46 = vld [vmem:[%s33746_s29 + $0x25c0] sm:$0x3] }
 0x399   : > { %v17727_v53 = vpop.f32.mrf.mxu0  ;;  %21086 = vmatmul.mubr.f32.vlgmr.msra.gmra.mxu0 %v3958_v25  ;;  %v17797_v58 = vpop.f32.mrf.mxu1  ;;  %21156 = vmatmul.mubr.f32.vlgmr.msra.gmra.mxu1 %v3965_v27  ;;  %v339_v25 = vld [vmem:[%s33738_s27 + $0x370] sm:$0xff] }
 0x39a   : > { %v17728_v57 = vadd.f32 %v17727_v53, %v17658_v41  ;;  %21190 = vmatpush1.xpose.msra.mxu0 %v1617_v49  ;;  %21260 = vmatpush1.xpose.msra.mxu1 %v1619_v50  ;;  %v1627_v27 = vld [vmem:[%s33746_s29 + $0x25b0] sm:$0x3]  ;;  %v4019_v33 = vcombine.high %v339_v25, %v339_v25  ;;  %v1630_v41 = vld [vmem:[%s33746_s29 + $0x25c8] sm:$0x3]  ;;  %v4026_v42 = vrot.slane %v339_v25, %v33752_v5 }
 0x39b   : > { %v17729_v59 = vpop.f32.mrf.mxu0  ;;  %21191 = vmatprep.subr.mxu0 %v850_v51  ;;  %v17799_v62 = vpop.f32.mrf.mxu1  ;;  %21261 = vmatprep.subr.mxu1 %v852_v54  ;;  %v864_v51 = vld [vmem:[%s33746_s29 + $0xdd8] sm:$0xff]  ;;  %v870_v25 = vld [vmem:[%s33746_s29 + $0xe08] sm:$0xff] }
 0x39c   : > { %v17798_v61 = vadd.f32 %v17797_v58, %v17728_v57  ;;  %21225 = vmatprep.mubr.f32.mxu0 %v3983_v52  ;;  %21295 = vmatprep.mubr.f32.mxu1 %v3984_v55  ;;  %v4033_v44 = vrot.slane %v4019_v33, %v33752_v5  ;;  %v4034_v49 = vcombine.high %v4026_v42, %v4026_v42  ;;  %v861_v57 = vld [vmem:[%s33746_s29 + $0xdc0] sm:$0xff] }
 0x39e   : > { %21192 = vmatpush1.xpose.msra.mxu0 %v849_v60  ;;  %21262 = vmatpush1.xpose.msra.mxu1 %v851_v63  ;;  %v4035_v52 = vcombine.high %v4033_v44, %v4033_v44  ;;  %v863_v60 = vld [vmem:[%s33746_s29 + $0xdd0] sm:$0xff]  ;;  %v1636_v63 = vld [vmem:[%s33746_s29 + $0x25f8] sm:$0x3] }
 0x39f   : > { %21329 = vmatprep.subr.mxu0 %v1622_v0  ;;  %21399 = vmatprep.subr.mxu1 %v1624_v2  ;;  %v1633_v2 = vld [vmem:[%s33746_s29 + $0x25e0] sm:$0x3] }
 0x3a1   : > { %v17867_v10 = vpop.f32.mrf.mxu0  ;;  %21226 = vmatmul.mubr.f32.vlgmr.msra.gmra.mxu0 %v3975_v45  ;;  %v17937_v15 = vpop.f32.mrf.mxu1  ;;  %21296 = vmatmul.mubr.f32.vlgmr.msra.gmra.mxu1 %v3982_v47  ;;  %v340_v45 = vld [vmem:[%s33738_s27 + $0x378] sm:$0xff]  ;;  %v1631_v47 = vld [vmem:[%s33746_s29 + $0x25d0] sm:$0x3] }
 0x3a2   : > { %v17868_v14 = vadd.f32 %v17867_v10, %v17798_v61  ;;  %21330 = vmatpush1.xpose.msra.mxu0 %v1621_v6  ;;  %21400 = vmatpush1.xpose.msra.mxu1 %v1623_v7  ;;  %v4036_v53 = vcombine.high %v340_v45, %v340_v45  ;;  %v1634_v61 = vld [vmem:[%s33746_s29 + $0x25e8] sm:$0x3]  ;;  %v4043_v62 = vrot.slane %v340_v45, %v33752_v5 }
 0x3a3   : > { %v17869_v16 = vpop.f32.mrf.mxu0  ;;  %21331 = vmatprep.subr.mxu0 %v854_v8  ;;  %v17939_v19 = vpop.f32.mrf.mxu1  ;;  %21401 = vmatprep.subr.mxu1 %v856_v11  ;;  %v868_v8 = vld [vmem:[%s33746_s29 + $0xdf8] sm:$0xff]  ;;  %v874_v45 = vld [vmem:[%s33746_s29 + $0xe28] sm:$0xff] }
 0x3a4   : > { %v17938_v18 = vadd.f32 %v17937_v15, %v17868_v14  ;;  %21365 = vmatprep.mubr.f32.mxu0 %v4000_v9  ;;  %21435 = vmatprep.mubr.f32.mxu1 %v4001_v12  ;;  %v4050_v0 = vrot.slane %v4036_v53, %v33752_v5  ;;  %v4051_v6 = vcombine.high %v4043_v62, %v4043_v62  ;;  %v865_v14 = vld [vmem:[%s33746_s29 + $0xde0] sm:$0xff] }
 0x3a6   : > { %21332 = vmatpush1.xpose.msra.mxu0 %v853_v17  ;;  %21402 = vmatpush1.xpose.msra.mxu1 %v855_v20  ;;  %v4052_v9 = vcombine.high %v4050_v0, %v4050_v0  ;;  %v867_v17 = vld [vmem:[%s33746_s29 + $0xdf0] sm:$0xff]  ;;  %v1640_v20 = vld [vmem:[%s33746_s29 + $0x2618] sm:$0x3] }
 0x3a7   : > { %21469 = vmatprep.subr.mxu0 %v1626_v21  ;;  %21539 = vmatprep.subr.mxu1 %v1628_v23  ;;  %v1637_v23 = vld [vmem:[%s33746_s29 + $0x2600] sm:$0x3] }
 0x3a9   : > { %v18007_v30 = vpop.f32.mrf.mxu0  ;;  %21366 = vmatmul.mubr.f32.vlgmr.msra.gmra.mxu0 %v3992_v1  ;;  %v18077_v35 = vpop.f32.mrf.mxu1  ;;  %21436 = vmatmul.mubr.f32.vlgmr.msra.gmra.mxu1 %v3999_v3  ;;  %v341_v1 = vld [vmem:[%s33738_s27 + $0x380] sm:$0xff]  ;;  %v1635_v3 = vld [vmem:[%s33746_s29 + $0x25f0] sm:$0x3] }
 0x3aa   : > { %v18008_v34 = vadd.f32 %v18007_v30, %v17938_v18  ;;  %21470 = vmatpush1.xpose.msra.mxu0 %v1625_v26  ;;  %21540 = vmatpush1.xpose.msra.mxu1 %v1627_v27  ;;  %v4053_v10 = vcombine.high %v341_v1, %v341_v1  ;;  %v1638_v18 = vld [vmem:[%s33746_s29 + $0x2608] sm:$0x3]  ;;  %v4060_v19 = vrot.slane %v341_v1, %v33752_v5 }
 0x3ab   : > { %v18009_v36 = vpop.f32.mrf.mxu0  ;;  %21471 = vmatprep.subr.mxu0 %v858_v28  ;;  %v18079_v39 = vpop.f32.mrf.mxu1  ;;  %21541 = vmatprep.subr.mxu1 %v860_v31  ;;  %v872_v28 = vld [vmem:[%s33746_s29 + $0xe18] sm:$0xff]  ;;  %v878_v1 = vld [vmem:[%s33746_s29 + $0xe48] sm:$0xff] }
 0x3ac   : > { %v18078_v38 = vadd.f32 %v18077_v35, %v18008_v34  ;;  %21505 = vmatprep.mubr.f32.mxu0 %v4017_v29  ;;  %21575 = vmatprep.mubr.f32.mxu1 %v4018_v32  ;;  %v4067_v21 = vrot.slane %v4053_v10, %v33752_v5  ;;  %v4068_v26 = vcombine.high %v4060_v19, %v4060_v19  ;;  %v869_v34 = vld [vmem:[%s33746_s29 + $0xe00] sm:$0xff] }
 0x3ae   : > { %21472 = vmatpush1.xpose.msra.mxu0 %v857_v37  ;;  %21542 = vmatpush1.xpose.msra.mxu1 %v859_v40  ;;  %v4069_v29 = vcombine.high %v4067_v21, %v4067_v21  ;;  %v871_v37 = vld [vmem:[%s33746_s29 + $0xe10] sm:$0xff]  ;;  %v1644_v40 = vld [vmem:[%s33746_s29 + $0x2638] sm:$0x3] }
 0x3af   : > { %21609 = vmatprep.subr.mxu0 %v1630_v41  ;;  %21679 = vmatprep.subr.mxu1 %v1632_v43  ;;  %v1641_v43 = vld [vmem:[%s33746_s29 + $0x2620] sm:$0x3] }
 0x3b1   : > { %v18147_v50 = vpop.f32.mrf.mxu0  ;;  %21506 = vmatmul.mubr.f32.vlgmr.msra.gmra.mxu0 %v4009_v22  ;;  %v18217_v55 = vpop.f32.mrf.mxu1  ;;  %21576 = vmatmul.mubr.f32.vlgmr.msra.gmra.mxu1 %v4016_v24  ;;  %v342_v22 = vld [vmem:[%s33738_s27 + $0x388] sm:$0xff]  ;;  %v1639_v24 = vld [vmem:[%s33746_s29 + $0x2610] sm:$0x3] }
 0x3b2   : > { %v18148_v54 = vadd.f32 %v18147_v50, %v18078_v38  ;;  %21610 = vmatpush1.xpose.msra.mxu0 %v1629_v46  ;;  %21680 = vmatpush1.xpose.msra.mxu1 %v1631_v47  ;;  %v4070_v30 = vcombine.high %v342_v22, %v342_v22  ;;  %v1642_v38 = vld [vmem:[%s33746_s29 + $0x2628] sm:$0x3]  ;;  %v4077_v39 = vrot.slane %v342_v22, %v33752_v5 }
 0x3b3   : > { %v18149_v56 = vpop.f32.mrf.mxu0  ;;  %21611 = vmatprep.subr.mxu0 %v862_v48  ;;  %v18219_v59 = vpop.f32.mrf.mxu1  ;;  %21681 = vmatprep.subr.mxu1 %v864_v51  ;;  %v876_v48 = vld [vmem:[%s33746_s29 + $0xe38] sm:$0xff]  ;;  %v882_v22 = vld [vmem:[%s33746_s29 + $0xe68] sm:$0xff] }
 0x3b4   : > { %v18218_v58 = vadd.f32 %v18217_v55, %v18148_v54  ;;  %21645 = vmatprep.mubr.f32.mxu0 %v4034_v49  ;;  %21715 = vmatprep.mubr.f32.mxu1 %v4035_v52  ;;  %v4084_v41 = vrot.slane %v4070_v30, %v33752_v5  ;;  %v4085_v46 = vcombine.high %v4077_v39, %v4077_v39  ;;  %v873_v54 = vld [vmem:[%s33746_s29 + $0xe20] sm:$0xff] }
 0x3b6   : > { %21612 = vmatpush1.xpose.msra.mxu0 %v861_v57  ;;  %21682 = vmatpush1.xpose.msra.mxu1 %v863_v60  ;;  %v4086_v49 = vcombine.high %v4084_v41, %v4084_v41  ;;  %v875_v57 = vld [vmem:[%s33746_s29 + $0xe30] sm:$0xff]  ;;  %v1648_v60 = vld [vmem:[%s33746_s29 + $0x2658] sm:$0x3] }
 0x3b7   : > { %21749 = vmatprep.subr.mxu0 %v1634_v61  ;;  %21819 = vmatprep.subr.mxu1 %v1636_v63  ;;  %v1645_v63 = vld [vmem:[%s33746_s29 + $0x2640] sm:$0x3] }
 0x3b9   : > { %v18287_v7 = vpop.f32.mrf.mxu0  ;;  %21646 = vmatmul.mubr.f32.vlgmr.msra.gmra.mxu0 %v4026_v42  ;;  %v18357_v12 = vpop.f32.mrf.mxu1  ;;  %21716 = vmatmul.mubr.f32.vlgmr.msra.gmra.mxu1 %v4033_v44  ;;  %v343_v42 = vld [vmem:[%s33738_s27 + $0x390] sm:$0xff] }
 0x3ba   : > { %v18288_v11 = vadd.f32 %v18287_v7, %v18218_v58  ;;  %21750 = vmatpush1.xpose.msra.mxu0 %v1633_v2  ;;  %21820 = vmatpush1.xpose.msra.mxu1 %v1635_v3  ;;  %v1643_v44 = vld [vmem:[%s33746_s29 + $0x2630] sm:$0x3]  ;;  %v4087_v50 = vcombine.high %v343_v42, %v343_v42  ;;  %v1646_v58 = vld [vmem:[%s33746_s29 + $0x2648] sm:$0x3]  ;;  %v4094_v59 = vrot.slane %v343_v42, %v33752_v5 }
 0x3bb   : > { %v18289_v13 = vpop.f32.mrf.mxu0  ;;  %21751 = vmatprep.subr.mxu0 %v866_v4  ;;  %v18359_v16 = vpop.f32.mrf.mxu1  ;;  %21821 = vmatprep.subr.mxu1 %v868_v8  ;;  %v880_v4 = vld [vmem:[%s33746_s29 + $0xe58] sm:$0xff]  ;;  %v886_v42 = vld [vmem:[%s33746_s29 + $0xe88] sm:$0xff] }
 0x3bc   : > { %v18358_v15 = vadd.f32 %v18357_v12, %v18288_v11  ;;  %21785 = vmatprep.mubr.f32.mxu0 %v4051_v6  ;;  %21855 = vmatprep.mubr.f32.mxu1 %v4052_v9  ;;  %v4101_v61 = vrot.slane %v4087_v50, %v33752_v5  ;;  %v4102_v2 = vcombine.high %v4094_v59, %v4094_v59  ;;  %v877_v11 = vld [vmem:[%s33746_s29 + $0xe40] sm:$0xff] }
 0x3be   : > { %21752 = vmatpush1.xpose.msra.mxu0 %v865_v14  ;;  %21822 = vmatpush1.xpose.msra.mxu1 %v867_v17  ;;  %v4103_v6 = vcombine.high %v4101_v61, %v4101_v61  ;;  %v879_v14 = vld [vmem:[%s33746_s29 + $0xe50] sm:$0xff]  ;;  %v1652_v17 = vld [vmem:[%s33746_s29 + $0x2678] sm:$0x3] }
 0x3bf   : > { %21889 = vmatprep.subr.mxu0 %v1638_v18  ;;  %21959 = vmatprep.subr.mxu1 %v1640_v20  ;;  %v1649_v20 = vld [vmem:[%s33746_s29 + $0x2660] sm:$0x3] }
 0x3c1   : > { %v18427_v27 = vpop.f32.mrf.mxu0  ;;  %21786 = vmatmul.mubr.f32.vlgmr.msra.gmra.mxu0 %v4043_v62  ;;  %v18497_v32 = vpop.f32.mrf.mxu1  ;;  %21856 = vmatmul.mubr.f32.vlgmr.msra.gmra.mxu1 %v4050_v0  ;;  %v344_v62 = vld [vmem:[%s33738_s27 + $0x398] sm:$0xff]  ;;  %v1647_v0 = vld [vmem:[%s33746_s29 + $0x2650] sm:$0x3] }
 0x3c2   : > { %v18428_v31 = vadd.f32 %v18427_v27, %v18358_v15  ;;  %21890 = vmatpush1.xpose.msra.mxu0 %v1637_v23  ;;  %21960 = vmatpush1.xpose.msra.mxu1 %v1639_v24  ;;  %v4104_v7 = vcombine.high %v344_v62, %v344_v62  ;;  %v1650_v15 = vld [vmem:[%s33746_s29 + $0x2668] sm:$0x3]  ;;  %v4111_v16 = vrot.slane %v344_v62, %v33752_v5 }
 0x3c3   : > { %v18429_v33 = vpop.f32.mrf.mxu0  ;;  %21891 = vmatprep.subr.mxu0 %v870_v25  ;;  %v18499_v36 = vpop.f32.mrf.mxu1  ;;  %21961 = vmatprep.subr.mxu1 %v872_v28  ;;  %v884_v25 = vld [vmem:[%s33746_s29 + $0xe78] sm:$0xff]  ;;  %v890_v62 = vld [vmem:[%s33746_s29 + $0xea8] sm:$0xff] }
 0x3c4   : > { %v18498_v35 = vadd.f32 %v18497_v32, %v18428_v31  ;;  %21925 = vmatprep.mubr.f32.mxu0 %v4068_v26  ;;  %21995 = vmatprep.mubr.f32.mxu1 %v4069_v29  ;;  %v4118_v18 = vrot.slane %v4104_v7, %v33752_v5  ;;  %v4119_v23 = vcombine.high %v4111_v16, %v4111_v16  ;;  %v881_v31 = vld [vmem:[%s33746_s29 + $0xe60] sm:$0xff] }
 0x3c6   : > { %21892 = vmatpush1.xpose.msra.mxu0 %v869_v34  ;;  %21962 = vmatpush1.xpose.msra.mxu1 %v871_v37  ;;  %v4120_v26 = vcombine.high %v4118_v18, %v4118_v18  ;;  %v883_v34 = vld [vmem:[%s33746_s29 + $0xe70] sm:$0xff]  ;;  %v1656_v37 = vld [vmem:[%s33746_s29 + $0x2698] sm:$0x3] }
 0x3c7   : > { %22029 = vmatprep.subr.mxu0 %v1642_v38  ;;  %22099 = vmatprep.subr.mxu1 %v1644_v40  ;;  %v1653_v40 = vld [vmem:[%s33746_s29 + $0x2680] sm:$0x3] }
 0x3c9   : > { %v18567_v47 = vpop.f32.mrf.mxu0  ;;  %21926 = vmatmul.mubr.f32.vlgmr.msra.gmra.mxu0 %v4060_v19  ;;  %v18637_v52 = vpop.f32.mrf.mxu1  ;;  %21996 = vmatmul.mubr.f32.vlgmr.msra.gmra.mxu1 %v4067_v21  ;;  %v345_v19 = vld [vmem:[%s33738_s27 + $0x3a0] sm:$0xff]  ;;  %v1651_v21 = vld [vmem:[%s33746_s29 + $0x2670] sm:$0x3] }
 0x3ca   : > { %v18568_v51 = vadd.f32 %v18567_v47, %v18498_v35  ;;  %22030 = vmatpush1.xpose.msra.mxu0 %v1641_v43  ;;  %22100 = vmatpush1.xpose.msra.mxu1 %v1643_v44  ;;  %v4121_v27 = vcombine.high %v345_v19, %v345_v19  ;;  %v1654_v35 = vld [vmem:[%s33746_s29 + $0x2688] sm:$0x3]  ;;  %v4128_v36 = vrot.slane %v345_v19, %v33752_v5 }
 0x3cb   : > { %v18569_v53 = vpop.f32.mrf.mxu0  ;;  %22031 = vmatprep.subr.mxu0 %v874_v45  ;;  %v18639_v56 = vpop.f32.mrf.mxu1  ;;  %22101 = vmatprep.subr.mxu1 %v876_v48  ;;  %v888_v45 = vld [vmem:[%s33746_s29 + $0xe98] sm:$0xff]  ;;  %v894_v19 = vld [vmem:[%s33746_s29 + $0xec8] sm:$0xff] }
 0x3cc   : > { %v18638_v55 = vadd.f32 %v18637_v52, %v18568_v51  ;;  %22065 = vmatprep.mubr.f32.mxu0 %v4085_v46  ;;  %22135 = vmatprep.mubr.f32.mxu1 %v4086_v49  ;;  %v4135_v38 = vrot.slane %v4121_v27, %v33752_v5  ;;  %v4136_v43 = vcombine.high %v4128_v36, %v4128_v36  ;;  %v885_v51 = vld [vmem:[%s33746_s29 + $0xe80] sm:$0xff] }
 0x3ce   : > { %22032 = vmatpush1.xpose.msra.mxu0 %v873_v54  ;;  %22102 = vmatpush1.xpose.msra.mxu1 %v875_v57  ;;  %v4137_v46 = vcombine.high %v4135_v38, %v4135_v38  ;;  %v887_v54 = vld [vmem:[%s33746_s29 + $0xe90] sm:$0xff]  ;;  %v1660_v57 = vld [vmem:[%s33746_s29 + $0x26b8] sm:$0x3] }
 0x3cf   : > { %22169 = vmatprep.subr.mxu0 %v1646_v58  ;;  %22239 = vmatprep.subr.mxu1 %v1648_v60  ;;  %v1657_v60 = vld [vmem:[%s33746_s29 + $0x26a0] sm:$0x3] }
 0x3d1   : > { %v18707_v3 = vpop.f32.mrf.mxu0  ;;  %22066 = vmatmul.mubr.f32.vlgmr.msra.gmra.mxu0 %v4077_v39  ;;  %v18777_v9 = vpop.f32.mrf.mxu1  ;;  %22136 = vmatmul.mubr.f32.vlgmr.msra.gmra.mxu1 %v4084_v41  ;;  %v346_v39 = vld [vmem:[%s33738_s27 + $0x3a8] sm:$0xff]  ;;  %v1655_v41 = vld [vmem:[%s33746_s29 + $0x2690] sm:$0x3] }
 0x3d2   : > { %v18708_v8 = vadd.f32 %v18707_v3, %v18638_v55  ;;  %22170 = vmatpush1.xpose.msra.mxu0 %v1645_v63  ;;  %22240 = vmatpush1.xpose.msra.mxu1 %v1647_v0  ;;  %v4138_v47 = vcombine.high %v346_v39, %v346_v39  ;;  %v1658_v55 = vld [vmem:[%s33746_s29 + $0x26a8] sm:$0x3]  ;;  %v4145_v56 = vrot.slane %v346_v39, %v33752_v5 }
 0x3d3   : > { %v18709_v10 = vpop.f32.mrf.mxu0  ;;  %22171 = vmatprep.subr.mxu0 %v878_v1  ;;  %v18779_v13 = vpop.f32.mrf.mxu1  ;;  %22241 = vmatprep.subr.mxu1 %v880_v4  ;;  %v892_v1 = vld [vmem:[%s33746_s29 + $0xeb8] sm:$0xff]  ;;  %v898_v39 = vld [vmem:[%s33746_s29 + $0xee8] sm:$0xff] }
 0x3d4   : > { %v18778_v12 = vadd.f32 %v18777_v9, %v18708_v8  ;;  %22205 = vmatprep.mubr.f32.mxu0 %v4102_v2  ;;  %22275 = vmatprep.mubr.f32.mxu1 %v4103_v6  ;;  %v4152_v58 = vrot.slane %v4138_v47, %v33752_v5  ;;  %v4153_v63 = vcombine.high %v4145_v56, %v4145_v56  ;;  %v889_v8 = vld [vmem:[%s33746_s29 + $0xea0] sm:$0xff] }
 0x3d6   : > { %22172 = vmatpush1.xpose.msra.mxu0 %v877_v11  ;;  %22242 = vmatpush1.xpose.msra.mxu1 %v879_v14  ;;  %v4154_v2 = vcombine.high %v4152_v58, %v4152_v58  ;;  %v891_v11 = vld [vmem:[%s33746_s29 + $0xeb0] sm:$0xff]  ;;  %v1664_v14 = vld [vmem:[%s33746_s29 + $0x26d8] sm:$0x3] }
 0x3d7   : > { %22309 = vmatprep.subr.mxu0 %v1650_v15  ;;  %22379 = vmatprep.subr.mxu1 %v1652_v17  ;;  %v1661_v17 = vld [vmem:[%s33746_s29 + $0x26c0] sm:$0x3] }
 0x3d9   : > { %v18847_v24 = vpop.f32.mrf.mxu0  ;;  %22206 = vmatmul.mubr.f32.vlgmr.msra.gmra.mxu0 %v4094_v59  ;;  %v18917_v29 = vpop.f32.mrf.mxu1  ;;  %22276 = vmatmul.mubr.f32.vlgmr.msra.gmra.mxu1 %v4101_v61  ;;  %v347_v59 = vld [vmem:[%s33738_s27 + $0x3b0] sm:$0xff] }
 0x3da   : > { %v18848_v28 = vadd.f32 %v18847_v24, %v18778_v12  ;;  %22310 = vmatpush1.xpose.msra.mxu0 %v1649_v20  ;;  %22380 = vmatpush1.xpose.msra.mxu1 %v1651_v21  ;;  %v1659_v61 = vld [vmem:[%s33746_s29 + $0x26b0] sm:$0x3]  ;;  %v4155_v3 = vcombine.high %v347_v59, %v347_v59  ;;  %v1662_v12 = vld [vmem:[%s33746_s29 + $0x26c8] sm:$0x3]  ;;  %v4162_v13 = vrot.slane %v347_v59, %v33752_v5 }
 0x3db   : > { %v18849_v30 = vpop.f32.mrf.mxu0  ;;  %22311 = vmatprep.subr.mxu0 %v882_v22  ;;  %v18919_v33 = vpop.f32.mrf.mxu1  ;;  %22381 = vmatprep.subr.mxu1 %v884_v25  ;;  %v896_v22 = vld [vmem:[%s33746_s29 + $0xed8] sm:$0xff]  ;;  %v902_v59 = vld [vmem:[%s33746_s29 + $0xf08] sm:$0xff] }
 0x3dc   : > { %v18918_v32 = vadd.f32 %v18917_v29, %v18848_v28  ;;  %22345 = vmatprep.mubr.f32.mxu0 %v4119_v23  ;;  %22415 = vmatprep.mubr.f32.mxu1 %v4120_v26  ;;  %v4169_v15 = vrot.slane %v4155_v3, %v33752_v5  ;;  %v4170_v20 = vcombine.high %v4162_v13, %v4162_v13  ;;  %v893_v28 = vld [vmem:[%s33746_s29 + $0xec0] sm:$0xff] }
 0x3de   : > { %22312 = vmatpush1.xpose.msra.mxu0 %v881_v31  ;;  %22382 = vmatpush1.xpose.msra.mxu1 %v883_v34  ;;  %v4171_v23 = vcombine.high %v4169_v15, %v4169_v15  ;;  %v895_v31 = vld [vmem:[%s33746_s29 + $0xed0] sm:$0xff]  ;;  %v1668_v34 = vld [vmem:[%s33746_s29 + $0x26f8] sm:$0x3] }
 0x3df   : > { %22449 = vmatprep.subr.mxu0 %v1654_v35  ;;  %22519 = vmatprep.subr.mxu1 %v1656_v37  ;;  %v1665_v37 = vld [vmem:[%s33746_s29 + $0x26e0] sm:$0x3] }
 0x3e1   : > { %v18987_v44 = vpop.f32.mrf.mxu0  ;;  %22346 = vmatmul.mubr.f32.vlgmr.msra.gmra.mxu0 %v4111_v16  ;;  %v19057_v49 = vpop.f32.mrf.mxu1  ;;  %22416 = vmatmul.mubr.f32.vlgmr.msra.gmra.mxu1 %v4118_v18  ;;  %v348_v16 = vld [vmem:[%s33738_s27 + $0x3b8] sm:$0xff]  ;;  %v1663_v18 = vld [vmem:[%s33746_s29 + $0x26d0] sm:$0x3] }
 0x3e2   : > { %v18988_v48 = vadd.f32 %v18987_v44, %v18918_v32  ;;  %22450 = vmatpush1.xpose.msra.mxu0 %v1653_v40  ;;  %22520 = vmatpush1.xpose.msra.mxu1 %v1655_v41  ;;  %v4172_v24 = vcombine.high %v348_v16, %v348_v16  ;;  %v1666_v32 = vld [vmem:[%s33746_s29 + $0x26e8] sm:$0x3]  ;;  %v4179_v33 = vrot.slane %v348_v16, %v33752_v5 }
 0x3e3   : > { %v18989_v50 = vpop.f32.mrf.mxu0  ;;  %22451 = vmatprep.subr.mxu0 %v886_v42  ;;  %v19059_v53 = vpop.f32.mrf.mxu1  ;;  %22521 = vmatprep.subr.mxu1 %v888_v45  ;;  %v900_v42 = vld [vmem:[%s33746_s29 + $0xef8] sm:$0xff]  ;;  %v906_v16 = vld [vmem:[%s33746_s29 + $0xf28] sm:$0xff] }
 0x3e4   : > { %v19058_v52 = vadd.f32 %v19057_v49, %v18988_v48  ;;  %22485 = vmatprep.mubr.f32.mxu0 %v4136_v43  ;;  %22555 = vmatprep.mubr.f32.mxu1 %v4137_v46  ;;  %v4186_v35 = vrot.slane %v4172_v24, %v33752_v5  ;;  %v4187_v40 = vcombine.high %v4179_v33, %v4179_v33  ;;  %v897_v48 = vld [vmem:[%s33746_s29 + $0xee0] sm:$0xff] }
 0x3e6   : > { %22452 = vmatpush1.xpose.msra.mxu0 %v885_v51  ;;  %22522 = vmatpush1.xpose.msra.mxu1 %v887_v54  ;;  %v4188_v43 = vcombine.high %v4186_v35, %v4186_v35  ;;  %v899_v51 = vld [vmem:[%s33746_s29 + $0xef0] sm:$0xff]  ;;  %v1672_v54 = vld [vmem:[%s33746_s29 + $0x2718] sm:$0x3] }
 0x3e7   : > { %22589 = vmatprep.subr.mxu0 %v1658_v55  ;;  %22659 = vmatprep.subr.mxu1 %v1660_v57  ;;  %v1669_v57 = vld [vmem:[%s33746_s29 + $0x2700] sm:$0x3] }
 0x3e9   : > { %v19127_v0 = vpop.f32.mrf.mxu0  ;;  %22486 = vmatmul.mubr.f32.vlgmr.msra.gmra.mxu0 %v4128_v36  ;;  %v19197_v6 = vpop.f32.mrf.mxu1  ;;  %22556 = vmatmul.mubr.f32.vlgmr.msra.gmra.mxu1 %v4135_v38  ;;  %v349_v36 = vld [vmem:[%s33738_s27 + $0x3c0] sm:$0xff]  ;;  %v1667_v38 = vld [vmem:[%s33746_s29 + $0x26f0] sm:$0x3] }
 0x3ea   : > { %v19128_v4 = vadd.f32 %v19127_v0, %v19058_v52  ;;  %22590 = vmatpush1.xpose.msra.mxu0 %v1657_v60  ;;  %22660 = vmatpush1.xpose.msra.mxu1 %v1659_v61  ;;  %v4189_v44 = vcombine.high %v349_v36, %v349_v36  ;;  %v1670_v52 = vld [vmem:[%s33746_s29 + $0x2708] sm:$0x3]  ;;  %v4196_v53 = vrot.slane %v349_v36, %v33752_v5 }
 0x3eb   : > { %v19129_v7 = vpop.f32.mrf.mxu0  ;;  %22591 = vmatprep.subr.mxu0 %v890_v62  ;;  %v19199_v10 = vpop.f32.mrf.mxu1  ;;  %22661 = vmatprep.subr.mxu1 %v892_v1  ;;  %v904_v62 = vld [vmem:[%s33746_s29 + $0xf18] sm:$0xff]  ;;  %v910_v36 = vld [vmem:[%s33746_s29 + $0xf48] sm:$0xff] }
 0x3ec   : > { %v19198_v9 = vadd.f32 %v19197_v6, %v19128_v4  ;;  %22625 = vmatprep.mubr.f32.mxu0 %v4153_v63  ;;  %22695 = vmatprep.mubr.f32.mxu1 %v4154_v2  ;;  %v4203_v55 = vrot.slane %v4189_v44, %v33752_v5  ;;  %v4204_v60 = vcombine.high %v4196_v53, %v4196_v53  ;;  %v901_v4 = vld [vmem:[%s33746_s29 + $0xf00] sm:$0xff] }
 0x3ee   : > { %22592 = vmatpush1.xpose.msra.mxu0 %v889_v8  ;;  %22662 = vmatpush1.xpose.msra.mxu1 %v891_v11  ;;  %v4205_v63 = vcombine.high %v4203_v55, %v4203_v55  ;;  %v903_v8 = vld [vmem:[%s33746_s29 + $0xf10] sm:$0xff]  ;;  %v1676_v11 = vld [vmem:[%s33746_s29 + $0x2738] sm:$0x3] }
 0x3ef   : > { %22729 = vmatprep.subr.mxu0 %v1662_v12  ;;  %22799 = vmatprep.subr.mxu1 %v1664_v14  ;;  %v1673_v14 = vld [vmem:[%s33746_s29 + $0x2720] sm:$0x3] }
 0x3f1   : > { %v19267_v21 = vpop.f32.mrf.mxu0  ;;  %22626 = vmatmul.mubr.f32.vlgmr.msra.gmra.mxu0 %v4145_v56  ;;  %v19337_v26 = vpop.f32.mrf.mxu1  ;;  %22696 = vmatmul.mubr.f32.vlgmr.msra.gmra.mxu1 %v4152_v58  ;;  %v350_v56 = vld [vmem:[%s33738_s27 + $0x3c8] sm:$0xff]  ;;  %v1671_v58 = vld [vmem:[%s33746_s29 + $0x2710] sm:$0x3] }
 0x3f2   : > { %v19268_v25 = vadd.f32 %v19267_v21, %v19198_v9  ;;  %22730 = vmatpush1.xpose.msra.mxu0 %v1661_v17  ;;  %22800 = vmatpush1.xpose.msra.mxu1 %v1663_v18  ;;  %v4206_v0 = vcombine.high %v350_v56, %v350_v56  ;;  %v1674_v9 = vld [vmem:[%s33746_s29 + $0x2728] sm:$0x3]  ;;  %v4213_v10 = vrot.slane %v350_v56, %v33752_v5 }
 0x3f3   : > { %v19269_v27 = vpop.f32.mrf.mxu0  ;;  %22731 = vmatprep.subr.mxu0 %v894_v19  ;;  %v19339_v30 = vpop.f32.mrf.mxu1  ;;  %22801 = vmatprep.subr.mxu1 %v896_v22  ;;  %v908_v19 = vld [vmem:[%s33746_s29 + $0xf38] sm:$0xff]  ;;  %v914_v56 = vld [vmem:[%s33746_s29 + $0xf68] sm:$0xff] }
 0x3f4   : > { %v19338_v29 = vadd.f32 %v19337_v26, %v19268_v25  ;;  %22765 = vmatprep.mubr.f32.mxu0 %v4170_v20  ;;  %22835 = vmatprep.mubr.f32.mxu1 %v4171_v23  ;;  %v4220_v12 = vrot.slane %v4206_v0, %v33752_v5  ;;  %v4221_v17 = vcombine.high %v4213_v10, %v4213_v10  ;;  %v905_v25 = vld [vmem:[%s33746_s29 + $0xf20] sm:$0xff] }
 0x3f6   : > { %22732 = vmatpush1.xpose.msra.mxu0 %v893_v28  ;;  %22802 = vmatpush1.xpose.msra.mxu1 %v895_v31  ;;  %v4222_v20 = vcombine.high %v4220_v12, %v4220_v12  ;;  %v907_v28 = vld [vmem:[%s33746_s29 + $0xf30] sm:$0xff]  ;;  %v1680_v31 = vld [vmem:[%s33746_s29 + $0x2758] sm:$0x3] }
 0x3f7   : > { %22869 = vmatprep.subr.mxu0 %v1666_v32  ;;  %22939 = vmatprep.subr.mxu1 %v1668_v34  ;;  %v1677_v34 = vld [vmem:[%s33746_s29 + $0x2740] sm:$0x3] }
 0x3f9   : > { %v19407_v41 = vpop.f32.mrf.mxu0  ;;  %22766 = vmatmul.mubr.f32.vlgmr.msra.gmra.mxu0 %v4162_v13  ;;  %v19477_v46 = vpop.f32.mrf.mxu1  ;;  %22836 = vmatmul.mubr.f32.vlgmr.msra.gmra.mxu1 %v4169_v15  ;;  %v351_v13 = vld [vmem:[%s33738_s27 + $0x3d0] sm:$0xff] }
 0x3fa   : > { %v19408_v45 = vadd.f32 %v19407_v41, %v19338_v29  ;;  %22870 = vmatpush1.xpose.msra.mxu0 %v1665_v37  ;;  %22940 = vmatpush1.xpose.msra.mxu1 %v1667_v38  ;;  %v1675_v15 = vld [vmem:[%s33746_s29 + $0x2730] sm:$0x3]  ;;  %v4223_v21 = vcombine.high %v351_v13, %v351_v13  ;;  %v1678_v29 = vld [vmem:[%s33746_s29 + $0x2748] sm:$0x3]  ;;  %v4230_v30 = vrot.slane %v351_v13, %v33752_v5 }
 0x3fb   : > { %v19409_v47 = vpop.f32.mrf.mxu0  ;;  %22871 = vmatprep.subr.mxu0 %v898_v39  ;;  %v19479_v50 = vpop.f32.mrf.mxu1  ;;  %22941 = vmatprep.subr.mxu1 %v900_v42  ;;  %v912_v39 = vld [vmem:[%s33746_s29 + $0xf58] sm:$0xff]  ;;  %v918_v13 = vld [vmem:[%s33746_s29 + $0xf88] sm:$0xff] }
 0x3fc   : > { %v19478_v49 = vadd.f32 %v19477_v46, %v19408_v45  ;;  %22905 = vmatprep.mubr.f32.mxu0 %v4187_v40  ;;  %22975 = vmatprep.mubr.f32.mxu1 %v4188_v43  ;;  %v4237_v32 = vrot.slane %v4223_v21, %v33752_v5  ;;  %v4238_v37 = vcombine.high %v4230_v30, %v4230_v30  ;;  %v909_v45 = vld [vmem:[%s33746_s29 + $0xf40] sm:$0xff] }
 0x3fe   : > { %22872 = vmatpush1.xpose.msra.mxu0 %v897_v48  ;;  %22942 = vmatpush1.xpose.msra.mxu1 %v899_v51  ;;  %v4239_v40 = vcombine.high %v4237_v32, %v4237_v32  ;;  %v911_v48 = vld [vmem:[%s33746_s29 + $0xf50] sm:$0xff]  ;;  %v1684_v51 = vld [vmem:[%s33746_s29 + $0x2778] sm:$0x3] }
 0x3ff   : > { %23009 = vmatprep.subr.mxu0 %v1670_v52  ;;  %23079 = vmatprep.subr.mxu1 %v1672_v54  ;;  %v1681_v54 = vld [vmem:[%s33746_s29 + $0x2760] sm:$0x3] }
 0x401   : > { %v19547_v61 = vpop.f32.mrf.mxu0  ;;  %22906 = vmatmul.mubr.f32.vlgmr.msra.gmra.mxu0 %v4179_v33  ;;  %v19617_v2 = vpop.f32.mrf.mxu1  ;;  %22976 = vmatmul.mubr.f32.vlgmr.msra.gmra.mxu1 %v4186_v35  ;;  %v352_v33 = vld [vmem:[%s33738_s27 + $0x3d8] sm:$0xff]  ;;  %v1679_v35 = vld [vmem:[%s33746_s29 + $0x2750] sm:$0x3] }
 0x402   : > { %v19548_v1 = vadd.f32 %v19547_v61, %v19478_v49  ;;  %23010 = vmatpush1.xpose.msra.mxu0 %v1669_v57  ;;  %23080 = vmatpush1.xpose.msra.mxu1 %v1671_v58  ;;  %v4240_v41 = vcombine.high %v352_v33, %v352_v33  ;;  %v1682_v49 = vld [vmem:[%s33746_s29 + $0x2768] sm:$0x3]  ;;  %v4247_v50 = vrot.slane %v352_v33, %v33752_v5 }
 0x403   : > { %v19549_v3 = vpop.f32.mrf.mxu0  ;;  %23011 = vmatprep.subr.mxu0 %v902_v59  ;;  %v19619_v7 = vpop.f32.mrf.mxu1  ;;  %23081 = vmatprep.subr.mxu1 %v904_v62  ;;  %v916_v59 = vld [vmem:[%s33746_s29 + $0xf78] sm:$0xff]  ;;  %v922_v33 = vld [vmem:[%s33746_s29 + $0xfa8] sm:$0xff] }
 0x404   : > { %v19618_v6 = vadd.f32 %v19617_v2, %v19548_v1  ;;  %23045 = vmatprep.mubr.f32.mxu0 %v4204_v60  ;;  %23115 = vmatprep.mubr.f32.mxu1 %v4205_v63  ;;  %v4254_v52 = vrot.slane %v4240_v41, %v33752_v5  ;;  %v4255_v57 = vcombine.high %v4247_v50, %v4247_v50  ;;  %v913_v1 = vld [vmem:[%s33746_s29 + $0xf60] sm:$0xff] }
 0x406   : > { %23012 = vmatpush1.xpose.msra.mxu0 %v901_v4  ;;  %23082 = vmatpush1.xpose.msra.mxu1 %v903_v8  ;;  %v4256_v60 = vcombine.high %v4254_v52, %v4254_v52  ;;  %v915_v4 = vld [vmem:[%s33746_s29 + $0xf70] sm:$0xff]  ;;  %v1688_v8 = vld [vmem:[%s33746_s29 + $0x2798] sm:$0x3] }
 0x407   : > { %23149 = vmatprep.subr.mxu0 %v1674_v9  ;;  %23219 = vmatprep.subr.mxu1 %v1676_v11  ;;  %v1685_v11 = vld [vmem:[%s33746_s29 + $0x2780] sm:$0x3] }
 0x409   : > { %v19687_v18 = vpop.f32.mrf.mxu0  ;;  %23046 = vmatmul.mubr.f32.vlgmr.msra.gmra.mxu0 %v4196_v53  ;;  %v19757_v23 = vpop.f32.mrf.mxu1  ;;  %23116 = vmatmul.mubr.f32.vlgmr.msra.gmra.mxu1 %v4203_v55  ;;  %v353_v53 = vld [vmem:[%s33738_s27 + $0x3e0] sm:$0xff]  ;;  %v1683_v55 = vld [vmem:[%s33746_s29 + $0x2770] sm:$0x3] }
 0x40a   : > { %v19688_v22 = vadd.f32 %v19687_v18, %v19618_v6  ;;  %23150 = vmatpush1.xpose.msra.mxu0 %v1673_v14  ;;  %23220 = vmatpush1.xpose.msra.mxu1 %v1675_v15  ;;  %v4257_v61 = vcombine.high %v353_v53, %v353_v53  ;;  %v1686_v6 = vld [vmem:[%s33746_s29 + $0x2788] sm:$0x3]  ;;  %v4264_v7 = vrot.slane %v353_v53, %v33752_v5 }
 0x40b   : > { %v19689_v24 = vpop.f32.mrf.mxu0  ;;  %23151 = vmatprep.subr.mxu0 %v906_v16  ;;  %v19759_v27 = vpop.f32.mrf.mxu1  ;;  %23221 = vmatprep.subr.mxu1 %v908_v19  ;;  %v920_v16 = vld [vmem:[%s33746_s29 + $0xf98] sm:$0xff]  ;;  %v926_v53 = vld [vmem:[%s33746_s29 + $0xfc8] sm:$0xff] }
 0x40c   : > { %v19758_v26 = vadd.f32 %v19757_v23, %v19688_v22  ;;  %23185 = vmatprep.mubr.f32.mxu0 %v4221_v17  ;;  %23255 = vmatprep.mubr.f32.mxu1 %v4222_v20  ;;  %v4271_v9 = vrot.slane %v4257_v61, %v33752_v5  ;;  %v4272_v14 = vcombine.high %v4264_v7, %v4264_v7  ;;  %v917_v22 = vld [vmem:[%s33746_s29 + $0xf80] sm:$0xff] }
 0x40e   : > { %23152 = vmatpush1.xpose.msra.mxu0 %v905_v25  ;;  %23222 = vmatpush1.xpose.msra.mxu1 %v907_v28  ;;  %v4273_v17 = vcombine.high %v4271_v9, %v4271_v9  ;;  %v919_v25 = vld [vmem:[%s33746_s29 + $0xf90] sm:$0xff]  ;;  %v1692_v28 = vld [vmem:[%s33746_s29 + $0x27b8] sm:$0x3] }
 0x40f   : > { %23289 = vmatprep.subr.mxu0 %v1678_v29  ;;  %23359 = vmatprep.subr.mxu1 %v1680_v31  ;;  %v1689_v31 = vld [vmem:[%s33746_s29 + $0x27a0] sm:$0x3] }
 0x411   : > { %v19827_v38 = vpop.f32.mrf.mxu0  ;;  %23186 = vmatmul.mubr.f32.vlgmr.msra.gmra.mxu0 %v4213_v10  ;;  %v19897_v43 = vpop.f32.mrf.mxu1  ;;  %23256 = vmatmul.mubr.f32.vlgmr.msra.gmra.mxu1 %v4220_v12  ;;  %v354_v10 = vld [vmem:[%s33738_s27 + $0x3e8] sm:$0xff]  ;;  %v1687_v12 = vld [vmem:[%s33746_s29 + $0x2790] sm:$0x3] }
 0x412   : > { %v19828_v42 = vadd.f32 %v19827_v38, %v19758_v26  ;;  %23290 = vmatpush1.xpose.msra.mxu0 %v1677_v34  ;;  %23360 = vmatpush1.xpose.msra.mxu1 %v1679_v35  ;;  %v4274_v18 = vcombine.high %v354_v10, %v354_v10  ;;  %v1690_v26 = vld [vmem:[%s33746_s29 + $0x27a8] sm:$0x3]  ;;  %v4281_v27 = vrot.slane %v354_v10, %v33752_v5 }
 0x413   : > { %v19829_v44 = vpop.f32.mrf.mxu0  ;;  %23291 = vmatprep.subr.mxu0 %v910_v36  ;;  %v19899_v47 = vpop.f32.mrf.mxu1  ;;  %23361 = vmatprep.subr.mxu1 %v912_v39  ;;  %v924_v36 = vld [vmem:[%s33746_s29 + $0xfb8] sm:$0xff]  ;;  %v930_v10 = vld [vmem:[%s33746_s29 + $0xfe8] sm:$0xff] }
 0x414   : > { %v19898_v46 = vadd.f32 %v19897_v43, %v19828_v42  ;;  %23325 = vmatprep.mubr.f32.mxu0 %v4238_v37  ;;  %23395 = vmatprep.mubr.f32.mxu1 %v4239_v40  ;;  %v4288_v29 = vrot.slane %v4274_v18, %v33752_v5  ;;  %v4289_v34 = vcombine.high %v4281_v27, %v4281_v27  ;;  %v921_v42 = vld [vmem:[%s33746_s29 + $0xfa0] sm:$0xff] }
 0x416   : > { %23292 = vmatpush1.xpose.msra.mxu0 %v909_v45  ;;  %23362 = vmatpush1.xpose.msra.mxu1 %v911_v48  ;;  %v4290_v37 = vcombine.high %v4288_v29, %v4288_v29  ;;  %v923_v45 = vld [vmem:[%s33746_s29 + $0xfb0] sm:$0xff]  ;;  %v1696_v48 = vld [vmem:[%s33746_s29 + $0x27d8] sm:$0x3] }
 0x417   : > { %23429 = vmatprep.subr.mxu0 %v1682_v49  ;;  %23499 = vmatprep.subr.mxu1 %v1684_v51  ;;  %v1693_v51 = vld [vmem:[%s33746_s29 + $0x27c0] sm:$0x3] }
 0x419   : > { %v19967_v58 = vpop.f32.mrf.mxu0  ;;  %23326 = vmatmul.mubr.f32.vlgmr.msra.gmra.mxu0 %v4230_v30  ;;  %v20037_v63 = vpop.f32.mrf.mxu1  ;;  %23396 = vmatmul.mubr.f32.vlgmr.msra.gmra.mxu1 %v4237_v32  ;;  %v355_v30 = vld [vmem:[%s33738_s27 + $0x3f0] sm:$0xff] }
 0x41a   : > { %v19968_v62 = vadd.f32 %v19967_v58, %v19898_v46  ;;  %23430 = vmatpush1.xpose.msra.mxu0 %v1681_v54  ;;  %23500 = vmatpush1.xpose.msra.mxu1 %v1683_v55  ;;  %v1691_v32 = vld [vmem:[%s33746_s29 + $0x27b0] sm:$0x3]  ;;  %v4291_v38 = vcombine.high %v355_v30, %v355_v30  ;;  %v1694_v46 = vld [vmem:[%s33746_s29 + $0x27c8] sm:$0x3]  ;;  %v4298_v47 = vrot.slane %v355_v30, %v33752_v5 }
 0x41b   : > { %v19969_v0 = vpop.f32.mrf.mxu0  ;;  %23431 = vmatprep.subr.mxu0 %v914_v56  ;;  %v20039_v3 = vpop.f32.mrf.mxu1  ;;  %23501 = vmatprep.subr.mxu1 %v916_v59  ;;  %v928_v56 = vld [vmem:[%s33746_s29 + $0xfd8] sm:$0xff]  ;;  %v934_v30 = vld [vmem:[%s33746_s29 + $0x1008] sm:$0xff] }
 0x41c   : > { %v20038_v2 = vadd.f32 %v20037_v63, %v19968_v62  ;;  %23465 = vmatprep.mubr.f32.mxu0 %v4255_v57  ;;  %23535 = vmatprep.mubr.f32.mxu1 %v4256_v60  ;;  %v4305_v49 = vrot.slane %v4291_v38, %v33752_v5  ;;  %v4306_v54 = vcombine.high %v4298_v47, %v4298_v47  ;;  %v925_v62 = vld [vmem:[%s33746_s29 + $0xfc0] sm:$0xff] }
 0x41e   : > { %23432 = vmatpush1.xpose.msra.mxu0 %v913_v1  ;;  %23502 = vmatpush1.xpose.msra.mxu1 %v915_v4  ;;  %v4307_v57 = vcombine.high %v4305_v49, %v4305_v49  ;;  %v927_v1 = vld [vmem:[%s33746_s29 + $0xfd0] sm:$0xff]  ;;  %v1700_v4 = vld [vmem:[%s33746_s29 + $0x27f8] sm:$0x3] }
 0x41f   : > { %23569 = vmatprep.subr.mxu0 %v1686_v6  ;;  %23639 = vmatprep.subr.mxu1 %v1688_v8  ;;  %v1697_v8 = vld [vmem:[%s33746_s29 + $0x27e0] sm:$0x3] }
 0x421   : > { %v20107_v15 = vpop.f32.mrf.mxu0  ;;  %23466 = vmatmul.mubr.f32.vlgmr.msra.gmra.mxu0 %v4247_v50  ;;  %v20177_v20 = vpop.f32.mrf.mxu1  ;;  %23536 = vmatmul.mubr.f32.vlgmr.msra.gmra.mxu1 %v4254_v52  ;;  %v356_v50 = vld [vmem:[%s33738_s27 + $0x3f8] sm:$0xff]  ;;  %v1695_v52 = vld [vmem:[%s33746_s29 + $0x27d0] sm:$0x3] }
 0x422   : > { %v20108_v19 = vadd.f32 %v20107_v15, %v20038_v2  ;;  %23570 = vmatpush1.xpose.msra.mxu0 %v1685_v11  ;;  %23640 = vmatpush1.xpose.msra.mxu1 %v1687_v12  ;;  %v4308_v58 = vcombine.high %v356_v50, %v356_v50  ;;  %v1698_v2 = vld [vmem:[%s33746_s29 + $0x27e8] sm:$0x3]  ;;  %v4315_v3 = vrot.slane %v356_v50, %v33752_v5 }
 0x423   : > { %v20109_v21 = vpop.f32.mrf.mxu0  ;;  %23571 = vmatprep.subr.mxu0 %v918_v13  ;;  %v20179_v24 = vpop.f32.mrf.mxu1  ;;  %23641 = vmatprep.subr.mxu1 %v920_v16  ;;  %v932_v13 = vld [vmem:[%s33746_s29 + $0xff8] sm:$0xff]  ;;  %v938_v50 = vld [vmem:[%s33746_s29 + $0x1028] sm:$0xff] }
 0x424   : > { %v20178_v23 = vadd.f32 %v20177_v20, %v20108_v19  ;;  %23605 = vmatprep.mubr.f32.mxu0 %v4272_v14  ;;  %23675 = vmatprep.mubr.f32.mxu1 %v4273_v17  ;;  %v4322_v6 = vrot.slane %v4308_v58, %v33752_v5  ;;  %v4323_v11 = vcombine.high %v4315_v3, %v4315_v3  ;;  %v929_v19 = vld [vmem:[%s33746_s29 + $0xfe0] sm:$0xff] }
 0x426   : > { %23572 = vmatpush1.xpose.msra.mxu0 %v917_v22  ;;  %23642 = vmatpush1.xpose.msra.mxu1 %v919_v25  ;;  %v4324_v14 = vcombine.high %v4322_v6, %v4322_v6  ;;  %v931_v22 = vld [vmem:[%s33746_s29 + $0xff0] sm:$0xff]  ;;  %v1704_v25 = vld [vmem:[%s33746_s29 + $0x2818] sm:$0x3] }
 0x427   : > { %23709 = vmatprep.subr.mxu0 %v1690_v26  ;;  %23779 = vmatprep.subr.mxu1 %v1692_v28  ;;  %v1701_v28 = vld [vmem:[%s33746_s29 + $0x2800] sm:$0x3] }
 0x429   : > { %v20247_v35 = vpop.f32.mrf.mxu0  ;;  %23606 = vmatmul.mubr.f32.vlgmr.msra.gmra.mxu0 %v4264_v7  ;;  %v20317_v40 = vpop.f32.mrf.mxu1  ;;  %23676 = vmatmul.mubr.f32.vlgmr.msra.gmra.mxu1 %v4271_v9  ;;  %v357_v7 = vld [vmem:[%s33738_s27 + $0x400] sm:$0xff]  ;;  %v1699_v9 = vld [vmem:[%s33746_s29 + $0x27f0] sm:$0x3] }
 0x42a   : > { %v20248_v39 = vadd.f32 %v20247_v35, %v20178_v23  ;;  %23710 = vmatpush1.xpose.msra.mxu0 %v1689_v31  ;;  %23780 = vmatpush1.xpose.msra.mxu1 %v1691_v32  ;;  %v4325_v15 = vcombine.high %v357_v7, %v357_v7  ;;  %v1702_v23 = vld [vmem:[%s33746_s29 + $0x2808] sm:$0x3]  ;;  %v4332_v24 = vrot.slane %v357_v7, %v33752_v5 }
 0x42b   : > { %v20249_v41 = vpop.f32.mrf.mxu0  ;;  %23711 = vmatprep.subr.mxu0 %v922_v33  ;;  %v20319_v44 = vpop.f32.mrf.mxu1  ;;  %23781 = vmatprep.subr.mxu1 %v924_v36  ;;  %v936_v33 = vld [vmem:[%s33746_s29 + $0x1018] sm:$0xff]  ;;  %v942_v7 = vld [vmem:[%s33746_s29 + $0x1048] sm:$0xff] }
 0x42c   : > { %v20318_v43 = vadd.f32 %v20317_v40, %v20248_v39  ;;  %23745 = vmatprep.mubr.f32.mxu0 %v4289_v34  ;;  %23815 = vmatprep.mubr.f32.mxu1 %v4290_v37  ;;  %v4339_v26 = vrot.slane %v4325_v15, %v33752_v5  ;;  %v4340_v31 = vcombine.high %v4332_v24, %v4332_v24  ;;  %v933_v39 = vld [vmem:[%s33746_s29 + $0x1000] sm:$0xff] }
 0x42e   : > { %23712 = vmatpush1.xpose.msra.mxu0 %v921_v42  ;;  %23782 = vmatpush1.xpose.msra.mxu1 %v923_v45  ;;  %v4341_v34 = vcombine.high %v4339_v26, %v4339_v26  ;;  %v935_v42 = vld [vmem:[%s33746_s29 + $0x1010] sm:$0xff]  ;;  %v1708_v45 = vld [vmem:[%s33746_s29 + $0x2838] sm:$0x3] }
 0x42f   : > { %23849 = vmatprep.subr.mxu0 %v1694_v46  ;;  %23919 = vmatprep.subr.mxu1 %v1696_v48  ;;  %v1705_v48 = vld [vmem:[%s33746_s29 + $0x2820] sm:$0x3] }
 0x431   : > { %v20387_v55 = vpop.f32.mrf.mxu0  ;;  %23746 = vmatmul.mubr.f32.vlgmr.msra.gmra.mxu0 %v4281_v27  ;;  %v20457_v60 = vpop.f32.mrf.mxu1  ;;  %23816 = vmatmul.mubr.f32.vlgmr.msra.gmra.mxu1 %v4288_v29  ;;  %v358_v27 = vld [vmem:[%s33738_s27 + $0x408] sm:$0xff]  ;;  %v1703_v29 = vld [vmem:[%s33746_s29 + $0x2810] sm:$0x3] }
 0x432   : > { %v20388_v59 = vadd.f32 %v20387_v55, %v20318_v43  ;;  %23850 = vmatpush1.xpose.msra.mxu0 %v1693_v51  ;;  %23920 = vmatpush1.xpose.msra.mxu1 %v1695_v52  ;;  %v4342_v35 = vcombine.high %v358_v27, %v358_v27  ;;  %v1706_v43 = vld [vmem:[%s33746_s29 + $0x2828] sm:$0x3]  ;;  %v4349_v44 = vrot.slane %v358_v27, %v33752_v5 }
 0x433   : > { %v20389_v61 = vpop.f32.mrf.mxu0  ;;  %23851 = vmatprep.subr.mxu0 %v926_v53  ;;  %v20459_v0 = vpop.f32.mrf.mxu1  ;;  %23921 = vmatprep.subr.mxu1 %v928_v56  ;;  %v940_v53 = vld [vmem:[%s33746_s29 + $0x1038] sm:$0xff]  ;;  %v946_v27 = vld [vmem:[%s33746_s29 + $0x1068] sm:$0xff] }
 0x434   : > { %v20458_v63 = vadd.f32 %v20457_v60, %v20388_v59  ;;  %23885 = vmatprep.mubr.f32.mxu0 %v4306_v54  ;;  %23955 = vmatprep.mubr.f32.mxu1 %v4307_v57  ;;  %v4356_v46 = vrot.slane %v4342_v35, %v33752_v5  ;;  %v4357_v51 = vcombine.high %v4349_v44, %v4349_v44  ;;  %v937_v59 = vld [vmem:[%s33746_s29 + $0x1020] sm:$0xff] }
 0x436   : > { %23852 = vmatpush1.xpose.msra.mxu0 %v925_v62  ;;  %23922 = vmatpush1.xpose.msra.mxu1 %v927_v1  ;;  %v4358_v54 = vcombine.high %v4356_v46, %v4356_v46  ;;  %v939_v62 = vld [vmem:[%s33746_s29 + $0x1030] sm:$0xff]  ;;  %v1712_v1 = vld [vmem:[%s33746_s29 + $0x2858] sm:$0x3] }
 0x437   : > { %23989 = vmatprep.subr.mxu0 %v1698_v2  ;;  %24059 = vmatprep.subr.mxu1 %v1700_v4  ;;  %v1709_v4 = vld [vmem:[%s33746_s29 + $0x2840] sm:$0x3] }
 0x439   : > { %v20527_v12 = vpop.f32.mrf.mxu0  ;;  %23886 = vmatmul.mubr.f32.vlgmr.msra.gmra.mxu0 %v4298_v47  ;;  %v20597_v17 = vpop.f32.mrf.mxu1  ;;  %23956 = vmatmul.mubr.f32.vlgmr.msra.gmra.mxu1 %v4305_v49  ;;  %v359_v47 = vld [vmem:[%s33738_s27 + $0x410] sm:$0xff] }
 0x43a   : > { %v20528_v16 = vadd.f32 %v20527_v12, %v20458_v63  ;;  %23990 = vmatpush1.xpose.msra.mxu0 %v1697_v8  ;;  %24060 = vmatpush1.xpose.msra.mxu1 %v1699_v9  ;;  %v1707_v49 = vld [vmem:[%s33746_s29 + $0x2830] sm:$0x3]  ;;  %v4359_v55 = vcombine.high %v359_v47, %v359_v47  ;;  %v1710_v63 = vld [vmem:[%s33746_s29 + $0x2848] sm:$0x3]  ;;  %v4366_v0 = vrot.slane %v359_v47, %v33752_v5 }
 0x43b   : > { %v20529_v18 = vpop.f32.mrf.mxu0  ;;  %23991 = vmatprep.subr.mxu0 %v930_v10  ;;  %v20599_v21 = vpop.f32.mrf.mxu1  ;;  %24061 = vmatprep.subr.mxu1 %v932_v13  ;;  %v944_v10 = vld [vmem:[%s33746_s29 + $0x1058] sm:$0xff]  ;;  %v950_v47 = vld [vmem:[%s33746_s29 + $0x1088] sm:$0xff] }
 0x43c   : > { %v20598_v20 = vadd.f32 %v20597_v17, %v20528_v16  ;;  %24025 = vmatprep.mubr.f32.mxu0 %v4323_v11  ;;  %24095 = vmatprep.mubr.f32.mxu1 %v4324_v14  ;;  %v4373_v2 = vrot.slane %v4359_v55, %v33752_v5  ;;  %v4374_v8 = vcombine.high %v4366_v0, %v4366_v0  ;;  %v941_v16 = vld [vmem:[%s33746_s29 + $0x1040] sm:$0xff] }
 0x43e   : > { %23992 = vmatpush1.xpose.msra.mxu0 %v929_v19  ;;  %24062 = vmatpush1.xpose.msra.mxu1 %v931_v22  ;;  %v4375_v11 = vcombine.high %v4373_v2, %v4373_v2  ;;  %v943_v19 = vld [vmem:[%s33746_s29 + $0x1050] sm:$0xff]  ;;  %v1716_v22 = vld [vmem:[%s33746_s29 + $0x2878] sm:$0x3] }
 0x43f   : > { %24129 = vmatprep.subr.mxu0 %v1702_v23  ;;  %24199 = vmatprep.subr.mxu1 %v1704_v25  ;;  %v1713_v25 = vld [vmem:[%s33746_s29 + $0x2860] sm:$0x3] }
 0x441   : > { %v20667_v32 = vpop.f32.mrf.mxu0  ;;  %24026 = vmatmul.mubr.f32.vlgmr.msra.gmra.mxu0 %v4315_v3  ;;  %v20737_v37 = vpop.f32.mrf.mxu1  ;;  %24096 = vmatmul.mubr.f32.vlgmr.msra.gmra.mxu1 %v4322_v6  ;;  %v360_v3 = vld [vmem:[%s33738_s27 + $0x418] sm:$0xff]  ;;  %v1711_v6 = vld [vmem:[%s33746_s29 + $0x2850] sm:$0x3] }
 0x442   : > { %v20668_v36 = vadd.f32 %v20667_v32, %v20598_v20  ;;  %24130 = vmatpush1.xpose.msra.mxu0 %v1701_v28  ;;  %24200 = vmatpush1.xpose.msra.mxu1 %v1703_v29  ;;  %v4376_v12 = vcombine.high %v360_v3, %v360_v3  ;;  %v1714_v20 = vld [vmem:[%s33746_s29 + $0x2868] sm:$0x3]  ;;  %v4383_v21 = vrot.slane %v360_v3, %v33752_v5 }
 0x443   : > { %v20669_v38 = vpop.f32.mrf.mxu0  ;;  %24131 = vmatprep.subr.mxu0 %v934_v30  ;;  %v20739_v41 = vpop.f32.mrf.mxu1  ;;  %24201 = vmatprep.subr.mxu1 %v936_v33  ;;  %v948_v30 = vld [vmem:[%s33746_s29 + $0x1078] sm:$0xff]  ;;  %v954_v3 = vld [vmem:[%s33746_s29 + $0x10a8] sm:$0xff] }
 0x444   : > { %v20738_v40 = vadd.f32 %v20737_v37, %v20668_v36  ;;  %24165 = vmatprep.mubr.f32.mxu0 %v4340_v31  ;;  %24235 = vmatprep.mubr.f32.mxu1 %v4341_v34  ;;  %v4390_v23 = vrot.slane %v4376_v12, %v33752_v5  ;;  %v4391_v28 = vcombine.high %v4383_v21, %v4383_v21  ;;  %v945_v36 = vld [vmem:[%s33746_s29 + $0x1060] sm:$0xff] }
 0x446   : > { %24132 = vmatpush1.xpose.msra.mxu0 %v933_v39  ;;  %24202 = vmatpush1.xpose.msra.mxu1 %v935_v42  ;;  %v4392_v31 = vcombine.high %v4390_v23, %v4390_v23  ;;  %v947_v39 = vld [vmem:[%s33746_s29 + $0x1070] sm:$0xff]  ;;  %v1720_v42 = vld [vmem:[%s33746_s29 + $0x2898] sm:$0x3] }
 0x447   : > { %24269 = vmatprep.subr.mxu0 %v1706_v43  ;;  %24339 = vmatprep.subr.mxu1 %v1708_v45  ;;  %v1717_v45 = vld [vmem:[%s33746_s29 + $0x2880] sm:$0x3] }
 0x449   : > { %v20807_v52 = vpop.f32.mrf.mxu0  ;;  %24166 = vmatmul.mubr.f32.vlgmr.msra.gmra.mxu0 %v4332_v24  ;;  %v20877_v57 = vpop.f32.mrf.mxu1  ;;  %24236 = vmatmul.mubr.f32.vlgmr.msra.gmra.mxu1 %v4339_v26  ;;  %v361_v24 = vld [vmem:[%s33738_s27 + $0x420] sm:$0xff]  ;;  %v1715_v26 = vld [vmem:[%s33746_s29 + $0x2870] sm:$0x3] }
 0x44a   : > { %v20808_v56 = vadd.f32 %v20807_v52, %v20738_v40  ;;  %24270 = vmatpush1.xpose.msra.mxu0 %v1705_v48  ;;  %24340 = vmatpush1.xpose.msra.mxu1 %v1707_v49  ;;  %v4393_v32 = vcombine.high %v361_v24, %v361_v24  ;;  %v1718_v40 = vld [vmem:[%s33746_s29 + $0x2888] sm:$0x3]  ;;  %v4400_v41 = vrot.slane %v361_v24, %v33752_v5 }
 0x44b   : > { %v20809_v58 = vpop.f32.mrf.mxu0  ;;  %24271 = vmatprep.subr.mxu0 %v938_v50  ;;  %v20879_v61 = vpop.f32.mrf.mxu1  ;;  %24341 = vmatprep.subr.mxu1 %v940_v53  ;;  %v952_v50 = vld [vmem:[%s33746_s29 + $0x1098] sm:$0xff]  ;;  %v958_v24 = vld [vmem:[%s33746_s29 + $0x10c8] sm:$0xff] }
 0x44c   : > { %v20878_v60 = vadd.f32 %v20877_v57, %v20808_v56  ;;  %24305 = vmatprep.mubr.f32.mxu0 %v4357_v51  ;;  %24375 = vmatprep.mubr.f32.mxu1 %v4358_v54  ;;  %v4407_v43 = vrot.slane %v4393_v32, %v33752_v5  ;;  %v4408_v48 = vcombine.high %v4400_v41, %v4400_v41  ;;  %v949_v56 = vld [vmem:[%s33746_s29 + $0x1080] sm:$0xff] }
 0x44e   : > { %24272 = vmatpush1.xpose.msra.mxu0 %v937_v59  ;;  %24342 = vmatpush1.xpose.msra.mxu1 %v939_v62  ;;  %v4409_v51 = vcombine.high %v4407_v43, %v4407_v43  ;;  %v951_v59 = vld [vmem:[%s33746_s29 + $0x1090] sm:$0xff]  ;;  %v1724_v62 = vld [vmem:[%s33746_s29 + $0x28b8] sm:$0x3] }
 0x44f   : > { %24409 = vmatprep.subr.mxu0 %v1710_v63  ;;  %24479 = vmatprep.subr.mxu1 %v1712_v1  ;;  %v1721_v1 = vld [vmem:[%s33746_s29 + $0x28a0] sm:$0x3] }
 0x451   : > { %v20947_v9 = vpop.f32.mrf.mxu0  ;;  %24306 = vmatmul.mubr.f32.vlgmr.msra.gmra.mxu0 %v4349_v44  ;;  %v21017_v14 = vpop.f32.mrf.mxu1  ;;  %24376 = vmatmul.mubr.f32.vlgmr.msra.gmra.mxu1 %v4356_v46  ;;  %v362_v44 = vld [vmem:[%s33738_s27 + $0x428] sm:$0xff]  ;;  %v1719_v46 = vld [vmem:[%s33746_s29 + $0x2890] sm:$0x3] }
 0x452   : > { %v20948_v13 = vadd.f32 %v20947_v9, %v20878_v60  ;;  %24410 = vmatpush1.xpose.msra.mxu0 %v1709_v4  ;;  %24480 = vmatpush1.xpose.msra.mxu1 %v1711_v6  ;;  %v4410_v52 = vcombine.high %v362_v44, %v362_v44  ;;  %v1722_v60 = vld [vmem:[%s33746_s29 + $0x28a8] sm:$0x3]  ;;  %v4417_v61 = vrot.slane %v362_v44, %v33752_v5 }
 0x453   : > { %v20949_v15 = vpop.f32.mrf.mxu0  ;;  %24411 = vmatprep.subr.mxu0 %v942_v7  ;;  %v21019_v18 = vpop.f32.mrf.mxu1  ;;  %24481 = vmatprep.subr.mxu1 %v944_v10  ;;  %v956_v7 = vld [vmem:[%s33746_s29 + $0x10b8] sm:$0xff]  ;;  %v962_v44 = vld [vmem:[%s33746_s29 + $0x10e8] sm:$0xff] }
 0x454   : > { %v21018_v17 = vadd.f32 %v21017_v14, %v20948_v13  ;;  %24445 = vmatprep.mubr.f32.mxu0 %v4374_v8  ;;  %24515 = vmatprep.mubr.f32.mxu1 %v4375_v11  ;;  %v4424_v63 = vrot.slane %v4410_v52, %v33752_v5  ;;  %v4425_v4 = vcombine.high %v4417_v61, %v4417_v61  ;;  %v953_v13 = vld [vmem:[%s33746_s29 + $0x10a0] sm:$0xff] }
 0x456   : > { %24412 = vmatpush1.xpose.msra.mxu0 %v941_v16  ;;  %24482 = vmatpush1.xpose.msra.mxu1 %v943_v19  ;;  %v4426_v8 = vcombine.high %v4424_v63, %v4424_v63  ;;  %v955_v16 = vld [vmem:[%s33746_s29 + $0x10b0] sm:$0xff]  ;;  %v1728_v19 = vld [vmem:[%s33746_s29 + $0x28d8] sm:$0x3] }
 0x457   : > { %24549 = vmatprep.subr.mxu0 %v1714_v20  ;;  %24619 = vmatprep.subr.mxu1 %v1716_v22  ;;  %v1725_v22 = vld [vmem:[%s33746_s29 + $0x28c0] sm:$0x3] }
 0x459   : > { %v21087_v29 = vpop.f32.mrf.mxu0  ;;  %24446 = vmatmul.mubr.f32.vlgmr.msra.gmra.mxu0 %v4366_v0  ;;  %v21157_v34 = vpop.f32.mrf.mxu1  ;;  %24516 = vmatmul.mubr.f32.vlgmr.msra.gmra.mxu1 %v4373_v2  ;;  %v363_v0 = vld [vmem:[%s33738_s27 + $0x430] sm:$0xff] }
 0x45a   : > { %v21088_v33 = vadd.f32 %v21087_v29, %v21018_v17  ;;  %24550 = vmatpush1.xpose.msra.mxu0 %v1713_v25  ;;  %24620 = vmatpush1.xpose.msra.mxu1 %v1715_v26  ;;  %v1723_v2 = vld [vmem:[%s33746_s29 + $0x28b0] sm:$0x3]  ;;  %v4427_v9 = vcombine.high %v363_v0, %v363_v0  ;;  %v1726_v17 = vld [vmem:[%s33746_s29 + $0x28c8] sm:$0x3]  ;;  %v4434_v18 = vrot.slane %v363_v0, %v33752_v5 }
 0x45b   : > { %v21089_v35 = vpop.f32.mrf.mxu0  ;;  %24551 = vmatprep.subr.mxu0 %v946_v27  ;;  %v21159_v38 = vpop.f32.mrf.mxu1  ;;  %24621 = vmatprep.subr.mxu1 %v948_v30  ;;  %v960_v27 = vld [vmem:[%s33746_s29 + $0x10d8] sm:$0xff]  ;;  %v966_v0 = vld [vmem:[%s33746_s29 + $0x1108] sm:$0xff] }
 0x45c   : > { %v21158_v37 = vadd.f32 %v21157_v34, %v21088_v33  ;;  %24585 = vmatprep.mubr.f32.mxu0 %v4391_v28  ;;  %24655 = vmatprep.mubr.f32.mxu1 %v4392_v31  ;;  %v4441_v20 = vrot.slane %v4427_v9, %v33752_v5  ;;  %v4442_v25 = vcombine.high %v4434_v18, %v4434_v18  ;;  %v957_v33 = vld [vmem:[%s33746_s29 + $0x10c0] sm:$0xff] }
 0x45e   : > { %24552 = vmatpush1.xpose.msra.mxu0 %v945_v36  ;;  %24622 = vmatpush1.xpose.msra.mxu1 %v947_v39  ;;  %v4443_v28 = vcombine.high %v4441_v20, %v4441_v20  ;;  %v959_v36 = vld [vmem:[%s33746_s29 + $0x10d0] sm:$0xff]  ;;  %v1732_v39 = vld [vmem:[%s33746_s29 + $0x28f8] sm:$0x3] }
 0x45f   : > { %24689 = vmatprep.subr.mxu0 %v1718_v40  ;;  %24759 = vmatprep.subr.mxu1 %v1720_v42  ;;  %v1729_v42 = vld [vmem:[%s33746_s29 + $0x28e0] sm:$0x3] }
 0x461   : > { %v21227_v49 = vpop.f32.mrf.mxu0  ;;  %24586 = vmatmul.mubr.f32.vlgmr.msra.gmra.mxu0 %v4383_v21  ;;  %v21297_v54 = vpop.f32.mrf.mxu1  ;;  %24656 = vmatmul.mubr.f32.vlgmr.msra.gmra.mxu1 %v4390_v23  ;;  %v364_v21 = vld [vmem:[%s33738_s27 + $0x438] sm:$0xff]  ;;  %v1727_v23 = vld [vmem:[%s33746_s29 + $0x28d0] sm:$0x3] }
 0x462   : > { %v21228_v53 = vadd.f32 %v21227_v49, %v21158_v37  ;;  %24690 = vmatpush1.xpose.msra.mxu0 %v1717_v45  ;;  %24760 = vmatpush1.xpose.msra.mxu1 %v1719_v46  ;;  %v4444_v29 = vcombine.high %v364_v21, %v364_v21  ;;  %v1730_v37 = vld [vmem:[%s33746_s29 + $0x28e8] sm:$0x3]  ;;  %v4451_v38 = vrot.slane %v364_v21, %v33752_v5 }
 0x463   : > { %v21229_v55 = vpop.f32.mrf.mxu0  ;;  %24691 = vmatprep.subr.mxu0 %v950_v47  ;;  %v21299_v58 = vpop.f32.mrf.mxu1  ;;  %24761 = vmatprep.subr.mxu1 %v952_v50  ;;  %v964_v47 = vld [vmem:[%s33746_s29 + $0x10f8] sm:$0xff]  ;;  %v970_v21 = vld [vmem:[%s33746_s29 + $0x1128] sm:$0xff] }
 0x464   : > { %v21298_v57 = vadd.f32 %v21297_v54, %v21228_v53  ;;  %24725 = vmatprep.mubr.f32.mxu0 %v4408_v48  ;;  %24795 = vmatprep.mubr.f32.mxu1 %v4409_v51  ;;  %v4458_v40 = vrot.slane %v4444_v29, %v33752_v5  ;;  %v4459_v45 = vcombine.high %v4451_v38, %v4451_v38  ;;  %v961_v53 = vld [vmem:[%s33746_s29 + $0x10e0] sm:$0xff] }
 0x466   : > { %24692 = vmatpush1.xpose.msra.mxu0 %v949_v56  ;;  %24762 = vmatpush1.xpose.msra.mxu1 %v951_v59  ;;  %v4460_v48 = vcombine.high %v4458_v40, %v4458_v40  ;;  %v963_v56 = vld [vmem:[%s33746_s29 + $0x10f0] sm:$0xff]  ;;  %v1736_v59 = vld [vmem:[%s33746_s29 + $0x2918] sm:$0x3] }
 0x467   : > { %24829 = vmatprep.subr.mxu0 %v1722_v60  ;;  %24899 = vmatprep.subr.mxu1 %v1724_v62  ;;  %v1733_v62 = vld [vmem:[%s33746_s29 + $0x2900] sm:$0x3] }
 0x469   : > { %v21367_v6 = vpop.f32.mrf.mxu0  ;;  %24726 = vmatmul.mubr.f32.vlgmr.msra.gmra.mxu0 %v4400_v41  ;;  %v21437_v11 = vpop.f32.mrf.mxu1  ;;  %24796 = vmatmul.mubr.f32.vlgmr.msra.gmra.mxu1 %v4407_v43  ;;  %v365_v41 = vld [vmem:[%s33738_s27 + $0x440] sm:$0xff]  ;;  %v1731_v43 = vld [vmem:[%s33746_s29 + $0x28f0] sm:$0x3] }
 0x46a   : > { %v21368_v10 = vadd.f32 %v21367_v6, %v21298_v57  ;;  %24830 = vmatpush1.xpose.msra.mxu0 %v1721_v1  ;;  %24900 = vmatpush1.xpose.msra.mxu1 %v1723_v2  ;;  %v4461_v49 = vcombine.high %v365_v41, %v365_v41  ;;  %v1734_v57 = vld [vmem:[%s33746_s29 + $0x2908] sm:$0x3]  ;;  %v4468_v58 = vrot.slane %v365_v41, %v33752_v5 }
 0x46b   : > { %v21369_v12 = vpop.f32.mrf.mxu0  ;;  %24831 = vmatprep.subr.mxu0 %v954_v3  ;;  %v21439_v15 = vpop.f32.mrf.mxu1  ;;  %24901 = vmatprep.subr.mxu1 %v956_v7  ;;  %v968_v3 = vld [vmem:[%s33746_s29 + $0x1118] sm:$0xff]  ;;  %v974_v41 = vld [vmem:[%s33746_s29 + $0x1148] sm:$0xff] }
 0x46c   : > { %v21438_v14 = vadd.f32 %v21437_v11, %v21368_v10  ;;  %24865 = vmatprep.mubr.f32.mxu0 %v4425_v4  ;;  %24935 = vmatprep.mubr.f32.mxu1 %v4426_v8  ;;  %v4475_v60 = vrot.slane %v4461_v49, %v33752_v5  ;;  %v4476_v1 = vcombine.high %v4468_v58, %v4468_v58  ;;  %v965_v10 = vld [vmem:[%s33746_s29 + $0x1100] sm:$0xff] }
 0x46e   : > { %24832 = vmatpush1.xpose.msra.mxu0 %v953_v13  ;;  %24902 = vmatpush1.xpose.msra.mxu1 %v955_v16  ;;  %v4477_v4 = vcombine.high %v4475_v60, %v4475_v60  ;;  %v967_v13 = vld [vmem:[%s33746_s29 + $0x1110] sm:$0xff]  ;;  %v1740_v16 = vld [vmem:[%s33746_s29 + $0x2938] sm:$0x3] }
 0x46f   : > { %24969 = vmatprep.subr.mxu0 %v1726_v17  ;;  %25039 = vmatprep.subr.mxu1 %v1728_v19  ;;  %v1737_v19 = vld [vmem:[%s33746_s29 + $0x2920] sm:$0x3] }
 0x471   : > { %v21507_v26 = vpop.f32.mrf.mxu0  ;;  %24866 = vmatmul.mubr.f32.vlgmr.msra.gmra.mxu0 %v4417_v61  ;;  %v21577_v31 = vpop.f32.mrf.mxu1  ;;  %24936 = vmatmul.mubr.f32.vlgmr.msra.gmra.mxu1 %v4424_v63  ;;  %v366_v61 = vld [vmem:[%s33738_s27 + $0x448] sm:$0xff]  ;;  %v1735_v63 = vld [vmem:[%s33746_s29 + $0x2910] sm:$0x3] }
 0x472   : > { %v21508_v30 = vadd.f32 %v21507_v26, %v21438_v14  ;;  %24970 = vmatpush1.xpose.msra.mxu0 %v1725_v22  ;;  %25040 = vmatpush1.xpose.msra.mxu1 %v1727_v23  ;;  %v4478_v6 = vcombine.high %v366_v61, %v366_v61  ;;  %v1738_v14 = vld [vmem:[%s33746_s29 + $0x2928] sm:$0x3]  ;;  %v4485_v15 = vrot.slane %v366_v61, %v33752_v5 }
 0x473   : > { %v21509_v32 = vpop.f32.mrf.mxu0  ;;  %24971 = vmatprep.subr.mxu0 %v958_v24  ;;  %v21579_v35 = vpop.f32.mrf.mxu1  ;;  %25041 = vmatprep.subr.mxu1 %v960_v27  ;;  %v972_v24 = vld [vmem:[%s33746_s29 + $0x1138] sm:$0xff]  ;;  %v978_v61 = vld [vmem:[%s33746_s29 + $0x1168] sm:$0xff] }
 0x474   : > { %v21578_v34 = vadd.f32 %v21577_v31, %v21508_v30  ;;  %25005 = vmatprep.mubr.f32.mxu0 %v4442_v25  ;;  %25075 = vmatprep.mubr.f32.mxu1 %v4443_v28  ;;  %v4492_v17 = vrot.slane %v4478_v6, %v33752_v5  ;;  %v4493_v22 = vcombine.high %v4485_v15, %v4485_v15  ;;  %v969_v30 = vld [vmem:[%s33746_s29 + $0x1120] sm:$0xff] }
 0x476   : > { %24972 = vmatpush1.xpose.msra.mxu0 %v957_v33  ;;  %25042 = vmatpush1.xpose.msra.mxu1 %v959_v36  ;;  %v4494_v25 = vcombine.high %v4492_v17, %v4492_v17  ;;  %v971_v33 = vld [vmem:[%s33746_s29 + $0x1130] sm:$0xff]  ;;  %v1744_v36 = vld [vmem:[%s33746_s29 + $0x2958] sm:$0x3] }
 0x477   : > { %25109 = vmatprep.subr.mxu0 %v1730_v37  ;;  %25179 = vmatprep.subr.mxu1 %v1732_v39  ;;  %v1741_v39 = vld [vmem:[%s33746_s29 + $0x2940] sm:$0x3] }
 0x479   : > { %v21647_v46 = vpop.f32.mrf.mxu0  ;;  %25006 = vmatmul.mubr.f32.vlgmr.msra.gmra.mxu0 %v4434_v18  ;;  %v21717_v51 = vpop.f32.mrf.mxu1  ;;  %25076 = vmatmul.mubr.f32.vlgmr.msra.gmra.mxu1 %v4441_v20  ;;  %v367_v18 = vld [vmem:[%s33738_s27 + $0x450] sm:$0xff] }
 0x47a   : > { %v21648_v50 = vadd.f32 %v21647_v46, %v21578_v34  ;;  %25110 = vmatpush1.xpose.msra.mxu0 %v1729_v42  ;;  %25180 = vmatpush1.xpose.msra.mxu1 %v1731_v43  ;;  %v1739_v20 = vld [vmem:[%s33746_s29 + $0x2930] sm:$0x3]  ;;  %v4495_v26 = vcombine.high %v367_v18, %v367_v18  ;;  %v1742_v34 = vld [vmem:[%s33746_s29 + $0x2948] sm:$0x3]  ;;  %v4502_v35 = vrot.slane %v367_v18, %v33752_v5 }
 0x47b   : > { %v21649_v52 = vpop.f32.mrf.mxu0  ;;  %25111 = vmatprep.subr.mxu0 %v962_v44  ;;  %v21719_v55 = vpop.f32.mrf.mxu1  ;;  %25181 = vmatprep.subr.mxu1 %v964_v47  ;;  %v976_v44 = vld [vmem:[%s33746_s29 + $0x1158] sm:$0xff]  ;;  %v982_v18 = vld [vmem:[%s33746_s29 + $0x1188] sm:$0xff] }
 0x47c   : > { %v21718_v54 = vadd.f32 %v21717_v51, %v21648_v50  ;;  %25145 = vmatprep.mubr.f32.mxu0 %v4459_v45  ;;  %25215 = vmatprep.mubr.f32.mxu1 %v4460_v48  ;;  %v4509_v37 = vrot.slane %v4495_v26, %v33752_v5  ;;  %v4510_v42 = vcombine.high %v4502_v35, %v4502_v35  ;;  %v973_v50 = vld [vmem:[%s33746_s29 + $0x1140] sm:$0xff] }
 0x47e   : > { %25112 = vmatpush1.xpose.msra.mxu0 %v961_v53  ;;  %25182 = vmatpush1.xpose.msra.mxu1 %v963_v56  ;;  %v4511_v45 = vcombine.high %v4509_v37, %v4509_v37  ;;  %v975_v53 = vld [vmem:[%s33746_s29 + $0x1150] sm:$0xff]  ;;  %v1748_v56 = vld [vmem:[%s33746_s29 + $0x2978] sm:$0x3] }
 0x47f   : > { %25249 = vmatprep.subr.mxu0 %v1734_v57  ;;  %25319 = vmatprep.subr.mxu1 %v1736_v59  ;;  %v1745_v59 = vld [vmem:[%s33746_s29 + $0x2960] sm:$0x3] }
 0x481   : > { %v21787_v2 = vpop.f32.mrf.mxu0  ;;  %25146 = vmatmul.mubr.f32.vlgmr.msra.gmra.mxu0 %v4451_v38  ;;  %v21857_v8 = vpop.f32.mrf.mxu1  ;;  %25216 = vmatmul.mubr.f32.vlgmr.msra.gmra.mxu1 %v4458_v40  ;;  %v368_v38 = vld [vmem:[%s33738_s27 + $0x458] sm:$0xff]  ;;  %v1743_v40 = vld [vmem:[%s33746_s29 + $0x2950] sm:$0x3] }
 0x482   : > { %v21788_v7 = vadd.f32 %v21787_v2, %v21718_v54  ;;  %25250 = vmatpush1.xpose.msra.mxu0 %v1733_v62  ;;  %25320 = vmatpush1.xpose.msra.mxu1 %v1735_v63  ;;  %v4512_v46 = vcombine.high %v368_v38, %v368_v38  ;;  %v1746_v54 = vld [vmem:[%s33746_s29 + $0x2968] sm:$0x3]  ;;  %v4519_v55 = vrot.slane %v368_v38, %v33752_v5 }
 0x483   : > { %v21789_v9 = vpop.f32.mrf.mxu0  ;;  %25251 = vmatprep.subr.mxu0 %v966_v0  ;;  %v21859_v12 = vpop.f32.mrf.mxu1  ;;  %25321 = vmatprep.subr.mxu1 %v968_v3  ;;  %v980_v0 = vld [vmem:[%s33746_s29 + $0x1178] sm:$0xff]  ;;  %v986_v38 = vld [vmem:[%s33746_s29 + $0x11a8] sm:$0xff] }
 0x484   : > { %v21858_v11 = vadd.f32 %v21857_v8, %v21788_v7  ;;  %25285 = vmatprep.mubr.f32.mxu0 %v4476_v1  ;;  %25355 = vmatprep.mubr.f32.mxu1 %v4477_v4  ;;  %v4526_v57 = vrot.slane %v4512_v46, %v33752_v5  ;;  %v4527_v62 = vcombine.high %v4519_v55, %v4519_v55  ;;  %v977_v7 = vld [vmem:[%s33746_s29 + $0x1160] sm:$0xff] }
 0x486   : > { %25252 = vmatpush1.xpose.msra.mxu0 %v965_v10  ;;  %25322 = vmatpush1.xpose.msra.mxu1 %v967_v13  ;;  %v4528_v1 = vcombine.high %v4526_v57, %v4526_v57  ;;  %v979_v10 = vld [vmem:[%s33746_s29 + $0x1170] sm:$0xff]  ;;  %v1752_v13 = vld [vmem:[%s33746_s29 + $0x2998] sm:$0x3] }
 0x487   : > { %25389 = vmatprep.subr.mxu0 %v1738_v14  ;;  %25459 = vmatprep.subr.mxu1 %v1740_v16  ;;  %v1749_v16 = vld [vmem:[%s33746_s29 + $0x2980] sm:$0x3] }
 0x489   : > { %v21927_v23 = vpop.f32.mrf.mxu0  ;;  %25286 = vmatmul.mubr.f32.vlgmr.msra.gmra.mxu0 %v4468_v58  ;;  %v21997_v28 = vpop.f32.mrf.mxu1  ;;  %25356 = vmatmul.mubr.f32.vlgmr.msra.gmra.mxu1 %v4475_v60  ;;  %v369_v58 = vld [vmem:[%s33738_s27 + $0x460] sm:$0xff]  ;;  %v1747_v60 = vld [vmem:[%s33746_s29 + $0x2970] sm:$0x3] }
 0x48a   : > { %v21928_v27 = vadd.f32 %v21927_v23, %v21858_v11  ;;  %25390 = vmatpush1.xpose.msra.mxu0 %v1737_v19  ;;  %25460 = vmatpush1.xpose.msra.mxu1 %v1739_v20  ;;  %v4529_v2 = vcombine.high %v369_v58, %v369_v58  ;;  %v1750_v11 = vld [vmem:[%s33746_s29 + $0x2988] sm:$0x3]  ;;  %v4536_v12 = vrot.slane %v369_v58, %v33752_v5 }
 0x48b   : > { %v21929_v29 = vpop.f32.mrf.mxu0  ;;  %25391 = vmatprep.subr.mxu0 %v970_v21  ;;  %v21999_v32 = vpop.f32.mrf.mxu1  ;;  %25461 = vmatprep.subr.mxu1 %v972_v24  ;;  %v984_v21 = vld [vmem:[%s33746_s29 + $0x1198] sm:$0xff]  ;;  %v990_v58 = vld [vmem:[%s33746_s29 + $0x11c8] sm:$0xff] }
 0x48c   : > { %v21998_v31 = vadd.f32 %v21997_v28, %v21928_v27  ;;  %25425 = vmatprep.mubr.f32.mxu0 %v4493_v22  ;;  %25495 = vmatprep.mubr.f32.mxu1 %v4494_v25  ;;  %v4543_v14 = vrot.slane %v4529_v2, %v33752_v5  ;;  %v4544_v19 = vcombine.high %v4536_v12, %v4536_v12  ;;  %v981_v27 = vld [vmem:[%s33746_s29 + $0x1180] sm:$0xff] }
 0x48e   : > { %25392 = vmatpush1.xpose.msra.mxu0 %v969_v30  ;;  %25462 = vmatpush1.xpose.msra.mxu1 %v971_v33  ;;  %v4545_v22 = vcombine.high %v4543_v14, %v4543_v14  ;;  %v983_v30 = vld [vmem:[%s33746_s29 + $0x1190] sm:$0xff]  ;;  %v1756_v33 = vld [vmem:[%s33746_s29 + $0x29b8] sm:$0x3] }
 0x48f   : > { %25529 = vmatprep.subr.mxu0 %v1742_v34  ;;  %25599 = vmatprep.subr.mxu1 %v1744_v36  ;;  %v1753_v36 = vld [vmem:[%s33746_s29 + $0x29a0] sm:$0x3] }
 0x491   : > { %v22067_v43 = vpop.f32.mrf.mxu0  ;;  %25426 = vmatmul.mubr.f32.vlgmr.msra.gmra.mxu0 %v4485_v15  ;;  %v22137_v48 = vpop.f32.mrf.mxu1  ;;  %25496 = vmatmul.mubr.f32.vlgmr.msra.gmra.mxu1 %v4492_v17  ;;  %v370_v15 = vld [vmem:[%s33738_s27 + $0x468] sm:$0xff]  ;;  %v1751_v17 = vld [vmem:[%s33746_s29 + $0x2990] sm:$0x3] }
 0x492   : > { %v22068_v47 = vadd.f32 %v22067_v43, %v21998_v31  ;;  %25530 = vmatpush1.xpose.msra.mxu0 %v1741_v39  ;;  %25600 = vmatpush1.xpose.msra.mxu1 %v1743_v40  ;;  %v4546_v23 = vcombine.high %v370_v15, %v370_v15  ;;  %v1754_v31 = vld [vmem:[%s33746_s29 + $0x29a8] sm:$0x3]  ;;  %v4553_v32 = vrot.slane %v370_v15, %v33752_v5 }
 0x493   : > { %v22069_v49 = vpop.f32.mrf.mxu0  ;;  %25531 = vmatprep.subr.mxu0 %v974_v41  ;;  %v22139_v52 = vpop.f32.mrf.mxu1  ;;  %25601 = vmatprep.subr.mxu1 %v976_v44  ;;  %v988_v41 = vld [vmem:[%s33746_s29 + $0x11b8] sm:$0xff]  ;;  %v994_v15 = vld [vmem:[%s33746_s29 + $0x11e8] sm:$0xff] }
 0x494   : > { %v22138_v51 = vadd.f32 %v22137_v48, %v22068_v47  ;;  %25565 = vmatprep.mubr.f32.mxu0 %v4510_v42  ;;  %25635 = vmatprep.mubr.f32.mxu1 %v4511_v45  ;;  %v4560_v34 = vrot.slane %v4546_v23, %v33752_v5  ;;  %v4561_v39 = vcombine.high %v4553_v32, %v4553_v32  ;;  %v985_v47 = vld [vmem:[%s33746_s29 + $0x11a0] sm:$0xff] }
 0x496   : > { %25532 = vmatpush1.xpose.msra.mxu0 %v973_v50  ;;  %25602 = vmatpush1.xpose.msra.mxu1 %v975_v53  ;;  %v4562_v42 = vcombine.high %v4560_v34, %v4560_v34  ;;  %v987_v50 = vld [vmem:[%s33746_s29 + $0x11b0] sm:$0xff]  ;;  %v1760_v53 = vld [vmem:[%s33746_s29 + $0x29d8] sm:$0x3] }
 0x497   : > { %25669 = vmatprep.subr.mxu0 %v1746_v54  ;;  %25739 = vmatprep.subr.mxu1 %v1748_v56  ;;  %v1757_v56 = vld [vmem:[%s33746_s29 + $0x29c0] sm:$0x3] }
 0x499   : > { %v22207_v63 = vpop.f32.mrf.mxu0  ;;  %25566 = vmatmul.mubr.f32.vlgmr.msra.gmra.mxu0 %v4502_v35  ;;  %v22277_v4 = vpop.f32.mrf.mxu1  ;;  %25636 = vmatmul.mubr.f32.vlgmr.msra.gmra.mxu1 %v4509_v37  ;;  %v371_v35 = vld [vmem:[%s33738_s27 + $0x470] sm:$0xff] }
 0x49a   : > { %v22208_v3 = vadd.f32 %v22207_v63, %v22138_v51  ;;  %25670 = vmatpush1.xpose.msra.mxu0 %v1745_v59  ;;  %25740 = vmatpush1.xpose.msra.mxu1 %v1747_v60  ;;  %v1755_v37 = vld [vmem:[%s33746_s29 + $0x29b0] sm:$0x3]  ;;  %v4563_v43 = vcombine.high %v371_v35, %v371_v35  ;;  %v1758_v51 = vld [vmem:[%s33746_s29 + $0x29c8] sm:$0x3]  ;;  %v4570_v52 = vrot.slane %v371_v35, %v33752_v5 }
 0x49b   : > { %v22209_v6 = vpop.f32.mrf.mxu0  ;;  %25671 = vmatprep.subr.mxu0 %v978_v61  ;;  %v22279_v9 = vpop.f32.mrf.mxu1  ;;  %25741 = vmatprep.subr.mxu1 %v980_v0  ;;  %v992_v61 = vld [vmem:[%s33746_s29 + $0x11d8] sm:$0xff]  ;;  %v998_v35 = vld [vmem:[%s33746_s29 + $0x1208] sm:$0xff] }
 0x49c   : > { %v22278_v8 = vadd.f32 %v22277_v4, %v22208_v3  ;;  %25705 = vmatprep.mubr.f32.mxu0 %v4527_v62  ;;  %25775 = vmatprep.mubr.f32.mxu1 %v4528_v1  ;;  %v4577_v54 = vrot.slane %v4563_v43, %v33752_v5  ;;  %v4578_v59 = vcombine.high %v4570_v52, %v4570_v52  ;;  %v989_v3 = vld [vmem:[%s33746_s29 + $0x11c0] sm:$0xff] }
 0x49e   : > { %25672 = vmatpush1.xpose.msra.mxu0 %v977_v7  ;;  %25742 = vmatpush1.xpose.msra.mxu1 %v979_v10  ;;  %v4579_v62 = vcombine.high %v4577_v54, %v4577_v54  ;;  %v991_v7 = vld [vmem:[%s33746_s29 + $0x11d0] sm:$0xff]  ;;  %v1764_v10 = vld [vmem:[%s33746_s29 + $0x29f8] sm:$0x3] }
 0x49f   : > { %25809 = vmatprep.subr.mxu0 %v1750_v11  ;;  %25879 = vmatprep.subr.mxu1 %v1752_v13  ;;  %v1761_v13 = vld [vmem:[%s33746_s29 + $0x29e0] sm:$0x3] }
 0x4a1   : > { %v22347_v20 = vpop.f32.mrf.mxu0  ;;  %25706 = vmatmul.mubr.f32.vlgmr.msra.gmra.mxu0 %v4519_v55  ;;  %v22417_v25 = vpop.f32.mrf.mxu1  ;;  %25776 = vmatmul.mubr.f32.vlgmr.msra.gmra.mxu1 %v4526_v57  ;;  %v372_v55 = vld [vmem:[%s33738_s27 + $0x478] sm:$0xff]  ;;  %v1759_v57 = vld [vmem:[%s33746_s29 + $0x29d0] sm:$0x3] }
 0x4a2   : > { %v22348_v24 = vadd.f32 %v22347_v20, %v22278_v8  ;;  %25810 = vmatpush1.xpose.msra.mxu0 %v1749_v16  ;;  %25880 = vmatpush1.xpose.msra.mxu1 %v1751_v17  ;;  %v4580_v63 = vcombine.high %v372_v55, %v372_v55  ;;  %v1762_v8 = vld [vmem:[%s33746_s29 + $0x29e8] sm:$0x3]  ;;  %v4587_v9 = vrot.slane %v372_v55, %v33752_v5 }
 0x4a3   : > { %v22349_v26 = vpop.f32.mrf.mxu0  ;;  %25811 = vmatprep.subr.mxu0 %v982_v18  ;;  %v22419_v29 = vpop.f32.mrf.mxu1  ;;  %25881 = vmatprep.subr.mxu1 %v984_v21  ;;  %v996_v18 = vld [vmem:[%s33746_s29 + $0x11f8] sm:$0xff]  ;;  %v1002_v55 = vld [vmem:[%s33746_s29 + $0x1228] sm:$0xff] }
 0x4a4   : > { %v22418_v28 = vadd.f32 %v22417_v25, %v22348_v24  ;;  %25845 = vmatprep.mubr.f32.mxu0 %v4544_v19  ;;  %25915 = vmatprep.mubr.f32.mxu1 %v4545_v22  ;;  %v4594_v11 = vrot.slane %v4580_v63, %v33752_v5  ;;  %v4595_v16 = vcombine.high %v4587_v9, %v4587_v9  ;;  %v993_v24 = vld [vmem:[%s33746_s29 + $0x11e0] sm:$0xff] }
 0x4a6   : > { %25812 = vmatpush1.xpose.msra.mxu0 %v981_v27  ;;  %25882 = vmatpush1.xpose.msra.mxu1 %v983_v30  ;;  %v4596_v19 = vcombine.high %v4594_v11, %v4594_v11  ;;  %v995_v27 = vld [vmem:[%s33746_s29 + $0x11f0] sm:$0xff]  ;;  %v1768_v30 = vld [vmem:[%s33746_s29 + $0x2a18] sm:$0x3] }
 0x4a7   : > { %25949 = vmatprep.subr.mxu0 %v1754_v31  ;;  %26019 = vmatprep.subr.mxu1 %v1756_v33  ;;  %v1765_v33 = vld [vmem:[%s33746_s29 + $0x2a00] sm:$0x3] }
 0x4a9   : > { %v22487_v40 = vpop.f32.mrf.mxu0  ;;  %25846 = vmatmul.mubr.f32.vlgmr.msra.gmra.mxu0 %v4536_v12  ;;  %v22557_v45 = vpop.f32.mrf.mxu1  ;;  %25916 = vmatmul.mubr.f32.vlgmr.msra.gmra.mxu1 %v4543_v14  ;;  %v373_v12 = vld [vmem:[%s33738_s27 + $0x480] sm:$0xff]  ;;  %v1763_v14 = vld [vmem:[%s33746_s29 + $0x29f0] sm:$0x3] }
 0x4aa   : > { %v22488_v44 = vadd.f32 %v22487_v40, %v22418_v28  ;;  %25950 = vmatpush1.xpose.msra.mxu0 %v1753_v36  ;;  %26020 = vmatpush1.xpose.msra.mxu1 %v1755_v37  ;;  %v4597_v20 = vcombine.high %v373_v12, %v373_v12  ;;  %v1766_v28 = vld [vmem:[%s33746_s29 + $0x2a08] sm:$0x3]  ;;  %v4604_v29 = vrot.slane %v373_v12, %v33752_v5 }
 0x4ab   : > { %v22489_v46 = vpop.f32.mrf.mxu0  ;;  %25951 = vmatprep.subr.mxu0 %v986_v38  ;;  %v22559_v49 = vpop.f32.mrf.mxu1  ;;  %26021 = vmatprep.subr.mxu1 %v988_v41  ;;  %v1000_v38 = vld [vmem:[%s33746_s29 + $0x1218] sm:$0xff]  ;;  %v1006_v12 = vld [vmem:[%s33746_s29 + $0x1248] sm:$0xff] }
 0x4ac   : > { %v22558_v48 = vadd.f32 %v22557_v45, %v22488_v44  ;;  %25985 = vmatprep.mubr.f32.mxu0 %v4561_v39  ;;  %26055 = vmatprep.mubr.f32.mxu1 %v4562_v42  ;;  %v4611_v31 = vrot.slane %v4597_v20, %v33752_v5  ;;  %v4612_v36 = vcombine.high %v4604_v29, %v4604_v29  ;;  %v997_v44 = vld [vmem:[%s33746_s29 + $0x1200] sm:$0xff] }
 0x4ae   : > { %25952 = vmatpush1.xpose.msra.mxu0 %v985_v47  ;;  %26022 = vmatpush1.xpose.msra.mxu1 %v987_v50  ;;  %v4613_v39 = vcombine.high %v4611_v31, %v4611_v31  ;;  %v999_v47 = vld [vmem:[%s33746_s29 + $0x1210] sm:$0xff]  ;;  %v1772_v50 = vld [vmem:[%s33746_s29 + $0x2a38] sm:$0x3] }
 0x4af   : > { %26089 = vmatprep.subr.mxu0 %v1758_v51  ;;  %26159 = vmatprep.subr.mxu1 %v1760_v53  ;;  %v1769_v53 = vld [vmem:[%s33746_s29 + $0x2a20] sm:$0x3] }
 0x4b1   : > { %v22627_v60 = vpop.f32.mrf.mxu0  ;;  %25986 = vmatmul.mubr.f32.vlgmr.msra.gmra.mxu0 %v4553_v32  ;;  %v22697_v1 = vpop.f32.mrf.mxu1  ;;  %26056 = vmatmul.mubr.f32.vlgmr.msra.gmra.mxu1 %v4560_v34  ;;  %v374_v32 = vld [vmem:[%s33738_s27 + $0x488] sm:$0xff]  ;;  %v1767_v34 = vld [vmem:[%s33746_s29 + $0x2a10] sm:$0x3] }
 0x4b2   : > { %v22628_v0 = vadd.f32 %v22627_v60, %v22558_v48  ;;  %26090 = vmatpush1.xpose.msra.mxu0 %v1757_v56  ;;  %26160 = vmatpush1.xpose.msra.mxu1 %v1759_v57  ;;  %v4614_v40 = vcombine.high %v374_v32, %v374_v32  ;;  %v1770_v48 = vld [vmem:[%s33746_s29 + $0x2a28] sm:$0x3]  ;;  %v4621_v49 = vrot.slane %v374_v32, %v33752_v5 }
 0x4b3   : > { %v22629_v2 = vpop.f32.mrf.mxu0  ;;  %26091 = vmatprep.subr.mxu0 %v990_v58  ;;  %v22699_v6 = vpop.f32.mrf.mxu1  ;;  %26161 = vmatprep.subr.mxu1 %v992_v61  ;;  %v1004_v58 = vld [vmem:[%s33746_s29 + $0x1238] sm:$0xff]  ;;  %v1010_v32 = vld [vmem:[%s33746_s29 + $0x1268] sm:$0xff] }
 0x4b4   : > { %v22698_v4 = vadd.f32 %v22697_v1, %v22628_v0  ;;  %26125 = vmatprep.mubr.f32.mxu0 %v4578_v59  ;;  %26195 = vmatprep.mubr.f32.mxu1 %v4579_v62  ;;  %v4628_v51 = vrot.slane %v4614_v40, %v33752_v5  ;;  %v4629_v56 = vcombine.high %v4621_v49, %v4621_v49  ;;  %v1001_v0 = vld [vmem:[%s33746_s29 + $0x1220] sm:$0xff] }
 0x4b6   : > { %26092 = vmatpush1.xpose.msra.mxu0 %v989_v3  ;;  %26162 = vmatpush1.xpose.msra.mxu1 %v991_v7  ;;  %v4630_v59 = vcombine.high %v4628_v51, %v4628_v51  ;;  %v1003_v3 = vld [vmem:[%s33746_s29 + $0x1230] sm:$0xff]  ;;  %v1776_v7 = vld [vmem:[%s33746_s29 + $0x2a58] sm:$0x3] }
 0x4b7   : > { %26229 = vmatprep.subr.mxu0 %v1762_v8  ;;  %26299 = vmatprep.subr.mxu1 %v1764_v10  ;;  %v1773_v10 = vld [vmem:[%s33746_s29 + $0x2a40] sm:$0x3] }
 0x4b9   : > { %v22767_v17 = vpop.f32.mrf.mxu0  ;;  %26126 = vmatmul.mubr.f32.vlgmr.msra.gmra.mxu0 %v4570_v52  ;;  %v22837_v22 = vpop.f32.mrf.mxu1  ;;  %26196 = vmatmul.mubr.f32.vlgmr.msra.gmra.mxu1 %v4577_v54  ;;  %v375_v52 = vld [vmem:[%s33738_s27 + $0x490] sm:$0xff] }
 0x4ba   : > { %v22768_v21 = vadd.f32 %v22767_v17, %v22698_v4  ;;  %26230 = vmatpush1.xpose.msra.mxu0 %v1761_v13  ;;  %26300 = vmatpush1.xpose.msra.mxu1 %v1763_v14  ;;  %v1771_v54 = vld [vmem:[%s33746_s29 + $0x2a30] sm:$0x3]  ;;  %v4631_v60 = vcombine.high %v375_v52, %v375_v52  ;;  %v1774_v4 = vld [vmem:[%s33746_s29 + $0x2a48] sm:$0x3]  ;;  %v4638_v6 = vrot.slane %v375_v52, %v33752_v5 }
 0x4bb   : > { %v22769_v23 = vpop.f32.mrf.mxu0  ;;  %26231 = vmatprep.subr.mxu0 %v994_v15  ;;  %v22839_v26 = vpop.f32.mrf.mxu1  ;;  %26301 = vmatprep.subr.mxu1 %v996_v18  ;;  %v1008_v15 = vld [vmem:[%s33746_s29 + $0x1258] sm:$0xff]  ;;  %v1014_v52 = vld [vmem:[%s33746_s29 + $0x1288] sm:$0xff] }
 0x4bc   : > { %v22838_v25 = vadd.f32 %v22837_v22, %v22768_v21  ;;  %26265 = vmatprep.mubr.f32.mxu0 %v4595_v16  ;;  %26335 = vmatprep.mubr.f32.mxu1 %v4596_v19  ;;  %v4645_v8 = vrot.slane %v4631_v60, %v33752_v5  ;;  %v4646_v13 = vcombine.high %v4638_v6, %v4638_v6  ;;  %v1005_v21 = vld [vmem:[%s33746_s29 + $0x1240] sm:$0xff] }
 0x4be   : > { %26232 = vmatpush1.xpose.msra.mxu0 %v993_v24  ;;  %26302 = vmatpush1.xpose.msra.mxu1 %v995_v27  ;;  %v4647_v16 = vcombine.high %v4645_v8, %v4645_v8  ;;  %v1007_v24 = vld [vmem:[%s33746_s29 + $0x1250] sm:$0xff]  ;;  %v1780_v27 = vld [vmem:[%s33746_s29 + $0x2a78] sm:$0x3] }
 0x4bf   : > { %26369 = vmatprep.subr.mxu0 %v1766_v28  ;;  %26439 = vmatprep.subr.mxu1 %v1768_v30  ;;  %v1777_v30 = vld [vmem:[%s33746_s29 + $0x2a60] sm:$0x3] }
 0x4c1   : > { %v22907_v37 = vpop.f32.mrf.mxu0  ;;  %26266 = vmatmul.mubr.f32.vlgmr.msra.gmra.mxu0 %v4587_v9  ;;  %v22977_v42 = vpop.f32.mrf.mxu1  ;;  %26336 = vmatmul.mubr.f32.vlgmr.msra.gmra.mxu1 %v4594_v11  ;;  %v376_v9 = vld [vmem:[%s33738_s27 + $0x498] sm:$0xff]  ;;  %v1775_v11 = vld [vmem:[%s33746_s29 + $0x2a50] sm:$0x3] }
 0x4c2   : > { %v22908_v41 = vadd.f32 %v22907_v37, %v22838_v25  ;;  %26370 = vmatpush1.xpose.msra.mxu0 %v1765_v33  ;;  %26440 = vmatpush1.xpose.msra.mxu1 %v1767_v34  ;;  %v4648_v17 = vcombine.high %v376_v9, %v376_v9  ;;  %v1778_v25 = vld [vmem:[%s33746_s29 + $0x2a68] sm:$0x3]  ;;  %v4655_v26 = vrot.slane %v376_v9, %v33752_v5 }
 0x4c3   : > { %v22909_v43 = vpop.f32.mrf.mxu0  ;;  %26371 = vmatprep.subr.mxu0 %v998_v35  ;;  %v22979_v46 = vpop.f32.mrf.mxu1  ;;  %26441 = vmatprep.subr.mxu1 %v1000_v38  ;;  %v1012_v35 = vld [vmem:[%s33746_s29 + $0x1278] sm:$0xff]  ;;  %v1018_v9 = vld [vmem:[%s33746_s29 + $0x12a8] sm:$0xff] }
 0x4c4   : > { %v22978_v45 = vadd.f32 %v22977_v42, %v22908_v41  ;;  %26405 = vmatprep.mubr.f32.mxu0 %v4612_v36  ;;  %26475 = vmatprep.mubr.f32.mxu1 %v4613_v39  ;;  %v4662_v28 = vrot.slane %v4648_v17, %v33752_v5  ;;  %v4663_v33 = vcombine.high %v4655_v26, %v4655_v26  ;;  %v1009_v41 = vld [vmem:[%s33746_s29 + $0x1260] sm:$0xff] }
 0x4c6   : > { %26372 = vmatpush1.xpose.msra.mxu0 %v997_v44  ;;  %26442 = vmatpush1.xpose.msra.mxu1 %v999_v47  ;;  %v4664_v36 = vcombine.high %v4662_v28, %v4662_v28  ;;  %v1011_v44 = vld [vmem:[%s33746_s29 + $0x1270] sm:$0xff]  ;;  %v1784_v47 = vld [vmem:[%s33746_s29 + $0x2a98] sm:$0x3] }
 0x4c7   : > { %26509 = vmatprep.subr.mxu0 %v1770_v48  ;;  %26579 = vmatprep.subr.mxu1 %v1772_v50  ;;  %v1781_v50 = vld [vmem:[%s33746_s29 + $0x2a80] sm:$0x3] }
 0x4c9   : > { %v23047_v57 = vpop.f32.mrf.mxu0  ;;  %26406 = vmatmul.mubr.f32.vlgmr.msra.gmra.mxu0 %v4604_v29  ;;  %v23117_v62 = vpop.f32.mrf.mxu1  ;;  %26476 = vmatmul.mubr.f32.vlgmr.msra.gmra.mxu1 %v4611_v31  ;;  %v377_v29 = vld [vmem:[%s33738_s27 + $0x4a0] sm:$0xff]  ;;  %v1779_v31 = vld [vmem:[%s33746_s29 + $0x2a70] sm:$0x3] }
 0x4ca   : > { %v23048_v61 = vadd.f32 %v23047_v57, %v22978_v45  ;;  %26510 = vmatpush1.xpose.msra.mxu0 %v1769_v53  ;;  %26580 = vmatpush1.xpose.msra.mxu1 %v1771_v54  ;;  %v4665_v37 = vcombine.high %v377_v29, %v377_v29  ;;  %v1782_v45 = vld [vmem:[%s33746_s29 + $0x2a88] sm:$0x3]  ;;  %v4672_v46 = vrot.slane %v377_v29, %v33752_v5 }
 0x4cb   : > { %v23049_v63 = vpop.f32.mrf.mxu0  ;;  %26511 = vmatprep.subr.mxu0 %v1002_v55  ;;  %v23119_v2 = vpop.f32.mrf.mxu1  ;;  %26581 = vmatprep.subr.mxu1 %v1004_v58  ;;  %v1016_v55 = vld [vmem:[%s33746_s29 + $0x1298] sm:$0xff]  ;;  %v1022_v29 = vld [vmem:[%s33746_s29 + $0x12c8] sm:$0xff] }
 0x4cc   : > { %v23118_v1 = vadd.f32 %v23117_v62, %v23048_v61  ;;  %26545 = vmatprep.mubr.f32.mxu0 %v4629_v56  ;;  %26615 = vmatprep.mubr.f32.mxu1 %v4630_v59  ;;  %v4679_v48 = vrot.slane %v4665_v37, %v33752_v5  ;;  %v4680_v53 = vcombine.high %v4672_v46, %v4672_v46  ;;  %v1013_v61 = vld [vmem:[%s33746_s29 + $0x1280] sm:$0xff] }
 0x4ce   : > { %26512 = vmatpush1.xpose.msra.mxu0 %v1001_v0  ;;  %26582 = vmatpush1.xpose.msra.mxu1 %v1003_v3  ;;  %v4681_v56 = vcombine.high %v4679_v48, %v4679_v48  ;;  %v1015_v0 = vld [vmem:[%s33746_s29 + $0x1290] sm:$0xff]  ;;  %v1788_v3 = vld [vmem:[%s33746_s29 + $0x2ab8] sm:$0x3] }
 0x4cf   : > { %26649 = vmatprep.subr.mxu0 %v1774_v4  ;;  %26719 = vmatprep.subr.mxu1 %v1776_v7  ;;  %v1785_v7 = vld [vmem:[%s33746_s29 + $0x2aa0] sm:$0x3] }
 0x4d1   : > { %v23187_v14 = vpop.f32.mrf.mxu0  ;;  %26546 = vmatmul.mubr.f32.vlgmr.msra.gmra.mxu0 %v4621_v49  ;;  %v23257_v19 = vpop.f32.mrf.mxu1  ;;  %26616 = vmatmul.mubr.f32.vlgmr.msra.gmra.mxu1 %v4628_v51  ;;  %v378_v49 = vld [vmem:[%s33738_s27 + $0x4a8] sm:$0xff]  ;;  %v1783_v51 = vld [vmem:[%s33746_s29 + $0x2a90] sm:$0x3] }
 0x4d2   : > { %v23188_v18 = vadd.f32 %v23187_v14, %v23118_v1  ;;  %26650 = vmatpush1.xpose.msra.mxu0 %v1773_v10  ;;  %26720 = vmatpush1.xpose.msra.mxu1 %v1775_v11  ;;  %v4682_v57 = vcombine.high %v378_v49, %v378_v49  ;;  %v1786_v1 = vld [vmem:[%s33746_s29 + $0x2aa8] sm:$0x3]  ;;  %v4689_v2 = vrot.slane %v378_v49, %v33752_v5 }
 0x4d3   : > { %v23189_v20 = vpop.f32.mrf.mxu0  ;;  %26651 = vmatprep.subr.mxu0 %v1006_v12  ;;  %v23259_v23 = vpop.f32.mrf.mxu1  ;;  %26721 = vmatprep.subr.mxu1 %v1008_v15  ;;  %v1020_v12 = vld [vmem:[%s33746_s29 + $0x12b8] sm:$0xff]  ;;  %v1026_v49 = vld [vmem:[%s33746_s29 + $0x12e8] sm:$0xff] }
 0x4d4   : > { %v23258_v22 = vadd.f32 %v23257_v19, %v23188_v18  ;;  %26685 = vmatprep.mubr.f32.mxu0 %v4646_v13  ;;  %26755 = vmatprep.mubr.f32.mxu1 %v4647_v16  ;;  %v4696_v4 = vrot.slane %v4682_v57, %v33752_v5  ;;  %v4697_v10 = vcombine.high %v4689_v2, %v4689_v2  ;;  %v1017_v18 = vld [vmem:[%s33746_s29 + $0x12a0] sm:$0xff] }
 0x4d6   : > { %26652 = vmatpush1.xpose.msra.mxu0 %v1005_v21  ;;  %26722 = vmatpush1.xpose.msra.mxu1 %v1007_v24  ;;  %v4698_v13 = vcombine.high %v4696_v4, %v4696_v4  ;;  %v1019_v21 = vld [vmem:[%s33746_s29 + $0x12b0] sm:$0xff]  ;;  %v1792_v24 = vld [vmem:[%s33746_s29 + $0x2ad8] sm:$0x3] }
 0x4d7   : > { %26789 = vmatprep.subr.mxu0 %v1778_v25  ;;  %26859 = vmatprep.subr.mxu1 %v1780_v27  ;;  %v1789_v27 = vld [vmem:[%s33746_s29 + $0x2ac0] sm:$0x3] }
 0x4d9   : > { %v23327_v34 = vpop.f32.mrf.mxu0  ;;  %26686 = vmatmul.mubr.f32.vlgmr.msra.gmra.mxu0 %v4638_v6  ;;  %v23397_v39 = vpop.f32.mrf.mxu1  ;;  %26756 = vmatmul.mubr.f32.vlgmr.msra.gmra.mxu1 %v4645_v8  ;;  %v379_v6 = vld [vmem:[%s33738_s27 + $0x4b0] sm:$0xff] }
 0x4da   : > { %v23328_v38 = vadd.f32 %v23327_v34, %v23258_v22  ;;  %26790 = vmatpush1.xpose.msra.mxu0 %v1777_v30  ;;  %26860 = vmatpush1.xpose.msra.mxu1 %v1779_v31  ;;  %v1787_v8 = vld [vmem:[%s33746_s29 + $0x2ab0] sm:$0x3]  ;;  %v4699_v14 = vcombine.high %v379_v6, %v379_v6  ;;  %v1790_v22 = vld [vmem:[%s33746_s29 + $0x2ac8] sm:$0x3]  ;;  %v4706_v23 = vrot.slane %v379_v6, %v33752_v5 }
 0x4db   : > { %v23329_v40 = vpop.f32.mrf.mxu0  ;;  %26791 = vmatprep.subr.mxu0 %v1010_v32  ;;  %v23399_v43 = vpop.f32.mrf.mxu1  ;;  %26861 = vmatprep.subr.mxu1 %v1012_v35  ;;  %v1024_v32 = vld [vmem:[%s33746_s29 + $0x12d8] sm:$0xff]  ;;  %v1030_v6 = vld [vmem:[%s33746_s29 + $0x1308] sm:$0xff] }
 0x4dc   : > { %v23398_v42 = vadd.f32 %v23397_v39, %v23328_v38  ;;  %26825 = vmatprep.mubr.f32.mxu0 %v4663_v33  ;;  %26895 = vmatprep.mubr.f32.mxu1 %v4664_v36  ;;  %v4713_v25 = vrot.slane %v4699_v14, %v33752_v5  ;;  %v4714_v30 = vcombine.high %v4706_v23, %v4706_v23  ;;  %v1021_v38 = vld [vmem:[%s33746_s29 + $0x12c0] sm:$0xff] }
 0x4de   : > { %26792 = vmatpush1.xpose.msra.mxu0 %v1009_v41  ;;  %26862 = vmatpush1.xpose.msra.mxu1 %v1011_v44  ;;  %v4715_v33 = vcombine.high %v4713_v25, %v4713_v25  ;;  %v1023_v41 = vld [vmem:[%s33746_s29 + $0x12d0] sm:$0xff]  ;;  %v1796_v44 = vld [vmem:[%s33746_s29 + $0x2af8] sm:$0x3] }
 0x4df   : > { %26929 = vmatprep.subr.mxu0 %v1782_v45  ;;  %26999 = vmatprep.subr.mxu1 %v1784_v47  ;;  %v1793_v47 = vld [vmem:[%s33746_s29 + $0x2ae0] sm:$0x3] }
 0x4e1   : > { %v23467_v54 = vpop.f32.mrf.mxu0  ;;  %26826 = vmatmul.mubr.f32.vlgmr.msra.gmra.mxu0 %v4655_v26  ;;  %v23537_v59 = vpop.f32.mrf.mxu1  ;;  %26896 = vmatmul.mubr.f32.vlgmr.msra.gmra.mxu1 %v4662_v28  ;;  %v380_v26 = vld [vmem:[%s33738_s27 + $0x4b8] sm:$0xff]  ;;  %v1791_v28 = vld [vmem:[%s33746_s29 + $0x2ad0] sm:$0x3] }
 0x4e2   : > { %v23468_v58 = vadd.f32 %v23467_v54, %v23398_v42  ;;  %26930 = vmatpush1.xpose.msra.mxu0 %v1781_v50  ;;  %27000 = vmatpush1.xpose.msra.mxu1 %v1783_v51  ;;  %v4716_v34 = vcombine.high %v380_v26, %v380_v26  ;;  %v1794_v42 = vld [vmem:[%s33746_s29 + $0x2ae8] sm:$0x3]  ;;  %v4723_v43 = vrot.slane %v380_v26, %v33752_v5 }
 0x4e3   : > { %v23469_v60 = vpop.f32.mrf.mxu0  ;;  %26931 = vmatprep.subr.mxu0 %v1014_v52  ;;  %v23539_v63 = vpop.f32.mrf.mxu1  ;;  %27001 = vmatprep.subr.mxu1 %v1016_v55  ;;  %v1028_v52 = vld [vmem:[%s33746_s29 + $0x12f8] sm:$0xff]  ;;  %v1034_v26 = vld [vmem:[%s33746_s29 + $0x1328] sm:$0xff] }
 0x4e4   : > { %v23538_v62 = vadd.f32 %v23537_v59, %v23468_v58  ;;  %26965 = vmatprep.mubr.f32.mxu0 %v4680_v53  ;;  %27035 = vmatprep.mubr.f32.mxu1 %v4681_v56  ;;  %v4730_v45 = vrot.slane %v4716_v34, %v33752_v5  ;;  %v4731_v50 = vcombine.high %v4723_v43, %v4723_v43  ;;  %v1025_v58 = vld [vmem:[%s33746_s29 + $0x12e0] sm:$0xff] }
 0x4e6   : > { %26932 = vmatpush1.xpose.msra.mxu0 %v1013_v61  ;;  %27002 = vmatpush1.xpose.msra.mxu1 %v1015_v0  ;;  %v4732_v53 = vcombine.high %v4730_v45, %v4730_v45  ;;  %v1027_v61 = vld [vmem:[%s33746_s29 + $0x12f0] sm:$0xff]  ;;  %v1800_v0 = vld [vmem:[%s33746_s29 + $0x2b18] sm:$0x3] }
 0x4e7   : > { %27069 = vmatprep.subr.mxu0 %v1786_v1  ;;  %27139 = vmatprep.subr.mxu1 %v1788_v3  ;;  %v1797_v3 = vld [vmem:[%s33746_s29 + $0x2b00] sm:$0x3] }
 0x4e9   : > { %v23607_v11 = vpop.f32.mrf.mxu0  ;;  %26966 = vmatmul.mubr.f32.vlgmr.msra.gmra.mxu0 %v4672_v46  ;;  %v23677_v16 = vpop.f32.mrf.mxu1  ;;  %27036 = vmatmul.mubr.f32.vlgmr.msra.gmra.mxu1 %v4679_v48  ;;  %v381_v46 = vld [vmem:[%s33738_s27 + $0x4c0] sm:$0xff]  ;;  %v1795_v48 = vld [vmem:[%s33746_s29 + $0x2af0] sm:$0x3] }
 0x4ea   : > { %v23608_v15 = vadd.f32 %v23607_v11, %v23538_v62  ;;  %27070 = vmatpush1.xpose.msra.mxu0 %v1785_v7  ;;  %27140 = vmatpush1.xpose.msra.mxu1 %v1787_v8  ;;  %v4733_v54 = vcombine.high %v381_v46, %v381_v46  ;;  %v1798_v62 = vld [vmem:[%s33746_s29 + $0x2b08] sm:$0x3]  ;;  %v4740_v63 = vrot.slane %v381_v46, %v33752_v5 }
 0x4eb   : > { %v23609_v17 = vpop.f32.mrf.mxu0  ;;  %27071 = vmatprep.subr.mxu0 %v1018_v9  ;;  %v23679_v20 = vpop.f32.mrf.mxu1  ;;  %27141 = vmatprep.subr.mxu1 %v1020_v12  ;;  %v1032_v9 = vld [vmem:[%s33746_s29 + $0x1318] sm:$0xff]  ;;  %v1038_v46 = vld [vmem:[%s33746_s29 + $0x1348] sm:$0xff] }
 0x4ec   : > { %v23678_v19 = vadd.f32 %v23677_v16, %v23608_v15  ;;  %27105 = vmatprep.mubr.f32.mxu0 %v4697_v10  ;;  %27175 = vmatprep.mubr.f32.mxu1 %v4698_v13  ;;  %v4747_v1 = vrot.slane %v4733_v54, %v33752_v5  ;;  %v4748_v7 = vcombine.high %v4740_v63, %v4740_v63  ;;  %v1029_v15 = vld [vmem:[%s33746_s29 + $0x1300] sm:$0xff] }
 0x4ee   : > { %27072 = vmatpush1.xpose.msra.mxu0 %v1017_v18  ;;  %27142 = vmatpush1.xpose.msra.mxu1 %v1019_v21  ;;  %v4749_v10 = vcombine.high %v4747_v1, %v4747_v1  ;;  %v1031_v18 = vld [vmem:[%s33746_s29 + $0x1310] sm:$0xff]  ;;  %v1804_v21 = vld [vmem:[%s33746_s29 + $0x2b38] sm:$0x3] }
 0x4ef   : > { %27209 = vmatprep.subr.mxu0 %v1790_v22  ;;  %27279 = vmatprep.subr.mxu1 %v1792_v24  ;;  %v1801_v24 = vld [vmem:[%s33746_s29 + $0x2b20] sm:$0x3] }
 0x4f1   : > { %v23747_v31 = vpop.f32.mrf.mxu0  ;;  %27106 = vmatmul.mubr.f32.vlgmr.msra.gmra.mxu0 %v4689_v2  ;;  %v23817_v36 = vpop.f32.mrf.mxu1  ;;  %27176 = vmatmul.mubr.f32.vlgmr.msra.gmra.mxu1 %v4696_v4  ;;  %v382_v2 = vld [vmem:[%s33738_s27 + $0x4c8] sm:$0xff]  ;;  %v1799_v4 = vld [vmem:[%s33746_s29 + $0x2b10] sm:$0x3] }
 0x4f2   : > { %v23748_v35 = vadd.f32 %v23747_v31, %v23678_v19  ;;  %27210 = vmatpush1.xpose.msra.mxu0 %v1789_v27  ;;  %27280 = vmatpush1.xpose.msra.mxu1 %v1791_v28  ;;  %v4750_v11 = vcombine.high %v382_v2, %v382_v2  ;;  %v1802_v19 = vld [vmem:[%s33746_s29 + $0x2b28] sm:$0x3]  ;;  %v4757_v20 = vrot.slane %v382_v2, %v33752_v5 }
 0x4f3   : > { %v23749_v37 = vpop.f32.mrf.mxu0  ;;  %27211 = vmatprep.subr.mxu0 %v1022_v29  ;;  %v23819_v40 = vpop.f32.mrf.mxu1  ;;  %27281 = vmatprep.subr.mxu1 %v1024_v32  ;;  %v1036_v29 = vld [vmem:[%s33746_s29 + $0x1338] sm:$0xff]  ;;  %v1042_v2 = vld [vmem:[%s33746_s29 + $0x1368] sm:$0xff] }
 0x4f4   : > { %v23818_v39 = vadd.f32 %v23817_v36, %v23748_v35  ;;  %27245 = vmatprep.mubr.f32.mxu0 %v4714_v30  ;;  %27315 = vmatprep.mubr.f32.mxu1 %v4715_v33  ;;  %v4764_v22 = vrot.slane %v4750_v11, %v33752_v5  ;;  %v4765_v27 = vcombine.high %v4757_v20, %v4757_v20  ;;  %v1033_v35 = vld [vmem:[%s33746_s29 + $0x1320] sm:$0xff] }
 0x4f6   : > { %27212 = vmatpush1.xpose.msra.mxu0 %v1021_v38  ;;  %27282 = vmatpush1.xpose.msra.mxu1 %v1023_v41  ;;  %v4766_v30 = vcombine.high %v4764_v22, %v4764_v22  ;;  %v1035_v38 = vld [vmem:[%s33746_s29 + $0x1330] sm:$0xff]  ;;  %v1808_v41 = vld [vmem:[%s33746_s29 + $0x2b58] sm:$0x3] }
 0x4f7   : > { %27349 = vmatprep.subr.mxu0 %v1794_v42  ;;  %27419 = vmatprep.subr.mxu1 %v1796_v44  ;;  %v1805_v44 = vld [vmem:[%s33746_s29 + $0x2b40] sm:$0x3] }
 0x4f9   : > { %v23887_v51 = vpop.f32.mrf.mxu0  ;;  %27246 = vmatmul.mubr.f32.vlgmr.msra.gmra.mxu0 %v4706_v23  ;;  %v23957_v56 = vpop.f32.mrf.mxu1  ;;  %27316 = vmatmul.mubr.f32.vlgmr.msra.gmra.mxu1 %v4713_v25  ;;  %v383_v23 = vld [vmem:[%s33738_s27 + $0x4d0] sm:$0xff] }
 0x4fa   : > { %v23888_v55 = vadd.f32 %v23887_v51, %v23818_v39  ;;  %27350 = vmatpush1.xpose.msra.mxu0 %v1793_v47  ;;  %27420 = vmatpush1.xpose.msra.mxu1 %v1795_v48  ;;  %v1803_v25 = vld [vmem:[%s33746_s29 + $0x2b30] sm:$0x3]  ;;  %v4767_v31 = vcombine.high %v383_v23, %v383_v23  ;;  %v1806_v39 = vld [vmem:[%s33746_s29 + $0x2b48] sm:$0x3]  ;;  %v4774_v40 = vrot.slane %v383_v23, %v33752_v5 }
 0x4fb   : > { %v23889_v57 = vpop.f32.mrf.mxu0  ;;  %27351 = vmatprep.subr.mxu0 %v1026_v49  ;;  %v23959_v60 = vpop.f32.mrf.mxu1  ;;  %27421 = vmatprep.subr.mxu1 %v1028_v52  ;;  %v1040_v49 = vld [vmem:[%s33746_s29 + $0x1358] sm:$0xff]  ;;  %v1046_v23 = vld [vmem:[%s33746_s29 + $0x1388] sm:$0xff] }
 0x4fc   : > { %v23958_v59 = vadd.f32 %v23957_v56, %v23888_v55  ;;  %27385 = vmatprep.mubr.f32.mxu0 %v4731_v50  ;;  %27455 = vmatprep.mubr.f32.mxu1 %v4732_v53  ;;  %v4781_v42 = vrot.slane %v4767_v31, %v33752_v5  ;;  %v4782_v47 = vcombine.high %v4774_v40, %v4774_v40  ;;  %v1037_v55 = vld [vmem:[%s33746_s29 + $0x1340] sm:$0xff] }
 0x4fe   : > { %27352 = vmatpush1.xpose.msra.mxu0 %v1025_v58  ;;  %27422 = vmatpush1.xpose.msra.mxu1 %v1027_v61  ;;  %v4783_v50 = vcombine.high %v4781_v42, %v4781_v42  ;;  %v1039_v58 = vld [vmem:[%s33746_s29 + $0x1350] sm:$0xff]  ;;  %v1812_v61 = vld [vmem:[%s33746_s29 + $0x2b78] sm:$0x3] }
 0x4ff   : > { %27489 = vmatprep.subr.mxu0 %v1798_v62  ;;  %27559 = vmatprep.subr.mxu1 %v1800_v0  ;;  %v1809_v0 = vld [vmem:[%s33746_s29 + $0x2b60] sm:$0x3] }
 0x501   : > { %v24027_v8 = vpop.f32.mrf.mxu0  ;;  %27386 = vmatmul.mubr.f32.vlgmr.msra.gmra.mxu0 %v4723_v43  ;;  %v24097_v13 = vpop.f32.mrf.mxu1  ;;  %27456 = vmatmul.mubr.f32.vlgmr.msra.gmra.mxu1 %v4730_v45  ;;  %v384_v43 = vld [vmem:[%s33738_s27 + $0x4d8] sm:$0xff]  ;;  %v1807_v45 = vld [vmem:[%s33746_s29 + $0x2b50] sm:$0x3] }
 0x502   : > { %v24028_v12 = vadd.f32 %v24027_v8, %v23958_v59  ;;  %27490 = vmatpush1.xpose.msra.mxu0 %v1797_v3  ;;  %27560 = vmatpush1.xpose.msra.mxu1 %v1799_v4  ;;  %v4784_v51 = vcombine.high %v384_v43, %v384_v43  ;;  %v1810_v59 = vld [vmem:[%s33746_s29 + $0x2b68] sm:$0x3]  ;;  %v4791_v60 = vrot.slane %v384_v43, %v33752_v5 }
 0x503   : > { %v24029_v14 = vpop.f32.mrf.mxu0  ;;  %27491 = vmatprep.subr.mxu0 %v1030_v6  ;;  %v24099_v17 = vpop.f32.mrf.mxu1  ;;  %27561 = vmatprep.subr.mxu1 %v1032_v9  ;;  %v1044_v6 = vld [vmem:[%s33746_s29 + $0x1378] sm:$0xff]  ;;  %v1050_v43 = vld [vmem:[%s33746_s29 + $0x13a8] sm:$0xff] }
 0x504   : > { %v24098_v16 = vadd.f32 %v24097_v13, %v24028_v12  ;;  %27525 = vmatprep.mubr.f32.mxu0 %v4748_v7  ;;  %27595 = vmatprep.mubr.f32.mxu1 %v4749_v10  ;;  %v4798_v62 = vrot.slane %v4784_v51, %v33752_v5  ;;  %v4799_v3 = vcombine.high %v4791_v60, %v4791_v60  ;;  %v1041_v12 = vld [vmem:[%s33746_s29 + $0x1360] sm:$0xff] }
 0x506   : > { %27492 = vmatpush1.xpose.msra.mxu0 %v1029_v15  ;;  %27562 = vmatpush1.xpose.msra.mxu1 %v1031_v18  ;;  %v4800_v7 = vcombine.high %v4798_v62, %v4798_v62  ;;  %v1043_v15 = vld [vmem:[%s33746_s29 + $0x1370] sm:$0xff]  ;;  %v1816_v18 = vld [vmem:[%s33746_s29 + $0x2b98] sm:$0x3] }
 0x507   : > { %27629 = vmatprep.subr.mxu0 %v1802_v19  ;;  %27699 = vmatprep.subr.mxu1 %v1804_v21  ;;  %v1813_v21 = vld [vmem:[%s33746_s29 + $0x2b80] sm:$0x3] }
 0x509   : > { %v24167_v28 = vpop.f32.mrf.mxu0  ;;  %27526 = vmatmul.mubr.f32.vlgmr.msra.gmra.mxu0 %v4740_v63  ;;  %v24237_v33 = vpop.f32.mrf.mxu1  ;;  %27596 = vmatmul.mubr.f32.vlgmr.msra.gmra.mxu1 %v4747_v1  ;;  %v385_v63 = vld [vmem:[%s33738_s27 + $0x4e0] sm:$0xff]  ;;  %v1811_v1 = vld [vmem:[%s33746_s29 + $0x2b70] sm:$0x3] }
 0x50a   : > { %v24168_v32 = vadd.f32 %v24167_v28, %v24098_v16  ;;  %27630 = vmatpush1.xpose.msra.mxu0 %v1801_v24  ;;  %27700 = vmatpush1.xpose.msra.mxu1 %v1803_v25  ;;  %v4801_v8 = vcombine.high %v385_v63, %v385_v63  ;;  %v1814_v16 = vld [vmem:[%s33746_s29 + $0x2b88] sm:$0x3]  ;;  %v4808_v17 = vrot.slane %v385_v63, %v33752_v5 }
 0x50b   : > { %v24169_v34 = vpop.f32.mrf.mxu0  ;;  %27631 = vmatprep.subr.mxu0 %v1034_v26  ;;  %v24239_v37 = vpop.f32.mrf.mxu1  ;;  %27701 = vmatprep.subr.mxu1 %v1036_v29  ;;  %v1048_v26 = vld [vmem:[%s33746_s29 + $0x1398] sm:$0xff]  ;;  %v1054_v63 = vld [vmem:[%s33746_s29 + $0x13c8] sm:$0xff] }
 0x50c   : > { %v24238_v36 = vadd.f32 %v24237_v33, %v24168_v32  ;;  %27665 = vmatprep.mubr.f32.mxu0 %v4765_v27  ;;  %27735 = vmatprep.mubr.f32.mxu1 %v4766_v30  ;;  %v4815_v19 = vrot.slane %v4801_v8, %v33752_v5  ;;  %v4816_v24 = vcombine.high %v4808_v17, %v4808_v17  ;;  %v1045_v32 = vld [vmem:[%s33746_s29 + $0x1380] sm:$0xff] }
 0x50e   : > { %27632 = vmatpush1.xpose.msra.mxu0 %v1033_v35  ;;  %27702 = vmatpush1.xpose.msra.mxu1 %v1035_v38  ;;  %v4817_v27 = vcombine.high %v4815_v19, %v4815_v19  ;;  %v1047_v35 = vld [vmem:[%s33746_s29 + $0x1390] sm:$0xff]  ;;  %v1820_v38 = vld [vmem:[%s33746_s29 + $0x2bb8] sm:$0x3] }
 0x50f   : > { %27769 = vmatprep.subr.mxu0 %v1806_v39  ;;  %27839 = vmatprep.subr.mxu1 %v1808_v41  ;;  %v1817_v41 = vld [vmem:[%s33746_s29 + $0x2ba0] sm:$0x3] }
 0x511   : > { %v24307_v48 = vpop.f32.mrf.mxu0  ;;  %27666 = vmatmul.mubr.f32.vlgmr.msra.gmra.mxu0 %v4757_v20  ;;  %v24377_v53 = vpop.f32.mrf.mxu1  ;;  %27736 = vmatmul.mubr.f32.vlgmr.msra.gmra.mxu1 %v4764_v22  ;;  %v386_v20 = vld [vmem:[%s33738_s27 + $0x4e8] sm:$0xff]  ;;  %v1815_v22 = vld [vmem:[%s33746_s29 + $0x2b90] sm:$0x3] }
 0x512   : > { %v24308_v52 = vadd.f32 %v24307_v48, %v24238_v36  ;;  %27770 = vmatpush1.xpose.msra.mxu0 %v1805_v44  ;;  %27840 = vmatpush1.xpose.msra.mxu1 %v1807_v45  ;;  %v4818_v28 = vcombine.high %v386_v20, %v386_v20  ;;  %v1818_v36 = vld [vmem:[%s33746_s29 + $0x2ba8] sm:$0x3]  ;;  %v4825_v37 = vrot.slane %v386_v20, %v33752_v5 }
 0x513   : > { %v24309_v54 = vpop.f32.mrf.mxu0  ;;  %27771 = vmatprep.subr.mxu0 %v1038_v46  ;;  %v24379_v57 = vpop.f32.mrf.mxu1  ;;  %27841 = vmatprep.subr.mxu1 %v1040_v49  ;;  %v1052_v46 = vld [vmem:[%s33746_s29 + $0x13b8] sm:$0xff]  ;;  %v1058_v20 = vld [vmem:[%s33746_s29 + $0x13e8] sm:$0xff] }
 0x514   : > { %v24378_v56 = vadd.f32 %v24377_v53, %v24308_v52  ;;  %27805 = vmatprep.mubr.f32.mxu0 %v4782_v47  ;;  %27875 = vmatprep.mubr.f32.mxu1 %v4783_v50  ;;  %v4832_v39 = vrot.slane %v4818_v28, %v33752_v5  ;;  %v4833_v44 = vcombine.high %v4825_v37, %v4825_v37  ;;  %v1049_v52 = vld [vmem:[%s33746_s29 + $0x13a0] sm:$0xff] }
 0x516   : > { %27772 = vmatpush1.xpose.msra.mxu0 %v1037_v55  ;;  %27842 = vmatpush1.xpose.msra.mxu1 %v1039_v58  ;;  %v4834_v47 = vcombine.high %v4832_v39, %v4832_v39  ;;  %v1051_v55 = vld [vmem:[%s33746_s29 + $0x13b0] sm:$0xff]  ;;  %v1824_v58 = vld [vmem:[%s33746_s29 + $0x2bd8] sm:$0x3] }
 0x517   : > { %27909 = vmatprep.subr.mxu0 %v1810_v59  ;;  %27979 = vmatprep.subr.mxu1 %v1812_v61  ;;  %v1821_v61 = vld [vmem:[%s33746_s29 + $0x2bc0] sm:$0x3] }
 0x519   : > { %v24447_v4 = vpop.f32.mrf.mxu0  ;;  %27806 = vmatmul.mubr.f32.vlgmr.msra.gmra.mxu0 %v4774_v40  ;;  %v24517_v10 = vpop.f32.mrf.mxu1  ;;  %27876 = vmatmul.mubr.f32.vlgmr.msra.gmra.mxu1 %v4781_v42  ;;  %v387_v40 = vld [vmem:[%s33738_s27 + $0x4f0] sm:$0xff] }
 0x51a   : > { %v24448_v9 = vadd.f32 %v24447_v4, %v24378_v56  ;;  %27910 = vmatpush1.xpose.msra.mxu0 %v1809_v0  ;;  %27980 = vmatpush1.xpose.msra.mxu1 %v1811_v1  ;;  %v1819_v42 = vld [vmem:[%s33746_s29 + $0x2bb0] sm:$0x3]  ;;  %v4835_v48 = vcombine.high %v387_v40, %v387_v40  ;;  %v1822_v56 = vld [vmem:[%s33746_s29 + $0x2bc8] sm:$0x3]  ;;  %v4842_v57 = vrot.slane %v387_v40, %v33752_v5 }
 0x51b   : > { %v24449_v11 = vpop.f32.mrf.mxu0  ;;  %27911 = vmatprep.subr.mxu0 %v1042_v2  ;;  %v24519_v14 = vpop.f32.mrf.mxu1  ;;  %27981 = vmatprep.subr.mxu1 %v1044_v6  ;;  %v1056_v2 = vld [vmem:[%s33746_s29 + $0x13d8] sm:$0xff]  ;;  %v1062_v40 = vld [vmem:[%s33746_s29 + $0x1408] sm:$0xff] }
 0x51c   : > { %v24518_v13 = vadd.f32 %v24517_v10, %v24448_v9  ;;  %27945 = vmatprep.mubr.f32.mxu0 %v4799_v3  ;;  %28015 = vmatprep.mubr.f32.mxu1 %v4800_v7  ;;  %v4849_v59 = vrot.slane %v4835_v48, %v33752_v5  ;;  %v4850_v0 = vcombine.high %v4842_v57, %v4842_v57  ;;  %v1053_v9 = vld [vmem:[%s33746_s29 + $0x13c0] sm:$0xff] }
 0x51e   : > { %27912 = vmatpush1.xpose.msra.mxu0 %v1041_v12  ;;  %27982 = vmatpush1.xpose.msra.mxu1 %v1043_v15  ;;  %v4851_v3 = vcombine.high %v4849_v59, %v4849_v59  ;;  %v1055_v12 = vld [vmem:[%s33746_s29 + $0x13d0] sm:$0xff]  ;;  %v1828_v15 = vld [vmem:[%s33746_s29 + $0x2bf8] sm:$0x3] }
 0x51f   : > { %28049 = vmatprep.subr.mxu0 %v1814_v16  ;;  %28119 = vmatprep.subr.mxu1 %v1816_v18  ;;  %v1825_v18 = vld [vmem:[%s33746_s29 + $0x2be0] sm:$0x3] }
 0x521   : > { %v24587_v25 = vpop.f32.mrf.mxu0  ;;  %27946 = vmatmul.mubr.f32.vlgmr.msra.gmra.mxu0 %v4791_v60  ;;  %v24657_v30 = vpop.f32.mrf.mxu1  ;;  %28016 = vmatmul.mubr.f32.vlgmr.msra.gmra.mxu1 %v4798_v62  ;;  %v388_v60 = vld [vmem:[%s33738_s27 + $0x4f8] sm:$0xff]  ;;  %v1823_v62 = vld [vmem:[%s33746_s29 + $0x2bd0] sm:$0x3] }
 0x522   : > { %v24588_v29 = vadd.f32 %v24587_v25, %v24518_v13  ;;  %28050 = vmatpush1.xpose.msra.mxu0 %v1813_v21  ;;  %28120 = vmatpush1.xpose.msra.mxu1 %v1815_v22  ;;  %v4852_v4 = vcombine.high %v388_v60, %v388_v60  ;;  %v1826_v13 = vld [vmem:[%s33746_s29 + $0x2be8] sm:$0x3]  ;;  %v4859_v14 = vrot.slane %v388_v60, %v33752_v5 }
 0x523   : > { %v24589_v31 = vpop.f32.mrf.mxu0  ;;  %28051 = vmatprep.subr.mxu0 %v1046_v23  ;;  %v24659_v34 = vpop.f32.mrf.mxu1  ;;  %28121 = vmatprep.subr.mxu1 %v1048_v26  ;;  %v1060_v23 = vld [vmem:[%s33746_s29 + $0x13f8] sm:$0xff]  ;;  %v1066_v60 = vld [vmem:[%s33746_s29 + $0x1428] sm:$0xff] }
 0x524   : > { %v24658_v33 = vadd.f32 %v24657_v30, %v24588_v29  ;;  %28085 = vmatprep.mubr.f32.mxu0 %v4816_v24  ;;  %28155 = vmatprep.mubr.f32.mxu1 %v4817_v27  ;;  %v4866_v16 = vrot.slane %v4852_v4, %v33752_v5  ;;  %v4867_v21 = vcombine.high %v4859_v14, %v4859_v14  ;;  %v1057_v29 = vld [vmem:[%s33746_s29 + $0x13e0] sm:$0xff] }
 0x526   : > { %28052 = vmatpush1.xpose.msra.mxu0 %v1045_v32  ;;  %28122 = vmatpush1.xpose.msra.mxu1 %v1047_v35  ;;  %v4868_v24 = vcombine.high %v4866_v16, %v4866_v16  ;;  %v1059_v32 = vld [vmem:[%s33746_s29 + $0x13f0] sm:$0xff]  ;;  %v1832_v35 = vld [vmem:[%s33746_s29 + $0x2c18] sm:$0x3] }
 0x527   : > { %28189 = vmatprep.subr.mxu0 %v1818_v36  ;;  %28259 = vmatprep.subr.mxu1 %v1820_v38  ;;  %v1829_v38 = vld [vmem:[%s33746_s29 + $0x2c00] sm:$0x3] }
 0x529   : > { %v24727_v45 = vpop.f32.mrf.mxu0  ;;  %28086 = vmatmul.mubr.f32.vlgmr.msra.gmra.mxu0 %v4808_v17  ;;  %v24797_v50 = vpop.f32.mrf.mxu1  ;;  %28156 = vmatmul.mubr.f32.vlgmr.msra.gmra.mxu1 %v4815_v19  ;;  %v389_v17 = vld [vmem:[%s33738_s27 + $0x500] sm:$0xff]  ;;  %v1827_v19 = vld [vmem:[%s33746_s29 + $0x2bf0] sm:$0x3] }
 0x52a   : > { %v24728_v49 = vadd.f32 %v24727_v45, %v24658_v33  ;;  %28190 = vmatpush1.xpose.msra.mxu0 %v1817_v41  ;;  %28260 = vmatpush1.xpose.msra.mxu1 %v1819_v42  ;;  %v4869_v25 = vcombine.high %v389_v17, %v389_v17  ;;  %v1830_v33 = vld [vmem:[%s33746_s29 + $0x2c08] sm:$0x3]  ;;  %v4876_v34 = vrot.slane %v389_v17, %v33752_v5 }
 0x52b   : > { %v24729_v51 = vpop.f32.mrf.mxu0  ;;  %28191 = vmatprep.subr.mxu0 %v1050_v43  ;;  %v24799_v54 = vpop.f32.mrf.mxu1  ;;  %28261 = vmatprep.subr.mxu1 %v1052_v46  ;;  %v1064_v43 = vld [vmem:[%s33746_s29 + $0x1418] sm:$0xff]  ;;  %v1070_v17 = vld [vmem:[%s33746_s29 + $0x1448] sm:$0xff] }
 0x52c   : > { %v24798_v53 = vadd.f32 %v24797_v50, %v24728_v49  ;;  %28225 = vmatprep.mubr.f32.mxu0 %v4833_v44  ;;  %28295 = vmatprep.mubr.f32.mxu1 %v4834_v47  ;;  %v4883_v36 = vrot.slane %v4869_v25, %v33752_v5  ;;  %v4884_v41 = vcombine.high %v4876_v34, %v4876_v34  ;;  %v1061_v49 = vld [vmem:[%s33746_s29 + $0x1400] sm:$0xff] }
 0x52e   : > { %28192 = vmatpush1.xpose.msra.mxu0 %v1049_v52  ;;  %28262 = vmatpush1.xpose.msra.mxu1 %v1051_v55  ;;  %v4885_v44 = vcombine.high %v4883_v36, %v4883_v36  ;;  %v1063_v52 = vld [vmem:[%s33746_s29 + $0x1410] sm:$0xff]  ;;  %v1836_v55 = vld [vmem:[%s33746_s29 + $0x2c38] sm:$0x3] }
 0x52f   : > { %28329 = vmatprep.subr.mxu0 %v1822_v56  ;;  %28399 = vmatprep.subr.mxu1 %v1824_v58  ;;  %v1833_v58 = vld [vmem:[%s33746_s29 + $0x2c20] sm:$0x3] }
 0x531   : > { %v24867_v1 = vpop.f32.mrf.mxu0  ;;  %28226 = vmatmul.mubr.f32.vlgmr.msra.gmra.mxu0 %v4825_v37  ;;  %v24937_v7 = vpop.f32.mrf.mxu1  ;;  %28296 = vmatmul.mubr.f32.vlgmr.msra.gmra.mxu1 %v4832_v39  ;;  %v390_v37 = vld [vmem:[%s33738_s27 + $0x508] sm:$0xff]  ;;  %v1831_v39 = vld [vmem:[%s33746_s29 + $0x2c10] sm:$0x3] }
 0x532   : > { %v24868_v6 = vadd.f32 %v24867_v1, %v24798_v53  ;;  %28330 = vmatpush1.xpose.msra.mxu0 %v1821_v61  ;;  %28400 = vmatpush1.xpose.msra.mxu1 %v1823_v62  ;;  %v4886_v45 = vcombine.high %v390_v37, %v390_v37  ;;  %v1834_v53 = vld [vmem:[%s33746_s29 + $0x2c28] sm:$0x3]  ;;  %v4893_v54 = vrot.slane %v390_v37, %v33752_v5 }
 0x533   : > { %v24869_v8 = vpop.f32.mrf.mxu0  ;;  %28331 = vmatprep.subr.mxu0 %v1054_v63  ;;  %v24939_v11 = vpop.f32.mrf.mxu1  ;;  %28401 = vmatprep.subr.mxu1 %v1056_v2  ;;  %v1068_v63 = vld [vmem:[%s33746_s29 + $0x1438] sm:$0xff]  ;;  %v1074_v37 = vld [vmem:[%s33746_s29 + $0x1468] sm:$0xff] }
 0x534   : > { %v24938_v10 = vadd.f32 %v24937_v7, %v24868_v6  ;;  %28365 = vmatprep.mubr.f32.mxu0 %v4850_v0  ;;  %28435 = vmatprep.mubr.f32.mxu1 %v4851_v3  ;;  %v4900_v56 = vrot.slane %v4886_v45, %v33752_v5  ;;  %v4901_v61 = vcombine.high %v4893_v54, %v4893_v54  ;;  %v1065_v6 = vld [vmem:[%s33746_s29 + $0x1420] sm:$0xff] }
 0x536   : > { %28332 = vmatpush1.xpose.msra.mxu0 %v1053_v9  ;;  %28402 = vmatpush1.xpose.msra.mxu1 %v1055_v12  ;;  %v4902_v0 = vcombine.high %v4900_v56, %v4900_v56  ;;  %v1067_v9 = vld [vmem:[%s33746_s29 + $0x1430] sm:$0xff]  ;;  %v1840_v12 = vld [vmem:[%s33746_s29 + $0x2c58] sm:$0x3] }
 0x537   : > { %28469 = vmatprep.subr.mxu0 %v1826_v13  ;;  %28539 = vmatprep.subr.mxu1 %v1828_v15  ;;  %v1837_v15 = vld [vmem:[%s33746_s29 + $0x2c40] sm:$0x3] }
 0x539   : > { %v25007_v22 = vpop.f32.mrf.mxu0  ;;  %28366 = vmatmul.mubr.f32.vlgmr.msra.gmra.mxu0 %v4842_v57  ;;  %v25077_v27 = vpop.f32.mrf.mxu1  ;;  %28436 = vmatmul.mubr.f32.vlgmr.msra.gmra.mxu1 %v4849_v59  ;;  %v391_v57 = vld [vmem:[%s33738_s27 + $0x510] sm:$0xff] }
 0x53a   : > { %v25008_v26 = vadd.f32 %v25007_v22, %v24938_v10  ;;  %28470 = vmatpush1.xpose.msra.mxu0 %v1825_v18  ;;  %28540 = vmatpush1.xpose.msra.mxu1 %v1827_v19  ;;  %v1835_v59 = vld [vmem:[%s33746_s29 + $0x2c30] sm:$0x3]  ;;  %v4903_v1 = vcombine.high %v391_v57, %v391_v57  ;;  %v1838_v10 = vld [vmem:[%s33746_s29 + $0x2c48] sm:$0x3]  ;;  %v4910_v11 = vrot.slane %v391_v57, %v33752_v5 }
 0x53b   : > { %v25009_v28 = vpop.f32.mrf.mxu0  ;;  %28471 = vmatprep.subr.mxu0 %v1058_v20  ;;  %v25079_v31 = vpop.f32.mrf.mxu1  ;;  %28541 = vmatprep.subr.mxu1 %v1060_v23  ;;  %v1072_v20 = vld [vmem:[%s33746_s29 + $0x1458] sm:$0xff]  ;;  %v1078_v57 = vld [vmem:[%s33746_s29 + $0x1488] sm:$0xff] }
 0x53c   : > { %v25078_v30 = vadd.f32 %v25077_v27, %v25008_v26  ;;  %28505 = vmatprep.mubr.f32.mxu0 %v4867_v21  ;;  %28575 = vmatprep.mubr.f32.mxu1 %v4868_v24  ;;  %v4917_v13 = vrot.slane %v4903_v1, %v33752_v5  ;;  %v4918_v18 = vcombine.high %v4910_v11, %v4910_v11  ;;  %v1069_v26 = vld [vmem:[%s33746_s29 + $0x1440] sm:$0xff] }
 0x53e   : > { %28472 = vmatpush1.xpose.msra.mxu0 %v1057_v29  ;;  %28542 = vmatpush1.xpose.msra.mxu1 %v1059_v32  ;;  %v4919_v21 = vcombine.high %v4917_v13, %v4917_v13  ;;  %v1071_v29 = vld [vmem:[%s33746_s29 + $0x1450] sm:$0xff]  ;;  %v1844_v32 = vld [vmem:[%s33746_s29 + $0x2c78] sm:$0x3] }
 0x53f   : > { %28609 = vmatprep.subr.mxu0 %v1830_v33  ;;  %28679 = vmatprep.subr.mxu1 %v1832_v35  ;;  %v1841_v35 = vld [vmem:[%s33746_s29 + $0x2c60] sm:$0x3] }
 0x541   : > { %v25147_v42 = vpop.f32.mrf.mxu0  ;;  %28506 = vmatmul.mubr.f32.vlgmr.msra.gmra.mxu0 %v4859_v14  ;;  %v25217_v47 = vpop.f32.mrf.mxu1  ;;  %28576 = vmatmul.mubr.f32.vlgmr.msra.gmra.mxu1 %v4866_v16  ;;  %v392_v14 = vld [vmem:[%s33738_s27 + $0x518] sm:$0xff]  ;;  %v1839_v16 = vld [vmem:[%s33746_s29 + $0x2c50] sm:$0x3] }
 0x542   : > { %v25148_v46 = vadd.f32 %v25147_v42, %v25078_v30  ;;  %28610 = vmatpush1.xpose.msra.mxu0 %v1829_v38  ;;  %28680 = vmatpush1.xpose.msra.mxu1 %v1831_v39  ;;  %v4920_v22 = vcombine.high %v392_v14, %v392_v14  ;;  %v1842_v30 = vld [vmem:[%s33746_s29 + $0x2c68] sm:$0x3]  ;;  %v4927_v31 = vrot.slane %v392_v14, %v33752_v5 }
 0x543   : > { %v25149_v48 = vpop.f32.mrf.mxu0  ;;  %28611 = vmatprep.subr.mxu0 %v1062_v40  ;;  %v25219_v51 = vpop.f32.mrf.mxu1  ;;  %28681 = vmatprep.subr.mxu1 %v1064_v43  ;;  %v1076_v40 = vld [vmem:[%s33746_s29 + $0x1478] sm:$0xff]  ;;  %v1082_v14 = vld [vmem:[%s33746_s29 + $0x14a8] sm:$0xff] }
 0x544   : > { %v25218_v50 = vadd.f32 %v25217_v47, %v25148_v46  ;;  %28645 = vmatprep.mubr.f32.mxu0 %v4884_v41  ;;  %28715 = vmatprep.mubr.f32.mxu1 %v4885_v44  ;;  %v4934_v33 = vrot.slane %v4920_v22, %v33752_v5  ;;  %v4935_v38 = vcombine.high %v4927_v31, %v4927_v31  ;;  %v1073_v46 = vld [vmem:[%s33746_s29 + $0x1460] sm:$0xff] }
 0x546   : > { %28612 = vmatpush1.xpose.msra.mxu0 %v1061_v49  ;;  %28682 = vmatpush1.xpose.msra.mxu1 %v1063_v52  ;;  %v4936_v41 = vcombine.high %v4934_v33, %v4934_v33  ;;  %v1075_v49 = vld [vmem:[%s33746_s29 + $0x1470] sm:$0xff]  ;;  %v1848_v52 = vld [vmem:[%s33746_s29 + $0x2c98] sm:$0x3] }
 0x547   : > { %28749 = vmatprep.subr.mxu0 %v1834_v53  ;;  %28819 = vmatprep.subr.mxu1 %v1836_v55  ;;  %v1845_v55 = vld [vmem:[%s33746_s29 + $0x2c80] sm:$0x3] }
 0x549   : > { %v25287_v62 = vpop.f32.mrf.mxu0  ;;  %28646 = vmatmul.mubr.f32.vlgmr.msra.gmra.mxu0 %v4876_v34  ;;  %v25357_v3 = vpop.f32.mrf.mxu1  ;;  %28716 = vmatmul.mubr.f32.vlgmr.msra.gmra.mxu1 %v4883_v36  ;;  %v393_v34 = vld [vmem:[%s33738_s27 + $0x520] sm:$0xff]  ;;  %v1843_v36 = vld [vmem:[%s33746_s29 + $0x2c70] sm:$0x3] }
 0x54a   : > { %v25288_v2 = vadd.f32 %v25287_v62, %v25218_v50  ;;  %28750 = vmatpush1.xpose.msra.mxu0 %v1833_v58  ;;  %28820 = vmatpush1.xpose.msra.mxu1 %v1835_v59  ;;  %v4937_v42 = vcombine.high %v393_v34, %v393_v34  ;;  %v1846_v50 = vld [vmem:[%s33746_s29 + $0x2c88] sm:$0x3]  ;;  %v4944_v51 = vrot.slane %v393_v34, %v33752_v5 }
 0x54b   : > { %v25289_v4 = vpop.f32.mrf.mxu0  ;;  %28751 = vmatprep.subr.mxu0 %v1066_v60  ;;  %v25359_v8 = vpop.f32.mrf.mxu1  ;;  %28821 = vmatprep.subr.mxu1 %v1068_v63  ;;  %v1080_v60 = vld [vmem:[%s33746_s29 + $0x1498] sm:$0xff]  ;;  %v1086_v34 = vld [vmem:[%s33746_s29 + $0x14c8] sm:$0xff] }
 0x54c   : > { %v25358_v7 = vadd.f32 %v25357_v3, %v25288_v2  ;;  %28785 = vmatprep.mubr.f32.mxu0 %v4901_v61  ;;  %28855 = vmatprep.mubr.f32.mxu1 %v4902_v0  ;;  %v4951_v53 = vrot.slane %v4937_v42, %v33752_v5  ;;  %v4952_v58 = vcombine.high %v4944_v51, %v4944_v51  ;;  %v1077_v2 = vld [vmem:[%s33746_s29 + $0x1480] sm:$0xff] }
 0x54e   : > { %28752 = vmatpush1.xpose.msra.mxu0 %v1065_v6  ;;  %28822 = vmatpush1.xpose.msra.mxu1 %v1067_v9  ;;  %v4953_v61 = vcombine.high %v4951_v53, %v4951_v53  ;;  %v1079_v6 = vld [vmem:[%s33746_s29 + $0x1490] sm:$0xff]  ;;  %v1852_v9 = vld [vmem:[%s33746_s29 + $0x2cb8] sm:$0x3] }
 0x54f   : > { %28889 = vmatprep.subr.mxu0 %v1838_v10  ;;  %28959 = vmatprep.subr.mxu1 %v1840_v12  ;;  %v1849_v12 = vld [vmem:[%s33746_s29 + $0x2ca0] sm:$0x3] }
 0x551   : > { %v25427_v19 = vpop.f32.mrf.mxu0  ;;  %28786 = vmatmul.mubr.f32.vlgmr.msra.gmra.mxu0 %v4893_v54  ;;  %v25497_v24 = vpop.f32.mrf.mxu1  ;;  %28856 = vmatmul.mubr.f32.vlgmr.msra.gmra.mxu1 %v4900_v56  ;;  %v394_v54 = vld [vmem:[%s33738_s27 + $0x528] sm:$0xff]  ;;  %v1847_v56 = vld [vmem:[%s33746_s29 + $0x2c90] sm:$0x3] }
 0x552   : > { %v25428_v23 = vadd.f32 %v25427_v19, %v25358_v7  ;;  %28890 = vmatpush1.xpose.msra.mxu0 %v1837_v15  ;;  %28960 = vmatpush1.xpose.msra.mxu1 %v1839_v16  ;;  %v4954_v62 = vcombine.high %v394_v54, %v394_v54  ;;  %v1850_v7 = vld [vmem:[%s33746_s29 + $0x2ca8] sm:$0x3]  ;;  %v4961_v8 = vrot.slane %v394_v54, %v33752_v5 }
 0x553   : > { %v25429_v25 = vpop.f32.mrf.mxu0  ;;  %28891 = vmatprep.subr.mxu0 %v1070_v17  ;;  %v25499_v28 = vpop.f32.mrf.mxu1  ;;  %28961 = vmatprep.subr.mxu1 %v1072_v20  ;;  %v1084_v17 = vld [vmem:[%s33746_s29 + $0x14b8] sm:$0xff]  ;;  %v1090_v54 = vld [vmem:[%s33746_s29 + $0x14e8] sm:$0xff] }
 0x554   : > { %v25498_v27 = vadd.f32 %v25497_v24, %v25428_v23  ;;  %28925 = vmatprep.mubr.f32.mxu0 %v4918_v18  ;;  %28995 = vmatprep.mubr.f32.mxu1 %v4919_v21  ;;  %v4968_v10 = vrot.slane %v4954_v62, %v33752_v5  ;;  %v4969_v15 = vcombine.high %v4961_v8, %v4961_v8  ;;  %v1081_v23 = vld [vmem:[%s33746_s29 + $0x14a0] sm:$0xff] }
 0x556   : > { %28892 = vmatpush1.xpose.msra.mxu0 %v1069_v26  ;;  %28962 = vmatpush1.xpose.msra.mxu1 %v1071_v29  ;;  %v4970_v18 = vcombine.high %v4968_v10, %v4968_v10  ;;  %v1083_v26 = vld [vmem:[%s33746_s29 + $0x14b0] sm:$0xff]  ;;  %v1856_v29 = vld [vmem:[%s33746_s29 + $0x2cd8] sm:$0x3] }
 0x557   : > { %29029 = vmatprep.subr.mxu0 %v1842_v30  ;;  %29099 = vmatprep.subr.mxu1 %v1844_v32  ;;  %v1853_v32 = vld [vmem:[%s33746_s29 + $0x2cc0] sm:$0x3] }
 0x559   : > { %v25567_v39 = vpop.f32.mrf.mxu0  ;;  %28926 = vmatmul.mubr.f32.vlgmr.msra.gmra.mxu0 %v4910_v11  ;;  %v25637_v44 = vpop.f32.mrf.mxu1  ;;  %28996 = vmatmul.mubr.f32.vlgmr.msra.gmra.mxu1 %v4917_v13  ;;  %v395_v11 = vld [vmem:[%s33738_s27 + $0x530] sm:$0xff] }
 0x55a   : > { %v25568_v43 = vadd.f32 %v25567_v39, %v25498_v27  ;;  %29030 = vmatpush1.xpose.msra.mxu0 %v1841_v35  ;;  %29100 = vmatpush1.xpose.msra.mxu1 %v1843_v36  ;;  %v1851_v13 = vld [vmem:[%s33746_s29 + $0x2cb0] sm:$0x3]  ;;  %v4971_v19 = vcombine.high %v395_v11, %v395_v11  ;;  %v1854_v27 = vld [vmem:[%s33746_s29 + $0x2cc8] sm:$0x3]  ;;  %v4978_v28 = vrot.slane %v395_v11, %v33752_v5 }
 0x55b   : > { %v25569_v45 = vpop.f32.mrf.mxu0  ;;  %29031 = vmatprep.subr.mxu0 %v1074_v37  ;;  %v25639_v48 = vpop.f32.mrf.mxu1  ;;  %29101 = vmatprep.subr.mxu1 %v1076_v40  ;;  %v1088_v37 = vld [vmem:[%s33746_s29 + $0x14d8] sm:$0xff]  ;;  %v1094_v11 = vld [vmem:[%s33746_s29 + $0x1508] sm:$0xff] }
 0x55c   : > { %v25638_v47 = vadd.f32 %v25637_v44, %v25568_v43  ;;  %29065 = vmatprep.mubr.f32.mxu0 %v4935_v38  ;;  %29135 = vmatprep.mubr.f32.mxu1 %v4936_v41  ;;  %v4985_v30 = vrot.slane %v4971_v19, %v33752_v5  ;;  %v4986_v35 = vcombine.high %v4978_v28, %v4978_v28  ;;  %v1085_v43 = vld [vmem:[%s33746_s29 + $0x14c0] sm:$0xff] }
 0x55e   : > { %29032 = vmatpush1.xpose.msra.mxu0 %v1073_v46  ;;  %29102 = vmatpush1.xpose.msra.mxu1 %v1075_v49  ;;  %v4987_v38 = vcombine.high %v4985_v30, %v4985_v30  ;;  %v1087_v46 = vld [vmem:[%s33746_s29 + $0x14d0] sm:$0xff]  ;;  %v1860_v49 = vld [vmem:[%s33746_s29 + $0x2cf8] sm:$0x3] }
 0x55f   : > { %29169 = vmatprep.subr.mxu0 %v1846_v50  ;;  %29239 = vmatprep.subr.mxu1 %v1848_v52  ;;  %v1857_v52 = vld [vmem:[%s33746_s29 + $0x2ce0] sm:$0x3] }
 0x561   : > { %v25707_v59 = vpop.f32.mrf.mxu0  ;;  %29066 = vmatmul.mubr.f32.vlgmr.msra.gmra.mxu0 %v4927_v31  ;;  %v25777_v0 = vpop.f32.mrf.mxu1  ;;  %29136 = vmatmul.mubr.f32.vlgmr.msra.gmra.mxu1 %v4934_v33  ;;  %v396_v31 = vld [vmem:[%s33738_s27 + $0x538] sm:$0xff]  ;;  %v1855_v33 = vld [vmem:[%s33746_s29 + $0x2cd0] sm:$0x3] }
 0x562   : > { %v25708_v63 = vadd.f32 %v25707_v59, %v25638_v47  ;;  %29170 = vmatpush1.xpose.msra.mxu0 %v1845_v55  ;;  %29240 = vmatpush1.xpose.msra.mxu1 %v1847_v56  ;;  %v4988_v39 = vcombine.high %v396_v31, %v396_v31  ;;  %v1858_v47 = vld [vmem:[%s33746_s29 + $0x2ce8] sm:$0x3]  ;;  %v4995_v48 = vrot.slane %v396_v31, %v33752_v5 }
 0x563   : > { %v25709_v1 = vpop.f32.mrf.mxu0  ;;  %29171 = vmatprep.subr.mxu0 %v1078_v57  ;;  %v25779_v4 = vpop.f32.mrf.mxu1  ;;  %29241 = vmatprep.subr.mxu1 %v1080_v60  ;;  %v1092_v57 = vld [vmem:[%s33746_s29 + $0x14f8] sm:$0xff]  ;;  %v1098_v31 = vld [vmem:[%s33746_s29 + $0x1528] sm:$0xff] }
 0x564   : > { %v25778_v3 = vadd.f32 %v25777_v0, %v25708_v63  ;;  %29205 = vmatprep.mubr.f32.mxu0 %v4952_v58  ;;  %29275 = vmatprep.mubr.f32.mxu1 %v4953_v61  ;;  %v5002_v50 = vrot.slane %v4988_v39, %v33752_v5  ;;  %v5003_v55 = vcombine.high %v4995_v48, %v4995_v48  ;;  %v1089_v63 = vld [vmem:[%s33746_s29 + $0x14e0] sm:$0xff] }
 0x566   : > { %29172 = vmatpush1.xpose.msra.mxu0 %v1077_v2  ;;  %29242 = vmatpush1.xpose.msra.mxu1 %v1079_v6  ;;  %v5004_v58 = vcombine.high %v5002_v50, %v5002_v50  ;;  %v1091_v2 = vld [vmem:[%s33746_s29 + $0x14f0] sm:$0xff]  ;;  %v1864_v6 = vld [vmem:[%s33746_s29 + $0x2d18] sm:$0x3] }
 0x567   : > { %29309 = vmatprep.subr.mxu0 %v1850_v7  ;;  %29379 = vmatprep.subr.mxu1 %v1852_v9  ;;  %v1861_v9 = vld [vmem:[%s33746_s29 + $0x2d00] sm:$0x3] }
 0x569   : > { %v25847_v16 = vpop.f32.mrf.mxu0  ;;  %29206 = vmatmul.mubr.f32.vlgmr.msra.gmra.mxu0 %v4944_v51  ;;  %v25917_v21 = vpop.f32.mrf.mxu1  ;;  %29276 = vmatmul.mubr.f32.vlgmr.msra.gmra.mxu1 %v4951_v53  ;;  %v397_v51 = vld [vmem:[%s33738_s27 + $0x540] sm:$0xff]  ;;  %v1859_v53 = vld [vmem:[%s33746_s29 + $0x2cf0] sm:$0x3] }
 0x56a   : > { %v25848_v20 = vadd.f32 %v25847_v16, %v25778_v3  ;;  %29310 = vmatpush1.xpose.msra.mxu0 %v1849_v12  ;;  %29380 = vmatpush1.xpose.msra.mxu1 %v1851_v13  ;;  %v5005_v59 = vcombine.high %v397_v51, %v397_v51  ;;  %v1862_v3 = vld [vmem:[%s33746_s29 + $0x2d08] sm:$0x3]  ;;  %v5012_v4 = vrot.slane %v397_v51, %v33752_v5 }
 0x56b   : > { %v25849_v22 = vpop.f32.mrf.mxu0  ;;  %29311 = vmatprep.subr.mxu0 %v1082_v14  ;;  %v25919_v25 = vpop.f32.mrf.mxu1  ;;  %29381 = vmatprep.subr.mxu1 %v1084_v17  ;;  %v1096_v14 = vld [vmem:[%s33746_s29 + $0x1518] sm:$0xff]  ;;  %v1102_v51 = vld [vmem:[%s33746_s29 + $0x1548] sm:$0xff] }
 0x56c   : > { %v25918_v24 = vadd.f32 %v25917_v21, %v25848_v20  ;;  %29345 = vmatprep.mubr.f32.mxu0 %v4969_v15  ;;  %29415 = vmatprep.mubr.f32.mxu1 %v4970_v18  ;;  %v5019_v7 = vrot.slane %v5005_v59, %v33752_v5  ;;  %v5020_v12 = vcombine.high %v5012_v4, %v5012_v4  ;;  %v1093_v20 = vld [vmem:[%s33746_s29 + $0x1500] sm:$0xff] }
 0x56e   : > { %29312 = vmatpush1.xpose.msra.mxu0 %v1081_v23  ;;  %29382 = vmatpush1.xpose.msra.mxu1 %v1083_v26  ;;  %v5021_v15 = vcombine.high %v5019_v7, %v5019_v7  ;;  %v1095_v23 = vld [vmem:[%s33746_s29 + $0x1510] sm:$0xff]  ;;  %v1868_v26 = vld [vmem:[%s33746_s29 + $0x2d38] sm:$0x3] }
 0x56f   : > { %29449 = vmatprep.subr.mxu0 %v1854_v27  ;;  %29519 = vmatprep.subr.mxu1 %v1856_v29  ;;  %v1865_v29 = vld [vmem:[%s33746_s29 + $0x2d20] sm:$0x3] }
 0x571   : > { %v25987_v36 = vpop.f32.mrf.mxu0  ;;  %29346 = vmatmul.mubr.f32.vlgmr.msra.gmra.mxu0 %v4961_v8  ;;  %v26057_v41 = vpop.f32.mrf.mxu1  ;;  %29416 = vmatmul.mubr.f32.vlgmr.msra.gmra.mxu1 %v4968_v10  ;;  %v398_v8 = vld [vmem:[%s33738_s27 + $0x548] sm:$0xff]  ;;  %v1863_v10 = vld [vmem:[%s33746_s29 + $0x2d10] sm:$0x3] }
 0x572   : > { %v25988_v40 = vadd.f32 %v25987_v36, %v25918_v24  ;;  %29450 = vmatpush1.xpose.msra.mxu0 %v1853_v32  ;;  %29520 = vmatpush1.xpose.msra.mxu1 %v1855_v33  ;;  %v5022_v16 = vcombine.high %v398_v8, %v398_v8  ;;  %v1866_v24 = vld [vmem:[%s33746_s29 + $0x2d28] sm:$0x3]  ;;  %v5029_v25 = vrot.slane %v398_v8, %v33752_v5 }
 0x573   : > { %v25989_v42 = vpop.f32.mrf.mxu0  ;;  %29451 = vmatprep.subr.mxu0 %v1086_v34  ;;  %v26059_v45 = vpop.f32.mrf.mxu1  ;;  %29521 = vmatprep.subr.mxu1 %v1088_v37  ;;  %v1100_v34 = vld [vmem:[%s33746_s29 + $0x1538] sm:$0xff]  ;;  %v1106_v8 = vld [vmem:[%s33746_s29 + $0x1568] sm:$0xff] }
 0x574   : > { %v26058_v44 = vadd.f32 %v26057_v41, %v25988_v40  ;;  %29485 = vmatprep.mubr.f32.mxu0 %v4986_v35  ;;  %29555 = vmatprep.mubr.f32.mxu1 %v4987_v38  ;;  %v5036_v27 = vrot.slane %v5022_v16, %v33752_v5  ;;  %v5037_v32 = vcombine.high %v5029_v25, %v5029_v25  ;;  %v1097_v40 = vld [vmem:[%s33746_s29 + $0x1520] sm:$0xff] }
 0x576   : > { %29452 = vmatpush1.xpose.msra.mxu0 %v1085_v43  ;;  %29522 = vmatpush1.xpose.msra.mxu1 %v1087_v46  ;;  %v5038_v35 = vcombine.high %v5036_v27, %v5036_v27  ;;  %v1099_v43 = vld [vmem:[%s33746_s29 + $0x1530] sm:$0xff]  ;;  %v1872_v46 = vld [vmem:[%s33746_s29 + $0x2d58] sm:$0x3] }
 0x577   : > { %29589 = vmatprep.subr.mxu0 %v1858_v47  ;;  %29659 = vmatprep.subr.mxu1 %v1860_v49  ;;  %v1869_v49 = vld [vmem:[%s33746_s29 + $0x2d40] sm:$0x3] }
 0x579   : > { %v26127_v56 = vpop.f32.mrf.mxu0  ;;  %29486 = vmatmul.mubr.f32.vlgmr.msra.gmra.mxu0 %v4978_v28  ;;  %v26197_v61 = vpop.f32.mrf.mxu1  ;;  %29556 = vmatmul.mubr.f32.vlgmr.msra.gmra.mxu1 %v4985_v30  ;;  %v399_v28 = vld [vmem:[%s33738_s27 + $0x550] sm:$0xff] }
 0x57a   : > { %v26128_v60 = vadd.f32 %v26127_v56, %v26058_v44  ;;  %29590 = vmatpush1.xpose.msra.mxu0 %v1857_v52  ;;  %29660 = vmatpush1.xpose.msra.mxu1 %v1859_v53  ;;  %v1867_v30 = vld [vmem:[%s33746_s29 + $0x2d30] sm:$0x3]  ;;  %v5039_v36 = vcombine.high %v399_v28, %v399_v28  ;;  %v1870_v44 = vld [vmem:[%s33746_s29 + $0x2d48] sm:$0x3]  ;;  %v5046_v45 = vrot.slane %v399_v28, %v33752_v5 }
 0x57b   : > { %v26129_v62 = vpop.f32.mrf.mxu0  ;;  %29591 = vmatprep.subr.mxu0 %v1090_v54  ;;  %v26199_v1 = vpop.f32.mrf.mxu1  ;;  %29661 = vmatprep.subr.mxu1 %v1092_v57  ;;  %v1104_v54 = vld [vmem:[%s33746_s29 + $0x1558] sm:$0xff]  ;;  %v1110_v28 = vld [vmem:[%s33746_s29 + $0x1588] sm:$0xff] }
 0x57c   : > { %v26198_v0 = vadd.f32 %v26197_v61, %v26128_v60  ;;  %29625 = vmatprep.mubr.f32.mxu0 %v5003_v55  ;;  %29695 = vmatprep.mubr.f32.mxu1 %v5004_v58  ;;  %v5053_v47 = vrot.slane %v5039_v36, %v33752_v5  ;;  %v5054_v52 = vcombine.high %v5046_v45, %v5046_v45  ;;  %v1101_v60 = vld [vmem:[%s33746_s29 + $0x1540] sm:$0xff] }
 0x57e   : > { %29592 = vmatpush1.xpose.msra.mxu0 %v1089_v63  ;;  %29662 = vmatpush1.xpose.msra.mxu1 %v1091_v2  ;;  %v5055_v55 = vcombine.high %v5053_v47, %v5053_v47  ;;  %v1103_v63 = vld [vmem:[%s33746_s29 + $0x1550] sm:$0xff]  ;;  %v1876_v2 = vld [vmem:[%s33746_s29 + $0x2d78] sm:$0x3] }
 0x57f   : > { %29729 = vmatprep.subr.mxu0 %v1862_v3  ;;  %29799 = vmatprep.subr.mxu1 %v1864_v6  ;;  %v1873_v6 = vld [vmem:[%s33746_s29 + $0x2d60] sm:$0x3] }
 0x581   : > { %v26267_v13 = vpop.f32.mrf.mxu0  ;;  %29626 = vmatmul.mubr.f32.vlgmr.msra.gmra.mxu0 %v4995_v48  ;;  %v26337_v18 = vpop.f32.mrf.mxu1  ;;  %29696 = vmatmul.mubr.f32.vlgmr.msra.gmra.mxu1 %v5002_v50  ;;  %v400_v48 = vld [vmem:[%s33738_s27 + $0x558] sm:$0xff]  ;;  %v1871_v50 = vld [vmem:[%s33746_s29 + $0x2d50] sm:$0x3] }
 0x582   : > { %v26268_v17 = vadd.f32 %v26267_v13, %v26198_v0  ;;  %29730 = vmatpush1.xpose.msra.mxu0 %v1861_v9  ;;  %29800 = vmatpush1.xpose.msra.mxu1 %v1863_v10  ;;  %v5056_v56 = vcombine.high %v400_v48, %v400_v48  ;;  %v1874_v0 = vld [vmem:[%s33746_s29 + $0x2d68] sm:$0x3]  ;;  %v5063_v1 = vrot.slane %v400_v48, %v33752_v5 }
 0x583   : > { %v26269_v19 = vpop.f32.mrf.mxu0  ;;  %29731 = vmatprep.subr.mxu0 %v1094_v11  ;;  %v26339_v22 = vpop.f32.mrf.mxu1  ;;  %29801 = vmatprep.subr.mxu1 %v1096_v14  ;;  %v1108_v11 = vld [vmem:[%s33746_s29 + $0x1578] sm:$0xff]  ;;  %v1114_v48 = vld [vmem:[%s33746_s29 + $0x15a8] sm:$0xff] }
 0x584   : > { %v26338_v21 = vadd.f32 %v26337_v18, %v26268_v17  ;;  %29765 = vmatprep.mubr.f32.mxu0 %v5020_v12  ;;  %29835 = vmatprep.mubr.f32.mxu1 %v5021_v15  ;;  %v5070_v3 = vrot.slane %v5056_v56, %v33752_v5  ;;  %v5071_v9 = vcombine.high %v5063_v1, %v5063_v1  ;;  %v1105_v17 = vld [vmem:[%s33746_s29 + $0x1560] sm:$0xff] }
 0x586   : > { %29732 = vmatpush1.xpose.msra.mxu0 %v1093_v20  ;;  %29802 = vmatpush1.xpose.msra.mxu1 %v1095_v23  ;;  %v5072_v12 = vcombine.high %v5070_v3, %v5070_v3  ;;  %v1107_v20 = vld [vmem:[%s33746_s29 + $0x1570] sm:$0xff]  ;;  %v1880_v23 = vld [vmem:[%s33746_s29 + $0x2d98] sm:$0x3] }
 0x587   : > { %29869 = vmatprep.subr.mxu0 %v1866_v24  ;;  %29939 = vmatprep.subr.mxu1 %v1868_v26  ;;  %v1877_v26 = vld [vmem:[%s33746_s29 + $0x2d80] sm:$0x3] }
 0x589   : > { %v26407_v33 = vpop.f32.mrf.mxu0  ;;  %29766 = vmatmul.mubr.f32.vlgmr.msra.gmra.mxu0 %v5012_v4  ;;  %v26477_v38 = vpop.f32.mrf.mxu1  ;;  %29836 = vmatmul.mubr.f32.vlgmr.msra.gmra.mxu1 %v5019_v7  ;;  %v401_v4 = vld [vmem:[%s33738_s27 + $0x560] sm:$0xff]  ;;  %v1875_v7 = vld [vmem:[%s33746_s29 + $0x2d70] sm:$0x3] }
 0x58a   : > { %v26408_v37 = vadd.f32 %v26407_v33, %v26338_v21  ;;  %29870 = vmatpush1.xpose.msra.mxu0 %v1865_v29  ;;  %29940 = vmatpush1.xpose.msra.mxu1 %v1867_v30  ;;  %v5073_v13 = vcombine.high %v401_v4, %v401_v4  ;;  %v1878_v21 = vld [vmem:[%s33746_s29 + $0x2d88] sm:$0x3]  ;;  %v5080_v22 = vrot.slane %v401_v4, %v33752_v5 }
 0x58b   : > { %v26409_v39 = vpop.f32.mrf.mxu0  ;;  %29871 = vmatprep.subr.mxu0 %v1098_v31  ;;  %v26479_v42 = vpop.f32.mrf.mxu1  ;;  %29941 = vmatprep.subr.mxu1 %v1100_v34  ;;  %v1112_v31 = vld [vmem:[%s33746_s29 + $0x1598] sm:$0xff]  ;;  %v1118_v4 = vld [vmem:[%s33746_s29 + $0x15c8] sm:$0xff] }
 0x58c   : > { %v26478_v41 = vadd.f32 %v26477_v38, %v26408_v37  ;;  %29905 = vmatprep.mubr.f32.mxu0 %v5037_v32  ;;  %29975 = vmatprep.mubr.f32.mxu1 %v5038_v35  ;;  %v5087_v24 = vrot.slane %v5073_v13, %v33752_v5  ;;  %v5088_v29 = vcombine.high %v5080_v22, %v5080_v22  ;;  %v1109_v37 = vld [vmem:[%s33746_s29 + $0x1580] sm:$0xff] }
 0x58e   : > { %29872 = vmatpush1.xpose.msra.mxu0 %v1097_v40  ;;  %29942 = vmatpush1.xpose.msra.mxu1 %v1099_v43  ;;  %v5089_v32 = vcombine.high %v5087_v24, %v5087_v24  ;;  %v1111_v40 = vld [vmem:[%s33746_s29 + $0x1590] sm:$0xff]  ;;  %v1884_v43 = vld [vmem:[%s33746_s29 + $0x2db8] sm:$0x3] }
 0x58f   : > { %30009 = vmatprep.subr.mxu0 %v1870_v44  ;;  %30079 = vmatprep.subr.mxu1 %v1872_v46  ;;  %v1881_v46 = vld [vmem:[%s33746_s29 + $0x2da0] sm:$0x3] }
 0x591   : > { %v26547_v53 = vpop.f32.mrf.mxu0  ;;  %29906 = vmatmul.mubr.f32.vlgmr.msra.gmra.mxu0 %v5029_v25  ;;  %v26617_v58 = vpop.f32.mrf.mxu1  ;;  %29976 = vmatmul.mubr.f32.vlgmr.msra.gmra.mxu1 %v5036_v27  ;;  %v402_v25 = vld [vmem:[%s33738_s27 + $0x568] sm:$0xff]  ;;  %v1879_v27 = vld [vmem:[%s33746_s29 + $0x2d90] sm:$0x3] }
 0x592   : > { %v26548_v57 = vadd.f32 %v26547_v53, %v26478_v41  ;;  %30010 = vmatpush1.xpose.msra.mxu0 %v1869_v49  ;;  %30080 = vmatpush1.xpose.msra.mxu1 %v1871_v50  ;;  %v5090_v33 = vcombine.high %v402_v25, %v402_v25  ;;  %v1882_v41 = vld [vmem:[%s33746_s29 + $0x2da8] sm:$0x3]  ;;  %v5097_v42 = vrot.slane %v402_v25, %v33752_v5 }
 0x593   : > { %v26549_v59 = vpop.f32.mrf.mxu0  ;;  %30011 = vmatprep.subr.mxu0 %v1102_v51  ;;  %v26619_v62 = vpop.f32.mrf.mxu1  ;;  %30081 = vmatprep.subr.mxu1 %v1104_v54  ;;  %v1116_v51 = vld [vmem:[%s33746_s29 + $0x15b8] sm:$0xff]  ;;  %v1122_v25 = vld [vmem:[%s33746_s29 + $0x15e8] sm:$0xff] }
 0x594   : > { %v26618_v61 = vadd.f32 %v26617_v58, %v26548_v57  ;;  %30045 = vmatprep.mubr.f32.mxu0 %v5054_v52  ;;  %30115 = vmatprep.mubr.f32.mxu1 %v5055_v55  ;;  %v5104_v44 = vrot.slane %v5090_v33, %v33752_v5  ;;  %v5105_v49 = vcombine.high %v5097_v42, %v5097_v42  ;;  %v1113_v57 = vld [vmem:[%s33746_s29 + $0x15a0] sm:$0xff] }
 0x596   : > { %30012 = vmatpush1.xpose.msra.mxu0 %v1101_v60  ;;  %30082 = vmatpush1.xpose.msra.mxu1 %v1103_v63  ;;  %v5106_v52 = vcombine.high %v5104_v44, %v5104_v44  ;;  %v1115_v60 = vld [vmem:[%s33746_s29 + $0x15b0] sm:$0xff]  ;;  %v1888_v63 = vld [vmem:[%s33746_s29 + $0x2dd8] sm:$0x3] }
 0x597   : > { %30149 = vmatprep.subr.mxu0 %v1874_v0  ;;  %30219 = vmatprep.subr.mxu1 %v1876_v2  ;;  %v1885_v2 = vld [vmem:[%s33746_s29 + $0x2dc0] sm:$0x3] }
 0x599   : > { %v26687_v10 = vpop.f32.mrf.mxu0  ;;  %30046 = vmatmul.mubr.f32.vlgmr.msra.gmra.mxu0 %v5046_v45  ;;  %v26757_v15 = vpop.f32.mrf.mxu1  ;;  %30116 = vmatmul.mubr.f32.vlgmr.msra.gmra.mxu1 %v5053_v47  ;;  %v403_v45 = vld [vmem:[%s33738_s27 + $0x570] sm:$0xff] }
 0x59a   : > { %v26688_v14 = vadd.f32 %v26687_v10, %v26618_v61  ;;  %30150 = vmatpush1.xpose.msra.mxu0 %v1873_v6  ;;  %30220 = vmatpush1.xpose.msra.mxu1 %v1875_v7  ;;  %v1883_v47 = vld [vmem:[%s33746_s29 + $0x2db0] sm:$0x3]  ;;  %v5107_v53 = vcombine.high %v403_v45, %v403_v45  ;;  %v1886_v61 = vld [vmem:[%s33746_s29 + $0x2dc8] sm:$0x3]  ;;  %v5114_v62 = vrot.slane %v403_v45, %v33752_v5 }
 0x59b   : > { %v26689_v16 = vpop.f32.mrf.mxu0  ;;  %30151 = vmatprep.subr.mxu0 %v1106_v8  ;;  %v26759_v19 = vpop.f32.mrf.mxu1  ;;  %30221 = vmatprep.subr.mxu1 %v1108_v11  ;;  %v1120_v8 = vld [vmem:[%s33746_s29 + $0x15d8] sm:$0xff]  ;;  %v1126_v45 = vld [vmem:[%s33746_s29 + $0x1608] sm:$0xff] }
 0x59c   : > { %v26758_v18 = vadd.f32 %v26757_v15, %v26688_v14  ;;  %30185 = vmatprep.mubr.f32.mxu0 %v5071_v9  ;;  %30255 = vmatprep.mubr.f32.mxu1 %v5072_v12  ;;  %v5121_v0 = vrot.slane %v5107_v53, %v33752_v5  ;;  %v5122_v6 = vcombine.high %v5114_v62, %v5114_v62  ;;  %v1117_v14 = vld [vmem:[%s33746_s29 + $0x15c0] sm:$0xff] }
 0x59e   : > { %30152 = vmatpush1.xpose.msra.mxu0 %v1105_v17  ;;  %30222 = vmatpush1.xpose.msra.mxu1 %v1107_v20  ;;  %v5123_v9 = vcombine.high %v5121_v0, %v5121_v0  ;;  %v1119_v17 = vld [vmem:[%s33746_s29 + $0x15d0] sm:$0xff]  ;;  %v1892_v20 = vld [vmem:[%s33746_s29 + $0x2df8] sm:$0x3] }
 0x59f   : > { %30289 = vmatprep.subr.mxu0 %v1878_v21  ;;  %30359 = vmatprep.subr.mxu1 %v1880_v23  ;;  %v1889_v23 = vld [vmem:[%s33746_s29 + $0x2de0] sm:$0x3] }
 0x5a1   : > { %v26827_v30 = vpop.f32.mrf.mxu0  ;;  %30186 = vmatmul.mubr.f32.vlgmr.msra.gmra.mxu0 %v5063_v1  ;;  %v26897_v35 = vpop.f32.mrf.mxu1  ;;  %30256 = vmatmul.mubr.f32.vlgmr.msra.gmra.mxu1 %v5070_v3  ;;  %v404_v1 = vld [vmem:[%s33738_s27 + $0x578] sm:$0xff]  ;;  %v1887_v3 = vld [vmem:[%s33746_s29 + $0x2dd0] sm:$0x3] }
 0x5a2   : > { %v26828_v34 = vadd.f32 %v26827_v30, %v26758_v18  ;;  %30290 = vmatpush1.xpose.msra.mxu0 %v1877_v26  ;;  %30360 = vmatpush1.xpose.msra.mxu1 %v1879_v27  ;;  %v5124_v10 = vcombine.high %v404_v1, %v404_v1  ;;  %v1890_v18 = vld [vmem:[%s33746_s29 + $0x2de8] sm:$0x3]  ;;  %v5131_v19 = vrot.slane %v404_v1, %v33752_v5 }
 0x5a3   : > { %v26829_v36 = vpop.f32.mrf.mxu0  ;;  %30291 = vmatprep.subr.mxu0 %v1110_v28  ;;  %v26899_v39 = vpop.f32.mrf.mxu1  ;;  %30361 = vmatprep.subr.mxu1 %v1112_v31  ;;  %v1124_v28 = vld [vmem:[%s33746_s29 + $0x15f8] sm:$0xff]  ;;  %v1130_v1 = vld [vmem:[%s33746_s29 + $0x1628] sm:$0xff] }
 0x5a4   : > { %v26898_v38 = vadd.f32 %v26897_v35, %v26828_v34  ;;  %30325 = vmatprep.mubr.f32.mxu0 %v5088_v29  ;;  %30395 = vmatprep.mubr.f32.mxu1 %v5089_v32  ;;  %v5138_v21 = vrot.slane %v5124_v10, %v33752_v5  ;;  %v5139_v26 = vcombine.high %v5131_v19, %v5131_v19  ;;  %v1121_v34 = vld [vmem:[%s33746_s29 + $0x15e0] sm:$0xff] }
 0x5a6   : > { %30292 = vmatpush1.xpose.msra.mxu0 %v1109_v37  ;;  %30362 = vmatpush1.xpose.msra.mxu1 %v1111_v40  ;;  %v5140_v29 = vcombine.high %v5138_v21, %v5138_v21  ;;  %v1123_v37 = vld [vmem:[%s33746_s29 + $0x15f0] sm:$0xff]  ;;  %v1896_v40 = vld [vmem:[%s33746_s29 + $0x2e18] sm:$0x3] }
 0x5a7   : > { %30429 = vmatprep.subr.mxu0 %v1882_v41  ;;  %30499 = vmatprep.subr.mxu1 %v1884_v43  ;;  %v1893_v43 = vld [vmem:[%s33746_s29 + $0x2e00] sm:$0x3] }
 0x5a9   : > { %v26967_v50 = vpop.f32.mrf.mxu0  ;;  %30326 = vmatmul.mubr.f32.vlgmr.msra.gmra.mxu0 %v5080_v22  ;;  %v27037_v55 = vpop.f32.mrf.mxu1  ;;  %30396 = vmatmul.mubr.f32.vlgmr.msra.gmra.mxu1 %v5087_v24  ;;  %v405_v22 = vld [vmem:[%s33738_s27 + $0x580] sm:$0xff]  ;;  %v1891_v24 = vld [vmem:[%s33746_s29 + $0x2df0] sm:$0x3] }
 0x5aa   : > { %v26968_v54 = vadd.f32 %v26967_v50, %v26898_v38  ;;  %30430 = vmatpush1.xpose.msra.mxu0 %v1881_v46  ;;  %30500 = vmatpush1.xpose.msra.mxu1 %v1883_v47  ;;  %v5141_v30 = vcombine.high %v405_v22, %v405_v22  ;;  %v1894_v38 = vld [vmem:[%s33746_s29 + $0x2e08] sm:$0x3]  ;;  %v5148_v39 = vrot.slane %v405_v22, %v33752_v5 }
 0x5ab   : > { %v26969_v56 = vpop.f32.mrf.mxu0  ;;  %30431 = vmatprep.subr.mxu0 %v1114_v48  ;;  %v27039_v59 = vpop.f32.mrf.mxu1  ;;  %30501 = vmatprep.subr.mxu1 %v1116_v51  ;;  %v1128_v48 = vld [vmem:[%s33746_s29 + $0x1618] sm:$0xff]  ;;  %v1134_v22 = vld [vmem:[%s33746_s29 + $0x1648] sm:$0xff] }
 0x5ac   : > { %v27038_v58 = vadd.f32 %v27037_v55, %v26968_v54  ;;  %30465 = vmatprep.mubr.f32.mxu0 %v5105_v49  ;;  %30535 = vmatprep.mubr.f32.mxu1 %v5106_v52  ;;  %v5155_v41 = vrot.slane %v5141_v30, %v33752_v5  ;;  %v5156_v46 = vcombine.high %v5148_v39, %v5148_v39  ;;  %v1125_v54 = vld [vmem:[%s33746_s29 + $0x1600] sm:$0xff] }
 0x5ae   : > { %30432 = vmatpush1.xpose.msra.mxu0 %v1113_v57  ;;  %30502 = vmatpush1.xpose.msra.mxu1 %v1115_v60  ;;  %v5157_v49 = vcombine.high %v5155_v41, %v5155_v41  ;;  %v1127_v57 = vld [vmem:[%s33746_s29 + $0x1610] sm:$0xff]  ;;  %v1900_v60 = vld [vmem:[%s33746_s29 + $0x2e38] sm:$0x3] }
 0x5af   : > { %30569 = vmatprep.subr.mxu0 %v1886_v61  ;;  %30639 = vmatprep.subr.mxu1 %v1888_v63  ;;  %v1897_v63 = vld [vmem:[%s33746_s29 + $0x2e20] sm:$0x3] }
 0x5b1   : > { %v27107_v7 = vpop.f32.mrf.mxu0  ;;  %30466 = vmatmul.mubr.f32.vlgmr.msra.gmra.mxu0 %v5097_v42  ;;  %v27177_v12 = vpop.f32.mrf.mxu1  ;;  %30536 = vmatmul.mubr.f32.vlgmr.msra.gmra.mxu1 %v5104_v44  ;;  %v406_v42 = vld [vmem:[%s33738_s27 + $0x588] sm:$0xff]  ;;  %v1895_v44 = vld [vmem:[%s33746_s29 + $0x2e10] sm:$0x3] }
 0x5b2   : > { %v27108_v11 = vadd.f32 %v27107_v7, %v27038_v58  ;;  %30570 = vmatpush1.xpose.msra.mxu0 %v1885_v2  ;;  %30640 = vmatpush1.xpose.msra.mxu1 %v1887_v3  ;;  %v5158_v50 = vcombine.high %v406_v42, %v406_v42  ;;  %v1898_v58 = vld [vmem:[%s33746_s29 + $0x2e28] sm:$0x3]  ;;  %v5165_v59 = vrot.slane %v406_v42, %v33752_v5 }
 0x5b3   : > { %v27109_v13 = vpop.f32.mrf.mxu0  ;;  %30571 = vmatprep.subr.mxu0 %v1118_v4  ;;  %v27179_v16 = vpop.f32.mrf.mxu1  ;;  %30641 = vmatprep.subr.mxu1 %v1120_v8  ;;  %v1132_v4 = vld [vmem:[%s33746_s29 + $0x1638] sm:$0xff]  ;;  %v1138_v42 = vld [vmem:[%s33746_s29 + $0x1668] sm:$0xff] }
 0x5b4   : > { %v27178_v15 = vadd.f32 %v27177_v12, %v27108_v11  ;;  %30605 = vmatprep.mubr.f32.mxu0 %v5122_v6  ;;  %30675 = vmatprep.mubr.f32.mxu1 %v5123_v9  ;;  %v5172_v61 = vrot.slane %v5158_v50, %v33752_v5  ;;  %v5173_v2 = vcombine.high %v5165_v59, %v5165_v59  ;;  %v1129_v11 = vld [vmem:[%s33746_s29 + $0x1620] sm:$0xff] }
 0x5b6   : > { %30572 = vmatpush1.xpose.msra.mxu0 %v1117_v14  ;;  %30642 = vmatpush1.xpose.msra.mxu1 %v1119_v17  ;;  %v5174_v6 = vcombine.high %v5172_v61, %v5172_v61  ;;  %v1131_v14 = vld [vmem:[%s33746_s29 + $0x1630] sm:$0xff]  ;;  %v1904_v17 = vld [vmem:[%s33746_s29 + $0x2e58] sm:$0x3] }
 0x5b7   : > { %30709 = vmatprep.subr.mxu0 %v1890_v18  ;;  %30779 = vmatprep.subr.mxu1 %v1892_v20  ;;  %v1901_v20 = vld [vmem:[%s33746_s29 + $0x2e40] sm:$0x3] }
 0x5b9   : > { %v27247_v27 = vpop.f32.mrf.mxu0  ;;  %30606 = vmatmul.mubr.f32.vlgmr.msra.gmra.mxu0 %v5114_v62  ;;  %v27317_v32 = vpop.f32.mrf.mxu1  ;;  %30676 = vmatmul.mubr.f32.vlgmr.msra.gmra.mxu1 %v5121_v0  ;;  %v407_v62 = vld [vmem:[%s33738_s27 + $0x590] sm:$0xff] }
 0x5ba   : > { %v27248_v31 = vadd.f32 %v27247_v27, %v27178_v15  ;;  %30710 = vmatpush1.xpose.msra.mxu0 %v1889_v23  ;;  %30780 = vmatpush1.xpose.msra.mxu1 %v1891_v24  ;;  %v1899_v0 = vld [vmem:[%s33746_s29 + $0x2e30] sm:$0x3]  ;;  %v5175_v7 = vcombine.high %v407_v62, %v407_v62  ;;  %v1902_v15 = vld [vmem:[%s33746_s29 + $0x2e48] sm:$0x3]  ;;  %v5182_v16 = vrot.slane %v407_v62, %v33752_v5 }
 0x5bb   : > { %v27249_v33 = vpop.f32.mrf.mxu0  ;;  %30711 = vmatprep.subr.mxu0 %v1122_v25  ;;  %v27319_v36 = vpop.f32.mrf.mxu1  ;;  %30781 = vmatprep.subr.mxu1 %v1124_v28  ;;  %v1136_v25 = vld [vmem:[%s33746_s29 + $0x1658] sm:$0xff]  ;;  %v1142_v62 = vld [vmem:[%s33746_s29 + $0x1688] sm:$0xff] }
 0x5bc   : > { %v27318_v35 = vadd.f32 %v27317_v32, %v27248_v31  ;;  %30745 = vmatprep.mubr.f32.mxu0 %v5139_v26  ;;  %30815 = vmatprep.mubr.f32.mxu1 %v5140_v29  ;;  %v5189_v18 = vrot.slane %v5175_v7, %v33752_v5  ;;  %v5190_v23 = vcombine.high %v5182_v16, %v5182_v16  ;;  %v1133_v31 = vld [vmem:[%s33746_s29 + $0x1640] sm:$0xff] }
 0x5be   : > { %30712 = vmatpush1.xpose.msra.mxu0 %v1121_v34  ;;  %30782 = vmatpush1.xpose.msra.mxu1 %v1123_v37  ;;  %v5191_v26 = vcombine.high %v5189_v18, %v5189_v18  ;;  %v1135_v34 = vld [vmem:[%s33746_s29 + $0x1650] sm:$0xff]  ;;  %v1908_v37 = vld [vmem:[%s33746_s29 + $0x2e78] sm:$0x3] }
 0x5bf   : > { %30849 = vmatprep.subr.mxu0 %v1894_v38  ;;  %30919 = vmatprep.subr.mxu1 %v1896_v40  ;;  %v1905_v40 = vld [vmem:[%s33746_s29 + $0x2e60] sm:$0x3] }
 0x5c1   : > { %v27387_v47 = vpop.f32.mrf.mxu0  ;;  %30746 = vmatmul.mubr.f32.vlgmr.msra.gmra.mxu0 %v5131_v19  ;;  %v27457_v52 = vpop.f32.mrf.mxu1  ;;  %30816 = vmatmul.mubr.f32.vlgmr.msra.gmra.mxu1 %v5138_v21  ;;  %v408_v19 = vld [vmem:[%s33738_s27 + $0x598] sm:$0xff]  ;;  %v1903_v21 = vld [vmem:[%s33746_s29 + $0x2e50] sm:$0x3] }
 0x5c2   : > { %v27388_v51 = vadd.f32 %v27387_v47, %v27318_v35  ;;  %30850 = vmatpush1.xpose.msra.mxu0 %v1893_v43  ;;  %30920 = vmatpush1.xpose.msra.mxu1 %v1895_v44  ;;  %v5192_v27 = vcombine.high %v408_v19, %v408_v19  ;;  %v1906_v35 = vld [vmem:[%s33746_s29 + $0x2e68] sm:$0x3]  ;;  %v5199_v36 = vrot.slane %v408_v19, %v33752_v5 }
 0x5c3   : > { %v27389_v53 = vpop.f32.mrf.mxu0  ;;  %30851 = vmatprep.subr.mxu0 %v1126_v45  ;;  %v27459_v56 = vpop.f32.mrf.mxu1  ;;  %30921 = vmatprep.subr.mxu1 %v1128_v48  ;;  %v1140_v45 = vld [vmem:[%s33746_s29 + $0x1678] sm:$0xff]  ;;  %v1146_v19 = vld [vmem:[%s33746_s29 + $0x16a8] sm:$0xff] }
 0x5c4   : > { %v27458_v55 = vadd.f32 %v27457_v52, %v27388_v51  ;;  %30885 = vmatprep.mubr.f32.mxu0 %v5156_v46  ;;  %30955 = vmatprep.mubr.f32.mxu1 %v5157_v49  ;;  %v5206_v38 = vrot.slane %v5192_v27, %v33752_v5  ;;  %v5207_v43 = vcombine.high %v5199_v36, %v5199_v36  ;;  %v1137_v51 = vld [vmem:[%s33746_s29 + $0x1660] sm:$0xff] }
 0x5c6   : > { %30852 = vmatpush1.xpose.msra.mxu0 %v1125_v54  ;;  %30922 = vmatpush1.xpose.msra.mxu1 %v1127_v57  ;;  %v5208_v46 = vcombine.high %v5206_v38, %v5206_v38  ;;  %v1139_v54 = vld [vmem:[%s33746_s29 + $0x1670] sm:$0xff]  ;;  %v1912_v57 = vld [vmem:[%s33746_s29 + $0x2e98] sm:$0x3] }
 0x5c7   : > { %30989 = vmatprep.subr.mxu0 %v1898_v58  ;;  %31059 = vmatprep.subr.mxu1 %v1900_v60  ;;  %v1909_v60 = vld [vmem:[%s33746_s29 + $0x2e80] sm:$0x3] }
 0x5c9   : > { %v27527_v3 = vpop.f32.mrf.mxu0  ;;  %30886 = vmatmul.mubr.f32.vlgmr.msra.gmra.mxu0 %v5148_v39  ;;  %v27597_v9 = vpop.f32.mrf.mxu1  ;;  %30956 = vmatmul.mubr.f32.vlgmr.msra.gmra.mxu1 %v5155_v41  ;;  %v409_v39 = vld [vmem:[%s33738_s27 + $0x5a0] sm:$0xff]  ;;  %v1907_v41 = vld [vmem:[%s33746_s29 + $0x2e70] sm:$0x3] }
 0x5ca   : > { %v27528_v8 = vadd.f32 %v27527_v3, %v27458_v55  ;;  %30990 = vmatpush1.xpose.msra.mxu0 %v1897_v63  ;;  %31060 = vmatpush1.xpose.msra.mxu1 %v1899_v0  ;;  %v5209_v47 = vcombine.high %v409_v39, %v409_v39  ;;  %v1910_v55 = vld [vmem:[%s33746_s29 + $0x2e88] sm:$0x3]  ;;  %v5216_v56 = vrot.slane %v409_v39, %v33752_v5 }
 0x5cb   : > { %v27529_v10 = vpop.f32.mrf.mxu0  ;;  %30991 = vmatprep.subr.mxu0 %v1130_v1  ;;  %v27599_v13 = vpop.f32.mrf.mxu1  ;;  %31061 = vmatprep.subr.mxu1 %v1132_v4  ;;  %v1144_v1 = vld [vmem:[%s33746_s29 + $0x1698] sm:$0xff]  ;;  %v1150_v39 = vld [vmem:[%s33746_s29 + $0x16c8] sm:$0xff] }
 0x5cc   : > { %v27598_v12 = vadd.f32 %v27597_v9, %v27528_v8  ;;  %31025 = vmatprep.mubr.f32.mxu0 %v5173_v2  ;;  %31095 = vmatprep.mubr.f32.mxu1 %v5174_v6  ;;  %v5223_v58 = vrot.slane %v5209_v47, %v33752_v5  ;;  %v5224_v63 = vcombine.high %v5216_v56, %v5216_v56  ;;  %v1141_v8 = vld [vmem:[%s33746_s29 + $0x1680] sm:$0xff] }
 0x5ce   : > { %30992 = vmatpush1.xpose.msra.mxu0 %v1129_v11  ;;  %31062 = vmatpush1.xpose.msra.mxu1 %v1131_v14  ;;  %v5225_v2 = vcombine.high %v5223_v58, %v5223_v58  ;;  %v1143_v11 = vld [vmem:[%s33746_s29 + $0x1690] sm:$0xff]  ;;  %v1916_v14 = vld [vmem:[%s33746_s29 + $0x2eb8] sm:$0x3] }
 0x5cf   : > { %31129 = vmatprep.subr.mxu0 %v1902_v15  ;;  %31199 = vmatprep.subr.mxu1 %v1904_v17  ;;  %v1913_v17 = vld [vmem:[%s33746_s29 + $0x2ea0] sm:$0x3] }
 0x5d1   : > { %v27667_v24 = vpop.f32.mrf.mxu0  ;;  %31026 = vmatmul.mubr.f32.vlgmr.msra.gmra.mxu0 %v5165_v59  ;;  %v27737_v29 = vpop.f32.mrf.mxu1  ;;  %31096 = vmatmul.mubr.f32.vlgmr.msra.gmra.mxu1 %v5172_v61  ;;  %v410_v59 = vld [vmem:[%s33738_s27 + $0x5a8] sm:$0xff]  ;;  %v1911_v61 = vld [vmem:[%s33746_s29 + $0x2e90] sm:$0x3] }
 0x5d2   : > { %v27668_v28 = vadd.f32 %v27667_v24, %v27598_v12  ;;  %31130 = vmatpush1.xpose.msra.mxu0 %v1901_v20  ;;  %31200 = vmatpush1.xpose.msra.mxu1 %v1903_v21  ;;  %v5226_v3 = vcombine.high %v410_v59, %v410_v59  ;;  %v1914_v12 = vld [vmem:[%s33746_s29 + $0x2ea8] sm:$0x3]  ;;  %v5233_v13 = vrot.slane %v410_v59, %v33752_v5 }
 0x5d3   : > { %v27669_v30 = vpop.f32.mrf.mxu0  ;;  %31131 = vmatprep.subr.mxu0 %v1134_v22  ;;  %v27739_v33 = vpop.f32.mrf.mxu1  ;;  %31201 = vmatprep.subr.mxu1 %v1136_v25  ;;  %v1148_v22 = vld [vmem:[%s33746_s29 + $0x16b8] sm:$0xff]  ;;  %v1154_v59 = vld [vmem:[%s33746_s29 + $0x16e8] sm:$0xff] }
 0x5d4   : > { %v27738_v32 = vadd.f32 %v27737_v29, %v27668_v28  ;;  %31165 = vmatprep.mubr.f32.mxu0 %v5190_v23  ;;  %31235 = vmatprep.mubr.f32.mxu1 %v5191_v26  ;;  %v5240_v15 = vrot.slane %v5226_v3, %v33752_v5  ;;  %v5241_v20 = vcombine.high %v5233_v13, %v5233_v13  ;;  %v1145_v28 = vld [vmem:[%s33746_s29 + $0x16a0] sm:$0xff] }
 0x5d6   : > { %31132 = vmatpush1.xpose.msra.mxu0 %v1133_v31  ;;  %31202 = vmatpush1.xpose.msra.mxu1 %v1135_v34  ;;  %v5242_v23 = vcombine.high %v5240_v15, %v5240_v15  ;;  %v1147_v31 = vld [vmem:[%s33746_s29 + $0x16b0] sm:$0xff]  ;;  %v1920_v34 = vld [vmem:[%s33746_s29 + $0x2ed8] sm:$0x3] }
 0x5d7   : > { %31269 = vmatprep.subr.mxu0 %v1906_v35  ;;  %31339 = vmatprep.subr.mxu1 %v1908_v37  ;;  %v1917_v37 = vld [vmem:[%s33746_s29 + $0x2ec0] sm:$0x3] }
 0x5d9   : > { %v27807_v44 = vpop.f32.mrf.mxu0  ;;  %31166 = vmatmul.mubr.f32.vlgmr.msra.gmra.mxu0 %v5182_v16  ;;  %v27877_v49 = vpop.f32.mrf.mxu1  ;;  %31236 = vmatmul.mubr.f32.vlgmr.msra.gmra.mxu1 %v5189_v18  ;;  %v411_v16 = vld [vmem:[%s33738_s27 + $0x5b0] sm:$0xff] }
 0x5da   : > { %v27808_v48 = vadd.f32 %v27807_v44, %v27738_v32  ;;  %31270 = vmatpush1.xpose.msra.mxu0 %v1905_v40  ;;  %31340 = vmatpush1.xpose.msra.mxu1 %v1907_v41  ;;  %v1915_v18 = vld [vmem:[%s33746_s29 + $0x2eb0] sm:$0x3]  ;;  %v5243_v24 = vcombine.high %v411_v16, %v411_v16  ;;  %v1918_v32 = vld [vmem:[%s33746_s29 + $0x2ec8] sm:$0x3]  ;;  %v5250_v33 = vrot.slane %v411_v16, %v33752_v5 }
 0x5db   : > { %v27809_v50 = vpop.f32.mrf.mxu0  ;;  %31271 = vmatprep.subr.mxu0 %v1138_v42  ;;  %v27879_v53 = vpop.f32.mrf.mxu1  ;;  %31341 = vmatprep.subr.mxu1 %v1140_v45  ;;  %v1152_v42 = vld [vmem:[%s33746_s29 + $0x16d8] sm:$0xff]  ;;  %v1158_v16 = vld [vmem:[%s33746_s29 + $0x1708] sm:$0xff] }
 0x5dc   : > { %v27878_v52 = vadd.f32 %v27877_v49, %v27808_v48  ;;  %31305 = vmatprep.mubr.f32.mxu0 %v5207_v43  ;;  %31375 = vmatprep.mubr.f32.mxu1 %v5208_v46  ;;  %v5257_v35 = vrot.slane %v5243_v24, %v33752_v5  ;;  %v5258_v40 = vcombine.high %v5250_v33, %v5250_v33  ;;  %v1149_v48 = vld [vmem:[%s33746_s29 + $0x16c0] sm:$0xff] }
 0x5de   : > { %31272 = vmatpush1.xpose.msra.mxu0 %v1137_v51  ;;  %31342 = vmatpush1.xpose.msra.mxu1 %v1139_v54  ;;  %v5259_v43 = vcombine.high %v5257_v35, %v5257_v35  ;;  %v1151_v51 = vld [vmem:[%s33746_s29 + $0x16d0] sm:$0xff]  ;;  %v1924_v54 = vld [vmem:[%s33746_s29 + $0x2ef8] sm:$0x3] }
 0x5df   : > { %31409 = vmatprep.subr.mxu0 %v1910_v55  ;;  %31479 = vmatprep.subr.mxu1 %v1912_v57  ;;  %v1921_v57 = vld [vmem:[%s33746_s29 + $0x2ee0] sm:$0x3] }
 0x5e1   : > { %v27947_v0 = vpop.f32.mrf.mxu0  ;;  %31306 = vmatmul.mubr.f32.vlgmr.msra.gmra.mxu0 %v5199_v36  ;;  %v28017_v6 = vpop.f32.mrf.mxu1  ;;  %31376 = vmatmul.mubr.f32.vlgmr.msra.gmra.mxu1 %v5206_v38  ;;  %v412_v36 = vld [vmem:[%s33738_s27 + $0x5b8] sm:$0xff]  ;;  %v1919_v38 = vld [vmem:[%s33746_s29 + $0x2ed0] sm:$0x3] }
 0x5e2   : > { %v27948_v4 = vadd.f32 %v27947_v0, %v27878_v52  ;;  %31410 = vmatpush1.xpose.msra.mxu0 %v1909_v60  ;;  %31480 = vmatpush1.xpose.msra.mxu1 %v1911_v61  ;;  %v5260_v44 = vcombine.high %v412_v36, %v412_v36  ;;  %v1922_v52 = vld [vmem:[%s33746_s29 + $0x2ee8] sm:$0x3]  ;;  %v5267_v53 = vrot.slane %v412_v36, %v33752_v5 }
 0x5e3   : > { %v27949_v7 = vpop.f32.mrf.mxu0  ;;  %31411 = vmatprep.subr.mxu0 %v1142_v62  ;;  %v28019_v10 = vpop.f32.mrf.mxu1  ;;  %31481 = vmatprep.subr.mxu1 %v1144_v1  ;;  %v1156_v62 = vld [vmem:[%s33746_s29 + $0x16f8] sm:$0xff]  ;;  %v1162_v36 = vld [vmem:[%s33746_s29 + $0x1728] sm:$0xff] }
 0x5e4   : > { %v28018_v9 = vadd.f32 %v28017_v6, %v27948_v4  ;;  %31445 = vmatprep.mubr.f32.mxu0 %v5224_v63  ;;  %31515 = vmatprep.mubr.f32.mxu1 %v5225_v2  ;;  %v5274_v55 = vrot.slane %v5260_v44, %v33752_v5  ;;  %v5275_v60 = vcombine.high %v5267_v53, %v5267_v53  ;;  %v1153_v4 = vld [vmem:[%s33746_s29 + $0x16e0] sm:$0xff] }
 0x5e6   : > { %31412 = vmatpush1.xpose.msra.mxu0 %v1141_v8  ;;  %31482 = vmatpush1.xpose.msra.mxu1 %v1143_v11  ;;  %v5276_v63 = vcombine.high %v5274_v55, %v5274_v55  ;;  %v1155_v8 = vld [vmem:[%s33746_s29 + $0x16f0] sm:$0xff]  ;;  %v1928_v11 = vld [vmem:[%s33746_s29 + $0x2f18] sm:$0x3] }
 0x5e7   : > { %31549 = vmatprep.subr.mxu0 %v1914_v12  ;;  %31619 = vmatprep.subr.mxu1 %v1916_v14  ;;  %v1925_v14 = vld [vmem:[%s33746_s29 + $0x2f00] sm:$0x3] }
 0x5e9   : > { %v28087_v21 = vpop.f32.mrf.mxu0  ;;  %31446 = vmatmul.mubr.f32.vlgmr.msra.gmra.mxu0 %v5216_v56  ;;  %v28157_v26 = vpop.f32.mrf.mxu1  ;;  %31516 = vmatmul.mubr.f32.vlgmr.msra.gmra.mxu1 %v5223_v58  ;;  %v413_v56 = vld [vmem:[%s33738_s27 + $0x5c0] sm:$0xff]  ;;  %v1923_v58 = vld [vmem:[%s33746_s29 + $0x2ef0] sm:$0x3] }
 0x5ea   : > { %v28088_v25 = vadd.f32 %v28087_v21, %v28018_v9  ;;  %31550 = vmatpush1.xpose.msra.mxu0 %v1913_v17  ;;  %31620 = vmatpush1.xpose.msra.mxu1 %v1915_v18  ;;  %v5277_v0 = vcombine.high %v413_v56, %v413_v56  ;;  %v1926_v9 = vld [vmem:[%s33746_s29 + $0x2f08] sm:$0x3]  ;;  %v5284_v10 = vrot.slane %v413_v56, %v33752_v5 }
 0x5eb   : > { %v28089_v27 = vpop.f32.mrf.mxu0  ;;  %31551 = vmatprep.subr.mxu0 %v1146_v19  ;;  %v28159_v30 = vpop.f32.mrf.mxu1  ;;  %31621 = vmatprep.subr.mxu1 %v1148_v22  ;;  %v1160_v19 = vld [vmem:[%s33746_s29 + $0x1718] sm:$0xff]  ;;  %v1166_v56 = vld [vmem:[%s33746_s29 + $0x1748] sm:$0xff] }
 0x5ec   : > { %v28158_v29 = vadd.f32 %v28157_v26, %v28088_v25  ;;  %31585 = vmatprep.mubr.f32.mxu0 %v5241_v20  ;;  %31655 = vmatprep.mubr.f32.mxu1 %v5242_v23  ;;  %v5291_v12 = vrot.slane %v5277_v0, %v33752_v5  ;;  %v5292_v17 = vcombine.high %v5284_v10, %v5284_v10  ;;  %v1157_v25 = vld [vmem:[%s33746_s29 + $0x1700] sm:$0xff] }
 0x5ee   : > { %31552 = vmatpush1.xpose.msra.mxu0 %v1145_v28  ;;  %31622 = vmatpush1.xpose.msra.mxu1 %v1147_v31  ;;  %v5293_v20 = vcombine.high %v5291_v12, %v5291_v12  ;;  %v1159_v28 = vld [vmem:[%s33746_s29 + $0x1710] sm:$0xff]  ;;  %v1932_v31 = vld [vmem:[%s33746_s29 + $0x2f38] sm:$0x3] }
 0x5ef   : > { %31689 = vmatprep.subr.mxu0 %v1918_v32  ;;  %31759 = vmatprep.subr.mxu1 %v1920_v34  ;;  %v1929_v34 = vld [vmem:[%s33746_s29 + $0x2f20] sm:$0x3] }
 0x5f1   : > { %v28227_v41 = vpop.f32.mrf.mxu0  ;;  %31586 = vmatmul.mubr.f32.vlgmr.msra.gmra.mxu0 %v5233_v13  ;;  %v28297_v46 = vpop.f32.mrf.mxu1  ;;  %31656 = vmatmul.mubr.f32.vlgmr.msra.gmra.mxu1 %v5240_v15  ;;  %v414_v13 = vld [vmem:[%s33738_s27 + $0x5c8] sm:$0xff]  ;;  %v1927_v15 = vld [vmem:[%s33746_s29 + $0x2f10] sm:$0x3] }
 0x5f2   : > { %v28228_v45 = vadd.f32 %v28227_v41, %v28158_v29  ;;  %31690 = vmatpush1.xpose.msra.mxu0 %v1917_v37  ;;  %31760 = vmatpush1.xpose.msra.mxu1 %v1919_v38  ;;  %v5294_v21 = vcombine.high %v414_v13, %v414_v13  ;;  %v1930_v29 = vld [vmem:[%s33746_s29 + $0x2f28] sm:$0x3]  ;;  %v5301_v30 = vrot.slane %v414_v13, %v33752_v5 }
 0x5f3   : > { %v28229_v47 = vpop.f32.mrf.mxu0  ;;  %31691 = vmatprep.subr.mxu0 %v1150_v39  ;;  %v28299_v50 = vpop.f32.mrf.mxu1  ;;  %31761 = vmatprep.subr.mxu1 %v1152_v42  ;;  %v1164_v39 = vld [vmem:[%s33746_s29 + $0x1738] sm:$0xff]  ;;  %v1170_v13 = vld [vmem:[%s33746_s29 + $0x1768] sm:$0xff] }
 0x5f4   : > { %v28298_v49 = vadd.f32 %v28297_v46, %v28228_v45  ;;  %31725 = vmatprep.mubr.f32.mxu0 %v5258_v40  ;;  %31795 = vmatprep.mubr.f32.mxu1 %v5259_v43  ;;  %v5308_v32 = vrot.slane %v5294_v21, %v33752_v5  ;;  %v5309_v37 = vcombine.high %v5301_v30, %v5301_v30  ;;  %v1161_v45 = vld [vmem:[%s33746_s29 + $0x1720] sm:$0xff] }
 0x5f6   : > { %31692 = vmatpush1.xpose.msra.mxu0 %v1149_v48  ;;  %31762 = vmatpush1.xpose.msra.mxu1 %v1151_v51  ;;  %v5310_v40 = vcombine.high %v5308_v32, %v5308_v32  ;;  %v1163_v48 = vld [vmem:[%s33746_s29 + $0x1730] sm:$0xff]  ;;  %v1936_v51 = vld [vmem:[%s33746_s29 + $0x2f58] sm:$0x3] }
 0x5f7   : > { %31829 = vmatprep.subr.mxu0 %v1922_v52  ;;  %31899 = vmatprep.subr.mxu1 %v1924_v54  ;;  %v1933_v54 = vld [vmem:[%s33746_s29 + $0x2f40] sm:$0x3] }
 0x5f9   : > { %v28367_v61 = vpop.f32.mrf.mxu0  ;;  %31726 = vmatmul.mubr.f32.vlgmr.msra.gmra.mxu0 %v5250_v33  ;;  %v28437_v2 = vpop.f32.mrf.mxu1  ;;  %31796 = vmatmul.mubr.f32.vlgmr.msra.gmra.mxu1 %v5257_v35  ;;  %v415_v33 = vld [vmem:[%s33738_s27 + $0x5d0] sm:$0xff] }
 0x5fa   : > { %v28368_v1 = vadd.f32 %v28367_v61, %v28298_v49  ;;  %31830 = vmatpush1.xpose.msra.mxu0 %v1921_v57  ;;  %31900 = vmatpush1.xpose.msra.mxu1 %v1923_v58  ;;  %v1931_v35 = vld [vmem:[%s33746_s29 + $0x2f30] sm:$0x3]  ;;  %v5311_v41 = vcombine.high %v415_v33, %v415_v33  ;;  %v1934_v49 = vld [vmem:[%s33746_s29 + $0x2f48] sm:$0x3]  ;;  %v5318_v50 = vrot.slane %v415_v33, %v33752_v5 }
 0x5fb   : > { %v28369_v3 = vpop.f32.mrf.mxu0  ;;  %31831 = vmatprep.subr.mxu0 %v1154_v59  ;;  %v28439_v7 = vpop.f32.mrf.mxu1  ;;  %31901 = vmatprep.subr.mxu1 %v1156_v62  ;;  %v1168_v59 = vld [vmem:[%s33746_s29 + $0x1758] sm:$0xff]  ;;  %v1174_v33 = vld [vmem:[%s33746_s29 + $0x1788] sm:$0xff] }
 0x5fc   : > { %v28438_v6 = vadd.f32 %v28437_v2, %v28368_v1  ;;  %31865 = vmatprep.mubr.f32.mxu0 %v5275_v60  ;;  %31935 = vmatprep.mubr.f32.mxu1 %v5276_v63  ;;  %v5325_v52 = vrot.slane %v5311_v41, %v33752_v5  ;;  %v5326_v57 = vcombine.high %v5318_v50, %v5318_v50  ;;  %v1165_v1 = vld [vmem:[%s33746_s29 + $0x1740] sm:$0xff] }
 0x5fe   : > { %31832 = vmatpush1.xpose.msra.mxu0 %v1153_v4  ;;  %31902 = vmatpush1.xpose.msra.mxu1 %v1155_v8  ;;  %v5327_v60 = vcombine.high %v5325_v52, %v5325_v52  ;;  %v1167_v4 = vld [vmem:[%s33746_s29 + $0x1750] sm:$0xff]  ;;  %v1940_v8 = vld [vmem:[%s33746_s29 + $0x2f78] sm:$0x3] }
 0x5ff   : > { %31969 = vmatprep.subr.mxu0 %v1926_v9  ;;  %32039 = vmatprep.subr.mxu1 %v1928_v11  ;;  %v1937_v11 = vld [vmem:[%s33746_s29 + $0x2f60] sm:$0x3] }
 0x601   : > { %v28507_v18 = vpop.f32.mrf.mxu0  ;;  %31866 = vmatmul.mubr.f32.vlgmr.msra.gmra.mxu0 %v5267_v53  ;;  %v28577_v23 = vpop.f32.mrf.mxu1  ;;  %31936 = vmatmul.mubr.f32.vlgmr.msra.gmra.mxu1 %v5274_v55  ;;  %v416_v53 = vld [vmem:[%s33738_s27 + $0x5d8] sm:$0xff]  ;;  %v1935_v55 = vld [vmem:[%s33746_s29 + $0x2f50] sm:$0x3] }
 0x602   : > { %v28508_v22 = vadd.f32 %v28507_v18, %v28438_v6  ;;  %31970 = vmatpush1.xpose.msra.mxu0 %v1925_v14  ;;  %32040 = vmatpush1.xpose.msra.mxu1 %v1927_v15  ;;  %v5328_v61 = vcombine.high %v416_v53, %v416_v53  ;;  %v1938_v6 = vld [vmem:[%s33746_s29 + $0x2f68] sm:$0x3]  ;;  %v5335_v7 = vrot.slane %v416_v53, %v33752_v5 }
 0x603   : > { %v28509_v24 = vpop.f32.mrf.mxu0  ;;  %31971 = vmatprep.subr.mxu0 %v1158_v16  ;;  %v28579_v27 = vpop.f32.mrf.mxu1  ;;  %32041 = vmatprep.subr.mxu1 %v1160_v19  ;;  %v1172_v16 = vld [vmem:[%s33746_s29 + $0x1778] sm:$0xff]  ;;  %v1178_v53 = vld [vmem:[%s33746_s29 + $0x17a8] sm:$0xff] }
 0x604   : > { %v28578_v26 = vadd.f32 %v28577_v23, %v28508_v22  ;;  %32005 = vmatprep.mubr.f32.mxu0 %v5292_v17  ;;  %32075 = vmatprep.mubr.f32.mxu1 %v5293_v20  ;;  %v5342_v9 = vrot.slane %v5328_v61, %v33752_v5  ;;  %v5343_v14 = vcombine.high %v5335_v7, %v5335_v7  ;;  %v1169_v22 = vld [vmem:[%s33746_s29 + $0x1760] sm:$0xff] }
 0x606   : > { %31972 = vmatpush1.xpose.msra.mxu0 %v1157_v25  ;;  %32042 = vmatpush1.xpose.msra.mxu1 %v1159_v28  ;;  %v5344_v17 = vcombine.high %v5342_v9, %v5342_v9  ;;  %v1171_v25 = vld [vmem:[%s33746_s29 + $0x1770] sm:$0xff]  ;;  %v1944_v28 = vld [vmem:[%s33746_s29 + $0x2f98] sm:$0x3] }
 0x607   : > { %32109 = vmatprep.subr.mxu0 %v1930_v29  ;;  %32179 = vmatprep.subr.mxu1 %v1932_v31  ;;  %v1941_v31 = vld [vmem:[%s33746_s29 + $0x2f80] sm:$0x3] }
 0x609   : > { %v28647_v38 = vpop.f32.mrf.mxu0  ;;  %32006 = vmatmul.mubr.f32.vlgmr.msra.gmra.mxu0 %v5284_v10  ;;  %v28717_v43 = vpop.f32.mrf.mxu1  ;;  %32076 = vmatmul.mubr.f32.vlgmr.msra.gmra.mxu1 %v5291_v12  ;;  %v417_v10 = vld [vmem:[%s33738_s27 + $0x5e0] sm:$0xff]  ;;  %v1939_v12 = vld [vmem:[%s33746_s29 + $0x2f70] sm:$0x3] }
 0x60a   : > { %v28648_v42 = vadd.f32 %v28647_v38, %v28578_v26  ;;  %32110 = vmatpush1.xpose.msra.mxu0 %v1929_v34  ;;  %32180 = vmatpush1.xpose.msra.mxu1 %v1931_v35  ;;  %v5345_v18 = vcombine.high %v417_v10, %v417_v10  ;;  %v1942_v26 = vld [vmem:[%s33746_s29 + $0x2f88] sm:$0x3]  ;;  %v5352_v27 = vrot.slane %v417_v10, %v33752_v5 }
 0x60b   : > { %v28649_v44 = vpop.f32.mrf.mxu0  ;;  %32111 = vmatprep.subr.mxu0 %v1162_v36  ;;  %v28719_v47 = vpop.f32.mrf.mxu1  ;;  %32181 = vmatprep.subr.mxu1 %v1164_v39  ;;  %v1176_v36 = vld [vmem:[%s33746_s29 + $0x1798] sm:$0xff]  ;;  %v1182_v10 = vld [vmem:[%s33746_s29 + $0x17c8] sm:$0xff] }
 0x60c   : > { %v28718_v46 = vadd.f32 %v28717_v43, %v28648_v42  ;;  %32145 = vmatprep.mubr.f32.mxu0 %v5309_v37  ;;  %32215 = vmatprep.mubr.f32.mxu1 %v5310_v40  ;;  %v5359_v29 = vrot.slane %v5345_v18, %v33752_v5  ;;  %v5360_v34 = vcombine.high %v5352_v27, %v5352_v27  ;;  %v1173_v42 = vld [vmem:[%s33746_s29 + $0x1780] sm:$0xff] }
 0x60e   : > { %32112 = vmatpush1.xpose.msra.mxu0 %v1161_v45  ;;  %32182 = vmatpush1.xpose.msra.mxu1 %v1163_v48  ;;  %v5361_v37 = vcombine.high %v5359_v29, %v5359_v29  ;;  %v1175_v45 = vld [vmem:[%s33746_s29 + $0x1790] sm:$0xff]  ;;  %v1948_v48 = vld [vmem:[%s33746_s29 + $0x2fb8] sm:$0x3] }
 0x60f   : > { %32249 = vmatprep.subr.mxu0 %v1934_v49  ;;  %32319 = vmatprep.subr.mxu1 %v1936_v51  ;;  %v1945_v51 = vld [vmem:[%s33746_s29 + $0x2fa0] sm:$0x3] }
 0x611   : > { %v28787_v58 = vpop.f32.mrf.mxu0  ;;  %32146 = vmatmul.mubr.f32.vlgmr.msra.gmra.mxu0 %v5301_v30  ;;  %v28857_v63 = vpop.f32.mrf.mxu1  ;;  %32216 = vmatmul.mubr.f32.vlgmr.msra.gmra.mxu1 %v5308_v32  ;;  %v418_v30 = vld [vmem:[%s33738_s27 + $0x5e8] sm:$0xff]  ;;  %v1943_v32 = vld [vmem:[%s33746_s29 + $0x2f90] sm:$0x3] }
 0x612   : > { %v28788_v62 = vadd.f32 %v28787_v58, %v28718_v46  ;;  %32250 = vmatpush1.xpose.msra.mxu0 %v1933_v54  ;;  %32320 = vmatpush1.xpose.msra.mxu1 %v1935_v55  ;;  %v5362_v38 = vcombine.high %v418_v30, %v418_v30  ;;  %v1946_v46 = vld [vmem:[%s33746_s29 + $0x2fa8] sm:$0x3]  ;;  %v5369_v47 = vrot.slane %v418_v30, %v33752_v5 }
 0x613   : > { %v28789_v0 = vpop.f32.mrf.mxu0  ;;  %32251 = vmatprep.subr.mxu0 %v1166_v56  ;;  %v28859_v3 = vpop.f32.mrf.mxu1  ;;  %32321 = vmatprep.subr.mxu1 %v1168_v59  ;;  %v1180_v56 = vld [vmem:[%s33746_s29 + $0x17b8] sm:$0xff] }
 0x614   : > { %v28858_v2 = vadd.f32 %v28857_v63, %v28788_v62  ;;  %32285 = vmatprep.mubr.f32.mxu0 %v5326_v57  ;;  %32355 = vmatprep.mubr.f32.mxu1 %v5327_v60  ;;  %v5376_v49 = vrot.slane %v5362_v38, %v33752_v5  ;;  %v5377_v54 = vcombine.high %v5369_v47, %v5369_v47  ;;  %v1177_v62 = vld [vmem:[%s33746_s29 + $0x17a0] sm:$0xff] }
 0x616   : > { %32252 = vmatpush1.xpose.msra.mxu0 %v1165_v1  ;;  %32322 = vmatpush1.xpose.msra.mxu1 %v1167_v4  ;;  %v5378_v57 = vcombine.high %v5376_v49, %v5376_v49  ;;  %v1179_v1 = vld [vmem:[%s33746_s29 + $0x17b0] sm:$0xff]  ;;  %v1952_v4 = vld [vmem:[%s33746_s29 + $0x2fd8] sm:$0x3] }
 0x617   : > { %32389 = vmatprep.subr.mxu0 %v1938_v6  ;;  %32459 = vmatprep.subr.mxu1 %v1940_v8  ;;  %v1949_v8 = vld [vmem:[%s33746_s29 + $0x2fc0] sm:$0x3] }
 0x619   : > { %v28927_v15 = vpop.f32.mrf.mxu0  ;;  %32286 = vmatmul.mubr.f32.vlgmr.msra.gmra.mxu0 %v5318_v50  ;;  %v28997_v20 = vpop.f32.mrf.mxu1  ;;  %32356 = vmatmul.mubr.f32.vlgmr.msra.gmra.mxu1 %v5325_v52  ;;  %v419_v50 = vld [vmem:[%s33738_s27 + $0x5f0] sm:$0xff] }
 0x61a   : > { %v28928_v19 = vadd.f32 %v28927_v15, %v28858_v2  ;;  %32390 = vmatpush1.xpose.msra.mxu0 %v1937_v11  ;;  %32460 = vmatpush1.xpose.msra.mxu1 %v1939_v12  ;;  %v1947_v52 = vld [vmem:[%s33746_s29 + $0x2fb0] sm:$0x3]  ;;  %v5379_v58 = vcombine.high %v419_v50, %v419_v50  ;;  %v1950_v2 = vld [vmem:[%s33746_s29 + $0x2fc8] sm:$0x3]  ;;  %v5386_v3 = vrot.slane %v419_v50, %v33752_v5 }
 0x61b   : > { %v28929_v21 = vpop.f32.mrf.mxu0  ;;  %32391 = vmatprep.subr.mxu0 %v1170_v13  ;;  %v28999_v24 = vpop.f32.mrf.mxu1  ;;  %32461 = vmatprep.subr.mxu1 %v1172_v16  ;;  %v1184_v13 = vld [vmem:[%s33746_s29 + $0x17d8] sm:$0xff] }
 0x61c   : > { %v28998_v23 = vadd.f32 %v28997_v20, %v28928_v19  ;;  %32425 = vmatprep.mubr.f32.mxu0 %v5343_v14  ;;  %32495 = vmatprep.mubr.f32.mxu1 %v5344_v17  ;;  %v5393_v6 = vrot.slane %v5379_v58, %v33752_v5  ;;  %v5394_v11 = vcombine.high %v5386_v3, %v5386_v3  ;;  %v1181_v19 = vld [vmem:[%s33746_s29 + $0x17c0] sm:$0xff] }
 0x61e   : > { %32392 = vmatpush1.xpose.msra.mxu0 %v1169_v22  ;;  %32462 = vmatpush1.xpose.msra.mxu1 %v1171_v25  ;;  %v5395_v14 = vcombine.high %v5393_v6, %v5393_v6  ;;  %v1183_v22 = vld [vmem:[%s33746_s29 + $0x17d0] sm:$0xff]  ;;  %v1956_v25 = vld [vmem:[%s33746_s29 + $0x2ff8] sm:$0x3] }
 0x61f   : > { %32529 = vmatprep.subr.mxu0 %v1942_v26  ;;  %32599 = vmatprep.subr.mxu1 %v1944_v28  ;;  %v1955_v28 = vld [vmem:[%s33746_s29 + $0x2ff0] sm:$0x3] }
 0x621   : > { %v29067_v35 = vpop.f32.mrf.mxu0  ;;  %32426 = vmatmul.mubr.f32.vlgmr.msra.gmra.mxu0 %v5335_v7  ;;  %v29137_v40 = vpop.f32.mrf.mxu1  ;;  %32496 = vmatmul.mubr.f32.vlgmr.msra.gmra.mxu1 %v5342_v9  ;;  %v420_v7 = vld [vmem:[%s33738_s27 + $0x5f8] sm:$0xff]  ;;  %v1951_v9 = vld [vmem:[%s33746_s29 + $0x2fd0] sm:$0x3] }
 0x622   : > { %v29068_v39 = vadd.f32 %v29067_v35, %v28998_v23  ;;  %32530 = vmatpush1.xpose.msra.mxu0 %v1941_v31  ;;  %32600 = vmatpush1.xpose.msra.mxu1 %v1943_v32  ;;  %v5396_v15 = vcombine.high %v420_v7, %v420_v7  ;;  %v1954_v23 = vld [vmem:[%s33746_s29 + $0x2fe8] sm:$0x3]  ;;  %v5403_v24 = vrot.slane %v420_v7, %v33752_v5  ;;  %v1188_v32 = vld [vmem:[%s33746_s29 + $0x17f8] sm:$0xff] }
 0x623   : > { %v29069_v41 = vpop.f32.mrf.mxu0  ;;  %32531 = vmatprep.subr.mxu0 %v1174_v33  ;;  %v29139_v44 = vpop.f32.mrf.mxu1  ;;  %32601 = vmatprep.subr.mxu1 %v1176_v36  ;;  %v1185_v36 = vld [vmem:[%s33746_s29 + $0x17e0] sm:$0xff] }
 0x624   : > { %v29138_v43 = vadd.f32 %v29137_v40, %v29068_v39  ;;  %32565 = vmatprep.mubr.f32.mxu0 %v5360_v34  ;;  %32635 = vmatprep.mubr.f32.mxu1 %v5361_v37  ;;  %v5410_v26 = vrot.slane %v5396_v15, %v33752_v5  ;;  %v5411_v30 = vcombine.high %v5403_v24, %v5403_v24  ;;  %v1187_v39 = vld [vmem:[%s33746_s29 + $0x17f0] sm:$0xff] }
 0x626   : > { %32532 = vmatpush1.xpose.msra.mxu0 %v1173_v42  ;;  %32602 = vmatpush1.xpose.msra.mxu1 %v1175_v45  ;;  %v5412_v33 = vcombine.high %v5410_v26, %v5410_v26 }
 0x627   : > { %32669 = vmatprep.subr.mxu0 %v1946_v46  ;;  %32739 = vmatprep.subr.mxu1 %v1948_v48 }
 0x629   : > { %v29207_v55 = vpop.f32.mrf.mxu0  ;;  %32566 = vmatmul.mubr.f32.vlgmr.msra.gmra.mxu0 %v5352_v27  ;;  %v29277_v60 = vpop.f32.mrf.mxu1  ;;  %32636 = vmatmul.mubr.f32.vlgmr.msra.gmra.mxu1 %v5359_v29  ;;  %v1953_v27 = vld [vmem:[%s33746_s29 + $0x2fe0] sm:$0x3]  ;;  %v1186_v29 = vld [vmem:[%s33746_s29 + $0x17e8] sm:$0xff] }
 0x62a   : > { %v29208_v59 = vadd.f32 %v29207_v55, %v29138_v43  ;;  %32670 = vmatpush1.xpose.msra.mxu0 %v1945_v51  ;;  %32740 = vmatpush1.xpose.msra.mxu1 %v1947_v52 }
 0x62b   : > { %v29209_v61 = vpop.f32.mrf.mxu0  ;;  %32671 = vmatprep.subr.mxu0 %v1178_v53  ;;  %v29279_v0 = vpop.f32.mrf.mxu1  ;;  %32741 = vmatprep.subr.mxu1 %v1180_v56 }
 0x62c   : > { %v29278_v63 = vadd.f32 %v29277_v60, %v29208_v59  ;;  %32705 = vmatprep.mubr.f32.mxu0 %v5377_v54  ;;  %32775 = vmatprep.mubr.f32.mxu1 %v5378_v57 }
 0x62e   : > { %32672 = vmatpush1.xpose.msra.mxu0 %v1177_v62  ;;  %32742 = vmatpush1.xpose.msra.mxu1 %v1179_v1 }
 0x62f   : > { %32809 = vmatprep.subr.mxu0 %v1950_v2  ;;  %32879 = vmatprep.subr.mxu1 %v1952_v4 }
 0x631   : > { %v29347_v12 = vpop.f32.mrf.mxu0  ;;  %32706 = vmatmul.mubr.f32.vlgmr.msra.gmra.mxu0 %v5369_v47  ;;  %v29417_v17 = vpop.f32.mrf.mxu1  ;;  %32776 = vmatmul.mubr.f32.vlgmr.msra.gmra.mxu1 %v5376_v49 }
 0x632   : > { %v29348_v16 = vadd.f32 %v29347_v12, %v29278_v63  ;;  %32810 = vmatpush1.xpose.msra.mxu0 %v1949_v8  ;;  %32880 = vmatpush1.xpose.msra.mxu1 %v1951_v9 }
 0x633   : > { %v29349_v18 = vpop.f32.mrf.mxu0  ;;  %32811 = vmatprep.subr.mxu0 %v1182_v10  ;;  %v29419_v21 = vpop.f32.mrf.mxu1  ;;  %32881 = vmatprep.subr.mxu1 %v1184_v13 }
 0x634   : > { %v29418_v20 = vadd.f32 %v29417_v17, %v29348_v16  ;;  %32845 = vmatprep.mubr.f32.mxu0 %v5394_v11  ;;  %32915 = vmatprep.mubr.f32.mxu1 %v5395_v14 }
 0x636   : > { %32812 = vmatpush1.xpose.msra.mxu0 %v1181_v19  ;;  %32882 = vmatpush1.xpose.msra.mxu1 %v1183_v22 }
 0x637   : > { %32949 = vmatprep.subr.mxu0 %v1954_v23  ;;  %33019 = vmatprep.subr.mxu1 %v1956_v25  ;;  %v33611_v25 = vmov 0.0  }
 0x638   : > { %227 = vst.msk [vmem:[%s35867_s30] sm:$0x3] %vm226_vm0, %v33611_v25 }
 0x639   : > { %v29487_v31 = vpop.f32.mrf.mxu0  ;;  %32846 = vmatmul.mubr.f32.vlgmr.msra.gmra.mxu0 %v5386_v3  ;;  %v29557_v35 = vpop.f32.mrf.mxu1  ;;  %32916 = vmatmul.mubr.f32.vlgmr.msra.gmra.mxu1 %v5393_v6 }
 0x63a   : > { %v29488_v34 = vadd.f32 %v29487_v31, %v29418_v20  ;;  %32950 = vmatpush1.xpose.msra.mxu0 %v1953_v27  ;;  %33020 = vmatpush1.xpose.msra.mxu1 %v1955_v28 }
 0x63b   : > { %v29489_v5 = vpop.f32.mrf.mxu0  ;;  %32951 = vmatprep.subr.mxu0 %v1186_v29  ;;  %v29559_v38 = vpop.f32.mrf.mxu1  ;;  %33021 = vmatprep.subr.mxu1 %v1188_v32 }
 0x63c   : > { %v29558_v37 = vadd.f32 %v29557_v35, %v29488_v34  ;;  %32985 = vmatprep.mubr.f32.mxu0 %v5411_v30  ;;  %33055 = vmatprep.mubr.f32.mxu1 %v5412_v33 }
 0x63e   : > { %32952 = vmatpush1.xpose.msra.mxu0 %v1185_v36  ;;  %33022 = vmatpush1.xpose.msra.mxu1 %v1187_v39 }
 0x641   : > { %v29627_v40 = vpop.f32.mrf.mxu0  ;;  %32986 = vmatmul.mubr.f32.vlgmr.msra.gmra.mxu0 %v5403_v24  ;;  %33056 = vmatmul.mubr.f32.vlgmr.msra.gmra.mxu1 %v5410_v26  ;;  %v29697_v42 = vpop.f32.mrf.mxu1 }
 0x642   : > { %v29628_v41 = vadd.f32 %v29627_v40, %v29558_v37 }
 0x643   : > { %v29629_v43 = vpop.f32.mrf.mxu0  ;;  %v29699_v45 = vpop.f32.mrf.mxu1 }
 0x644   : > { %v29698_v44 = vadd.f32 %v29697_v42, %v29628_v41 }
 0x649   : > { %v29767_v46 = vpop.f32.mrf.mxu0  ;;  %v29837_v48 = vpop.f32.mrf.mxu1 }
 0x64a   : > { %v29768_v47 = vadd.f32 %v29767_v46, %v29698_v44 }
 0x64b   : > { %v29769_v49 = vpop.f32.mrf.mxu0  ;;  %v29839_v51 = vpop.f32.mrf.mxu1 }
 0x64c   : > { %v29838_v50 = vadd.f32 %v29837_v48, %v29768_v47 }
 0x651   : > { %v29907_v52 = vpop.f32.mrf.mxu0  ;;  %v29977_v54 = vpop.f32.mrf.mxu1 }
 0x652   : > { %v29908_v53 = vadd.f32 %v29907_v52, %v29838_v50 }
 0x653   : > { %v29909_v55 = vpop.f32.mrf.mxu0  ;;  %v29979_v57 = vpop.f32.mrf.mxu1 }
 0x654   : > { %v29978_v56 = vadd.f32 %v29977_v54, %v29908_v53 }
 0x659   : > { %v30047_v58 = vpop.f32.mrf.mxu0  ;;  %v30117_v60 = vpop.f32.mrf.mxu1 }
 0x65a   : > { %v30048_v59 = vadd.f32 %v30047_v58, %v29978_v56 }
 0x65b   : > { %v30049_v61 = vpop.f32.mrf.mxu0  ;;  %v30119_v63 = vpop.f32.mrf.mxu1 }
 0x65c   : > { %v30118_v62 = vadd.f32 %v30117_v60, %v30048_v59 }
 0x661   : > { %v30187_v0 = vpop.f32.mrf.mxu0  ;;  %v30257_v2 = vpop.f32.mrf.mxu1 }
 0x662   : > { %v30188_v1 = vadd.f32 %v30187_v0, %v30118_v62 }
 0x663   : > { %v30189_v3 = vpop.f32.mrf.mxu0  ;;  %v30259_v6 = vpop.f32.mrf.mxu1 }
 0x664   : > { %v30258_v4 = vadd.f32 %v30257_v2, %v30188_v1 }
 0x669   : > { %v30327_v7 = vpop.f32.mrf.mxu0  ;;  %v30397_v9 = vpop.f32.mrf.mxu1 }
 0x66a   : > { %v30328_v8 = vadd.f32 %v30327_v7, %v30258_v4 }
 0x66b   : > { %v30329_v10 = vpop.f32.mrf.mxu0  ;;  %v30399_v12 = vpop.f32.mrf.mxu1 }
 0x66c   : > { %v30398_v11 = vadd.f32 %v30397_v9, %v30328_v8 }
 0x671   : > { %v30467_v13 = vpop.f32.mrf.mxu0  ;;  %v30537_v15 = vpop.f32.mrf.mxu1 }
 0x672   : > { %v30468_v14 = vadd.f32 %v30467_v13, %v30398_v11 }
 0x673   : > { %v30469_v16 = vpop.f32.mrf.mxu0  ;;  %v30539_v18 = vpop.f32.mrf.mxu1 }
 0x674   : > { %v30538_v17 = vadd.f32 %v30537_v15, %v30468_v14 }
 0x679   : > { %v30607_v19 = vpop.f32.mrf.mxu0  ;;  %v30677_v21 = vpop.f32.mrf.mxu1 }
 0x67a   : > { %v30608_v20 = vadd.f32 %v30607_v19, %v30538_v17 }
 0x67b   : > { %v30609_v22 = vpop.f32.mrf.mxu0  ;;  %v30679_v24 = vpop.f32.mrf.mxu1 }
 0x67c   : > { %v30678_v23 = vadd.f32 %v30677_v21, %v30608_v20 }
 0x681   : > { %v30747_v26 = vpop.f32.mrf.mxu0  ;;  %v30817_v28 = vpop.f32.mrf.mxu1 }
 0x682   : > { %v30748_v27 = vadd.f32 %v30747_v26, %v30678_v23 }
 0x683   : > { %v30749_v29 = vpop.f32.mrf.mxu0  ;;  %v30819_v31 = vpop.f32.mrf.mxu1 }
 0x684   : > { %v30818_v30 = vadd.f32 %v30817_v28, %v30748_v27 }
 0x689   : > { %v30887_v32 = vpop.f32.mrf.mxu0  ;;  %v30957_v33 = vpop.f32.mrf.mxu1 }
 0x68a   : > { %v30888_v47 = vadd.f32 %v30887_v32, %v30818_v30 }
 0x68b   : > { %v30889_v34 = vpop.f32.mrf.mxu0  ;;  %v30959_v35 = vpop.f32.mrf.mxu1 }
 0x68c   : > { %v30958_v51 = vadd.f32 %v30957_v33, %v30888_v47 }
 0x691   : > { %v31027_v5 = vpop.f32.mrf.mxu0  ;;  %v31097_v36 = vpop.f32.mrf.mxu1 }
 0x692   : > { %v31028_v53 = vadd.f32 %v31027_v5, %v30958_v51 }
 0x693   : > { %v31029_v37 = vpop.f32.mrf.mxu0  ;;  %v31099_v38 = vpop.f32.mrf.mxu1 }
 0x694   : > { %v31098_v55 = vadd.f32 %v31097_v36, %v31028_v53 }
 0x699   : > { %v31167_v39 = vpop.f32.mrf.mxu0  ;;  %v31237_v40 = vpop.f32.mrf.mxu1 }
 0x69a   : > { %v31168_v58 = vadd.f32 %v31167_v39, %v31098_v55 }
 0x69b   : > { %v31169_v41 = vpop.f32.mrf.mxu0  ;;  %v31239_v42 = vpop.f32.mrf.mxu1 }
 0x69c   : > { %v31238_v60 = vadd.f32 %v31237_v40, %v31168_v58 }
 0x6a1   : > { %v31307_v43 = vpop.f32.mrf.mxu0  ;;  %v31377_v44 = vpop.f32.mrf.mxu1 }
 0x6a2   : > { %v31308_v62 = vadd.f32 %v31307_v43, %v31238_v60  ;;  %v228_v60 = vld [vmem:[%s35867_s30] sm:$0x3] }
 0x6a3   : > { %v31309_v45 = vpop.f32.mrf.mxu0  ;;  %v31379_v46 = vpop.f32.mrf.mxu1 }
 0x6a4   : > { %v31378_v2 = vadd.f32 %v31377_v44, %v31308_v62 }
 0x6a9   : > { %v31447_v48 = vpop.f32.mrf.mxu0  ;;  %v31517_v49 = vpop.f32.mrf.mxu1 }
 0x6aa   : > { %v31448_v3 = vadd.f32 %v31447_v48, %v31378_v2 }
 0x6ab   : > { %v31449_v50 = vpop.f32.mrf.mxu0  ;;  %v31519_v52 = vpop.f32.mrf.mxu1 }
 0x6ac   : > { %v31518_v8 = vadd.f32 %v31517_v49, %v31448_v3 }
 0x6b1   : > { %v31587_v54 = vpop.f32.mrf.mxu0  ;;  %v31657_v56 = vpop.f32.mrf.mxu1 }
 0x6b2   : > { %v31588_v10 = vadd.f32 %v31587_v54, %v31518_v8 }
 0x6b3   : > { %v31589_v57 = vpop.f32.mrf.mxu0  ;;  %v31659_v59 = vpop.f32.mrf.mxu1 }
 0x6b4   : > { %v31658_v12 = vadd.f32 %v31657_v56, %v31588_v10 }
 0x6b9   : > { %v31727_v61 = vpop.f32.mrf.mxu0  ;;  %v31797_v63 = vpop.f32.mrf.mxu1 }
 0x6ba   : > { %v31728_v15 = vadd.f32 %v31727_v61, %v31658_v12 }
 0x6bb   : > { %v31729_v0 = vpop.f32.mrf.mxu0  ;;  %v31799_v1 = vpop.f32.mrf.mxu1 }
 0x6bc   : > { %v31798_v17 = vadd.f32 %v31797_v63, %v31728_v15 }
 0x6c1   : > { %v31867_v4 = vpop.f32.mrf.mxu0  ;;  %v31937_v6 = vpop.f32.mrf.mxu1 }
 0x6c2   : > { %v31868_v19 = vadd.f32 %v31867_v4, %v31798_v17 }
 0x6c3   : > { %v31869_v7 = vpop.f32.mrf.mxu0  ;;  %v31939_v9 = vpop.f32.mrf.mxu1 }
 0x6c4   : > { %v31938_v23 = vadd.f32 %v31937_v6, %v31868_v19 }
 0x6c9   : > { %v32007_v11 = vpop.f32.mrf.mxu0  ;;  %v32077_v13 = vpop.f32.mrf.mxu1 }
 0x6ca   : > { %v32008_v24 = vadd.f32 %v32007_v11, %v31938_v23 }
 0x6cb   : > { %v32009_v14 = vpop.f32.mrf.mxu0  ;;  %v32079_v16 = vpop.f32.mrf.mxu1 }
 0x6cc   : > { %v32078_v28 = vadd.f32 %v32077_v13, %v32008_v24 }
 0x6d1   : > { %v32147_v18 = vpop.f32.mrf.mxu0  ;;  %v32217_v20 = vpop.f32.mrf.mxu1 }
 0x6d2   : > { %v32148_v30 = vadd.f32 %v32147_v18, %v32078_v28 }
 0x6d3   : > { %v32149_v21 = vpop.f32.mrf.mxu0  ;;  %v32219_v22 = vpop.f32.mrf.mxu1 }
 0x6d4   : > { %v32218_v32 = vadd.f32 %v32217_v20, %v32148_v30 }
 0x6d9   : > { %v32287_v25 = vpop.f32.mrf.mxu0  ;;  %v32357_v26 = vpop.f32.mrf.mxu1 }
 0x6da   : > { %v32288_v35 = vadd.f32 %v32287_v25, %v32218_v32 }
 0x6db   : > { %v32289_v27 = vpop.f32.mrf.mxu0  ;;  %v32359_v29 = vpop.f32.mrf.mxu1 }
 0x6dc   : > { %v32358_v36 = vadd.f32 %v32357_v26, %v32288_v35 }
 0x6e1   : > { %v32427_v31 = vpop.f32.mrf.mxu0  ;;  %v32497_v33 = vpop.f32.mrf.mxu1 }
 0x6e2   : > { %v32428_v38 = vadd.f32 %v32427_v31, %v32358_v36 }
 0x6e3   : > { %v32429_v34 = vpop.f32.mrf.mxu0  ;;  %v32499_v5 = vpop.f32.mrf.mxu1 }
 0x6e4   : > { %v32498_v42 = vadd.f32 %v32497_v33, %v32428_v38 }
 0x6e9   : > { %v32567_v37 = vpop.f32.mrf.mxu0  ;;  %v32637_v39 = vpop.f32.mrf.mxu1 }
 0x6ea   : > { %v32568_v43 = vadd.f32 %v32567_v37, %v32498_v42 }
 0x6eb   : > { %v32569_v40 = vpop.f32.mrf.mxu0  ;;  %v32639_v41 = vpop.f32.mrf.mxu1 }
 0x6ec   : > { %v32638_v47 = vadd.f32 %v32637_v39, %v32568_v43 }
 0x6f1   : > { %v32707_v44 = vpop.f32.mrf.mxu0  ;;  %v32777_v45 = vpop.f32.mrf.mxu1 }
 0x6f2   : > { %v32708_v49 = vadd.f32 %v32707_v44, %v32638_v47 }
 0x6f3   : > { %v32709_v46 = vpop.f32.mrf.mxu0  ;;  %v32779_v48 = vpop.f32.mrf.mxu1 }
 0x6f4   : > { %v32778_v51 = vadd.f32 %v32777_v45, %v32708_v49 }
 0x6f9   : > { %v32847_v50 = vpop.f32.mrf.mxu0  ;;  %v32917_v52 = vpop.f32.mrf.mxu1 }
 0x6fa   : > { %v32848_v54 = vadd.f32 %v32847_v50, %v32778_v51 }
 0x6fb   : > { %v32849_v53 = vpop.f32.mrf.mxu0  ;;  %v32919_v55 = vpop.f32.mrf.mxu1 }
 0x6fc   : > { %v32918_v56 = vadd.f32 %v32917_v52, %v32848_v54 }
 0x701   : > { %v32987_v57 = vpop.f32.mrf.mxu0  ;;  %v33057_v59 = vpop.f32.mrf.mxu1 }
 0x702   : > { %v32988_v58 = vadd.f32 %v32987_v57, %v32918_v56 }
 0x703   : > { %v32989_v61 = vpop.f32.mrf.mxu0  ;;  %v33059_v63 = vpop.f32.mrf.mxu1 }
 0x704   : > { %v33058_v62 = vadd.f32 %v33057_v59, %v32988_v58 }
 0x706   : > { %v33061_v0 = vadd.f32 %v33058_v62, %v228_v60 }
 0x708   : > { %33063 = vst.msk [vmem:[%s35867_s30] sm:$0x3] %vm226_vm0, %v33061_v0 }
 0x709   : > { %33532 = shalt.err (!%p33529_p6)
}
 0x70a   : > { %s33533_s19 = scalar_lea.hbm %s33076_s5, 32  ;;  %s33537_s27 = scalar_lea.hbm %s35917_s2, 64 }
 0x70b   : > { %p33534_p7 = scmp.ne.s32.totalorder %s33076_s5, %s33533_s19  ;;  %p33538_p2 = scmp.lt.s32.totalorder %s33076_s5, %s35917_s2 }
 0x70c   : > { %p33539_p8 = scmp.lt.s32.totalorder %s33537_s27, %s33533_s19 }
 0x70d   : > { %p33535_p10 = pnand %p33534_p7, %p33679_p9 }
 0x70e   : > { %p33540_p0 = por %p33539_p8, %p33538_p2 }
 0x70f   : > { %p33536_p13 = pneg %p33535_p10 }
 0x711   : > { %p33541_p12 = pnand %p33540_p0, %p33536_p13 }
 0x713   : > { %33544 = shalt.err (!%p33541_p12)
}
 0x714   : > { %33203 = dma.vmem_to_hbm [thread:$0]  (%p33679_p9), %s33079_s7, 32, %s33076_s5, %s33065_s6  }
 0x715 PF: > { %s33090_s29 = sand.u32 1, %s33583_s9   ;;  %p35924_p1 = scmp.ge.s32.totalorder %s33603_s14, 2 }
 0x716   : > { %s33091_s21 = scalar_lea.sflag [#allocation4], %s33090_s29 }
 0x717   : > { %p33213_p3 = pnand %p35924_p1, %p33686_p11 }
 0x719   : > { %p33214_p4 = pneg %p33213_p3 }
 0x71b   : > { %33578 = dma.done.wait (%p33214_p4), %s33091_s21, 32  }
 0x71c   : > { %33580 = vsyncadd (%p33214_p4), %s33091_s21, 4294967264  ;;  %s21_s14 = sadd.s32 1, %s33603_s14   ;;  %s35925_s9 = smov %s33587_s10 }
 0x71d   : > { %p18_p5 = scmp.ge.s32.totalorder %s21_s14, 4   ;;  %s35926_s10 = smov %s33591_s11 }
 0x71e   : > { %s35927_s11 = smov %s33684_s23  ;;  %s35928_s12 = smov %s33599_s13 }
 0x71f   : > { %s35929_s13 = smov %s35931_s17  ;;  %20 = sbr.rel (!%p18_p5) target bundleno = 8 (0x8), region = 90 }
 0x724   :  { %33096 = vsyncpa [#allocation3], 1 }
 0x725   :  { %33098 = vsyncpa [#allocation3 + $0x1], 1 }
 0x726   :  { %33099 = vsyncpa [#allocation6], 1 }
 0x727   :  { %33101 = vsyncpa [#allocation6 + $0x1], 1 }
 0x728   :  { %33102 = vsyncpa [#allocation4], 1 }
 0x729   :  { %33104 = vsyncpa [#allocation4 + $0x1], 1 }

</bundles_post_ra>
